<compile_context>
chip_gen: v6e
topology: v6e:2x2x1
jax: 0.10.0
libtpu: 0.0.40
codegen_flags: <defaults>
</compile_context>

<pallas_src>
import jax
import jax.numpy as jnp
from jax.experimental import pallas as pl
from jax.experimental.pallas import tpu as pltpu

_BN_EPS = 1e-5
_LANE = 128
_VMEM_LIMIT = 32 * 1024 * 1024   # leave headroom on v7x (64 MiB / TC)


def _round_up(x, m):
    return ((x + m - 1) // m) * m


# ---------------------------------------------------------------------------
# Pallas kernels
# ---------------------------------------------------------------------------
def _make_conv_kernel(*, wo, stride, kw, kh, nph, relu, has_residual):
    """Fused conv + folded-BN + optional residual + ReLU.

    One output row per (n, ho) grid point; accumulates over the kh kernel rows
    (innermost 'arbitrary' grid axis) into a resident f32 VMEM scratch.
    """

    def kernel(*refs):
        x_phs = refs[:nph]                        # each: (Wp_phase, Cin) bf16
        w_ref, s_ref, b_ref = refs[nph:nph + 3]   # (kh*kw, Cin, Cout), (1,Cout)x2
        r_ref = refs[nph + 3] if has_residual else None
        o_ref = refs[-2]                          # (Wo, Cout) bf16
        acc_ref = refs[-1]                        # (Wo, Cout) f32 scratch

        i = pl.program_id(2)                      # kernel-row index

        @pl.when(i == 0)
        def _init():
            acc_ref[...] = jnp.zeros_like(acc_ref)

        acc = acc_ref[...]
        base = i * kw
        for j in range(kw):                       # unrolled horizontal taps
            p, q = j % stride, j // stride        # column phase / offset
            a = x_phs[p][pl.ds(q, wo), :]         # contiguous (Wo, Cin) load
            acc = acc + jnp.dot(a, w_ref[base + j],
                                preferred_element_type=jnp.float32)
        acc_ref[...] = acc

        @pl.when(i == kh - 1)                     # epilogue once per output row
        def _finalize():
            out = acc_ref[...] * s_ref[...] + b_ref[...]
            if has_residual:
                out = out + r_ref[...].astype(jnp.float32)
            if relu:
                out = jnp.maximum(out, 0.0)
            o_ref[...] = out.astype(o_ref.dtype)

    return kernel


def _make_maxpool_kernel(*, wo, stride, kw, nph):
    def kernel(*refs):
        x_phs = refs[:nph]
        o_ref = refs[nph]
        i = pl.program_id(2)

        def tap(j):
            p, q = j % stride, j // stride
            return x_phs[p][pl.ds(q, wo), :]

        m = tap(0)
        for j in range(1, kw):
            m = jnp.maximum(m, tap(j))

        @pl.when(i == 0)
        def _init():
            o_ref[...] = m

        @pl.when(i != 0)
        def _acc():
            o_ref[...] = jnp.maximum(o_ref[...], m)

    return kernel


def _avgpool_fc_kernel(x_ref, w_ref, b_ref, o_ref):
    # x: (N, HW, C) bf16 -> mean over HW (XLU reduce) -> FC in f32.
    pooled = jnp.mean(x_ref[...].astype(jnp.float32), axis=1)
    o_ref[...] = jnp.dot(pooled, w_ref[...],
                         preferred_element_type=jnp.float32) + b_ref[...]


# ---------------------------------------------------------------------------
# Kernel wrappers
# ---------------------------------------------------------------------------
def _row_phases(xp, stride, kw):
    """Column-phase views of the spatially padded input.

    Horizontal tap j lives in phase j % stride at column offset j // stride,
    so every in-kernel read is a contiguous pl.ds load (no strided vloads).
    """
    nph = min(stride, kw)
    return [xp[:, :, p::stride, :] for p in range(nph)]


def conv_bn_act(x, w4, scale, shift, *, stride, padding, relu=True, residual=None):
    """NHWC conv (no bias) + folded BN + optional residual + ReLU."""
    N, H, W, Cin = x.shape
    kh, kw, wcin, Cout = w4.shape
    assert wcin == Cin, (wcin, Cin)
    Ho = (H + 2 * padding - kh) // stride + 1
    Wo = (W + 2 * padding - kw) // stride + 1
    xp = x if padding == 0 else jnp.pad(
        x, ((0, 0), (padding, padding), (padding, padding), (0, 0)))
    phases = _row_phases(xp, stride, kw)
    nph = len(phases)

    w = w4.reshape(kh * kw, Cin, Cout)                    # whole weight, VMEM-resident
    scale2 = scale.reshape(1, Cout).astype(jnp.float32)
    shift2 = shift.reshape(1, Cout).astype(jnp.float32)

    kernel = _make_conv_kernel(wo=Wo, stride=stride, kw=kw, kh=kh, nph=nph,
                               relu=relu, has_residual=residual is not None)

    x_map = lambda n, ho, i: (n, ho * stride + i, 0, 0)
    const3 = lambda n, ho, i: (0, 0, 0)
    const2 = lambda n, ho, i: (0, 0)
    out_map = lambda n, ho, i: (n, ho, 0, 0)

    in_specs = [pl.BlockSpec((None, None, ph.shape[2], Cin), x_map) for ph in phases]
    in_specs += [
        pl.BlockSpec((kh * kw, Cin, Cout), const3),
        pl.BlockSpec((1, Cout), const2),
        pl.BlockSpec((1, Cout), const2),
    ]
    inputs = list(phases) + [w, scale2, shift2]
    if residual is not None:
        in_specs.append(pl.BlockSpec((None, None, Wo, Cout), out_map))
        inputs.append(residual)

    return pl.pallas_call(
        kernel,
        out_shape=jax.ShapeDtypeStruct((N, Ho, Wo, Cout), jnp.bfloat16),
        grid=(N, Ho, kh),
        in_specs=in_specs,
        out_specs=pl.BlockSpec((None, None, Wo, Cout), out_map),
        scratch_shapes=[pltpu.VMEM((Wo, Cout), jnp.float32)],
        compiler_params=pltpu.CompilerParams(
            dimension_semantics=("parallel", "parallel", "arbitrary"),
            vmem_limit_bytes=_VMEM_LIMIT),
    )(*inputs)


def maxpool_3x3_s2_p1(x):
    N, H, W, C = x.shape
    k, s, p = 3, 2, 1
    Ho = (H + 2 * p - k) // s + 1
    Wo = (W + 2 * p - k) // s + 1
    neg = float(jnp.finfo(x.dtype).min)
    xp = jnp.pad(x, ((0, 0), (p, p), (p, p), (0, 0)), constant_values=neg)
    phases = _row_phases(xp, s, k)
    nph = len(phases)

    kernel = _make_maxpool_kernel(wo=Wo, stride=s, kw=k, nph=nph)
    x_map = lambda n, ho, i: (n, ho * s + i, 0, 0)
    out_map = lambda n, ho, i: (n, ho, 0, 0)
    in_specs = [pl.BlockSpec((None, None, ph.shape[2], C), x_map) for ph in phases]

    return pl.pallas_call(
        kernel,
        out_shape=jax.ShapeDtypeStruct((N, Ho, Wo, C), x.dtype),
        grid=(N, Ho, k),
        in_specs=in_specs,
        out_specs=pl.BlockSpec((None, None, Wo, C), out_map),
        compiler_params=pltpu.CompilerParams(
            dimension_semantics=("parallel", "parallel", "arbitrary"),
            vmem_limit_bytes=_VMEM_LIMIT),
    )(*phases)


def avgpool_fc(x, fc_w, fc_b):
    """Fused global-average-pool + Linear (FC output padded to 128 lanes)."""
    N, H, W, C = x.shape
    xr = x.reshape(N, H * W, C)
    ncp = fc_w.shape[1]
    b2 = fc_b.reshape(1, ncp).astype(jnp.float32)

    def full(shape):
        return pl.BlockSpec(shape, lambda i, _n=len(shape): (0,) * _n)

    return pl.pallas_call(
        _avgpool_fc_kernel,
        out_shape=jax.ShapeDtypeStruct((N, ncp), jnp.float32),
        grid=(1,),
        in_specs=[full(xr.shape), full(fc_w.shape), full(b2.shape)],
        out_specs=full((N, ncp)),
        compiler_params=pltpu.CompilerParams(vmem_limit_bytes=_VMEM_LIMIT),
    )(xr, fc_w, b2)


# ---------------------------------------------------------------------------
# Parameter init (mirrors the PyTorch __init__ initializers, channel-padded)
# ---------------------------------------------------------------------------
def _kaiming_conv(key, kh, kw, cin, cout):
    fan_out = cout * kh * kw                      # mode='fan_out', relu gain
    std = (2.0 / fan_out) ** 0.5
    return jax.random.normal(key, (kh, kw, cin, cout), jnp.float32) * std


def _pad_axis(a, axis, target, value=0.0):
    pad = target - a.shape[axis]
    if pad <= 0:
        return a
    cfg = [(0, 0)] * a.ndim
    cfg[axis] = (0, pad)
    return jnp.pad(a, cfg, constant_values=value)


def _conv_weight(key, kh, kw, cin, cout, cin_pad, cout_pad):
    w = _kaiming_conv(key, kh, kw, cin, cout)
    w = _pad_axis(_pad_axis(w, 2, cin_pad), 3, cout_pad)   # zero-padded channels
    return w.astype(jnp.bfloat16)                          # bf16 MXU feed


def _bn_params(c, c_pad):
    gamma = jnp.ones((c,), jnp.float32)
    beta = jnp.zeros((c,), jnp.float32)
    mean = jnp.zeros((c,), jnp.float32)
    var = jnp.ones((c,), jnp.float32)
    scale = gamma / jnp.sqrt(var + _BN_EPS)
    shift = beta - mean * scale
    scale = _pad_axis(scale, 0, c_pad, value=1.0)   # padded lanes: acc==0 -> any scale
    shift = _pad_axis(shift, 0, c_pad, value=0.0)   # padded lanes stay exactly 0
    return scale, shift


def init_resnet_params(key, in_channels, layers, num_classes):
    keys = iter(jax.random.split(key, 256))
    params = {'num_classes': num_classes}

    cin_pad = _round_up(in_channels, 16)            # aligned K for the stem MXU tiles
    c0, c0p = 64, _round_up(64, _LANE)
    params['conv1'] = _conv_weight(next(keys), 7, 7, in_channels, c0, cin_pad, c0p)
    params['bn1'] = _bn_params(c0, c0p)

    in_c, in_cp = c0, c0p
    stages = []
    for planes, nblocks, stage_stride in zip([64, 128, 256, 512], layers, [1, 2, 2, 2]):
        pp = _round_up(planes, _LANE)
        blocks = []
        for b in range(nblocks):
            s = stage_stride if b == 0 else 1
            blk = {
                'stride': s,
                'conv1': _conv_weight(next(keys), 3, 3, in_c, planes, in_cp, pp),
                'bn1': _bn_params(planes, pp),
                'conv2': _conv_weight(next(keys), 3, 3, planes, planes, pp, pp),
                'bn2': _bn_params(planes, pp),
            }
            if s != 1 or in_c != planes:
                blk['down_conv'] = _conv_weight(next(keys), 1, 1, in_c, planes, in_cp, pp)
                blk['down_bn'] = _bn_params(planes, pp)
            blocks.append(blk)
            in_c, in_cp = planes, pp
        stages.append(blocks)
    params['stages'] = stages

    # nn.Linear default init: U(-1/sqrt(fan_in), 1/sqrt(fan_in)); fan_in = 512*expansion
    fan_in = 512
    nc_pad = _round_up(num_classes, _LANE)
    bound = 1.0 / (fan_in ** 0.5)
    k1, k2 = jax.random.split(next(keys))
    fw = jax.random.uniform(k1, (fan_in, num_classes), jnp.float32, -bound, bound)
    fb = jax.random.uniform(k2, (num_classes,), jnp.float32, -bound, bound)
    params['fc_w'] = _pad_axis(fw, 1, nc_pad)
    params['fc_b'] = _pad_axis(fb, 0, nc_pad)
    return params


# ---------------------------------------------------------------------------
# Forward pass
# ---------------------------------------------------------------------------
def _basic_block(blk, x):
    s = blk['stride']
    if 'down_conv' in blk:
        identity = conv_bn_act(x, blk['down_conv'], *blk['down_bn'],
                               stride=s, padding=0, relu=False)
    else:
        identity = x
    out = conv_bn_act(x, blk['conv1'], *blk['bn1'], stride=s, padding=1, relu=True)
    # conv2 + bn2 + residual add + final ReLU fused in one kernel
    out = conv_bn_act(out, blk['conv2'], *blk['bn2'], stride=1, padding=1,
                      relu=True, residual=identity)
    return out


def resnet_forward(params, x_nhwc):
    x = x_nhwc.astype(jnp.bfloat16)
    cin_pad = params['conv1'].shape[2]
    if x.shape[-1] != cin_pad:                     # pad stem input channels (zeros)
        x = jnp.pad(x, ((0, 0), (0, 0), (0, 0), (0, cin_pad - x.shape[-1])))
    x = conv_bn_act(x, params['conv1'], *params['bn1'], stride=2, padding=3, relu=True)
    x = maxpool_3x3_s2_p1(x)
    for blocks in params['stages']:
        for blk in blocks:
            x = _basic_block(blk, x)
    logits = avgpool_fc(x, params['fc_w'], params['fc_b'])   # (N, 128), lane-dense
    return logits[:, :params['num_classes']]


# ---------------------------------------------------------------------------
if __name__ == "__main__":
    key = jax.random.PRNGKey(0)
    pkey, xkey = jax.random.split(key)

    in_channels = 3
    num_classes = 10
    layers = [1, 1, 1, 1]   # tiny BasicBlock ResNet (expansion = 1)

    params = init_resnet_params(pkey, in_channels, layers, num_classes)

    # PyTorch conv inputs are NCHW; transpose once at the boundary to NHWC.
    x_nchw = jax.random.normal(xkey, (2, in_channels, 32, 32), jnp.float32)
    x_nhwc = jnp.transpose(x_nchw, (0, 2, 3, 1))

    fwd = jax.jit(lambda xx: resnet_forward(params, xx))
    out = jax.block_until_ready(fwd(x_nhwc))
    assert out.shape == (2, num_classes), out.shape
    assert bool(jnp.all(jnp.isfinite(out)))
    print("KERNEL_OK")
</pallas_src>

<mosaic_0001>
module attributes {stable_mosaic.version = 11 : i64} {
  func.func @kernel(%arg0: i32, %arg1: i32, %arg2: i32, %arg3: memref<1x1x19x16xbf16, #tpu.memory_space<vmem>>, %arg4: memref<1x1x19x16xbf16, #tpu.memory_space<vmem>>, %arg5: memref<49x16x128xbf16, #tpu.memory_space<vmem>>, %arg6: memref<1x128xf32, #tpu.memory_space<vmem>>, %arg7: memref<1x128xf32, #tpu.memory_space<vmem>>, %arg8: memref<1x1x16x128xbf16, #tpu.memory_space<vmem>>, %arg9: memref<16x128xf32, #tpu.memory_space<vmem>>) attributes {dimension_semantics = [#tpu.dimension_semantics<parallel>, #tpu.dimension_semantics<parallel>, #tpu.dimension_semantics<arbitrary>], iteration_bounds = array<i64: 2, 16, 7>, scalar_prefetch = 0 : i64, scratch_operands = 1 : i64, tpu.core_type = #tpu.core_type<tc>, window_params = [{transform_indices = @transform_0, window_bounds = array<i64: 1, 1, 19, 16>}, {transform_indices = @transform_1, window_bounds = array<i64: 1, 1, 19, 16>}, {pipeline_mode = #tpu.pipeline_mode<synchronous>, transform_indices = @transform_2, window_bounds = array<i64: 49, 16, 128>}, {pipeline_mode = #tpu.pipeline_mode<synchronous>, transform_indices = @transform_3, window_bounds = array<i64: 1, 128>}, {pipeline_mode = #tpu.pipeline_mode<synchronous>, transform_indices = @transform_4, window_bounds = array<i64: 1, 128>}, {transform_indices = @transform_5, window_bounds = array<i64: 1, 1, 16, 128>}]} {
    %c0_i32 = arith.constant 0 : i32
    %0 = arith.cmpi eq, %arg2, %c0_i32 : i32
    %1 = arith.extui %0 : i1 to i32
    %c0_i32_0 = arith.constant 0 : i32
    %2 = arith.cmpi ne, %1, %c0_i32_0 : i32
    scf.if %2 {
      %cst_52 = arith.constant 0.000000e+00 : f32
      %65 = vector.broadcast %cst_52 : f32 to vector<16x128xf32>
      %c0_53 = arith.constant 0 : index
      %c0_54 = arith.constant 0 : index
      %66 = vector.load %arg9[%c0_53, %c0_54] : memref<16x128xf32, #tpu.memory_space<vmem>>, vector<16x128xf32>
      tpu.vector_store %arg9[%c0_53, %c0_54], %65 {strides = array<i32>} : memref<16x128xf32, #tpu.memory_space<vmem>>, vector<16x128xf32>,
    } else {
    }
    %c0 = arith.constant 0 : index
    %c0_1 = arith.constant 0 : index
    %3 = vector.load %arg9[%c0, %c0_1] : memref<16x128xf32, #tpu.memory_space<vmem>>, vector<16x128xf32>
    %c7_i32 = arith.constant 7 : i32
    %4 = arith.muli %arg2, %c7_i32 : i32
    %c0_2 = arith.constant 0 : index
    %c0_3 = arith.constant 0 : index
    %c0_4 = arith.constant 0 : index
    %c0_5 = arith.constant 0 : index
    %5 = vector.load %arg3[%c0_2, %c0_3, %c0_4, %c0_5] : memref<1x1x19x16xbf16, #tpu.memory_space<vmem>>, vector<1x1x16x16xbf16>
    %6 = vector.shape_cast %5 : vector<1x1x16x16xbf16> to vector<16x16xbf16>
    %c0_i32_6 = arith.constant 0 : i32
    %7 = arith.addi %4, %c0_i32_6 : i32
    %8 = arith.index_cast %7 : i32 to index
    %c0_7 = arith.constant 0 : index
    %c0_8 = arith.constant 0 : index
    %9 = vector.load %arg5[%8, %c0_7, %c0_8] : memref<49x16x128xbf16, #tpu.memory_space<vmem>>, vector<1x16x128xbf16>
    %10 = vector.shape_cast %9 : vector<1x16x128xbf16> to vector<16x128xbf16>
    %cst = arith.constant dense<0.000000e+00> : vector<16x128xf32>
    %11 = tpu.matmul %6, %10, %cst {dimension_numbers = #tpu.dot_dimension_numbers<[1], [0], [0], [1], [0, 0, 1, 1], [], []>} : vector<16x16xbf16>, vector<16x128xbf16>, vector<16x128xf32> -> vector<16x128xf32>
    %12 = arith.addf %3, %11 : vector<16x128xf32>
    %c0_9 = arith.constant 0 : index
    %c0_10 = arith.constant 0 : index
    %c0_11 = arith.constant 0 : index
    %c0_12 = arith.constant 0 : index
    %13 = vector.load %arg4[%c0_9, %c0_10, %c0_11, %c0_12] : memref<1x1x19x16xbf16, #tpu.memory_space<vmem>>, vector<1x1x16x16xbf16>
    %14 = vector.shape_cast %13 : vector<1x1x16x16xbf16> to vector<16x16xbf16>
    %c1_i32 = arith.constant 1 : i32
    %15 = arith.addi %4, %c1_i32 : i32
    %16 = arith.index_cast %15 : i32 to index
    %c0_13 = arith.constant 0 : index
    %c0_14 = arith.constant 0 : index
    %17 = vector.load %arg5[%16, %c0_13, %c0_14] : memref<49x16x128xbf16, #tpu.memory_space<vmem>>, vector<1x16x128xbf16>
    %18 = vector.shape_cast %17 : vector<1x16x128xbf16> to vector<16x128xbf16>
    %cst_15 = arith.constant dense<0.000000e+00> : vector<16x128xf32>
    %19 = tpu.matmul %14, %18, %cst_15 {dimension_numbers = #tpu.dot_dimension_numbers<[1], [0], [0], [1], [0, 0, 1, 1], [], []>} : vector<16x16xbf16>, vector<16x128xbf16>, vector<16x128xf32> -> vector<16x128xf32>
    %20 = arith.addf %12, %19 : vector<16x128xf32>
    %c0_16 = arith.constant 0 : index
    %c0_17 = arith.constant 0 : index
    %c1 = arith.constant 1 : index
    %c0_18 = arith.constant 0 : index
    %21 = vector.load %arg3[%c0_16, %c0_17, %c1, %c0_18] : memref<1x1x19x16xbf16, #tpu.memory_space<vmem>>, vector<1x1x16x16xbf16>
    %22 = vector.shape_cast %21 : vector<1x1x16x16xbf16> to vector<16x16xbf16>
    %c2_i32 = arith.constant 2 : i32
    %23 = arith.addi %4, %c2_i32 : i32
    %24 = arith.index_cast %23 : i32 to index
    %c0_19 = arith.constant 0 : index
    %c0_20 = arith.constant 0 : index
    %25 = vector.load %arg5[%24, %c0_19, %c0_20] : memref<49x16x128xbf16, #tpu.memory_space<vmem>>, vector<1x16x128xbf16>
    %26 = vector.shape_cast %25 : vector<1x16x128xbf16> to vector<16x128xbf16>
    %cst_21 = arith.constant dense<0.000000e+00> : vector<16x128xf32>
    %27 = tpu.matmul %22, %26, %cst_21 {dimension_numbers = #tpu.dot_dimension_numbers<[1], [0], [0], [1], [0, 0, 1, 1], [], []>} : vector<16x16xbf16>, vector<16x128xbf16>, vector<16x128xf32> -> vector<16x128xf32>
    %28 = arith.addf %20, %27 : vector<16x128xf32>
    %c0_22 = arith.constant 0 : index
    %c0_23 = arith.constant 0 : index
    %c1_24 = arith.constant 1 : index
    %c0_25 = arith.constant 0 : index
    %29 = vector.load %arg4[%c0_22, %c0_23, %c1_24, %c0_25] : memref<1x1x19x16xbf16, #tpu.memory_space<vmem>>, vector<1x1x16x16xbf16>
    %30 = vector.shape_cast %29 : vector<1x1x16x16xbf16> to vector<16x16xbf16>
    %c3_i32 = arith.constant 3 : i32
    %31 = arith.addi %4, %c3_i32 : i32
    %32 = arith.index_cast %31 : i32 to index
    %c0_26 = arith.constant 0 : index
    %c0_27 = arith.constant 0 : index
    %33 = vector.load %arg5[%32, %c0_26, %c0_27] : memref<49x16x128xbf16, #tpu.memory_space<vmem>>, vector<1x16x128xbf16>
    %34 = vector.shape_cast %33 : vector<1x16x128xbf16> to vector<16x128xbf16>
    %cst_28 = arith.constant dense<0.000000e+00> : vector<16x128xf32>
    %35 = tpu.matmul %30, %34, %cst_28 {dimension_numbers = #tpu.dot_dimension_numbers<[1], [0], [0], [1], [0, 0, 1, 1], [], []>} : vector<16x16xbf16>, vector<16x128xbf16>, vector<16x128xf32> -> vector<16x128xf32>
    %36 = arith.addf %28, %35 : vector<16x128xf32>
    %c0_29 = arith.constant 0 : index
    %c0_30 = arith.constant 0 : index
    %c2 = arith.constant 2 : index
    %c0_31 = arith.constant 0 : index
    %37 = vector.load %arg3[%c0_29, %c0_30, %c2, %c0_31] : memref<1x1x19x16xbf16, #tpu.memory_space<vmem>>, vector<1x1x16x16xbf16>
    %38 = vector.shape_cast %37 : vector<1x1x16x16xbf16> to vector<16x16xbf16>
    %c4_i32 = arith.constant 4 : i32
    %39 = arith.addi %4, %c4_i32 : i32
    %40 = arith.index_cast %39 : i32 to index
    %c0_32 = arith.constant 0 : index
    %c0_33 = arith.constant 0 : index
    %41 = vector.load %arg5[%40, %c0_32, %c0_33] : memref<49x16x128xbf16, #tpu.memory_space<vmem>>, vector<1x16x128xbf16>
    %42 = vector.shape_cast %41 : vector<1x16x128xbf16> to vector<16x128xbf16>
    %cst_34 = arith.constant dense<0.000000e+00> : vector<16x128xf32>
    %43 = tpu.matmul %38, %42, %cst_34 {dimension_numbers = #tpu.dot_dimension_numbers<[1], [0], [0], [1], [0, 0, 1, 1], [], []>} : vector<16x16xbf16>, vector<16x128xbf16>, vector<16x128xf32> -> vector<16x128xf32>
    %44 = arith.addf %36, %43 : vector<16x128xf32>
    %c0_35 = arith.constant 0 : index
    %c0_36 = arith.constant 0 : index
    %c2_37 = arith.constant 2 : index
    %c0_38 = arith.constant 0 : index
    %45 = vector.load %arg4[%c0_35, %c0_36, %c2_37, %c0_38] : memref<1x1x19x16xbf16, #tpu.memory_space<vmem>>, vector<1x1x16x16xbf16>
    %46 = vector.shape_cast %45 : vector<1x1x16x16xbf16> to vector<16x16xbf16>
    %c5_i32 = arith.constant 5 : i32
    %47 = arith.addi %4, %c5_i32 : i32
    %48 = arith.index_cast %47 : i32 to index
    %c0_39 = arith.constant 0 : index
    %c0_40 = arith.constant 0 : index
    %49 = vector.load %arg5[%48, %c0_39, %c0_40] : memref<49x16x128xbf16, #tpu.memory_space<vmem>>, vector<1x16x128xbf16>
    %50 = vector.shape_cast %49 : vector<1x16x128xbf16> to vector<16x128xbf16>
    %cst_41 = arith.constant dense<0.000000e+00> : vector<16x128xf32>
    %51 = tpu.matmul %46, %50, %cst_41 {dimension_numbers = #tpu.dot_dimension_numbers<[1], [0], [0], [1], [0, 0, 1, 1], [], []>} : vector<16x16xbf16>, vector<16x128xbf16>, vector<16x128xf32> -> vector<16x128xf32>
    %52 = arith.addf %44, %51 : vector<16x128xf32>
    %c0_42 = arith.constant 0 : index
    %c0_43 = arith.constant 0 : index
    %c3 = arith.constant 3 : index
    %c0_44 = arith.constant 0 : index
    %53 = vector.load %arg3[%c0_42, %c0_43, %c3, %c0_44] : memref<1x1x19x16xbf16, #tpu.memory_space<vmem>>, vector<1x1x16x16xbf16>
    %54 = vector.shape_cast %53 : vector<1x1x16x16xbf16> to vector<16x16xbf16>
    %c6_i32 = arith.constant 6 : i32
    %55 = arith.addi %4, %c6_i32 : i32
    %56 = arith.index_cast %55 : i32 to index
    %c0_45 = arith.constant 0 : index
    %c0_46 = arith.constant 0 : index
    %57 = vector.load %arg5[%56, %c0_45, %c0_46] : memref<49x16x128xbf16, #tpu.memory_space<vmem>>, vector<1x16x128xbf16>
    %58 = vector.shape_cast %57 : vector<1x16x128xbf16> to vector<16x128xbf16>
    %cst_47 = arith.constant dense<0.000000e+00> : vector<16x128xf32>
    %59 = tpu.matmul %54, %58, %cst_47 {dimension_numbers = #tpu.dot_dimension_numbers<[1], [0], [0], [1], [0, 0, 1, 1], [], []>} : vector<16x16xbf16>, vector<16x128xbf16>, vector<16x128xf32> -> vector<16x128xf32>
    %60 = arith.addf %52, %59 : vector<16x128xf32>
    %c0_48 = arith.constant 0 : index
    %c0_49 = arith.constant 0 : index
    %61 = vector.load %arg9[%c0_48, %c0_49] : memref<16x128xf32, #tpu.memory_space<vmem>>, vector<16x128xf32>
    tpu.vector_store %arg9[%c0_48, %c0_49], %60 {strides = array<i32>} : memref<16x128xf32, #tpu.memory_space<vmem>>, vector<16x128xf32>,
    %c6_i32_50 = arith.constant 6 : i32
    %62 = arith.cmpi eq, %arg2, %c6_i32_50 : i32
    %63 = arith.extui %62 : i1 to i32
    %c0_i32_51 = arith.constant 0 : i32
    %64 = arith.cmpi ne, %63, %c0_i32_51 : i32
    scf.if %64 {
      %c0_52 = arith.constant 0 : index
      %c0_53 = arith.constant 0 : index
      %65 = vector.load %arg9[%c0_52, %c0_53] : memref<16x128xf32, #tpu.memory_space<vmem>>, vector<16x128xf32>
      %c0_54 = arith.constant 0 : index
      %c0_55 = arith.constant 0 : index
      %66 = vector.load %arg6[%c0_54, %c0_55] : memref<1x128xf32, #tpu.memory_space<vmem>>, vector<1x128xf32>
      %67 = vector.broadcast %66 : vector<1x128xf32> to vector<16x128xf32>
      %68 = arith.mulf %65, %67 : vector<16x128xf32>
      %c0_56 = arith.constant 0 : index
      %c0_57 = arith.constant 0 : index
      %69 = vector.load %arg7[%c0_56, %c0_57] : memref<1x128xf32, #tpu.memory_space<vmem>>, vector<1x128xf32>
      %70 = vector.broadcast %69 : vector<1x128xf32> to vector<16x128xf32>
      %71 = arith.addf %68, %70 : vector<16x128xf32>
      %cst_58 = arith.constant 0.000000e+00 : f32
      %72 = vector.broadcast %cst_58 : f32 to vector<16x128xf32>
      %73 = arith.maximumf %71, %72 : vector<16x128xf32>
      %74 = arith.truncf %73 : vector<16x128xf32> to vector<16x128xbf16>
      %c0_59 = arith.constant 0 : index
      %c0_60 = arith.constant 0 : index
      %c0_61 = arith.constant 0 : index
      %c0_62 = arith.constant 0 : index
      %75 = vector.load %arg8[%c0_59, %c0_60, %c0_61, %c0_62] : memref<1x1x16x128xbf16, #tpu.memory_space<vmem>>, vector<1x1x16x128xbf16>
      %76 = vector.shape_cast %75 : vector<1x1x16x128xbf16> to vector<16x128xbf16>
      %77 = vector.shape_cast %74 : vector<16x128xbf16> to vector<1x1x16x128xbf16>
      tpu.vector_store %arg8[%c0_59, %c0_60, %c0_61, %c0_62], %77 {strides = array<i32>} : memref<1x1x16x128xbf16, #tpu.memory_space<vmem>>, vector<1x1x16x128xbf16>,
    } else {
    }
    return
  }
  func.func @transform_0(%arg0: i32, %arg1: i32, %arg2: i32) -> (i32, i32, i32, i32) {
    %c2_i32 = arith.constant 2 : i32
    %0 = arith.muli %arg1, %c2_i32 : i32
    %1 = arith.addi %0, %arg2 : i32
    %c0_i32 = arith.constant 0 : i32
    %c0_i32_0 = arith.constant 0 : i32
    %c0_i32_1 = arith.constant 0 : i32
    return %arg0, %1, %c0_i32, %c0_i32_0 : i32, i32, i32, i32
  }
  func.func @transform_1(%arg0: i32, %arg1: i32, %arg2: i32) -> (i32, i32, i32, i32) {
    %c2_i32 = arith.constant 2 : i32
    %0 = arith.muli %arg1, %c2_i32 : i32
    %1 = arith.addi %0, %arg2 : i32
    %c0_i32 = arith.constant 0 : i32
    %c0_i32_0 = arith.constant 0 : i32
    %c0_i32_1 = arith.constant 0 : i32
    return %arg0, %1, %c0_i32, %c0_i32_0 : i32, i32, i32, i32
  }
  func.func @transform_2(%arg0: i32, %arg1: i32, %arg2: i32) -> (i32, i32, i32) {
    %c0_i32 = arith.constant 0 : i32
    %c0_i32_0 = arith.constant 0 : i32
    %c0_i32_1 = arith.constant 0 : i32
    %c0_i32_2 = arith.constant 0 : i32
    return %c0_i32, %c0_i32_0, %c0_i32_1 : i32, i32, i32
  }
  func.func @transform_3(%arg0: i32, %arg1: i32, %arg2: i32) -> (i32, i32) {
    %c0_i32 = arith.constant 0 : i32
    %c0_i32_0 = arith.constant 0 : i32
    %c0_i32_1 = arith.constant 0 : i32
    return %c0_i32, %c0_i32_0 : i32, i32
  }
  func.func @transform_4(%arg0: i32, %arg1: i32, %arg2: i32) -> (i32, i32) {
    %c0_i32 = arith.constant 0 : i32
    %c0_i32_0 = arith.constant 0 : i32
    %c0_i32_1 = arith.constant 0 : i32
    return %c0_i32, %c0_i32_0 : i32, i32
  }
  func.func @transform_5(%arg0: i32, %arg1: i32, %arg2: i32) -> (i32, i32, i32, i32) {
    %c0_i32 = arith.constant 0 : i32
    %c0_i32_0 = arith.constant 0 : i32
    %c0_i32_1 = arith.constant 0 : i32
    return %arg0, %arg1, %c0_i32, %c0_i32_0 : i32, i32, i32, i32
  }
}

module attributes {stable_mosaic.version = 11 : i64} {
  func.func @kernel(%arg0: i32, %arg1: i32, %arg2: i32, %arg3: memref<1x1x9x128xbf16, #tpu.memory_space<vmem>>, %arg4: memref<1x1x9x128xbf16, #tpu.memory_space<vmem>>, %arg5: memref<1x1x8x128xbf16, #tpu.memory_space<vmem>>) attributes {dimension_semantics = [#tpu.dimension_semantics<parallel>, #tpu.dimension_semantics<parallel>, #tpu.dimension_semantics<arbitrary>], iteration_bounds = array<i64: 2, 8, 3>, scalar_prefetch = 0 : i64, scratch_operands = 0 : i64, tpu.core_type = #tpu.core_type<tc>, window_params = [{transform_indices = @transform_0, window_bounds = array<i64: 1, 1, 9, 128>}, {transform_indices = @transform_1, window_bounds = array<i64: 1, 1, 9, 128>}, {transform_indices = @transform_2, window_bounds = array<i64: 1, 1, 8, 128>}]} {
    %c0 = arith.constant 0 : index
    %c0_0 = arith.constant 0 : index
    %c0_1 = arith.constant 0 : index
    %c0_2 = arith.constant 0 : index
    %0 = vector.load %arg3[%c0, %c0_0, %c0_1, %c0_2] : memref<1x1x9x128xbf16, #tpu.memory_space<vmem>>, vector<1x1x8x128xbf16>
    %1 = vector.shape_cast %0 : vector<1x1x8x128xbf16> to vector<8x128xbf16>
    %c0_3 = arith.constant 0 : index
    %c0_4 = arith.constant 0 : index
    %c0_5 = arith.constant 0 : index
    %c0_6 = arith.constant 0 : index
    %2 = vector.load %arg4[%c0_3, %c0_4, %c0_5, %c0_6] : memref<1x1x9x128xbf16, #tpu.memory_space<vmem>>, vector<1x1x8x128xbf16>
    %3 = vector.shape_cast %2 : vector<1x1x8x128xbf16> to vector<8x128xbf16>
    %4 = arith.maximumf %1, %3 : vector<8x128xbf16>
    %c0_7 = arith.constant 0 : index
    %c0_8 = arith.constant 0 : index
    %c1 = arith.constant 1 : index
    %c0_9 = arith.constant 0 : index
    %5 = vector.load %arg3[%c0_7, %c0_8, %c1, %c0_9] : memref<1x1x9x128xbf16, #tpu.memory_space<vmem>>, vector<1x1x8x128xbf16>
    %6 = vector.shape_cast %5 : vector<1x1x8x128xbf16> to vector<8x128xbf16>
    %7 = arith.maximumf %4, %6 : vector<8x128xbf16>
    %c0_i32 = arith.constant 0 : i32
    %8 = arith.cmpi eq, %arg2, %c0_i32 : i32
    %9 = arith.extui %8 : i1 to i32
    %c0_i32_10 = arith.constant 0 : i32
    %10 = arith.cmpi ne, %9, %c0_i32_10 : i32
    scf.if %10 {
      %c0_13 = arith.constant 0 : index
      %c0_14 = arith.constant 0 : index
      %c0_15 = arith.constant 0 : index
      %c0_16 = arith.constant 0 : index
      %14 = vector.load %arg5[%c0_13, %c0_14, %c0_15, %c0_16] : memref<1x1x8x128xbf16, #tpu.memory_space<vmem>>, vector<1x1x8x128xbf16>
      %15 = vector.shape_cast %14 : vector<1x1x8x128xbf16> to vector<8x128xbf16>
      %16 = vector.shape_cast %7 : vector<8x128xbf16> to vector<1x1x8x128xbf16>
      tpu.vector_store %arg5[%c0_13, %c0_14, %c0_15, %c0_16], %16 {strides = array<i32>} : memref<1x1x8x128xbf16, #tpu.memory_space<vmem>>, vector<1x1x8x128xbf16>,
    } else {
    }
    %c0_i32_11 = arith.constant 0 : i32
    %11 = arith.cmpi ne, %arg2, %c0_i32_11 : i32
    %12 = arith.extui %11 : i1 to i32
    %c0_i32_12 = arith.constant 0 : i32
    %13 = arith.cmpi ne, %12, %c0_i32_12 : i32
    scf.if %13 {
      %c0_13 = arith.constant 0 : index
      %c0_14 = arith.constant 0 : index
      %c0_15 = arith.constant 0 : index
      %c0_16 = arith.constant 0 : index
      %14 = vector.load %arg5[%c0_13, %c0_14, %c0_15, %c0_16] : memref<1x1x8x128xbf16, #tpu.memory_space<vmem>>, vector<1x1x8x128xbf16>
      %15 = vector.shape_cast %14 : vector<1x1x8x128xbf16> to vector<8x128xbf16>
      %16 = arith.maximumf %15, %7 : vector<8x128xbf16>
      %c0_17 = arith.constant 0 : index
      %c0_18 = arith.constant 0 : index
      %c0_19 = arith.constant 0 : index
      %c0_20 = arith.constant 0 : index
      %17 = vector.load %arg5[%c0_17, %c0_18, %c0_19, %c0_20] : memref<1x1x8x128xbf16, #tpu.memory_space<vmem>>, vector<1x1x8x128xbf16>
      %18 = vector.shape_cast %17 : vector<1x1x8x128xbf16> to vector<8x128xbf16>
      %19 = vector.shape_cast %16 : vector<8x128xbf16> to vector<1x1x8x128xbf16>
      tpu.vector_store %arg5[%c0_17, %c0_18, %c0_19, %c0_20], %19 {strides = array<i32>} : memref<1x1x8x128xbf16, #tpu.memory_space<vmem>>, vector<1x1x8x128xbf16>,
    } else {
    }
    return
  }
  func.func @transform_0(%arg0: i32, %arg1: i32, %arg2: i32) -> (i32, i32, i32, i32) {
    %c2_i32 = arith.constant 2 : i32
    %0 = arith.muli %arg1, %c2_i32 : i32
    %1 = arith.addi %0, %arg2 : i32
    %c0_i32 = arith.constant 0 : i32
    %c0_i32_0 = arith.constant 0 : i32
    %c0_i32_1 = arith.constant 0 : i32
    return %arg0, %1, %c0_i32, %c0_i32_0 : i32, i32, i32, i32
  }
  func.func @transform_1(%arg0: i32, %arg1: i32, %arg2: i32) -> (i32, i32, i32, i32) {
    %c2_i32 = arith.constant 2 : i32
    %0 = arith.muli %arg1, %c2_i32 : i32
    %1 = arith.addi %0, %arg2 : i32
    %c0_i32 = arith.constant 0 : i32
    %c0_i32_0 = arith.constant 0 : i32
    %c0_i32_1 = arith.constant 0 : i32
    return %arg0, %1, %c0_i32, %c0_i32_0 : i32, i32, i32, i32
  }
  func.func @transform_2(%arg0: i32, %arg1: i32, %arg2: i32) -> (i32, i32, i32, i32) {
    %c0_i32 = arith.constant 0 : i32
    %c0_i32_0 = arith.constant 0 : i32
    %c0_i32_1 = arith.constant 0 : i32
    return %arg0, %arg1, %c0_i32, %c0_i32_0 : i32, i32, i32, i32
  }
}

module attributes {stable_mosaic.version = 11 : i64} {
  func.func @kernel(%arg0: i32, %arg1: i32, %arg2: i32, %arg3: memref<1x1x10x128xbf16, #tpu.memory_space<vmem>>, %arg4: memref<9x128x128xbf16, #tpu.memory_space<vmem>>, %arg5: memref<1x128xf32, #tpu.memory_space<vmem>>, %arg6: memref<1x128xf32, #tpu.memory_space<vmem>>, %arg7: memref<1x1x8x128xbf16, #tpu.memory_space<vmem>>, %arg8: memref<8x128xf32, #tpu.memory_space<vmem>>) attributes {dimension_semantics = [#tpu.dimension_semantics<parallel>, #tpu.dimension_semantics<parallel>, #tpu.dimension_semantics<arbitrary>], iteration_bounds = array<i64: 2, 8, 3>, scalar_prefetch = 0 : i64, scratch_operands = 1 : i64, tpu.core_type = #tpu.core_type<tc>, window_params = [{transform_indices = @transform_0, window_bounds = array<i64: 1, 1, 10, 128>}, {pipeline_mode = #tpu.pipeline_mode<synchronous>, transform_indices = @transform_1, window_bounds = array<i64: 9, 128, 128>}, {pipeline_mode = #tpu.pipeline_mode<synchronous>, transform_indices = @transform_2, window_bounds = array<i64: 1, 128>}, {pipeline_mode = #tpu.pipeline_mode<synchronous>, transform_indices = @transform_3, window_bounds = array<i64: 1, 128>}, {transform_indices = @transform_4, window_bounds = array<i64: 1, 1, 8, 128>}]} {
    %c0_i32 = arith.constant 0 : i32
    %0 = arith.cmpi eq, %arg2, %c0_i32 : i32
    %1 = arith.extui %0 : i1 to i32
    %c0_i32_0 = arith.constant 0 : i32
    %2 = arith.cmpi ne, %1, %c0_i32_0 : i32
    scf.if %2 {
      %cst_25 = arith.constant 0.000000e+00 : f32
      %33 = vector.broadcast %cst_25 : f32 to vector<8x128xf32>
      %c0_26 = arith.constant 0 : index
      %c0_27 = arith.constant 0 : index
      %34 = vector.load %arg8[%c0_26, %c0_27] : memref<8x128xf32, #tpu.memory_space<vmem>>, vector<8x128xf32>
      tpu.vector_store %arg8[%c0_26, %c0_27], %33 {strides = array<i32>} : memref<8x128xf32, #tpu.memory_space<vmem>>, vector<8x128xf32>,
    } else {
    }
    %c0 = arith.constant 0 : index
    %c0_1 = arith.constant 0 : index
    %3 = vector.load %arg8[%c0, %c0_1] : memref<8x128xf32, #tpu.memory_space<vmem>>, vector<8x128xf32>
    %c3_i32 = arith.constant 3 : i32
    %4 = arith.muli %arg2, %c3_i32 : i32
    %c0_2 = arith.constant 0 : index
    %c0_3 = arith.constant 0 : index
    %c0_4 = arith.constant 0 : index
    %c0_5 = arith.constant 0 : index
    %5 = vector.load %arg3[%c0_2, %c0_3, %c0_4, %c0_5] : memref<1x1x10x128xbf16, #tpu.memory_space<vmem>>, vector<1x1x8x128xbf16>
    %6 = vector.shape_cast %5 : vector<1x1x8x128xbf16> to vector<8x128xbf16>
    %c0_i32_6 = arith.constant 0 : i32
    %7 = arith.addi %4, %c0_i32_6 : i32
    %8 = arith.index_cast %7 : i32 to index
    %c0_7 = arith.constant 0 : index
    %c0_8 = arith.constant 0 : index
    %9 = vector.load %arg4[%8, %c0_7, %c0_8] : memref<9x128x128xbf16, #tpu.memory_space<vmem>>, vector<1x128x128xbf16>
    %10 = vector.shape_cast %9 : vector<1x128x128xbf16> to vector<128x128xbf16>
    %cst = arith.constant dense<0.000000e+00> : vector<8x128xf32>
    %11 = tpu.matmul %6, %10, %cst {dimension_numbers = #tpu.dot_dimension_numbers<[1], [0], [0], [1], [0, 0, 1, 1], [], []>} : vector<8x128xbf16>, vector<128x128xbf16>, vector<8x128xf32> -> vector<8x128xf32>
    %12 = arith.addf %3, %11 : vector<8x128xf32>
    %c0_9 = arith.constant 0 : index
    %c0_10 = arith.constant 0 : index
    %c1 = arith.constant 1 : index
    %c0_11 = arith.constant 0 : index
    %13 = vector.load %arg3[%c0_9, %c0_10, %c1, %c0_11] : memref<1x1x10x128xbf16, #tpu.memory_space<vmem>>, vector<1x1x8x128xbf16>
    %14 = vector.shape_cast %13 : vector<1x1x8x128xbf16> to vector<8x128xbf16>
    %c1_i32 = arith.constant 1 : i32
    %15 = arith.addi %4, %c1_i32 : i32
    %16 = arith.index_cast %15 : i32 to index
    %c0_12 = arith.constant 0 : index
    %c0_13 = arith.constant 0 : index
    %17 = vector.load %arg4[%16, %c0_12, %c0_13] : memref<9x128x128xbf16, #tpu.memory_space<vmem>>, vector<1x128x128xbf16>
    %18 = vector.shape_cast %17 : vector<1x128x128xbf16> to vector<128x128xbf16>
    %cst_14 = arith.constant dense<0.000000e+00> : vector<8x128xf32>
    %19 = tpu.matmul %14, %18, %cst_14 {dimension_numbers = #tpu.dot_dimension_numbers<[1], [0], [0], [1], [0, 0, 1, 1], [], []>} : vector<8x128xbf16>, vector<128x128xbf16>, vector<8x128xf32> -> vector<8x128xf32>
    %20 = arith.addf %12, %19 : vector<8x128xf32>
    %c0_15 = arith.constant 0 : index
    %c0_16 = arith.constant 0 : index
    %c2 = arith.constant 2 : index
    %c0_17 = arith.constant 0 : index
    %21 = vector.load %arg3[%c0_15, %c0_16, %c2, %c0_17] : memref<1x1x10x128xbf16, #tpu.memory_space<vmem>>, vector<1x1x8x128xbf16>
    %22 = vector.shape_cast %21 : vector<1x1x8x128xbf16> to vector<8x128xbf16>
    %c2_i32 = arith.constant 2 : i32
    %23 = arith.addi %4, %c2_i32 : i32
    %24 = arith.index_cast %23 : i32 to index
    %c0_18 = arith.constant 0 : index
    %c0_19 = arith.constant 0 : index
    %25 = vector.load %arg4[%24, %c0_18, %c0_19] : memref<9x128x128xbf16, #tpu.memory_space<vmem>>, vector<1x128x128xbf16>
    %26 = vector.shape_cast %25 : vector<1x128x128xbf16> to vector<128x128xbf16>
    %cst_20 = arith.constant dense<0.000000e+00> : vector<8x128xf32>
    %27 = tpu.matmul %22, %26, %cst_20 {dimension_numbers = #tpu.dot_dimension_numbers<[1], [0], [0], [1], [0, 0, 1, 1], [], []>} : vector<8x128xbf16>, vector<128x128xbf16>, vector<8x128xf32> -> vector<8x128xf32>
    %28 = arith.addf %20, %27 : vector<8x128xf32>
    %c0_21 = arith.constant 0 : index
    %c0_22 = arith.constant 0 : index
    %29 = vector.load %arg8[%c0_21, %c0_22] : memref<8x128xf32, #tpu.memory_space<vmem>>, vector<8x128xf32>
    tpu.vector_store %arg8[%c0_21, %c0_22], %28 {strides = array<i32>} : memref<8x128xf32, #tpu.memory_space<vmem>>, vector<8x128xf32>,
    %c2_i32_23 = arith.constant 2 : i32
    %30 = arith.cmpi eq, %arg2, %c2_i32_23 : i32
    %31 = arith.extui %30 : i1 to i32
    %c0_i32_24 = arith.constant 0 : i32
    %32 = arith.cmpi ne, %31, %c0_i32_24 : i32
    scf.if %32 {
      %c0_25 = arith.constant 0 : index
      %c0_26 = arith.constant 0 : index
      %33 = vector.load %arg8[%c0_25, %c0_26] : memref<8x128xf32, #tpu.memory_space<vmem>>, vector<8x128xf32>
      %c0_27 = arith.constant 0 : index
      %c0_28 = arith.constant 0 : index
      %34 = vector.load %arg5[%c0_27, %c0_28] : memref<1x128xf32, #tpu.memory_space<vmem>>, vector<1x128xf32>
      %35 = vector.broadcast %34 : vector<1x128xf32> to vector<8x128xf32>
      %36 = arith.mulf %33, %35 : vector<8x128xf32>
      %c0_29 = arith.constant 0 : index
      %c0_30 = arith.constant 0 : index
      %37 = vector.load %arg6[%c0_29, %c0_30] : memref<1x128xf32, #tpu.memory_space<vmem>>, vector<1x128xf32>
      %38 = vector.broadcast %37 : vector<1x128xf32> to vector<8x128xf32>
      %39 = arith.addf %36, %38 : vector<8x128xf32>
      %cst_31 = arith.constant 0.000000e+00 : f32
      %40 = vector.broadcast %cst_31 : f32 to vector<8x128xf32>
      %41 = arith.maximumf %39, %40 : vector<8x128xf32>
      %42 = arith.truncf %41 : vector<8x128xf32> to vector<8x128xbf16>
      %c0_32 = arith.constant 0 : index
      %c0_33 = arith.constant 0 : index
      %c0_34 = arith.constant 0 : index
      %c0_35 = arith.constant 0 : index
      %43 = vector.load %arg7[%c0_32, %c0_33, %c0_34, %c0_35] : memref<1x1x8x128xbf16, #tpu.memory_space<vmem>>, vector<1x1x8x128xbf16>
      %44 = vector.shape_cast %43 : vector<1x1x8x128xbf16> to vector<8x128xbf16>
      %45 = vector.shape_cast %42 : vector<8x128xbf16> to vector<1x1x8x128xbf16>
      tpu.vector_store %arg7[%c0_32, %c0_33, %c0_34, %c0_35], %45 {strides = array<i32>} : memref<1x1x8x128xbf16, #tpu.memory_space<vmem>>, vector<1x1x8x128xbf16>,
    } else {
    }
    return
  }
  func.func @transform_0(%arg0: i32, %arg1: i32, %arg2: i32) -> (i32, i32, i32, i32) {
    %c1_i32 = arith.constant 1 : i32
    %0 = arith.muli %arg1, %c1_i32 : i32
    %1 = arith.addi %0, %arg2 : i32
    %c0_i32 = arith.constant 0 : i32
    %c0_i32_0 = arith.constant 0 : i32
    %c0_i32_1 = arith.constant 0 : i32
    return %arg0, %1, %c0_i32, %c0_i32_0 : i32, i32, i32, i32
  }
  func.func @transform_1(%arg0: i32, %arg1: i32, %arg2: i32) -> (i32, i32, i32) {
    %c0_i32 = arith.constant 0 : i32
    %c0_i32_0 = arith.constant 0 : i32
    %c0_i32_1 = arith.constant 0 : i32
    %c0_i32_2 = arith.constant 0 : i32
    return %c0_i32, %c0_i32_0, %c0_i32_1 : i32, i32, i32
  }
  func.func @transform_2(%arg0: i32, %arg1: i32, %arg2: i32) -> (i32, i32) {
    %c0_i32 = arith.constant 0 : i32
    %c0_i32_0 = arith.constant 0 : i32
    %c0_i32_1 = arith.constant 0 : i32
    return %c0_i32, %c0_i32_0 : i32, i32
  }
  func.func @transform_3(%arg0: i32, %arg1: i32, %arg2: i32) -> (i32, i32) {
    %c0_i32 = arith.constant 0 : i32
    %c0_i32_0 = arith.constant 0 : i32
    %c0_i32_1 = arith.constant 0 : i32
    return %c0_i32, %c0_i32_0 : i32, i32
  }
  func.func @transform_4(%arg0: i32, %arg1: i32, %arg2: i32) -> (i32, i32, i32, i32) {
    %c0_i32 = arith.constant 0 : i32
    %c0_i32_0 = arith.constant 0 : i32
    %c0_i32_1 = arith.constant 0 : i32
    return %arg0, %arg1, %c0_i32, %c0_i32_0 : i32, i32, i32, i32
  }
}

module attributes {stable_mosaic.version = 11 : i64} {
  func.func @kernel(%arg0: i32, %arg1: i32, %arg2: i32, %arg3: memref<1x1x10x128xbf16, #tpu.memory_space<vmem>>, %arg4: memref<9x128x128xbf16, #tpu.memory_space<vmem>>, %arg5: memref<1x128xf32, #tpu.memory_space<vmem>>, %arg6: memref<1x128xf32, #tpu.memory_space<vmem>>, %arg7: memref<1x1x8x128xbf16, #tpu.memory_space<vmem>>, %arg8: memref<1x1x8x128xbf16, #tpu.memory_space<vmem>>, %arg9: memref<8x128xf32, #tpu.memory_space<vmem>>) attributes {dimension_semantics = [#tpu.dimension_semantics<parallel>, #tpu.dimension_semantics<parallel>, #tpu.dimension_semantics<arbitrary>], iteration_bounds = array<i64: 2, 8, 3>, scalar_prefetch = 0 : i64, scratch_operands = 1 : i64, tpu.core_type = #tpu.core_type<tc>, window_params = [{transform_indices = @transform_0, window_bounds = array<i64: 1, 1, 10, 128>}, {pipeline_mode = #tpu.pipeline_mode<synchronous>, transform_indices = @transform_1, window_bounds = array<i64: 9, 128, 128>}, {pipeline_mode = #tpu.pipeline_mode<synchronous>, transform_indices = @transform_2, window_bounds = array<i64: 1, 128>}, {pipeline_mode = #tpu.pipeline_mode<synchronous>, transform_indices = @transform_3, window_bounds = array<i64: 1, 128>}, {transform_indices = @transform_4, window_bounds = array<i64: 1, 1, 8, 128>}, {transform_indices = @transform_5, window_bounds = array<i64: 1, 1, 8, 128>}]} {
    %c0_i32 = arith.constant 0 : i32
    %0 = arith.cmpi eq, %arg2, %c0_i32 : i32
    %1 = arith.extui %0 : i1 to i32
    %c0_i32_0 = arith.constant 0 : i32
    %2 = arith.cmpi ne, %1, %c0_i32_0 : i32
    scf.if %2 {
      %cst_25 = arith.constant 0.000000e+00 : f32
      %33 = vector.broadcast %cst_25 : f32 to vector<8x128xf32>
      %c0_26 = arith.constant 0 : index
      %c0_27 = arith.constant 0 : index
      %34 = vector.load %arg9[%c0_26, %c0_27] : memref<8x128xf32, #tpu.memory_space<vmem>>, vector<8x128xf32>
      tpu.vector_store %arg9[%c0_26, %c0_27], %33 {strides = array<i32>} : memref<8x128xf32, #tpu.memory_space<vmem>>, vector<8x128xf32>,
    } else {
    }
    %c0 = arith.constant 0 : index
    %c0_1 = arith.constant 0 : index
    %3 = vector.load %arg9[%c0, %c0_1] : memref<8x128xf32, #tpu.memory_space<vmem>>, vector<8x128xf32>
    %c3_i32 = arith.constant 3 : i32
    %4 = arith.muli %arg2, %c3_i32 : i32
    %c0_2 = arith.constant 0 : index
    %c0_3 = arith.constant 0 : index
    %c0_4 = arith.constant 0 : index
    %c0_5 = arith.constant 0 : index
    %5 = vector.load %arg3[%c0_2, %c0_3, %c0_4, %c0_5] : memref<1x1x10x128xbf16, #tpu.memory_space<vmem>>, vector<1x1x8x128xbf16>
    %6 = vector.shape_cast %5 : vector<1x1x8x128xbf16> to vector<8x128xbf16>
    %c0_i32_6 = arith.constant 0 : i32
    %7 = arith.addi %4, %c0_i32_6 : i32
    %8 = arith.index_cast %7 : i32 to index
    %c0_7 = arith.constant 0 : index
    %c0_8 = arith.constant 0 : index
    %9 = vector.load %arg4[%8, %c0_7, %c0_8] : memref<9x128x128xbf16, #tpu.memory_space<vmem>>, vector<1x128x128xbf16>
    %10 = vector.shape_cast %9 : vector<1x128x128xbf16> to vector<128x128xbf16>
    %cst = arith.constant dense<0.000000e+00> : vector<8x128xf32>
    %11 = tpu.matmul %6, %10, %cst {dimension_numbers = #tpu.dot_dimension_numbers<[1], [0], [0], [1], [0, 0, 1, 1], [], []>} : vector<8x128xbf16>, vector<128x128xbf16>, vector<8x128xf32> -> vector<8x128xf32>
    %12 = arith.addf %3, %11 : vector<8x128xf32>
    %c0_9 = arith.constant 0 : index
    %c0_10 = arith.constant 0 : index
    %c1 = arith.constant 1 : index
    %c0_11 = arith.constant 0 : index
    %13 = vector.load %arg3[%c0_9, %c0_10, %c1, %c0_11] : memref<1x1x10x128xbf16, #tpu.memory_space<vmem>>, vector<1x1x8x128xbf16>
    %14 = vector.shape_cast %13 : vector<1x1x8x128xbf16> to vector<8x128xbf16>
    %c1_i32 = arith.constant 1 : i32
    %15 = arith.addi %4, %c1_i32 : i32
    %16 = arith.index_cast %15 : i32 to index
    %c0_12 = arith.constant 0 : index
    %c0_13 = arith.constant 0 : index
    %17 = vector.load %arg4[%16, %c0_12, %c0_13] : memref<9x128x128xbf16, #tpu.memory_space<vmem>>, vector<1x128x128xbf16>
    %18 = vector.shape_cast %17 : vector<1x128x128xbf16> to vector<128x128xbf16>
    %cst_14 = arith.constant dense<0.000000e+00> : vector<8x128xf32>
    %19 = tpu.matmul %14, %18, %cst_14 {dimension_numbers = #tpu.dot_dimension_numbers<[1], [0], [0], [1], [0, 0, 1, 1], [], []>} : vector<8x128xbf16>, vector<128x128xbf16>, vector<8x128xf32> -> vector<8x128xf32>
    %20 = arith.addf %12, %19 : vector<8x128xf32>
    %c0_15 = arith.constant 0 : index
    %c0_16 = arith.constant 0 : index
    %c2 = arith.constant 2 : index
    %c0_17 = arith.constant 0 : index
    %21 = vector.load %arg3[%c0_15, %c0_16, %c2, %c0_17] : memref<1x1x10x128xbf16, #tpu.memory_space<vmem>>, vector<1x1x8x128xbf16>
    %22 = vector.shape_cast %21 : vector<1x1x8x128xbf16> to vector<8x128xbf16>
    %c2_i32 = arith.constant 2 : i32
    %23 = arith.addi %4, %c2_i32 : i32
    %24 = arith.index_cast %23 : i32 to index
    %c0_18 = arith.constant 0 : index
    %c0_19 = arith.constant 0 : index
    %25 = vector.load %arg4[%24, %c0_18, %c0_19] : memref<9x128x128xbf16, #tpu.memory_space<vmem>>, vector<1x128x128xbf16>
    %26 = vector.shape_cast %25 : vector<1x128x128xbf16> to vector<128x128xbf16>
    %cst_20 = arith.constant dense<0.000000e+00> : vector<8x128xf32>
    %27 = tpu.matmul %22, %26, %cst_20 {dimension_numbers = #tpu.dot_dimension_numbers<[1], [0], [0], [1], [0, 0, 1, 1], [], []>} : vector<8x128xbf16>, vector<128x128xbf16>, vector<8x128xf32> -> vector<8x128xf32>
    %28 = arith.addf %20, %27 : vector<8x128xf32>
    %c0_21 = arith.constant 0 : index
    %c0_22 = arith.constant 0 : index
    %29 = vector.load %arg9[%c0_21, %c0_22] : memref<8x128xf32, #tpu.memory_space<vmem>>, vector<8x128xf32>
    tpu.vector_store %arg9[%c0_21, %c0_22], %28 {strides = array<i32>} : memref<8x128xf32, #tpu.memory_space<vmem>>, vector<8x128xf32>,
    %c2_i32_23 = arith.constant 2 : i32
    %30 = arith.cmpi eq, %arg2, %c2_i32_23 : i32
    %31 = arith.extui %30 : i1 to i32
    %c0_i32_24 = arith.constant 0 : i32
    %32 = arith.cmpi ne, %31, %c0_i32_24 : i32
    scf.if %32 {
      %c0_25 = arith.constant 0 : index
      %c0_26 = arith.constant 0 : index
      %33 = vector.load %arg9[%c0_25, %c0_26] : memref<8x128xf32, #tpu.memory_space<vmem>>, vector<8x128xf32>
      %c0_27 = arith.constant 0 : index
      %c0_28 = arith.constant 0 : index
      %34 = vector.load %arg5[%c0_27, %c0_28] : memref<1x128xf32, #tpu.memory_space<vmem>>, vector<1x128xf32>
      %35 = vector.broadcast %34 : vector<1x128xf32> to vector<8x128xf32>
      %36 = arith.mulf %33, %35 : vector<8x128xf32>
      %c0_29 = arith.constant 0 : index
      %c0_30 = arith.constant 0 : index
      %37 = vector.load %arg6[%c0_29, %c0_30] : memref<1x128xf32, #tpu.memory_space<vmem>>, vector<1x128xf32>
      %38 = vector.broadcast %37 : vector<1x128xf32> to vector<8x128xf32>
      %39 = arith.addf %36, %38 : vector<8x128xf32>
      %c0_31 = arith.constant 0 : index
      %c0_32 = arith.constant 0 : index
      %c0_33 = arith.constant 0 : index
      %c0_34 = arith.constant 0 : index
      %40 = vector.load %arg7[%c0_31, %c0_32, %c0_33, %c0_34] : memref<1x1x8x128xbf16, #tpu.memory_space<vmem>>, vector<1x1x8x128xbf16>
      %41 = vector.shape_cast %40 : vector<1x1x8x128xbf16> to vector<8x128xbf16>
      %42 = arith.extf %41 : vector<8x128xbf16> to vector<8x128xf32>
      %43 = arith.addf %39, %42 : vector<8x128xf32>
      %cst_35 = arith.constant 0.000000e+00 : f32
      %44 = vector.broadcast %cst_35 : f32 to vector<8x128xf32>
      %45 = arith.maximumf %43, %44 : vector<8x128xf32>
      %46 = arith.truncf %45 : vector<8x128xf32> to vector<8x128xbf16>
      %c0_36 = arith.constant 0 : index
      %c0_37 = arith.constant 0 : index
      %c0_38 = arith.constant 0 : index
      %c0_39 = arith.constant 0 : index
      %47 = vector.load %arg8[%c0_36, %c0_37, %c0_38, %c0_39] : memref<1x1x8x128xbf16, #tpu.memory_space<vmem>>, vector<1x1x8x128xbf16>
      %48 = vector.shape_cast %47 : vector<1x1x8x128xbf16> to vector<8x128xbf16>
      %49 = vector.shape_cast %46 : vector<8x128xbf16> to vector<1x1x8x128xbf16>
      tpu.vector_store %arg8[%c0_36, %c0_37, %c0_38, %c0_39], %49 {strides = array<i32>} : memref<1x1x8x128xbf16, #tpu.memory_space<vmem>>, vector<1x1x8x128xbf16>,
    } else {
    }
    return
  }
  func.func @transform_0(%arg0: i32, %arg1: i32, %arg2: i32) -> (i32, i32, i32, i32) {
    %c1_i32 = arith.constant 1 : i32
    %0 = arith.muli %arg1, %c1_i32 : i32
    %1 = arith.addi %0, %arg2 : i32
    %c0_i32 = arith.constant 0 : i32
    %c0_i32_0 = arith.constant 0 : i32
    %c0_i32_1 = arith.constant 0 : i32
    return %arg0, %1, %c0_i32, %c0_i32_0 : i32, i32, i32, i32
  }
  func.func @transform_1(%arg0: i32, %arg1: i32, %arg2: i32) -> (i32, i32, i32) {
    %c0_i32 = arith.constant 0 : i32
    %c0_i32_0 = arith.constant 0 : i32
    %c0_i32_1 = arith.constant 0 : i32
    %c0_i32_2 = arith.constant 0 : i32
    return %c0_i32, %c0_i32_0, %c0_i32_1 : i32, i32, i32
  }
  func.func @transform_2(%arg0: i32, %arg1: i32, %arg2: i32) -> (i32, i32) {
    %c0_i32 = arith.constant 0 : i32
    %c0_i32_0 = arith.constant 0 : i32
    %c0_i32_1 = arith.constant 0 : i32
    return %c0_i32, %c0_i32_0 : i32, i32
  }
  func.func @transform_3(%arg0: i32, %arg1: i32, %arg2: i32) -> (i32, i32) {
    %c0_i32 = arith.constant 0 : i32
    %c0_i32_0 = arith.constant 0 : i32
    %c0_i32_1 = arith.constant 0 : i32
    return %c0_i32, %c0_i32_0 : i32, i32
  }
  func.func @transform_4(%arg0: i32, %arg1: i32, %arg2: i32) -> (i32, i32, i32, i32) {
    %c0_i32 = arith.constant 0 : i32
    %c0_i32_0 = arith.constant 0 : i32
    %c0_i32_1 = arith.constant 0 : i32
    return %arg0, %arg1, %c0_i32, %c0_i32_0 : i32, i32, i32, i32
  }
  func.func @transform_5(%arg0: i32, %arg1: i32, %arg2: i32) -> (i32, i32, i32, i32) {
    %c0_i32 = arith.constant 0 : i32
    %c0_i32_0 = arith.constant 0 : i32
    %c0_i32_1 = arith.constant 0 : i32
    return %arg0, %arg1, %c0_i32, %c0_i32_0 : i32, i32, i32, i32
  }
}

module attributes {stable_mosaic.version = 11 : i64} {
  func.func @kernel(%arg0: i32, %arg1: i32, %arg2: i32, %arg3: memref<1x1x5x128xbf16, #tpu.memory_space<vmem>>, %arg4: memref<1x1x5x128xbf16, #tpu.memory_space<vmem>>, %arg5: memref<9x128x128xbf16, #tpu.memory_space<vmem>>, %arg6: memref<1x128xf32, #tpu.memory_space<vmem>>, %arg7: memref<1x128xf32, #tpu.memory_space<vmem>>, %arg8: memref<1x1x4x128xbf16, #tpu.memory_space<vmem>>, %arg9: memref<4x128xf32, #tpu.memory_space<vmem>>) attributes {dimension_semantics = [#tpu.dimension_semantics<parallel>, #tpu.dimension_semantics<parallel>, #tpu.dimension_semantics<arbitrary>], iteration_bounds = array<i64: 2, 4, 3>, scalar_prefetch = 0 : i64, scratch_operands = 1 : i64, tpu.core_type = #tpu.core_type<tc>, window_params = [{transform_indices = @transform_0, window_bounds = array<i64: 1, 1, 5, 128>}, {transform_indices = @transform_1, window_bounds = array<i64: 1, 1, 5, 128>}, {pipeline_mode = #tpu.pipeline_mode<synchronous>, transform_indices = @transform_2, window_bounds = array<i64: 9, 128, 128>}, {pipeline_mode = #tpu.pipeline_mode<synchronous>, transform_indices = @transform_3, window_bounds = array<i64: 1, 128>}, {pipeline_mode = #tpu.pipeline_mode<synchronous>, transform_indices = @transform_4, window_bounds = array<i64: 1, 128>}, {transform_indices = @transform_5, window_bounds = array<i64: 1, 1, 4, 128>}]} {
    %c0_i32 = arith.constant 0 : i32
    %0 = arith.cmpi eq, %arg2, %c0_i32 : i32
    %1 = arith.extui %0 : i1 to i32
    %c0_i32_0 = arith.constant 0 : i32
    %2 = arith.cmpi ne, %1, %c0_i32_0 : i32
    scf.if %2 {
      %cst_26 = arith.constant 0.000000e+00 : f32
      %33 = vector.broadcast %cst_26 : f32 to vector<4x128xf32>
      %c0_27 = arith.constant 0 : index
      %c0_28 = arith.constant 0 : index
      %34 = vector.load %arg9[%c0_27, %c0_28] : memref<4x128xf32, #tpu.memory_space<vmem>>, vector<4x128xf32>
      tpu.vector_store %arg9[%c0_27, %c0_28], %33 {strides = array<i32>} : memref<4x128xf32, #tpu.memory_space<vmem>>, vector<4x128xf32>,
    } else {
    }
    %c0 = arith.constant 0 : index
    %c0_1 = arith.constant 0 : index
    %3 = vector.load %arg9[%c0, %c0_1] : memref<4x128xf32, #tpu.memory_space<vmem>>, vector<4x128xf32>
    %c3_i32 = arith.constant 3 : i32
    %4 = arith.muli %arg2, %c3_i32 : i32
    %c0_2 = arith.constant 0 : index
    %c0_3 = arith.constant 0 : index
    %c0_4 = arith.constant 0 : index
    %c0_5 = arith.constant 0 : index
    %5 = vector.load %arg3[%c0_2, %c0_3, %c0_4, %c0_5] : memref<1x1x5x128xbf16, #tpu.memory_space<vmem>>, vector<1x1x4x128xbf16>
    %6 = vector.shape_cast %5 : vector<1x1x4x128xbf16> to vector<4x128xbf16>
    %c0_i32_6 = arith.constant 0 : i32
    %7 = arith.addi %4, %c0_i32_6 : i32
    %8 = arith.index_cast %7 : i32 to index
    %c0_7 = arith.constant 0 : index
    %c0_8 = arith.constant 0 : index
    %9 = vector.load %arg5[%8, %c0_7, %c0_8] : memref<9x128x128xbf16, #tpu.memory_space<vmem>>, vector<1x128x128xbf16>
    %10 = vector.shape_cast %9 : vector<1x128x128xbf16> to vector<128x128xbf16>
    %cst = arith.constant dense<0.000000e+00> : vector<4x128xf32>
    %11 = tpu.matmul %6, %10, %cst {dimension_numbers = #tpu.dot_dimension_numbers<[1], [0], [0], [1], [0, 0, 1, 1], [], []>} : vector<4x128xbf16>, vector<128x128xbf16>, vector<4x128xf32> -> vector<4x128xf32>
    %12 = arith.addf %3, %11 : vector<4x128xf32>
    %c0_9 = arith.constant 0 : index
    %c0_10 = arith.constant 0 : index
    %c0_11 = arith.constant 0 : index
    %c0_12 = arith.constant 0 : index
    %13 = vector.load %arg4[%c0_9, %c0_10, %c0_11, %c0_12] : memref<1x1x5x128xbf16, #tpu.memory_space<vmem>>, vector<1x1x4x128xbf16>
    %14 = vector.shape_cast %13 : vector<1x1x4x128xbf16> to vector<4x128xbf16>
    %c1_i32 = arith.constant 1 : i32
    %15 = arith.addi %4, %c1_i32 : i32
    %16 = arith.index_cast %15 : i32 to index
    %c0_13 = arith.constant 0 : index
    %c0_14 = arith.constant 0 : index
    %17 = vector.load %arg5[%16, %c0_13, %c0_14] : memref<9x128x128xbf16, #tpu.memory_space<vmem>>, vector<1x128x128xbf16>
    %18 = vector.shape_cast %17 : vector<1x128x128xbf16> to vector<128x128xbf16>
    %cst_15 = arith.constant dense<0.000000e+00> : vector<4x128xf32>
    %19 = tpu.matmul %14, %18, %cst_15 {dimension_numbers = #tpu.dot_dimension_numbers<[1], [0], [0], [1], [0, 0, 1, 1], [], []>} : vector<4x128xbf16>, vector<128x128xbf16>, vector<4x128xf32> -> vector<4x128xf32>
    %20 = arith.addf %12, %19 : vector<4x128xf32>
    %c0_16 = arith.constant 0 : index
    %c0_17 = arith.constant 0 : index
    %c1 = arith.constant 1 : index
    %c0_18 = arith.constant 0 : index
    %21 = vector.load %arg3[%c0_16, %c0_17, %c1, %c0_18] : memref<1x1x5x128xbf16, #tpu.memory_space<vmem>>, vector<1x1x4x128xbf16>
    %22 = vector.shape_cast %21 : vector<1x1x4x128xbf16> to vector<4x128xbf16>
    %c2_i32 = arith.constant 2 : i32
    %23 = arith.addi %4, %c2_i32 : i32
    %24 = arith.index_cast %23 : i32 to index
    %c0_19 = arith.constant 0 : index
    %c0_20 = arith.constant 0 : index
    %25 = vector.load %arg5[%24, %c0_19, %c0_20] : memref<9x128x128xbf16, #tpu.memory_space<vmem>>, vector<1x128x128xbf16>
    %26 = vector.shape_cast %25 : vector<1x128x128xbf16> to vector<128x128xbf16>
    %cst_21 = arith.constant dense<0.000000e+00> : vector<4x128xf32>
    %27 = tpu.matmul %22, %26, %cst_21 {dimension_numbers = #tpu.dot_dimension_numbers<[1], [0], [0], [1], [0, 0, 1, 1], [], []>} : vector<4x128xbf16>, vector<128x128xbf16>, vector<4x128xf32> -> vector<4x128xf32>
    %28 = arith.addf %20, %27 : vector<4x128xf32>
    %c0_22 = arith.constant 0 : index
    %c0_23 = arith.constant 0 : index
    %29 = vector.load %arg9[%c0_22, %c0_23] : memref<4x128xf32, #tpu.memory_space<vmem>>, vector<4x128xf32>
    tpu.vector_store %arg9[%c0_22, %c0_23], %28 {strides = array<i32>} : memref<4x128xf32, #tpu.memory_space<vmem>>, vector<4x128xf32>,
    %c2_i32_24 = arith.constant 2 : i32
    %30 = arith.cmpi eq, %arg2, %c2_i32_24 : i32
    %31 = arith.extui %30 : i1 to i32
    %c0_i32_25 = arith.constant 0 : i32
    %32 = arith.cmpi ne, %31, %c0_i32_25 : i32
    scf.if %32 {
      %c0_26 = arith.constant 0 : index
      %c0_27 = arith.constant 0 : index
      %33 = vector.load %arg9[%c0_26, %c0_27] : memref<4x128xf32, #tpu.memory_space<vmem>>, vector<4x128xf32>
      %c0_28 = arith.constant 0 : index
      %c0_29 = arith.constant 0 : index
      %34 = vector.load %arg6[%c0_28, %c0_29] : memref<1x128xf32, #tpu.memory_space<vmem>>, vector<1x128xf32>
      %35 = vector.broadcast %34 : vector<1x128xf32> to vector<4x128xf32>
      %36 = arith.mulf %33, %35 : vector<4x128xf32>
      %c0_30 = arith.constant 0 : index
      %c0_31 = arith.constant 0 : index
      %37 = vector.load %arg7[%c0_30, %c0_31] : memref<1x128xf32, #tpu.memory_space<vmem>>, vector<1x128xf32>
      %38 = vector.broadcast %37 : vector<1x128xf32> to vector<4x128xf32>
      %39 = arith.addf %36, %38 : vector<4x128xf32>
      %cst_32 = arith.constant 0.000000e+00 : f32
      %40 = vector.broadcast %cst_32 : f32 to vector<4x128xf32>
      %41 = arith.maximumf %39, %40 : vector<4x128xf32>
      %42 = arith.truncf %41 : vector<4x128xf32> to vector<4x128xbf16>
      %c0_33 = arith.constant 0 : index
      %c0_34 = arith.constant 0 : index
      %c0_35 = arith.constant 0 : index
      %c0_36 = arith.constant 0 : index
      %43 = vector.load %arg8[%c0_33, %c0_34, %c0_35, %c0_36] : memref<1x1x4x128xbf16, #tpu.memory_space<vmem>>, vector<1x1x4x128xbf16>
      %44 = vector.shape_cast %43 : vector<1x1x4x128xbf16> to vector<4x128xbf16>
      %45 = vector.shape_cast %42 : vector<4x128xbf16> to vector<1x1x4x128xbf16>
      tpu.vector_store %arg8[%c0_33, %c0_34, %c0_35, %c0_36], %45 {strides = array<i32>} : memref<1x1x4x128xbf16, #tpu.memory_space<vmem>>, vector<1x1x4x128xbf16>,
    } else {
    }
    return
  }
  func.func @transform_0(%arg0: i32, %arg1: i32, %arg2: i32) -> (i32, i32, i32, i32) {
    %c2_i32 = arith.constant 2 : i32
    %0 = arith.muli %arg1, %c2_i32 : i32
    %1 = arith.addi %0, %arg2 : i32
    %c0_i32 = arith.constant 0 : i32
    %c0_i32_0 = arith.constant 0 : i32
    %c0_i32_1 = arith.constant 0 : i32
    return %arg0, %1, %c0_i32, %c0_i32_0 : i32, i32, i32, i32
  }
  func.func @transform_1(%arg0: i32, %arg1: i32, %arg2: i32) -> (i32, i32, i32, i32) {
    %c2_i32 = arith.constant 2 : i32
    %0 = arith.muli %arg1, %c2_i32 : i32
    %1 = arith.addi %0, %arg2 : i32
    %c0_i32 = arith.constant 0 : i32
    %c0_i32_0 = arith.constant 0 : i32
    %c0_i32_1 = arith.constant 0 : i32
    return %arg0, %1, %c0_i32, %c0_i32_0 : i32, i32, i32, i32
  }
  func.func @transform_2(%arg0: i32, %arg1: i32, %arg2: i32) -> (i32, i32, i32) {
    %c0_i32 = arith.constant 0 : i32
    %c0_i32_0 = arith.constant 0 : i32
    %c0_i32_1 = arith.constant 0 : i32
    %c0_i32_2 = arith.constant 0 : i32
    return %c0_i32, %c0_i32_0, %c0_i32_1 : i32, i32, i32
  }
  func.func @transform_3(%arg0: i32, %arg1: i32, %arg2: i32) -> (i32, i32) {
    %c0_i32 = arith.constant 0 : i32
    %c0_i32_0 = arith.constant 0 : i32
    %c0_i32_1 = arith.constant 0 : i32
    return %c0_i32, %c0_i32_0 : i32, i32
  }
  func.func @transform_4(%arg0: i32, %arg1: i32, %arg2: i32) -> (i32, i32) {
    %c0_i32 = arith.constant 0 : i32
    %c0_i32_0 = arith.constant 0 : i32
    %c0_i32_1 = arith.constant 0 : i32
    return %c0_i32, %c0_i32_0 : i32, i32
  }
  func.func @transform_5(%arg0: i32, %arg1: i32, %arg2: i32) -> (i32, i32, i32, i32) {
    %c0_i32 = arith.constant 0 : i32
    %c0_i32_0 = arith.constant 0 : i32
    %c0_i32_1 = arith.constant 0 : i32
    return %arg0, %arg1, %c0_i32, %c0_i32_0 : i32, i32, i32, i32
  }
}

module attributes {stable_mosaic.version = 11 : i64} {
  func.func @kernel(%arg0: i32, %arg1: i32, %arg2: i32, %arg3: memref<1x1x4x128xbf16, #tpu.memory_space<vmem>>, %arg4: memref<1x128x128xbf16, #tpu.memory_space<vmem>>, %arg5: memref<1x128xf32, #tpu.memory_space<vmem>>, %arg6: memref<1x128xf32, #tpu.memory_space<vmem>>, %arg7: memref<1x1x4x128xbf16, #tpu.memory_space<vmem>>, %arg8: memref<4x128xf32, #tpu.memory_space<vmem>>) attributes {dimension_semantics = [#tpu.dimension_semantics<parallel>, #tpu.dimension_semantics<parallel>, #tpu.dimension_semantics<arbitrary>], iteration_bounds = array<i64: 2, 4, 1>, scalar_prefetch = 0 : i64, scratch_operands = 1 : i64, tpu.core_type = #tpu.core_type<tc>, window_params = [{transform_indices = @transform_0, window_bounds = array<i64: 1, 1, 4, 128>}, {pipeline_mode = #tpu.pipeline_mode<synchronous>, transform_indices = @transform_1, window_bounds = array<i64: 1, 128, 128>}, {pipeline_mode = #tpu.pipeline_mode<synchronous>, transform_indices = @transform_2, window_bounds = array<i64: 1, 128>}, {pipeline_mode = #tpu.pipeline_mode<synchronous>, transform_indices = @transform_3, window_bounds = array<i64: 1, 128>}, {transform_indices = @transform_4, window_bounds = array<i64: 1, 1, 4, 128>}]} {
    %c0_i32 = arith.constant 0 : i32
    %0 = arith.cmpi eq, %arg2, %c0_i32 : i32
    %1 = arith.extui %0 : i1 to i32
    %c0_i32_0 = arith.constant 0 : i32
    %2 = arith.cmpi ne, %1, %c0_i32_0 : i32
    scf.if %2 {
      %cst_13 = arith.constant 0.000000e+00 : f32
      %17 = vector.broadcast %cst_13 : f32 to vector<4x128xf32>
      %c0_14 = arith.constant 0 : index
      %c0_15 = arith.constant 0 : index
      %18 = vector.load %arg8[%c0_14, %c0_15] : memref<4x128xf32, #tpu.memory_space<vmem>>, vector<4x128xf32>
      tpu.vector_store %arg8[%c0_14, %c0_15], %17 {strides = array<i32>} : memref<4x128xf32, #tpu.memory_space<vmem>>, vector<4x128xf32>,
    } else {
    }
    %c0 = arith.constant 0 : index
    %c0_1 = arith.constant 0 : index
    %3 = vector.load %arg8[%c0, %c0_1] : memref<4x128xf32, #tpu.memory_space<vmem>>, vector<4x128xf32>
    %c1_i32 = arith.constant 1 : i32
    %4 = arith.muli %arg2, %c1_i32 : i32
    %c0_2 = arith.constant 0 : index
    %c0_3 = arith.constant 0 : index
    %c0_4 = arith.constant 0 : index
    %c0_5 = arith.constant 0 : index
    %5 = vector.load %arg3[%c0_2, %c0_3, %c0_4, %c0_5] : memref<1x1x4x128xbf16, #tpu.memory_space<vmem>>, vector<1x1x4x128xbf16>
    %6 = vector.shape_cast %5 : vector<1x1x4x128xbf16> to vector<4x128xbf16>
    %c0_i32_6 = arith.constant 0 : i32
    %7 = arith.addi %4, %c0_i32_6 : i32
    %8 = arith.index_cast %7 : i32 to index
    %c0_7 = arith.constant 0 : index
    %c0_8 = arith.constant 0 : index
    %9 = vector.load %arg4[%8, %c0_7, %c0_8] : memref<1x128x128xbf16, #tpu.memory_space<vmem>>, vector<1x128x128xbf16>
    %10 = vector.shape_cast %9 : vector<1x128x128xbf16> to vector<128x128xbf16>
    %cst = arith.constant dense<0.000000e+00> : vector<4x128xf32>
    %11 = tpu.matmul %6, %10, %cst {dimension_numbers = #tpu.dot_dimension_numbers<[1], [0], [0], [1], [0, 0, 1, 1], [], []>} : vector<4x128xbf16>, vector<128x128xbf16>, vector<4x128xf32> -> vector<4x128xf32>
    %12 = arith.addf %3, %11 : vector<4x128xf32>
    %c0_9 = arith.constant 0 : index
    %c0_10 = arith.constant 0 : index
    %13 = vector.load %arg8[%c0_9, %c0_10] : memref<4x128xf32, #tpu.memory_space<vmem>>, vector<4x128xf32>
    tpu.vector_store %arg8[%c0_9, %c0_10], %12 {strides = array<i32>} : memref<4x128xf32, #tpu.memory_space<vmem>>, vector<4x128xf32>,
    %c0_i32_11 = arith.constant 0 : i32
    %14 = arith.cmpi eq, %arg2, %c0_i32_11 : i32
    %15 = arith.extui %14 : i1 to i32
    %c0_i32_12 = arith.constant 0 : i32
    %16 = arith.cmpi ne, %15, %c0_i32_12 : i32
    scf.if %16 {
      %c0_13 = arith.constant 0 : index
      %c0_14 = arith.constant 0 : index
      %17 = vector.load %arg8[%c0_13, %c0_14] : memref<4x128xf32, #tpu.memory_space<vmem>>, vector<4x128xf32>
      %c0_15 = arith.constant 0 : index
      %c0_16 = arith.constant 0 : index
      %18 = vector.load %arg5[%c0_15, %c0_16] : memref<1x128xf32, #tpu.memory_space<vmem>>, vector<1x128xf32>
      %19 = vector.broadcast %18 : vector<1x128xf32> to vector<4x128xf32>
      %20 = arith.mulf %17, %19 : vector<4x128xf32>
      %c0_17 = arith.constant 0 : index
      %c0_18 = arith.constant 0 : index
      %21 = vector.load %arg6[%c0_17, %c0_18] : memref<1x128xf32, #tpu.memory_space<vmem>>, vector<1x128xf32>
      %22 = vector.broadcast %21 : vector<1x128xf32> to vector<4x128xf32>
      %23 = arith.addf %20, %22 : vector<4x128xf32>
      %24 = arith.truncf %23 : vector<4x128xf32> to vector<4x128xbf16>
      %c0_19 = arith.constant 0 : index
      %c0_20 = arith.constant 0 : index
      %c0_21 = arith.constant 0 : index
      %c0_22 = arith.constant 0 : index
      %25 = vector.load %arg7[%c0_19, %c0_20, %c0_21, %c0_22] : memref<1x1x4x128xbf16, #tpu.memory_space<vmem>>, vector<1x1x4x128xbf16>
      %26 = vector.shape_cast %25 : vector<1x1x4x128xbf16> to vector<4x128xbf16>
      %27 = vector.shape_cast %24 : vector<4x128xbf16> to vector<1x1x4x128xbf16>
      tpu.vector_store %arg7[%c0_19, %c0_20, %c0_21, %c0_22], %27 {strides = array<i32>} : memref<1x1x4x128xbf16, #tpu.memory_space<vmem>>, vector<1x1x4x128xbf16>,
    } else {
    }
    return
  }
  func.func @transform_0(%arg0: i32, %arg1: i32, %arg2: i32) -> (i32, i32, i32, i32) {
    %c2_i32 = arith.constant 2 : i32
    %0 = arith.muli %arg1, %c2_i32 : i32
    %1 = arith.addi %0, %arg2 : i32
    %c0_i32 = arith.constant 0 : i32
    %c0_i32_0 = arith.constant 0 : i32
    %c0_i32_1 = arith.constant 0 : i32
    return %arg0, %1, %c0_i32, %c0_i32_0 : i32, i32, i32, i32
  }
  func.func @transform_1(%arg0: i32, %arg1: i32, %arg2: i32) -> (i32, i32, i32) {
    %c0_i32 = arith.constant 0 : i32
    %c0_i32_0 = arith.constant 0 : i32
    %c0_i32_1 = arith.constant 0 : i32
    %c0_i32_2 = arith.constant 0 : i32
    return %c0_i32, %c0_i32_0, %c0_i32_1 : i32, i32, i32
  }
  func.func @transform_2(%arg0: i32, %arg1: i32, %arg2: i32) -> (i32, i32) {
    %c0_i32 = arith.constant 0 : i32
    %c0_i32_0 = arith.constant 0 : i32
    %c0_i32_1 = arith.constant 0 : i32
    return %c0_i32, %c0_i32_0 : i32, i32
  }
  func.func @transform_3(%arg0: i32, %arg1: i32, %arg2: i32) -> (i32, i32) {
    %c0_i32 = arith.constant 0 : i32
    %c0_i32_0 = arith.constant 0 : i32
    %c0_i32_1 = arith.constant 0 : i32
    return %c0_i32, %c0_i32_0 : i32, i32
  }
  func.func @transform_4(%arg0: i32, %arg1: i32, %arg2: i32) -> (i32, i32, i32, i32) {
    %c0_i32 = arith.constant 0 : i32
    %c0_i32_0 = arith.constant 0 : i32
    %c0_i32_1 = arith.constant 0 : i32
    return %arg0, %arg1, %c0_i32, %c0_i32_0 : i32, i32, i32, i32
  }
}

module attributes {stable_mosaic.version = 11 : i64} {
  func.func @kernel(%arg0: i32, %arg1: i32, %arg2: i32, %arg3: memref<1x1x6x128xbf16, #tpu.memory_space<vmem>>, %arg4: memref<9x128x128xbf16, #tpu.memory_space<vmem>>, %arg5: memref<1x128xf32, #tpu.memory_space<vmem>>, %arg6: memref<1x128xf32, #tpu.memory_space<vmem>>, %arg7: memref<1x1x4x128xbf16, #tpu.memory_space<vmem>>, %arg8: memref<1x1x4x128xbf16, #tpu.memory_space<vmem>>, %arg9: memref<4x128xf32, #tpu.memory_space<vmem>>) attributes {dimension_semantics = [#tpu.dimension_semantics<parallel>, #tpu.dimension_semantics<parallel>, #tpu.dimension_semantics<arbitrary>], iteration_bounds = array<i64: 2, 4, 3>, scalar_prefetch = 0 : i64, scratch_operands = 1 : i64, tpu.core_type = #tpu.core_type<tc>, window_params = [{transform_indices = @transform_0, window_bounds = array<i64: 1, 1, 6, 128>}, {pipeline_mode = #tpu.pipeline_mode<synchronous>, transform_indices = @transform_1, window_bounds = array<i64: 9, 128, 128>}, {pipeline_mode = #tpu.pipeline_mode<synchronous>, transform_indices = @transform_2, window_bounds = array<i64: 1, 128>}, {pipeline_mode = #tpu.pipeline_mode<synchronous>, transform_indices = @transform_3, window_bounds = array<i64: 1, 128>}, {transform_indices = @transform_4, window_bounds = array<i64: 1, 1, 4, 128>}, {transform_indices = @transform_5, window_bounds = array<i64: 1, 1, 4, 128>}]} {
    %c0_i32 = arith.constant 0 : i32
    %0 = arith.cmpi eq, %arg2, %c0_i32 : i32
    %1 = arith.extui %0 : i1 to i32
    %c0_i32_0 = arith.constant 0 : i32
    %2 = arith.cmpi ne, %1, %c0_i32_0 : i32
    scf.if %2 {
      %cst_25 = arith.constant 0.000000e+00 : f32
      %33 = vector.broadcast %cst_25 : f32 to vector<4x128xf32>
      %c0_26 = arith.constant 0 : index
      %c0_27 = arith.constant 0 : index
      %34 = vector.load %arg9[%c0_26, %c0_27] : memref<4x128xf32, #tpu.memory_space<vmem>>, vector<4x128xf32>
      tpu.vector_store %arg9[%c0_26, %c0_27], %33 {strides = array<i32>} : memref<4x128xf32, #tpu.memory_space<vmem>>, vector<4x128xf32>,
    } else {
    }
    %c0 = arith.constant 0 : index
    %c0_1 = arith.constant 0 : index
    %3 = vector.load %arg9[%c0, %c0_1] : memref<4x128xf32, #tpu.memory_space<vmem>>, vector<4x128xf32>
    %c3_i32 = arith.constant 3 : i32
    %4 = arith.muli %arg2, %c3_i32 : i32
    %c0_2 = arith.constant 0 : index
    %c0_3 = arith.constant 0 : index
    %c0_4 = arith.constant 0 : index
    %c0_5 = arith.constant 0 : index
    %5 = vector.load %arg3[%c0_2, %c0_3, %c0_4, %c0_5] : memref<1x1x6x128xbf16, #tpu.memory_space<vmem>>, vector<1x1x4x128xbf16>
    %6 = vector.shape_cast %5 : vector<1x1x4x128xbf16> to vector<4x128xbf16>
    %c0_i32_6 = arith.constant 0 : i32
    %7 = arith.addi %4, %c0_i32_6 : i32
    %8 = arith.index_cast %7 : i32 to index
    %c0_7 = arith.constant 0 : index
    %c0_8 = arith.constant 0 : index
    %9 = vector.load %arg4[%8, %c0_7, %c0_8] : memref<9x128x128xbf16, #tpu.memory_space<vmem>>, vector<1x128x128xbf16>
    %10 = vector.shape_cast %9 : vector<1x128x128xbf16> to vector<128x128xbf16>
    %cst = arith.constant dense<0.000000e+00> : vector<4x128xf32>
    %11 = tpu.matmul %6, %10, %cst {dimension_numbers = #tpu.dot_dimension_numbers<[1], [0], [0], [1], [0, 0, 1, 1], [], []>} : vector<4x128xbf16>, vector<128x128xbf16>, vector<4x128xf32> -> vector<4x128xf32>
    %12 = arith.addf %3, %11 : vector<4x128xf32>
    %c0_9 = arith.constant 0 : index
    %c0_10 = arith.constant 0 : index
    %c1 = arith.constant 1 : index
    %c0_11 = arith.constant 0 : index
    %13 = vector.load %arg3[%c0_9, %c0_10, %c1, %c0_11] : memref<1x1x6x128xbf16, #tpu.memory_space<vmem>>, vector<1x1x4x128xbf16>
    %14 = vector.shape_cast %13 : vector<1x1x4x128xbf16> to vector<4x128xbf16>
    %c1_i32 = arith.constant 1 : i32
    %15 = arith.addi %4, %c1_i32 : i32
    %16 = arith.index_cast %15 : i32 to index
    %c0_12 = arith.constant 0 : index
    %c0_13 = arith.constant 0 : index
    %17 = vector.load %arg4[%16, %c0_12, %c0_13] : memref<9x128x128xbf16, #tpu.memory_space<vmem>>, vector<1x128x128xbf16>
    %18 = vector.shape_cast %17 : vector<1x128x128xbf16> to vector<128x128xbf16>
    %cst_14 = arith.constant dense<0.000000e+00> : vector<4x128xf32>
    %19 = tpu.matmul %14, %18, %cst_14 {dimension_numbers = #tpu.dot_dimension_numbers<[1], [0], [0], [1], [0, 0, 1, 1], [], []>} : vector<4x128xbf16>, vector<128x128xbf16>, vector<4x128xf32> -> vector<4x128xf32>
    %20 = arith.addf %12, %19 : vector<4x128xf32>
    %c0_15 = arith.constant 0 : index
    %c0_16 = arith.constant 0 : index
    %c2 = arith.constant 2 : index
    %c0_17 = arith.constant 0 : index
    %21 = vector.load %arg3[%c0_15, %c0_16, %c2, %c0_17] : memref<1x1x6x128xbf16, #tpu.memory_space<vmem>>, vector<1x1x4x128xbf16>
    %22 = vector.shape_cast %21 : vector<1x1x4x128xbf16> to vector<4x128xbf16>
    %c2_i32 = arith.constant 2 : i32
    %23 = arith.addi %4, %c2_i32 : i32
    %24 = arith.index_cast %23 : i32 to index
    %c0_18 = arith.constant 0 : index
    %c0_19 = arith.constant 0 : index
    %25 = vector.load %arg4[%24, %c0_18, %c0_19] : memref<9x128x128xbf16, #tpu.memory_space<vmem>>, vector<1x128x128xbf16>
    %26 = vector.shape_cast %25 : vector<1x128x128xbf16> to vector<128x128xbf16>
    %cst_20 = arith.constant dense<0.000000e+00> : vector<4x128xf32>
    %27 = tpu.matmul %22, %26, %cst_20 {dimension_numbers = #tpu.dot_dimension_numbers<[1], [0], [0], [1], [0, 0, 1, 1], [], []>} : vector<4x128xbf16>, vector<128x128xbf16>, vector<4x128xf32> -> vector<4x128xf32>
    %28 = arith.addf %20, %27 : vector<4x128xf32>
    %c0_21 = arith.constant 0 : index
    %c0_22 = arith.constant 0 : index
    %29 = vector.load %arg9[%c0_21, %c0_22] : memref<4x128xf32, #tpu.memory_space<vmem>>, vector<4x128xf32>
    tpu.vector_store %arg9[%c0_21, %c0_22], %28 {strides = array<i32>} : memref<4x128xf32, #tpu.memory_space<vmem>>, vector<4x128xf32>,
    %c2_i32_23 = arith.constant 2 : i32
    %30 = arith.cmpi eq, %arg2, %c2_i32_23 : i32
    %31 = arith.extui %30 : i1 to i32
    %c0_i32_24 = arith.constant 0 : i32
    %32 = arith.cmpi ne, %31, %c0_i32_24 : i32
    scf.if %32 {
      %c0_25 = arith.constant 0 : index
      %c0_26 = arith.constant 0 : index
      %33 = vector.load %arg9[%c0_25, %c0_26] : memref<4x128xf32, #tpu.memory_space<vmem>>, vector<4x128xf32>
      %c0_27 = arith.constant 0 : index
      %c0_28 = arith.constant 0 : index
      %34 = vector.load %arg5[%c0_27, %c0_28] : memref<1x128xf32, #tpu.memory_space<vmem>>, vector<1x128xf32>
      %35 = vector.broadcast %34 : vector<1x128xf32> to vector<4x128xf32>
      %36 = arith.mulf %33, %35 : vector<4x128xf32>
      %c0_29 = arith.constant 0 : index
      %c0_30 = arith.constant 0 : index
      %37 = vector.load %arg6[%c0_29, %c0_30] : memref<1x128xf32, #tpu.memory_space<vmem>>, vector<1x128xf32>
      %38 = vector.broadcast %37 : vector<1x128xf32> to vector<4x128xf32>
      %39 = arith.addf %36, %38 : vector<4x128xf32>
      %c0_31 = arith.constant 0 : index
      %c0_32 = arith.constant 0 : index
      %c0_33 = arith.constant 0 : index
      %c0_34 = arith.constant 0 : index
      %40 = vector.load %arg7[%c0_31, %c0_32, %c0_33, %c0_34] : memref<1x1x4x128xbf16, #tpu.memory_space<vmem>>, vector<1x1x4x128xbf16>
      %41 = vector.shape_cast %40 : vector<1x1x4x128xbf16> to vector<4x128xbf16>
      %42 = arith.extf %41 : vector<4x128xbf16> to vector<4x128xf32>
      %43 = arith.addf %39, %42 : vector<4x128xf32>
      %cst_35 = arith.constant 0.000000e+00 : f32
      %44 = vector.broadcast %cst_35 : f32 to vector<4x128xf32>
      %45 = arith.maximumf %43, %44 : vector<4x128xf32>
      %46 = arith.truncf %45 : vector<4x128xf32> to vector<4x128xbf16>
      %c0_36 = arith.constant 0 : index
      %c0_37 = arith.constant 0 : index
      %c0_38 = arith.constant 0 : index
      %c0_39 = arith.constant 0 : index
      %47 = vector.load %arg8[%c0_36, %c0_37, %c0_38, %c0_39] : memref<1x1x4x128xbf16, #tpu.memory_space<vmem>>, vector<1x1x4x128xbf16>
      %48 = vector.shape_cast %47 : vector<1x1x4x128xbf16> to vector<4x128xbf16>
      %49 = vector.shape_cast %46 : vector<4x128xbf16> to vector<1x1x4x128xbf16>
      tpu.vector_store %arg8[%c0_36, %c0_37, %c0_38, %c0_39], %49 {strides = array<i32>} : memref<1x1x4x128xbf16, #tpu.memory_space<vmem>>, vector<1x1x4x128xbf16>,
    } else {
    }
    return
  }
  func.func @transform_0(%arg0: i32, %arg1: i32, %arg2: i32) -> (i32, i32, i32, i32) {
    %c1_i32 = arith.constant 1 : i32
    %0 = arith.muli %arg1, %c1_i32 : i32
    %1 = arith.addi %0, %arg2 : i32
    %c0_i32 = arith.constant 0 : i32
    %c0_i32_0 = arith.constant 0 : i32
    %c0_i32_1 = arith.constant 0 : i32
    return %arg0, %1, %c0_i32, %c0_i32_0 : i32, i32, i32, i32
  }
  func.func @transform_1(%arg0: i32, %arg1: i32, %arg2: i32) -> (i32, i32, i32) {
    %c0_i32 = arith.constant 0 : i32
    %c0_i32_0 = arith.constant 0 : i32
    %c0_i32_1 = arith.constant 0 : i32
    %c0_i32_2 = arith.constant 0 : i32
    return %c0_i32, %c0_i32_0, %c0_i32_1 : i32, i32, i32
  }
  func.func @transform_2(%arg0: i32, %arg1: i32, %arg2: i32) -> (i32, i32) {
    %c0_i32 = arith.constant 0 : i32
    %c0_i32_0 = arith.constant 0 : i32
    %c0_i32_1 = arith.constant 0 : i32
    return %c0_i32, %c0_i32_0 : i32, i32
  }
  func.func @transform_3(%arg0: i32, %arg1: i32, %arg2: i32) -> (i32, i32) {
    %c0_i32 = arith.constant 0 : i32
    %c0_i32_0 = arith.constant 0 : i32
    %c0_i32_1 = arith.constant 0 : i32
    return %c0_i32, %c0_i32_0 : i32, i32
  }
  func.func @transform_4(%arg0: i32, %arg1: i32, %arg2: i32) -> (i32, i32, i32, i32) {
    %c0_i32 = arith.constant 0 : i32
    %c0_i32_0 = arith.constant 0 : i32
    %c0_i32_1 = arith.constant 0 : i32
    return %arg0, %arg1, %c0_i32, %c0_i32_0 : i32, i32, i32, i32
  }
  func.func @transform_5(%arg0: i32, %arg1: i32, %arg2: i32) -> (i32, i32, i32, i32) {
    %c0_i32 = arith.constant 0 : i32
    %c0_i32_0 = arith.constant 0 : i32
    %c0_i32_1 = arith.constant 0 : i32
    return %arg0, %arg1, %c0_i32, %c0_i32_0 : i32, i32, i32, i32
  }
}

module attributes {stable_mosaic.version = 11 : i64} {
  func.func @kernel(%arg0: i32, %arg1: i32, %arg2: i32, %arg3: memref<1x1x3x128xbf16, #tpu.memory_space<vmem>>, %arg4: memref<1x1x3x128xbf16, #tpu.memory_space<vmem>>, %arg5: memref<9x128x256xbf16, #tpu.memory_space<vmem>>, %arg6: memref<1x256xf32, #tpu.memory_space<vmem>>, %arg7: memref<1x256xf32, #tpu.memory_space<vmem>>, %arg8: memref<1x1x2x256xbf16, #tpu.memory_space<vmem>>, %arg9: memref<2x256xf32, #tpu.memory_space<vmem>>) attributes {dimension_semantics = [#tpu.dimension_semantics<parallel>, #tpu.dimension_semantics<parallel>, #tpu.dimension_semantics<arbitrary>], iteration_bounds = array<i64: 2, 2, 3>, scalar_prefetch = 0 : i64, scratch_operands = 1 : i64, tpu.core_type = #tpu.core_type<tc>, window_params = [{transform_indices = @transform_0, window_bounds = array<i64: 1, 1, 3, 128>}, {transform_indices = @transform_1, window_bounds = array<i64: 1, 1, 3, 128>}, {pipeline_mode = #tpu.pipeline_mode<synchronous>, transform_indices = @transform_2, window_bounds = array<i64: 9, 128, 256>}, {pipeline_mode = #tpu.pipeline_mode<synchronous>, transform_indices = @transform_3, window_bounds = array<i64: 1, 256>}, {pipeline_mode = #tpu.pipeline_mode<synchronous>, transform_indices = @transform_4, window_bounds = array<i64: 1, 256>}, {transform_indices = @transform_5, window_bounds = array<i64: 1, 1, 2, 256>}]} {
    %c0_i32 = arith.constant 0 : i32
    %0 = arith.cmpi eq, %arg2, %c0_i32 : i32
    %1 = arith.extui %0 : i1 to i32
    %c0_i32_0 = arith.constant 0 : i32
    %2 = arith.cmpi ne, %1, %c0_i32_0 : i32
    scf.if %2 {
      %cst_26 = arith.constant 0.000000e+00 : f32
      %33 = vector.broadcast %cst_26 : f32 to vector<2x256xf32>
      %c0_27 = arith.constant 0 : index
      %c0_28 = arith.constant 0 : index
      %34 = vector.load %arg9[%c0_27, %c0_28] : memref<2x256xf32, #tpu.memory_space<vmem>>, vector<2x256xf32>
      tpu.vector_store %arg9[%c0_27, %c0_28], %33 {strides = array<i32>} : memref<2x256xf32, #tpu.memory_space<vmem>>, vector<2x256xf32>,
    } else {
    }
    %c0 = arith.constant 0 : index
    %c0_1 = arith.constant 0 : index
    %3 = vector.load %arg9[%c0, %c0_1] : memref<2x256xf32, #tpu.memory_space<vmem>>, vector<2x256xf32>
    %c3_i32 = arith.constant 3 : i32
    %4 = arith.muli %arg2, %c3_i32 : i32
    %c0_2 = arith.constant 0 : index
    %c0_3 = arith.constant 0 : index
    %c0_4 = arith.constant 0 : index
    %c0_5 = arith.constant 0 : index
    %5 = vector.load %arg3[%c0_2, %c0_3, %c0_4, %c0_5] : memref<1x1x3x128xbf16, #tpu.memory_space<vmem>>, vector<1x1x2x128xbf16>
    %6 = vector.shape_cast %5 : vector<1x1x2x128xbf16> to vector<2x128xbf16>
    %c0_i32_6 = arith.constant 0 : i32
    %7 = arith.addi %4, %c0_i32_6 : i32
    %8 = arith.index_cast %7 : i32 to index
    %c0_7 = arith.constant 0 : index
    %c0_8 = arith.constant 0 : index
    %9 = vector.load %arg5[%8, %c0_7, %c0_8] : memref<9x128x256xbf16, #tpu.memory_space<vmem>>, vector<1x128x256xbf16>
    %10 = vector.shape_cast %9 : vector<1x128x256xbf16> to vector<128x256xbf16>
    %cst = arith.constant dense<0.000000e+00> : vector<2x256xf32>
    %11 = tpu.matmul %6, %10, %cst {dimension_numbers = #tpu.dot_dimension_numbers<[1], [0], [0], [1], [0, 0, 1, 1], [], []>} : vector<2x128xbf16>, vector<128x256xbf16>, vector<2x256xf32> -> vector<2x256xf32>
    %12 = arith.addf %3, %11 : vector<2x256xf32>
    %c0_9 = arith.constant 0 : index
    %c0_10 = arith.constant 0 : index
    %c0_11 = arith.constant 0 : index
    %c0_12 = arith.constant 0 : index
    %13 = vector.load %arg4[%c0_9, %c0_10, %c0_11, %c0_12] : memref<1x1x3x128xbf16, #tpu.memory_space<vmem>>, vector<1x1x2x128xbf16>
    %14 = vector.shape_cast %13 : vector<1x1x2x128xbf16> to vector<2x128xbf16>
    %c1_i32 = arith.constant 1 : i32
    %15 = arith.addi %4, %c1_i32 : i32
    %16 = arith.index_cast %15 : i32 to index
    %c0_13 = arith.constant 0 : index
    %c0_14 = arith.constant 0 : index
    %17 = vector.load %arg5[%16, %c0_13, %c0_14] : memref<9x128x256xbf16, #tpu.memory_space<vmem>>, vector<1x128x256xbf16>
    %18 = vector.shape_cast %17 : vector<1x128x256xbf16> to vector<128x256xbf16>
    %cst_15 = arith.constant dense<0.000000e+00> : vector<2x256xf32>
    %19 = tpu.matmul %14, %18, %cst_15 {dimension_numbers = #tpu.dot_dimension_numbers<[1], [0], [0], [1], [0, 0, 1, 1], [], []>} : vector<2x128xbf16>, vector<128x256xbf16>, vector<2x256xf32> -> vector<2x256xf32>
    %20 = arith.addf %12, %19 : vector<2x256xf32>
    %c0_16 = arith.constant 0 : index
    %c0_17 = arith.constant 0 : index
    %c1 = arith.constant 1 : index
    %c0_18 = arith.constant 0 : index
    %21 = vector.load %arg3[%c0_16, %c0_17, %c1, %c0_18] : memref<1x1x3x128xbf16, #tpu.memory_space<vmem>>, vector<1x1x2x128xbf16>
    %22 = vector.shape_cast %21 : vector<1x1x2x128xbf16> to vector<2x128xbf16>
    %c2_i32 = arith.constant 2 : i32
    %23 = arith.addi %4, %c2_i32 : i32
    %24 = arith.index_cast %23 : i32 to index
    %c0_19 = arith.constant 0 : index
    %c0_20 = arith.constant 0 : index
    %25 = vector.load %arg5[%24, %c0_19, %c0_20] : memref<9x128x256xbf16, #tpu.memory_space<vmem>>, vector<1x128x256xbf16>
    %26 = vector.shape_cast %25 : vector<1x128x256xbf16> to vector<128x256xbf16>
    %cst_21 = arith.constant dense<0.000000e+00> : vector<2x256xf32>
    %27 = tpu.matmul %22, %26, %cst_21 {dimension_numbers = #tpu.dot_dimension_numbers<[1], [0], [0], [1], [0, 0, 1, 1], [], []>} : vector<2x128xbf16>, vector<128x256xbf16>, vector<2x256xf32> -> vector<2x256xf32>
    %28 = arith.addf %20, %27 : vector<2x256xf32>
    %c0_22 = arith.constant 0 : index
    %c0_23 = arith.constant 0 : index
    %29 = vector.load %arg9[%c0_22, %c0_23] : memref<2x256xf32, #tpu.memory_space<vmem>>, vector<2x256xf32>
    tpu.vector_store %arg9[%c0_22, %c0_23], %28 {strides = array<i32>} : memref<2x256xf32, #tpu.memory_space<vmem>>, vector<2x256xf32>,
    %c2_i32_24 = arith.constant 2 : i32
    %30 = arith.cmpi eq, %arg2, %c2_i32_24 : i32
    %31 = arith.extui %30 : i1 to i32
    %c0_i32_25 = arith.constant 0 : i32
    %32 = arith.cmpi ne, %31, %c0_i32_25 : i32
    scf.if %32 {
      %c0_26 = arith.constant 0 : index
      %c0_27 = arith.constant 0 : index
      %33 = vector.load %arg9[%c0_26, %c0_27] : memref<2x256xf32, #tpu.memory_space<vmem>>, vector<2x256xf32>
      %c0_28 = arith.constant 0 : index
      %c0_29 = arith.constant 0 : index
      %34 = vector.load %arg6[%c0_28, %c0_29] : memref<1x256xf32, #tpu.memory_space<vmem>>, vector<1x256xf32>
      %35 = vector.broadcast %34 : vector<1x256xf32> to vector<2x256xf32>
      %36 = arith.mulf %33, %35 : vector<2x256xf32>
      %c0_30 = arith.constant 0 : index
      %c0_31 = arith.constant 0 : index
      %37 = vector.load %arg7[%c0_30, %c0_31] : memref<1x256xf32, #tpu.memory_space<vmem>>, vector<1x256xf32>
      %38 = vector.broadcast %37 : vector<1x256xf32> to vector<2x256xf32>
      %39 = arith.addf %36, %38 : vector<2x256xf32>
      %cst_32 = arith.constant 0.000000e+00 : f32
      %40 = vector.broadcast %cst_32 : f32 to vector<2x256xf32>
      %41 = arith.maximumf %39, %40 : vector<2x256xf32>
      %42 = arith.truncf %41 : vector<2x256xf32> to vector<2x256xbf16>
      %c0_33 = arith.constant 0 : index
      %c0_34 = arith.constant 0 : index
      %c0_35 = arith.constant 0 : index
      %c0_36 = arith.constant 0 : index
      %43 = vector.load %arg8[%c0_33, %c0_34, %c0_35, %c0_36] : memref<1x1x2x256xbf16, #tpu.memory_space<vmem>>, vector<1x1x2x256xbf16>
      %44 = vector.shape_cast %43 : vector<1x1x2x256xbf16> to vector<2x256xbf16>
      %45 = vector.shape_cast %42 : vector<2x256xbf16> to vector<1x1x2x256xbf16>
      tpu.vector_store %arg8[%c0_33, %c0_34, %c0_35, %c0_36], %45 {strides = array<i32>} : memref<1x1x2x256xbf16, #tpu.memory_space<vmem>>, vector<1x1x2x256xbf16>,
    } else {
    }
    return
  }
  func.func @transform_0(%arg0: i32, %arg1: i32, %arg2: i32) -> (i32, i32, i32, i32) {
    %c2_i32 = arith.constant 2 : i32
    %0 = arith.muli %arg1, %c2_i32 : i32
    %1 = arith.addi %0, %arg2 : i32
    %c0_i32 = arith.constant 0 : i32
    %c0_i32_0 = arith.constant 0 : i32
    %c0_i32_1 = arith.constant 0 : i32
    return %arg0, %1, %c0_i32, %c0_i32_0 : i32, i32, i32, i32
  }
  func.func @transform_1(%arg0: i32, %arg1: i32, %arg2: i32) -> (i32, i32, i32, i32) {
    %c2_i32 = arith.constant 2 : i32
    %0 = arith.muli %arg1, %c2_i32 : i32
    %1 = arith.addi %0, %arg2 : i32
    %c0_i32 = arith.constant 0 : i32
    %c0_i32_0 = arith.constant 0 : i32
    %c0_i32_1 = arith.constant 0 : i32
    return %arg0, %1, %c0_i32, %c0_i32_0 : i32, i32, i32, i32
  }
  func.func @transform_2(%arg0: i32, %arg1: i32, %arg2: i32) -> (i32, i32, i32) {
    %c0_i32 = arith.constant 0 : i32
    %c0_i32_0 = arith.constant 0 : i32
    %c0_i32_1 = arith.constant 0 : i32
    %c0_i32_2 = arith.constant 0 : i32
    return %c0_i32, %c0_i32_0, %c0_i32_1 : i32, i32, i32
  }
  func.func @transform_3(%arg0: i32, %arg1: i32, %arg2: i32) -> (i32, i32) {
    %c0_i32 = arith.constant 0 : i32
    %c0_i32_0 = arith.constant 0 : i32
    %c0_i32_1 = arith.constant 0 : i32
    return %c0_i32, %c0_i32_0 : i32, i32
  }
  func.func @transform_4(%arg0: i32, %arg1: i32, %arg2: i32) -> (i32, i32) {
    %c0_i32 = arith.constant 0 : i32
    %c0_i32_0 = arith.constant 0 : i32
    %c0_i32_1 = arith.constant 0 : i32
    return %c0_i32, %c0_i32_0 : i32, i32
  }
  func.func @transform_5(%arg0: i32, %arg1: i32, %arg2: i32) -> (i32, i32, i32, i32) {
    %c0_i32 = arith.constant 0 : i32
    %c0_i32_0 = arith.constant 0 : i32
    %c0_i32_1 = arith.constant 0 : i32
    return %arg0, %arg1, %c0_i32, %c0_i32_0 : i32, i32, i32, i32
  }
}

module attributes {stable_mosaic.version = 11 : i64} {
  func.func @kernel(%arg0: i32, %arg1: i32, %arg2: i32, %arg3: memref<1x1x2x128xbf16, #tpu.memory_space<vmem>>, %arg4: memref<1x128x256xbf16, #tpu.memory_space<vmem>>, %arg5: memref<1x256xf32, #tpu.memory_space<vmem>>, %arg6: memref<1x256xf32, #tpu.memory_space<vmem>>, %arg7: memref<1x1x2x256xbf16, #tpu.memory_space<vmem>>, %arg8: memref<2x256xf32, #tpu.memory_space<vmem>>) attributes {dimension_semantics = [#tpu.dimension_semantics<parallel>, #tpu.dimension_semantics<parallel>, #tpu.dimension_semantics<arbitrary>], iteration_bounds = array<i64: 2, 2, 1>, scalar_prefetch = 0 : i64, scratch_operands = 1 : i64, tpu.core_type = #tpu.core_type<tc>, window_params = [{transform_indices = @transform_0, window_bounds = array<i64: 1, 1, 2, 128>}, {pipeline_mode = #tpu.pipeline_mode<synchronous>, transform_indices = @transform_1, window_bounds = array<i64: 1, 128, 256>}, {pipeline_mode = #tpu.pipeline_mode<synchronous>, transform_indices = @transform_2, window_bounds = array<i64: 1, 256>}, {pipeline_mode = #tpu.pipeline_mode<synchronous>, transform_indices = @transform_3, window_bounds = array<i64: 1, 256>}, {transform_indices = @transform_4, window_bounds = array<i64: 1, 1, 2, 256>}]} {
    %c0_i32 = arith.constant 0 : i32
    %0 = arith.cmpi eq, %arg2, %c0_i32 : i32
    %1 = arith.extui %0 : i1 to i32
    %c0_i32_0 = arith.constant 0 : i32
    %2 = arith.cmpi ne, %1, %c0_i32_0 : i32
    scf.if %2 {
      %cst_13 = arith.constant 0.000000e+00 : f32
      %17 = vector.broadcast %cst_13 : f32 to vector<2x256xf32>
      %c0_14 = arith.constant 0 : index
      %c0_15 = arith.constant 0 : index
      %18 = vector.load %arg8[%c0_14, %c0_15] : memref<2x256xf32, #tpu.memory_space<vmem>>, vector<2x256xf32>
      tpu.vector_store %arg8[%c0_14, %c0_15], %17 {strides = array<i32>} : memref<2x256xf32, #tpu.memory_space<vmem>>, vector<2x256xf32>,
    } else {
    }
    %c0 = arith.constant 0 : index
    %c0_1 = arith.constant 0 : index
    %3 = vector.load %arg8[%c0, %c0_1] : memref<2x256xf32, #tpu.memory_space<vmem>>, vector<2x256xf32>
    %c1_i32 = arith.constant 1 : i32
    %4 = arith.muli %arg2, %c1_i32 : i32
    %c0_2 = arith.constant 0 : index
    %c0_3 = arith.constant 0 : index
    %c0_4 = arith.constant 0 : index
    %c0_5 = arith.constant 0 : index
    %5 = vector.load %arg3[%c0_2, %c0_3, %c0_4, %c0_5] : memref<1x1x2x128xbf16, #tpu.memory_space<vmem>>, vector<1x1x2x128xbf16>
    %6 = vector.shape_cast %5 : vector<1x1x2x128xbf16> to vector<2x128xbf16>
    %c0_i32_6 = arith.constant 0 : i32
    %7 = arith.addi %4, %c0_i32_6 : i32
    %8 = arith.index_cast %7 : i32 to index
    %c0_7 = arith.constant 0 : index
    %c0_8 = arith.constant 0 : index
    %9 = vector.load %arg4[%8, %c0_7, %c0_8] : memref<1x128x256xbf16, #tpu.memory_space<vmem>>, vector<1x128x256xbf16>
    %10 = vector.shape_cast %9 : vector<1x128x256xbf16> to vector<128x256xbf16>
    %cst = arith.constant dense<0.000000e+00> : vector<2x256xf32>
    %11 = tpu.matmul %6, %10, %cst {dimension_numbers = #tpu.dot_dimension_numbers<[1], [0], [0], [1], [0, 0, 1, 1], [], []>} : vector<2x128xbf16>, vector<128x256xbf16>, vector<2x256xf32> -> vector<2x256xf32>
    %12 = arith.addf %3, %11 : vector<2x256xf32>
    %c0_9 = arith.constant 0 : index
    %c0_10 = arith.constant 0 : index
    %13 = vector.load %arg8[%c0_9, %c0_10] : memref<2x256xf32, #tpu.memory_space<vmem>>, vector<2x256xf32>
    tpu.vector_store %arg8[%c0_9, %c0_10], %12 {strides = array<i32>} : memref<2x256xf32, #tpu.memory_space<vmem>>, vector<2x256xf32>,
    %c0_i32_11 = arith.constant 0 : i32
    %14 = arith.cmpi eq, %arg2, %c0_i32_11 : i32
    %15 = arith.extui %14 : i1 to i32
    %c0_i32_12 = arith.constant 0 : i32
    %16 = arith.cmpi ne, %15, %c0_i32_12 : i32
    scf.if %16 {
      %c0_13 = arith.constant 0 : index
      %c0_14 = arith.constant 0 : index
      %17 = vector.load %arg8[%c0_13, %c0_14] : memref<2x256xf32, #tpu.memory_space<vmem>>, vector<2x256xf32>
      %c0_15 = arith.constant 0 : index
      %c0_16 = arith.constant 0 : index
      %18 = vector.load %arg5[%c0_15, %c0_16] : memref<1x256xf32, #tpu.memory_space<vmem>>, vector<1x256xf32>
      %19 = vector.broadcast %18 : vector<1x256xf32> to vector<2x256xf32>
      %20 = arith.mulf %17, %19 : vector<2x256xf32>
      %c0_17 = arith.constant 0 : index
      %c0_18 = arith.constant 0 : index
      %21 = vector.load %arg6[%c0_17, %c0_18] : memref<1x256xf32, #tpu.memory_space<vmem>>, vector<1x256xf32>
      %22 = vector.broadcast %21 : vector<1x256xf32> to vector<2x256xf32>
      %23 = arith.addf %20, %22 : vector<2x256xf32>
      %24 = arith.truncf %23 : vector<2x256xf32> to vector<2x256xbf16>
      %c0_19 = arith.constant 0 : index
      %c0_20 = arith.constant 0 : index
      %c0_21 = arith.constant 0 : index
      %c0_22 = arith.constant 0 : index
      %25 = vector.load %arg7[%c0_19, %c0_20, %c0_21, %c0_22] : memref<1x1x2x256xbf16, #tpu.memory_space<vmem>>, vector<1x1x2x256xbf16>
      %26 = vector.shape_cast %25 : vector<1x1x2x256xbf16> to vector<2x256xbf16>
      %27 = vector.shape_cast %24 : vector<2x256xbf16> to vector<1x1x2x256xbf16>
      tpu.vector_store %arg7[%c0_19, %c0_20, %c0_21, %c0_22], %27 {strides = array<i32>} : memref<1x1x2x256xbf16, #tpu.memory_space<vmem>>, vector<1x1x2x256xbf16>,
    } else {
    }
    return
  }
  func.func @transform_0(%arg0: i32, %arg1: i32, %arg2: i32) -> (i32, i32, i32, i32) {
    %c2_i32 = arith.constant 2 : i32
    %0 = arith.muli %arg1, %c2_i32 : i32
    %1 = arith.addi %0, %arg2 : i32
    %c0_i32 = arith.constant 0 : i32
    %c0_i32_0 = arith.constant 0 : i32
    %c0_i32_1 = arith.constant 0 : i32
    return %arg0, %1, %c0_i32, %c0_i32_0 : i32, i32, i32, i32
  }
  func.func @transform_1(%arg0: i32, %arg1: i32, %arg2: i32) -> (i32, i32, i32) {
    %c0_i32 = arith.constant 0 : i32
    %c0_i32_0 = arith.constant 0 : i32
    %c0_i32_1 = arith.constant 0 : i32
    %c0_i32_2 = arith.constant 0 : i32
    return %c0_i32, %c0_i32_0, %c0_i32_1 : i32, i32, i32
  }
  func.func @transform_2(%arg0: i32, %arg1: i32, %arg2: i32) -> (i32, i32) {
    %c0_i32 = arith.constant 0 : i32
    %c0_i32_0 = arith.constant 0 : i32
    %c0_i32_1 = arith.constant 0 : i32
    return %c0_i32, %c0_i32_0 : i32, i32
  }
  func.func @transform_3(%arg0: i32, %arg1: i32, %arg2: i32) -> (i32, i32) {
    %c0_i32 = arith.constant 0 : i32
    %c0_i32_0 = arith.constant 0 : i32
    %c0_i32_1 = arith.constant 0 : i32
    return %c0_i32, %c0_i32_0 : i32, i32
  }
  func.func @transform_4(%arg0: i32, %arg1: i32, %arg2: i32) -> (i32, i32, i32, i32) {
    %c0_i32 = arith.constant 0 : i32
    %c0_i32_0 = arith.constant 0 : i32
    %c0_i32_1 = arith.constant 0 : i32
    return %arg0, %arg1, %c0_i32, %c0_i32_0 : i32, i32, i32, i32
  }
}

module attributes {stable_mosaic.version = 11 : i64} {
  func.func @kernel(%arg0: i32, %arg1: i32, %arg2: i32, %arg3: memref<1x1x4x256xbf16, #tpu.memory_space<vmem>>, %arg4: memref<9x256x256xbf16, #tpu.memory_space<vmem>>, %arg5: memref<1x256xf32, #tpu.memory_space<vmem>>, %arg6: memref<1x256xf32, #tpu.memory_space<vmem>>, %arg7: memref<1x1x2x256xbf16, #tpu.memory_space<vmem>>, %arg8: memref<1x1x2x256xbf16, #tpu.memory_space<vmem>>, %arg9: memref<2x256xf32, #tpu.memory_space<vmem>>) attributes {dimension_semantics = [#tpu.dimension_semantics<parallel>, #tpu.dimension_semantics<parallel>, #tpu.dimension_semantics<arbitrary>], iteration_bounds = array<i64: 2, 2, 3>, scalar_prefetch = 0 : i64, scratch_operands = 1 : i64, tpu.core_type = #tpu.core_type<tc>, window_params = [{transform_indices = @transform_0, window_bounds = array<i64: 1, 1, 4, 256>}, {pipeline_mode = #tpu.pipeline_mode<synchronous>, transform_indices = @transform_1, window_bounds = array<i64: 9, 256, 256>}, {pipeline_mode = #tpu.pipeline_mode<synchronous>, transform_indices = @transform_2, window_bounds = array<i64: 1, 256>}, {pipeline_mode = #tpu.pipeline_mode<synchronous>, transform_indices = @transform_3, window_bounds = array<i64: 1, 256>}, {transform_indices = @transform_4, window_bounds = array<i64: 1, 1, 2, 256>}, {transform_indices = @transform_5, window_bounds = array<i64: 1, 1, 2, 256>}]} {
    %c0_i32 = arith.constant 0 : i32
    %0 = arith.cmpi eq, %arg2, %c0_i32 : i32
    %1 = arith.extui %0 : i1 to i32
    %c0_i32_0 = arith.constant 0 : i32
    %2 = arith.cmpi ne, %1, %c0_i32_0 : i32
    scf.if %2 {
      %cst_25 = arith.constant 0.000000e+00 : f32
      %33 = vector.broadcast %cst_25 : f32 to vector<2x256xf32>
      %c0_26 = arith.constant 0 : index
      %c0_27 = arith.constant 0 : index
      %34 = vector.load %arg9[%c0_26, %c0_27] : memref<2x256xf32, #tpu.memory_space<vmem>>, vector<2x256xf32>
      tpu.vector_store %arg9[%c0_26, %c0_27], %33 {strides = array<i32>} : memref<2x256xf32, #tpu.memory_space<vmem>>, vector<2x256xf32>,
    } else {
    }
    %c0 = arith.constant 0 : index
    %c0_1 = arith.constant 0 : index
    %3 = vector.load %arg9[%c0, %c0_1] : memref<2x256xf32, #tpu.memory_space<vmem>>, vector<2x256xf32>
    %c3_i32 = arith.constant 3 : i32
    %4 = arith.muli %arg2, %c3_i32 : i32
    %c0_2 = arith.constant 0 : index
    %c0_3 = arith.constant 0 : index
    %c0_4 = arith.constant 0 : index
    %c0_5 = arith.constant 0 : index
    %5 = vector.load %arg3[%c0_2, %c0_3, %c0_4, %c0_5] : memref<1x1x4x256xbf16, #tpu.memory_space<vmem>>, vector<1x1x2x256xbf16>
    %6 = vector.shape_cast %5 : vector<1x1x2x256xbf16> to vector<2x256xbf16>
    %c0_i32_6 = arith.constant 0 : i32
    %7 = arith.addi %4, %c0_i32_6 : i32
    %8 = arith.index_cast %7 : i32 to index
    %c0_7 = arith.constant 0 : index
    %c0_8 = arith.constant 0 : index
    %9 = vector.load %arg4[%8, %c0_7, %c0_8] : memref<9x256x256xbf16, #tpu.memory_space<vmem>>, vector<1x256x256xbf16>
    %10 = vector.shape_cast %9 : vector<1x256x256xbf16> to vector<256x256xbf16>
    %cst = arith.constant dense<0.000000e+00> : vector<2x256xf32>
    %11 = tpu.matmul %6, %10, %cst {dimension_numbers = #tpu.dot_dimension_numbers<[1], [0], [0], [1], [0, 0, 1, 1], [], []>} : vector<2x256xbf16>, vector<256x256xbf16>, vector<2x256xf32> -> vector<2x256xf32>
    %12 = arith.addf %3, %11 : vector<2x256xf32>
    %c0_9 = arith.constant 0 : index
    %c0_10 = arith.constant 0 : index
    %c1 = arith.constant 1 : index
    %c0_11 = arith.constant 0 : index
    %13 = vector.load %arg3[%c0_9, %c0_10, %c1, %c0_11] : memref<1x1x4x256xbf16, #tpu.memory_space<vmem>>, vector<1x1x2x256xbf16>
    %14 = vector.shape_cast %13 : vector<1x1x2x256xbf16> to vector<2x256xbf16>
    %c1_i32 = arith.constant 1 : i32
    %15 = arith.addi %4, %c1_i32 : i32
    %16 = arith.index_cast %15 : i32 to index
    %c0_12 = arith.constant 0 : index
    %c0_13 = arith.constant 0 : index
    %17 = vector.load %arg4[%16, %c0_12, %c0_13] : memref<9x256x256xbf16, #tpu.memory_space<vmem>>, vector<1x256x256xbf16>
    %18 = vector.shape_cast %17 : vector<1x256x256xbf16> to vector<256x256xbf16>
    %cst_14 = arith.constant dense<0.000000e+00> : vector<2x256xf32>
    %19 = tpu.matmul %14, %18, %cst_14 {dimension_numbers = #tpu.dot_dimension_numbers<[1], [0], [0], [1], [0, 0, 1, 1], [], []>} : vector<2x256xbf16>, vector<256x256xbf16>, vector<2x256xf32> -> vector<2x256xf32>
    %20 = arith.addf %12, %19 : vector<2x256xf32>
    %c0_15 = arith.constant 0 : index
    %c0_16 = arith.constant 0 : index
    %c2 = arith.constant 2 : index
    %c0_17 = arith.constant 0 : index
    %21 = vector.load %arg3[%c0_15, %c0_16, %c2, %c0_17] : memref<1x1x4x256xbf16, #tpu.memory_space<vmem>>, vector<1x1x2x256xbf16>
    %22 = vector.shape_cast %21 : vector<1x1x2x256xbf16> to vector<2x256xbf16>
    %c2_i32 = arith.constant 2 : i32
    %23 = arith.addi %4, %c2_i32 : i32
    %24 = arith.index_cast %23 : i32 to index
    %c0_18 = arith.constant 0 : index
    %c0_19 = arith.constant 0 : index
    %25 = vector.load %arg4[%24, %c0_18, %c0_19] : memref<9x256x256xbf16, #tpu.memory_space<vmem>>, vector<1x256x256xbf16>
    %26 = vector.shape_cast %25 : vector<1x256x256xbf16> to vector<256x256xbf16>
    %cst_20 = arith.constant dense<0.000000e+00> : vector<2x256xf32>
    %27 = tpu.matmul %22, %26, %cst_20 {dimension_numbers = #tpu.dot_dimension_numbers<[1], [0], [0], [1], [0, 0, 1, 1], [], []>} : vector<2x256xbf16>, vector<256x256xbf16>, vector<2x256xf32> -> vector<2x256xf32>
    %28 = arith.addf %20, %27 : vector<2x256xf32>
    %c0_21 = arith.constant 0 : index
    %c0_22 = arith.constant 0 : index
    %29 = vector.load %arg9[%c0_21, %c0_22] : memref<2x256xf32, #tpu.memory_space<vmem>>, vector<2x256xf32>
    tpu.vector_store %arg9[%c0_21, %c0_22], %28 {strides = array<i32>} : memref<2x256xf32, #tpu.memory_space<vmem>>, vector<2x256xf32>,
    %c2_i32_23 = arith.constant 2 : i32
    %30 = arith.cmpi eq, %arg2, %c2_i32_23 : i32
    %31 = arith.extui %30 : i1 to i32
    %c0_i32_24 = arith.constant 0 : i32
    %32 = arith.cmpi ne, %31, %c0_i32_24 : i32
    scf.if %32 {
      %c0_25 = arith.constant 0 : index
      %c0_26 = arith.constant 0 : index
      %33 = vector.load %arg9[%c0_25, %c0_26] : memref<2x256xf32, #tpu.memory_space<vmem>>, vector<2x256xf32>
      %c0_27 = arith.constant 0 : index
      %c0_28 = arith.constant 0 : index
      %34 = vector.load %arg5[%c0_27, %c0_28] : memref<1x256xf32, #tpu.memory_space<vmem>>, vector<1x256xf32>
      %35 = vector.broadcast %34 : vector<1x256xf32> to vector<2x256xf32>
      %36 = arith.mulf %33, %35 : vector<2x256xf32>
      %c0_29 = arith.constant 0 : index
      %c0_30 = arith.constant 0 : index
      %37 = vector.load %arg6[%c0_29, %c0_30] : memref<1x256xf32, #tpu.memory_space<vmem>>, vector<1x256xf32>
      %38 = vector.broadcast %37 : vector<1x256xf32> to vector<2x256xf32>
      %39 = arith.addf %36, %38 : vector<2x256xf32>
      %c0_31 = arith.constant 0 : index
      %c0_32 = arith.constant 0 : index
      %c0_33 = arith.constant 0 : index
      %c0_34 = arith.constant 0 : index
      %40 = vector.load %arg7[%c0_31, %c0_32, %c0_33, %c0_34] : memref<1x1x2x256xbf16, #tpu.memory_space<vmem>>, vector<1x1x2x256xbf16>
      %41 = vector.shape_cast %40 : vector<1x1x2x256xbf16> to vector<2x256xbf16>
      %42 = arith.extf %41 : vector<2x256xbf16> to vector<2x256xf32>
      %43 = arith.addf %39, %42 : vector<2x256xf32>
      %cst_35 = arith.constant 0.000000e+00 : f32
      %44 = vector.broadcast %cst_35 : f32 to vector<2x256xf32>
      %45 = arith.maximumf %43, %44 : vector<2x256xf32>
      %46 = arith.truncf %45 : vector<2x256xf32> to vector<2x256xbf16>
      %c0_36 = arith.constant 0 : index
      %c0_37 = arith.constant 0 : index
      %c0_38 = arith.constant 0 : index
      %c0_39 = arith.constant 0 : index
      %47 = vector.load %arg8[%c0_36, %c0_37, %c0_38, %c0_39] : memref<1x1x2x256xbf16, #tpu.memory_space<vmem>>, vector<1x1x2x256xbf16>
      %48 = vector.shape_cast %47 : vector<1x1x2x256xbf16> to vector<2x256xbf16>
      %49 = vector.shape_cast %46 : vector<2x256xbf16> to vector<1x1x2x256xbf16>
      tpu.vector_store %arg8[%c0_36, %c0_37, %c0_38, %c0_39], %49 {strides = array<i32>} : memref<1x1x2x256xbf16, #tpu.memory_space<vmem>>, vector<1x1x2x256xbf16>,
    } else {
    }
    return
  }
  func.func @transform_0(%arg0: i32, %arg1: i32, %arg2: i32) -> (i32, i32, i32, i32) {
    %c1_i32 = arith.constant 1 : i32
    %0 = arith.muli %arg1, %c1_i32 : i32
    %1 = arith.addi %0, %arg2 : i32
    %c0_i32 = arith.constant 0 : i32
    %c0_i32_0 = arith.constant 0 : i32
    %c0_i32_1 = arith.constant 0 : i32
    return %arg0, %1, %c0_i32, %c0_i32_0 : i32, i32, i32, i32
  }
  func.func @transform_1(%arg0: i32, %arg1: i32, %arg2: i32) -> (i32, i32, i32) {
    %c0_i32 = arith.constant 0 : i32
    %c0_i32_0 = arith.constant 0 : i32
    %c0_i32_1 = arith.constant 0 : i32
    %c0_i32_2 = arith.constant 0 : i32
    return %c0_i32, %c0_i32_0, %c0_i32_1 : i32, i32, i32
  }
  func.func @transform_2(%arg0: i32, %arg1: i32, %arg2: i32) -> (i32, i32) {
    %c0_i32 = arith.constant 0 : i32
    %c0_i32_0 = arith.constant 0 : i32
    %c0_i32_1 = arith.constant 0 : i32
    return %c0_i32, %c0_i32_0 : i32, i32
  }
  func.func @transform_3(%arg0: i32, %arg1: i32, %arg2: i32) -> (i32, i32) {
    %c0_i32 = arith.constant 0 : i32
    %c0_i32_0 = arith.constant 0 : i32
    %c0_i32_1 = arith.constant 0 : i32
    return %c0_i32, %c0_i32_0 : i32, i32
  }
  func.func @transform_4(%arg0: i32, %arg1: i32, %arg2: i32) -> (i32, i32, i32, i32) {
    %c0_i32 = arith.constant 0 : i32
    %c0_i32_0 = arith.constant 0 : i32
    %c0_i32_1 = arith.constant 0 : i32
    return %arg0, %arg1, %c0_i32, %c0_i32_0 : i32, i32, i32, i32
  }
  func.func @transform_5(%arg0: i32, %arg1: i32, %arg2: i32) -> (i32, i32, i32, i32) {
    %c0_i32 = arith.constant 0 : i32
    %c0_i32_0 = arith.constant 0 : i32
    %c0_i32_1 = arith.constant 0 : i32
    return %arg0, %arg1, %c0_i32, %c0_i32_0 : i32, i32, i32, i32
  }
}

module attributes {stable_mosaic.version = 11 : i64} {
  func.func @kernel(%arg0: i32, %arg1: i32, %arg2: i32, %arg3: memref<1x1x2x256xbf16, #tpu.memory_space<vmem>>, %arg4: memref<1x1x2x256xbf16, #tpu.memory_space<vmem>>, %arg5: memref<9x256x512xbf16, #tpu.memory_space<vmem>>, %arg6: memref<1x512xf32, #tpu.memory_space<vmem>>, %arg7: memref<1x512xf32, #tpu.memory_space<vmem>>, %arg8: memref<1x1x1x512xbf16, #tpu.memory_space<vmem>>, %arg9: memref<1x512xf32, #tpu.memory_space<vmem>>) attributes {dimension_semantics = [#tpu.dimension_semantics<parallel>, #tpu.dimension_semantics<parallel>, #tpu.dimension_semantics<arbitrary>], iteration_bounds = array<i64: 2, 1, 3>, scalar_prefetch = 0 : i64, scratch_operands = 1 : i64, tpu.core_type = #tpu.core_type<tc>, window_params = [{transform_indices = @transform_0, window_bounds = array<i64: 1, 1, 2, 256>}, {transform_indices = @transform_1, window_bounds = array<i64: 1, 1, 2, 256>}, {pipeline_mode = #tpu.pipeline_mode<synchronous>, transform_indices = @transform_2, window_bounds = array<i64: 9, 256, 512>}, {pipeline_mode = #tpu.pipeline_mode<synchronous>, transform_indices = @transform_3, window_bounds = array<i64: 1, 512>}, {pipeline_mode = #tpu.pipeline_mode<synchronous>, transform_indices = @transform_4, window_bounds = array<i64: 1, 512>}, {transform_indices = @transform_5, window_bounds = array<i64: 1, 1, 1, 512>}]} {
    %c0_i32 = arith.constant 0 : i32
    %0 = arith.cmpi eq, %arg2, %c0_i32 : i32
    %1 = arith.extui %0 : i1 to i32
    %c0_i32_0 = arith.constant 0 : i32
    %2 = arith.cmpi ne, %1, %c0_i32_0 : i32
    scf.if %2 {
      %cst_26 = arith.constant 0.000000e+00 : f32
      %33 = vector.broadcast %cst_26 : f32 to vector<1x512xf32>
      %c0_27 = arith.constant 0 : index
      %c0_28 = arith.constant 0 : index
      %34 = vector.load %arg9[%c0_27, %c0_28] : memref<1x512xf32, #tpu.memory_space<vmem>>, vector<1x512xf32>
      tpu.vector_store %arg9[%c0_27, %c0_28], %33 {strides = array<i32>} : memref<1x512xf32, #tpu.memory_space<vmem>>, vector<1x512xf32>,
    } else {
    }
    %c0 = arith.constant 0 : index
    %c0_1 = arith.constant 0 : index
    %3 = vector.load %arg9[%c0, %c0_1] : memref<1x512xf32, #tpu.memory_space<vmem>>, vector<1x512xf32>
    %c3_i32 = arith.constant 3 : i32
    %4 = arith.muli %arg2, %c3_i32 : i32
    %c0_2 = arith.constant 0 : index
    %c0_3 = arith.constant 0 : index
    %c0_4 = arith.constant 0 : index
    %c0_5 = arith.constant 0 : index
    %5 = vector.load %arg3[%c0_2, %c0_3, %c0_4, %c0_5] : memref<1x1x2x256xbf16, #tpu.memory_space<vmem>>, vector<1x1x1x256xbf16>
    %6 = vector.shape_cast %5 : vector<1x1x1x256xbf16> to vector<1x256xbf16>
    %c0_i32_6 = arith.constant 0 : i32
    %7 = arith.addi %4, %c0_i32_6 : i32
    %8 = arith.index_cast %7 : i32 to index
    %c0_7 = arith.constant 0 : index
    %c0_8 = arith.constant 0 : index
    %9 = vector.load %arg5[%8, %c0_7, %c0_8] : memref<9x256x512xbf16, #tpu.memory_space<vmem>>, vector<1x256x512xbf16>
    %10 = vector.shape_cast %9 : vector<1x256x512xbf16> to vector<256x512xbf16>
    %cst = arith.constant dense<0.000000e+00> : vector<1x512xf32>
    %11 = tpu.matmul %6, %10, %cst {dimension_numbers = #tpu.dot_dimension_numbers<[1], [0], [0], [1], [0, 0, 1, 1], [], []>} : vector<1x256xbf16>, vector<256x512xbf16>, vector<1x512xf32> -> vector<1x512xf32>
    %12 = arith.addf %3, %11 : vector<1x512xf32>
    %c0_9 = arith.constant 0 : index
    %c0_10 = arith.constant 0 : index
    %c0_11 = arith.constant 0 : index
    %c0_12 = arith.constant 0 : index
    %13 = vector.load %arg4[%c0_9, %c0_10, %c0_11, %c0_12] : memref<1x1x2x256xbf16, #tpu.memory_space<vmem>>, vector<1x1x1x256xbf16>
    %14 = vector.shape_cast %13 : vector<1x1x1x256xbf16> to vector<1x256xbf16>
    %c1_i32 = arith.constant 1 : i32
    %15 = arith.addi %4, %c1_i32 : i32
    %16 = arith.index_cast %15 : i32 to index
    %c0_13 = arith.constant 0 : index
    %c0_14 = arith.constant 0 : index
    %17 = vector.load %arg5[%16, %c0_13, %c0_14] : memref<9x256x512xbf16, #tpu.memory_space<vmem>>, vector<1x256x512xbf16>
    %18 = vector.shape_cast %17 : vector<1x256x512xbf16> to vector<256x512xbf16>
    %cst_15 = arith.constant dense<0.000000e+00> : vector<1x512xf32>
    %19 = tpu.matmul %14, %18, %cst_15 {dimension_numbers = #tpu.dot_dimension_numbers<[1], [0], [0], [1], [0, 0, 1, 1], [], []>} : vector<1x256xbf16>, vector<256x512xbf16>, vector<1x512xf32> -> vector<1x512xf32>
    %20 = arith.addf %12, %19 : vector<1x512xf32>
    %c0_16 = arith.constant 0 : index
    %c0_17 = arith.constant 0 : index
    %c1 = arith.constant 1 : index
    %c0_18 = arith.constant 0 : index
    %21 = vector.load %arg3[%c0_16, %c0_17, %c1, %c0_18] : memref<1x1x2x256xbf16, #tpu.memory_space<vmem>>, vector<1x1x1x256xbf16>
    %22 = vector.shape_cast %21 : vector<1x1x1x256xbf16> to vector<1x256xbf16>
    %c2_i32 = arith.constant 2 : i32
    %23 = arith.addi %4, %c2_i32 : i32
    %24 = arith.index_cast %23 : i32 to index
    %c0_19 = arith.constant 0 : index
    %c0_20 = arith.constant 0 : index
    %25 = vector.load %arg5[%24, %c0_19, %c0_20] : memref<9x256x512xbf16, #tpu.memory_space<vmem>>, vector<1x256x512xbf16>
    %26 = vector.shape_cast %25 : vector<1x256x512xbf16> to vector<256x512xbf16>
    %cst_21 = arith.constant dense<0.000000e+00> : vector<1x512xf32>
    %27 = tpu.matmul %22, %26, %cst_21 {dimension_numbers = #tpu.dot_dimension_numbers<[1], [0], [0], [1], [0, 0, 1, 1], [], []>} : vector<1x256xbf16>, vector<256x512xbf16>, vector<1x512xf32> -> vector<1x512xf32>
    %28 = arith.addf %20, %27 : vector<1x512xf32>
    %c0_22 = arith.constant 0 : index
    %c0_23 = arith.constant 0 : index
    %29 = vector.load %arg9[%c0_22, %c0_23] : memref<1x512xf32, #tpu.memory_space<vmem>>, vector<1x512xf32>
    tpu.vector_store %arg9[%c0_22, %c0_23], %28 {strides = array<i32>} : memref<1x512xf32, #tpu.memory_space<vmem>>, vector<1x512xf32>,
    %c2_i32_24 = arith.constant 2 : i32
    %30 = arith.cmpi eq, %arg2, %c2_i32_24 : i32
    %31 = arith.extui %30 : i1 to i32
    %c0_i32_25 = arith.constant 0 : i32
    %32 = arith.cmpi ne, %31, %c0_i32_25 : i32
    scf.if %32 {
      %c0_26 = arith.constant 0 : index
      %c0_27 = arith.constant 0 : index
      %33 = vector.load %arg9[%c0_26, %c0_27] : memref<1x512xf32, #tpu.memory_space<vmem>>, vector<1x512xf32>
      %c0_28 = arith.constant 0 : index
      %c0_29 = arith.constant 0 : index
      %34 = vector.load %arg6[%c0_28, %c0_29] : memref<1x512xf32, #tpu.memory_space<vmem>>, vector<1x512xf32>
      %35 = arith.mulf %33, %34 : vector<1x512xf32>
      %c0_30 = arith.constant 0 : index
      %c0_31 = arith.constant 0 : index
      %36 = vector.load %arg7[%c0_30, %c0_31] : memref<1x512xf32, #tpu.memory_space<vmem>>, vector<1x512xf32>
      %37 = arith.addf %35, %36 : vector<1x512xf32>
      %cst_32 = arith.constant 0.000000e+00 : f32
      %38 = vector.broadcast %cst_32 : f32 to vector<1x512xf32>
      %39 = arith.maximumf %37, %38 : vector<1x512xf32>
      %40 = arith.truncf %39 : vector<1x512xf32> to vector<1x512xbf16>
      %c0_33 = arith.constant 0 : index
      %c0_34 = arith.constant 0 : index
      %c0_35 = arith.constant 0 : index
      %c0_36 = arith.constant 0 : index
      %41 = vector.load %arg8[%c0_33, %c0_34, %c0_35, %c0_36] : memref<1x1x1x512xbf16, #tpu.memory_space<vmem>>, vector<1x1x1x512xbf16>
      %42 = vector.shape_cast %41 : vector<1x1x1x512xbf16> to vector<1x512xbf16>
      %43 = vector.shape_cast %40 : vector<1x512xbf16> to vector<1x1x1x512xbf16>
      tpu.vector_store %arg8[%c0_33, %c0_34, %c0_35, %c0_36], %43 {strides = array<i32>} : memref<1x1x1x512xbf16, #tpu.memory_space<vmem>>, vector<1x1x1x512xbf16>,
    } else {
    }
    return
  }
  func.func @transform_0(%arg0: i32, %arg1: i32, %arg2: i32) -> (i32, i32, i32, i32) {
    %c2_i32 = arith.constant 2 : i32
    %0 = arith.muli %arg1, %c2_i32 : i32
    %1 = arith.addi %0, %arg2 : i32
    %c0_i32 = arith.constant 0 : i32
    %c0_i32_0 = arith.constant 0 : i32
    %c0_i32_1 = arith.constant 0 : i32
    return %arg0, %1, %c0_i32, %c0_i32_0 : i32, i32, i32, i32
  }
  func.func @transform_1(%arg0: i32, %arg1: i32, %arg2: i32) -> (i32, i32, i32, i32) {
    %c2_i32 = arith.constant 2 : i32
    %0 = arith.muli %arg1, %c2_i32 : i32
    %1 = arith.addi %0, %arg2 : i32
    %c0_i32 = arith.constant 0 : i32
    %c0_i32_0 = arith.constant 0 : i32
    %c0_i32_1 = arith.constant 0 : i32
    return %arg0, %1, %c0_i32, %c0_i32_0 : i32, i32, i32, i32
  }
  func.func @transform_2(%arg0: i32, %arg1: i32, %arg2: i32) -> (i32, i32, i32) {
    %c0_i32 = arith.constant 0 : i32
    %c0_i32_0 = arith.constant 0 : i32
    %c0_i32_1 = arith.constant 0 : i32
    %c0_i32_2 = arith.constant 0 : i32
    return %c0_i32, %c0_i32_0, %c0_i32_1 : i32, i32, i32
  }
  func.func @transform_3(%arg0: i32, %arg1: i32, %arg2: i32) -> (i32, i32) {
    %c0_i32 = arith.constant 0 : i32
    %c0_i32_0 = arith.constant 0 : i32
    %c0_i32_1 = arith.constant 0 : i32
    return %c0_i32, %c0_i32_0 : i32, i32
  }
  func.func @transform_4(%arg0: i32, %arg1: i32, %arg2: i32) -> (i32, i32) {
    %c0_i32 = arith.constant 0 : i32
    %c0_i32_0 = arith.constant 0 : i32
    %c0_i32_1 = arith.constant 0 : i32
    return %c0_i32, %c0_i32_0 : i32, i32
  }
  func.func @transform_5(%arg0: i32, %arg1: i32, %arg2: i32) -> (i32, i32, i32, i32) {
    %c0_i32 = arith.constant 0 : i32
    %c0_i32_0 = arith.constant 0 : i32
    %c0_i32_1 = arith.constant 0 : i32
    return %arg0, %arg1, %c0_i32, %c0_i32_0 : i32, i32, i32, i32
  }
}

module attributes {stable_mosaic.version = 11 : i64} {
  func.func @kernel(%arg0: i32, %arg1: i32, %arg2: i32, %arg3: memref<1x1x1x256xbf16, #tpu.memory_space<vmem>>, %arg4: memref<1x256x512xbf16, #tpu.memory_space<vmem>>, %arg5: memref<1x512xf32, #tpu.memory_space<vmem>>, %arg6: memref<1x512xf32, #tpu.memory_space<vmem>>, %arg7: memref<1x1x1x512xbf16, #tpu.memory_space<vmem>>, %arg8: memref<1x512xf32, #tpu.memory_space<vmem>>) attributes {dimension_semantics = [#tpu.dimension_semantics<parallel>, #tpu.dimension_semantics<parallel>, #tpu.dimension_semantics<arbitrary>], iteration_bounds = array<i64: 2, 1, 1>, scalar_prefetch = 0 : i64, scratch_operands = 1 : i64, tpu.core_type = #tpu.core_type<tc>, window_params = [{transform_indices = @transform_0, window_bounds = array<i64: 1, 1, 1, 256>}, {pipeline_mode = #tpu.pipeline_mode<synchronous>, transform_indices = @transform_1, window_bounds = array<i64: 1, 256, 512>}, {pipeline_mode = #tpu.pipeline_mode<synchronous>, transform_indices = @transform_2, window_bounds = array<i64: 1, 512>}, {pipeline_mode = #tpu.pipeline_mode<synchronous>, transform_indices = @transform_3, window_bounds = array<i64: 1, 512>}, {transform_indices = @transform_4, window_bounds = array<i64: 1, 1, 1, 512>}]} {
    %c0_i32 = arith.constant 0 : i32
    %0 = arith.cmpi eq, %arg2, %c0_i32 : i32
    %1 = arith.extui %0 : i1 to i32
    %c0_i32_0 = arith.constant 0 : i32
    %2 = arith.cmpi ne, %1, %c0_i32_0 : i32
    scf.if %2 {
      %cst_13 = arith.constant 0.000000e+00 : f32
      %17 = vector.broadcast %cst_13 : f32 to vector<1x512xf32>
      %c0_14 = arith.constant 0 : index
      %c0_15 = arith.constant 0 : index
      %18 = vector.load %arg8[%c0_14, %c0_15] : memref<1x512xf32, #tpu.memory_space<vmem>>, vector<1x512xf32>
      tpu.vector_store %arg8[%c0_14, %c0_15], %17 {strides = array<i32>} : memref<1x512xf32, #tpu.memory_space<vmem>>, vector<1x512xf32>,
    } else {
    }
    %c0 = arith.constant 0 : index
    %c0_1 = arith.constant 0 : index
    %3 = vector.load %arg8[%c0, %c0_1] : memref<1x512xf32, #tpu.memory_space<vmem>>, vector<1x512xf32>
    %c1_i32 = arith.constant 1 : i32
    %4 = arith.muli %arg2, %c1_i32 : i32
    %c0_2 = arith.constant 0 : index
    %c0_3 = arith.constant 0 : index
    %c0_4 = arith.constant 0 : index
    %c0_5 = arith.constant 0 : index
    %5 = vector.load %arg3[%c0_2, %c0_3, %c0_4, %c0_5] : memref<1x1x1x256xbf16, #tpu.memory_space<vmem>>, vector<1x1x1x256xbf16>
    %6 = vector.shape_cast %5 : vector<1x1x1x256xbf16> to vector<1x256xbf16>
    %c0_i32_6 = arith.constant 0 : i32
    %7 = arith.addi %4, %c0_i32_6 : i32
    %8 = arith.index_cast %7 : i32 to index
    %c0_7 = arith.constant 0 : index
    %c0_8 = arith.constant 0 : index
    %9 = vector.load %arg4[%8, %c0_7, %c0_8] : memref<1x256x512xbf16, #tpu.memory_space<vmem>>, vector<1x256x512xbf16>
    %10 = vector.shape_cast %9 : vector<1x256x512xbf16> to vector<256x512xbf16>
    %cst = arith.constant dense<0.000000e+00> : vector<1x512xf32>
    %11 = tpu.matmul %6, %10, %cst {dimension_numbers = #tpu.dot_dimension_numbers<[1], [0], [0], [1], [0, 0, 1, 1], [], []>} : vector<1x256xbf16>, vector<256x512xbf16>, vector<1x512xf32> -> vector<1x512xf32>
    %12 = arith.addf %3, %11 : vector<1x512xf32>
    %c0_9 = arith.constant 0 : index
    %c0_10 = arith.constant 0 : index
    %13 = vector.load %arg8[%c0_9, %c0_10] : memref<1x512xf32, #tpu.memory_space<vmem>>, vector<1x512xf32>
    tpu.vector_store %arg8[%c0_9, %c0_10], %12 {strides = array<i32>} : memref<1x512xf32, #tpu.memory_space<vmem>>, vector<1x512xf32>,
    %c0_i32_11 = arith.constant 0 : i32
    %14 = arith.cmpi eq, %arg2, %c0_i32_11 : i32
    %15 = arith.extui %14 : i1 to i32
    %c0_i32_12 = arith.constant 0 : i32
    %16 = arith.cmpi ne, %15, %c0_i32_12 : i32
    scf.if %16 {
      %c0_13 = arith.constant 0 : index
      %c0_14 = arith.constant 0 : index
      %17 = vector.load %arg8[%c0_13, %c0_14] : memref<1x512xf32, #tpu.memory_space<vmem>>, vector<1x512xf32>
      %c0_15 = arith.constant 0 : index
      %c0_16 = arith.constant 0 : index
      %18 = vector.load %arg5[%c0_15, %c0_16] : memref<1x512xf32, #tpu.memory_space<vmem>>, vector<1x512xf32>
      %19 = arith.mulf %17, %18 : vector<1x512xf32>
      %c0_17 = arith.constant 0 : index
      %c0_18 = arith.constant 0 : index
      %20 = vector.load %arg6[%c0_17, %c0_18] : memref<1x512xf32, #tpu.memory_space<vmem>>, vector<1x512xf32>
      %21 = arith.addf %19, %20 : vector<1x512xf32>
      %22 = arith.truncf %21 : vector<1x512xf32> to vector<1x512xbf16>
      %c0_19 = arith.constant 0 : index
      %c0_20 = arith.constant 0 : index
      %c0_21 = arith.constant 0 : index
      %c0_22 = arith.constant 0 : index
      %23 = vector.load %arg7[%c0_19, %c0_20, %c0_21, %c0_22] : memref<1x1x1x512xbf16, #tpu.memory_space<vmem>>, vector<1x1x1x512xbf16>
      %24 = vector.shape_cast %23 : vector<1x1x1x512xbf16> to vector<1x512xbf16>
      %25 = vector.shape_cast %22 : vector<1x512xbf16> to vector<1x1x1x512xbf16>
      tpu.vector_store %arg7[%c0_19, %c0_20, %c0_21, %c0_22], %25 {strides = array<i32>} : memref<1x1x1x512xbf16, #tpu.memory_space<vmem>>, vector<1x1x1x512xbf16>,
    } else {
    }
    return
  }
  func.func @transform_0(%arg0: i32, %arg1: i32, %arg2: i32) -> (i32, i32, i32, i32) {
    %c2_i32 = arith.constant 2 : i32
    %0 = arith.muli %arg1, %c2_i32 : i32
    %1 = arith.addi %0, %arg2 : i32
    %c0_i32 = arith.constant 0 : i32
    %c0_i32_0 = arith.constant 0 : i32
    %c0_i32_1 = arith.constant 0 : i32
    return %arg0, %1, %c0_i32, %c0_i32_0 : i32, i32, i32, i32
  }
  func.func @transform_1(%arg0: i32, %arg1: i32, %arg2: i32) -> (i32, i32, i32) {
    %c0_i32 = arith.constant 0 : i32
    %c0_i32_0 = arith.constant 0 : i32
    %c0_i32_1 = arith.constant 0 : i32
    %c0_i32_2 = arith.constant 0 : i32
    return %c0_i32, %c0_i32_0, %c0_i32_1 : i32, i32, i32
  }
  func.func @transform_2(%arg0: i32, %arg1: i32, %arg2: i32) -> (i32, i32) {
    %c0_i32 = arith.constant 0 : i32
    %c0_i32_0 = arith.constant 0 : i32
    %c0_i32_1 = arith.constant 0 : i32
    return %c0_i32, %c0_i32_0 : i32, i32
  }
  func.func @transform_3(%arg0: i32, %arg1: i32, %arg2: i32) -> (i32, i32) {
    %c0_i32 = arith.constant 0 : i32
    %c0_i32_0 = arith.constant 0 : i32
    %c0_i32_1 = arith.constant 0 : i32
    return %c0_i32, %c0_i32_0 : i32, i32
  }
  func.func @transform_4(%arg0: i32, %arg1: i32, %arg2: i32) -> (i32, i32, i32, i32) {
    %c0_i32 = arith.constant 0 : i32
    %c0_i32_0 = arith.constant 0 : i32
    %c0_i32_1 = arith.constant 0 : i32
    return %arg0, %arg1, %c0_i32, %c0_i32_0 : i32, i32, i32, i32
  }
}

module attributes {stable_mosaic.version = 11 : i64} {
  func.func @_avgpool_fc_kernel(%arg0: i32, %arg1: memref<2x1x512xbf16, #tpu.memory_space<vmem>>, %arg2: memref<512x128xf32, #tpu.memory_space<vmem>>, %arg3: memref<1x128xf32, #tpu.memory_space<vmem>>, %arg4: memref<2x128xf32, #tpu.memory_space<vmem>>) attributes {dimension_semantics = [#tpu.dimension_semantics<arbitrary>], iteration_bounds = array<i64: 1>, scalar_prefetch = 0 : i64, scratch_operands = 0 : i64, tpu.core_type = #tpu.core_type<tc>, window_params = [{pipeline_mode = #tpu.pipeline_mode<synchronous>, transform_indices = @transform_0, window_bounds = array<i64: 2, 1, 512>}, {pipeline_mode = #tpu.pipeline_mode<synchronous>, transform_indices = @transform_1, window_bounds = array<i64: 512, 128>}, {pipeline_mode = #tpu.pipeline_mode<synchronous>, transform_indices = @transform_2, window_bounds = array<i64: 1, 128>}, {pipeline_mode = #tpu.pipeline_mode<synchronous>, transform_indices = @transform_3, window_bounds = array<i64: 2, 128>}]} {
    %c0 = arith.constant 0 : index
    %c0_0 = arith.constant 0 : index
    %c0_1 = arith.constant 0 : index
    %0 = vector.load %arg1[%c0, %c0_0, %c0_1] : memref<2x1x512xbf16, #tpu.memory_space<vmem>>, vector<2x1x512xbf16>
    %1 = arith.extf %0 : vector<2x1x512xbf16> to vector<2x1x512xf32>
    %cst = arith.constant dense<0.000000e+00> : vector<2x512xf32>
    %2 = vector.multi_reduction <add>, %1, %cst [1] : vector<2x1x512xf32> to vector<2x512xf32>
    %cst_2 = arith.constant 1.000000e+00 : f32
    %3 = vector.broadcast %cst_2 : f32 to vector<2x512xf32>
    %4 = arith.divf %2, %3 : vector<2x512xf32>
    %c0_3 = arith.constant 0 : index
    %c0_4 = arith.constant 0 : index
    %5 = vector.load %arg2[%c0_3, %c0_4] : memref<512x128xf32, #tpu.memory_space<vmem>>, vector<512x128xf32>
    %cst_5 = arith.constant dense<0.000000e+00> : vector<2x128xf32>
    %6 = tpu.matmul %4, %5, %cst_5 {dimension_numbers = #tpu.dot_dimension_numbers<[1], [0], [0], [1], [0, 0, 1, 1], [], []>} : vector<2x512xf32>, vector<512x128xf32>, vector<2x128xf32> -> vector<2x128xf32>
    %c0_6 = arith.constant 0 : index
    %c0_7 = arith.constant 0 : index
    %7 = vector.load %arg3[%c0_6, %c0_7] : memref<1x128xf32, #tpu.memory_space<vmem>>, vector<1x128xf32>
    %8 = vector.broadcast %7 : vector<1x128xf32> to vector<2x128xf32>
    %9 = arith.addf %6, %8 : vector<2x128xf32>
    %c0_8 = arith.constant 0 : index
    %c0_9 = arith.constant 0 : index
    %10 = vector.load %arg4[%c0_8, %c0_9] : memref<2x128xf32, #tpu.memory_space<vmem>>, vector<2x128xf32>
    tpu.vector_store %arg4[%c0_8, %c0_9], %9 {strides = array<i32>} : memref<2x128xf32, #tpu.memory_space<vmem>>, vector<2x128xf32>,
    return
  }
  func.func @transform_0(%arg0: i32) -> (i32, i32, i32) {
    %c0_i32 = arith.constant 0 : i32
    %c0_i32_0 = arith.constant 0 : i32
    %c0_i32_1 = arith.constant 0 : i32
    %c0_i32_2 = arith.constant 0 : i32
    return %c0_i32, %c0_i32_0, %c0_i32_1 : i32, i32, i32
  }
  func.func @transform_1(%arg0: i32) -> (i32, i32) {
    %c0_i32 = arith.constant 0 : i32
    %c0_i32_0 = arith.constant 0 : i32
    %c0_i32_1 = arith.constant 0 : i32
    return %c0_i32, %c0_i32_0 : i32, i32
  }
  func.func @transform_2(%arg0: i32) -> (i32, i32) {
    %c0_i32 = arith.constant 0 : i32
    %c0_i32_0 = arith.constant 0 : i32
    %c0_i32_1 = arith.constant 0 : i32
    return %c0_i32, %c0_i32_0 : i32, i32
  }
  func.func @transform_3(%arg0: i32) -> (i32, i32) {
    %c0_i32 = arith.constant 0 : i32
    %c0_i32_0 = arith.constant 0 : i32
    %c0_i32_1 = arith.constant 0 : i32
    return %c0_i32, %c0_i32_0 : i32, i32
  }
}

module attributes {stable_mosaic.version = 11 : i64} {
  func.func @kernel(%arg0: i32, %arg1: i32, %arg2: i32, %arg3: memref<1x1x3x512xbf16, #tpu.memory_space<vmem>>, %arg4: memref<9x512x512xbf16, #tpu.memory_space<vmem>>, %arg5: memref<1x512xf32, #tpu.memory_space<vmem>>, %arg6: memref<1x512xf32, #tpu.memory_space<vmem>>, %arg7: memref<1x1x1x512xbf16, #tpu.memory_space<vmem>>, %arg8: memref<1x1x1x512xbf16, #tpu.memory_space<vmem>>, %arg9: memref<1x512xf32, #tpu.memory_space<vmem>>) attributes {dimension_semantics = [#tpu.dimension_semantics<parallel>, #tpu.dimension_semantics<parallel>, #tpu.dimension_semantics<arbitrary>], iteration_bounds = array<i64: 2, 1, 3>, scalar_prefetch = 0 : i64, scratch_operands = 1 : i64, tpu.core_type = #tpu.core_type<tc>, window_params = [{transform_indices = @transform_0, window_bounds = array<i64: 1, 1, 3, 512>}, {pipeline_mode = #tpu.pipeline_mode<synchronous>, transform_indices = @transform_1, window_bounds = array<i64: 9, 512, 512>}, {pipeline_mode = #tpu.pipeline_mode<synchronous>, transform_indices = @transform_2, window_bounds = array<i64: 1, 512>}, {pipeline_mode = #tpu.pipeline_mode<synchronous>, transform_indices = @transform_3, window_bounds = array<i64: 1, 512>}, {transform_indices = @transform_4, window_bounds = array<i64: 1, 1, 1, 512>}, {transform_indices = @transform_5, window_bounds = array<i64: 1, 1, 1, 512>}]} {
    %c0_i32 = arith.constant 0 : i32
    %0 = arith.cmpi eq, %arg2, %c0_i32 : i32
    %1 = arith.extui %0 : i1 to i32
    %c0_i32_0 = arith.constant 0 : i32
    %2 = arith.cmpi ne, %1, %c0_i32_0 : i32
    scf.if %2 {
      %cst_25 = arith.constant 0.000000e+00 : f32
      %33 = vector.broadcast %cst_25 : f32 to vector<1x512xf32>
      %c0_26 = arith.constant 0 : index
      %c0_27 = arith.constant 0 : index
      %34 = vector.load %arg9[%c0_26, %c0_27] : memref<1x512xf32, #tpu.memory_space<vmem>>, vector<1x512xf32>
      tpu.vector_store %arg9[%c0_26, %c0_27], %33 {strides = array<i32>} : memref<1x512xf32, #tpu.memory_space<vmem>>, vector<1x512xf32>,
    } else {
    }
    %c0 = arith.constant 0 : index
    %c0_1 = arith.constant 0 : index
    %3 = vector.load %arg9[%c0, %c0_1] : memref<1x512xf32, #tpu.memory_space<vmem>>, vector<1x512xf32>
    %c3_i32 = arith.constant 3 : i32
    %4 = arith.muli %arg2, %c3_i32 : i32
    %c0_2 = arith.constant 0 : index
    %c0_3 = arith.constant 0 : index
    %c0_4 = arith.constant 0 : index
    %c0_5 = arith.constant 0 : index
    %5 = vector.load %arg3[%c0_2, %c0_3, %c0_4, %c0_5] : memref<1x1x3x512xbf16, #tpu.memory_space<vmem>>, vector<1x1x1x512xbf16>
    %6 = vector.shape_cast %5 : vector<1x1x1x512xbf16> to vector<1x512xbf16>
    %c0_i32_6 = arith.constant 0 : i32
    %7 = arith.addi %4, %c0_i32_6 : i32
    %8 = arith.index_cast %7 : i32 to index
    %c0_7 = arith.constant 0 : index
    %c0_8 = arith.constant 0 : index
    %9 = vector.load %arg4[%8, %c0_7, %c0_8] : memref<9x512x512xbf16, #tpu.memory_space<vmem>>, vector<1x512x512xbf16>
    %10 = vector.shape_cast %9 : vector<1x512x512xbf16> to vector<512x512xbf16>
    %cst = arith.constant dense<0.000000e+00> : vector<1x512xf32>
    %11 = tpu.matmul %6, %10, %cst {dimension_numbers = #tpu.dot_dimension_numbers<[1], [0], [0], [1], [0, 0, 1, 1], [], []>} : vector<1x512xbf16>, vector<512x512xbf16>, vector<1x512xf32> -> vector<1x512xf32>
    %12 = arith.addf %3, %11 : vector<1x512xf32>
    %c0_9 = arith.constant 0 : index
    %c0_10 = arith.constant 0 : index
    %c1 = arith.constant 1 : index
    %c0_11 = arith.constant 0 : index
    %13 = vector.load %arg3[%c0_9, %c0_10, %c1, %c0_11] : memref<1x1x3x512xbf16, #tpu.memory_space<vmem>>, vector<1x1x1x512xbf16>
    %14 = vector.shape_cast %13 : vector<1x1x1x512xbf16> to vector<1x512xbf16>
    %c1_i32 = arith.constant 1 : i32
    %15 = arith.addi %4, %c1_i32 : i32
    %16 = arith.index_cast %15 : i32 to index
    %c0_12 = arith.constant 0 : index
    %c0_13 = arith.constant 0 : index
    %17 = vector.load %arg4[%16, %c0_12, %c0_13] : memref<9x512x512xbf16, #tpu.memory_space<vmem>>, vector<1x512x512xbf16>
    %18 = vector.shape_cast %17 : vector<1x512x512xbf16> to vector<512x512xbf16>
    %cst_14 = arith.constant dense<0.000000e+00> : vector<1x512xf32>
    %19 = tpu.matmul %14, %18, %cst_14 {dimension_numbers = #tpu.dot_dimension_numbers<[1], [0], [0], [1], [0, 0, 1, 1], [], []>} : vector<1x512xbf16>, vector<512x512xbf16>, vector<1x512xf32> -> vector<1x512xf32>
    %20 = arith.addf %12, %19 : vector<1x512xf32>
    %c0_15 = arith.constant 0 : index
    %c0_16 = arith.constant 0 : index
    %c2 = arith.constant 2 : index
    %c0_17 = arith.constant 0 : index
    %21 = vector.load %arg3[%c0_15, %c0_16, %c2, %c0_17] : memref<1x1x3x512xbf16, #tpu.memory_space<vmem>>, vector<1x1x1x512xbf16>
    %22 = vector.shape_cast %21 : vector<1x1x1x512xbf16> to vector<1x512xbf16>
    %c2_i32 = arith.constant 2 : i32
    %23 = arith.addi %4, %c2_i32 : i32
    %24 = arith.index_cast %23 : i32 to index
    %c0_18 = arith.constant 0 : index
    %c0_19 = arith.constant 0 : index
    %25 = vector.load %arg4[%24, %c0_18, %c0_19] : memref<9x512x512xbf16, #tpu.memory_space<vmem>>, vector<1x512x512xbf16>
    %26 = vector.shape_cast %25 : vector<1x512x512xbf16> to vector<512x512xbf16>
    %cst_20 = arith.constant dense<0.000000e+00> : vector<1x512xf32>
    %27 = tpu.matmul %22, %26, %cst_20 {dimension_numbers = #tpu.dot_dimension_numbers<[1], [0], [0], [1], [0, 0, 1, 1], [], []>} : vector<1x512xbf16>, vector<512x512xbf16>, vector<1x512xf32> -> vector<1x512xf32>
    %28 = arith.addf %20, %27 : vector<1x512xf32>
    %c0_21 = arith.constant 0 : index
    %c0_22 = arith.constant 0 : index
    %29 = vector.load %arg9[%c0_21, %c0_22] : memref<1x512xf32, #tpu.memory_space<vmem>>, vector<1x512xf32>
    tpu.vector_store %arg9[%c0_21, %c0_22], %28 {strides = array<i32>} : memref<1x512xf32, #tpu.memory_space<vmem>>, vector<1x512xf32>,
    %c2_i32_23 = arith.constant 2 : i32
    %30 = arith.cmpi eq, %arg2, %c2_i32_23 : i32
    %31 = arith.extui %30 : i1 to i32
    %c0_i32_24 = arith.constant 0 : i32
    %32 = arith.cmpi ne, %31, %c0_i32_24 : i32
    scf.if %32 {
      %c0_25 = arith.constant 0 : index
      %c0_26 = arith.constant 0 : index
      %33 = vector.load %arg9[%c0_25, %c0_26] : memref<1x512xf32, #tpu.memory_space<vmem>>, vector<1x512xf32>
      %c0_27 = arith.constant 0 : index
      %c0_28 = arith.constant 0 : index
      %34 = vector.load %arg5[%c0_27, %c0_28] : memref<1x512xf32, #tpu.memory_space<vmem>>, vector<1x512xf32>
      %35 = arith.mulf %33, %34 : vector<1x512xf32>
      %c0_29 = arith.constant 0 : index
      %c0_30 = arith.constant 0 : index
      %36 = vector.load %arg6[%c0_29, %c0_30] : memref<1x512xf32, #tpu.memory_space<vmem>>, vector<1x512xf32>
      %37 = arith.addf %35, %36 : vector<1x512xf32>
      %c0_31 = arith.constant 0 : index
      %c0_32 = arith.constant 0 : index
      %c0_33 = arith.constant 0 : index
      %c0_34 = arith.constant 0 : index
      %38 = vector.load %arg7[%c0_31, %c0_32, %c0_33, %c0_34] : memref<1x1x1x512xbf16, #tpu.memory_space<vmem>>, vector<1x1x1x512xbf16>
      %39 = vector.shape_cast %38 : vector<1x1x1x512xbf16> to vector<1x512xbf16>
      %40 = arith.extf %39 : vector<1x512xbf16> to vector<1x512xf32>
      %41 = arith.addf %37, %40 : vector<1x512xf32>
      %cst_35 = arith.constant 0.000000e+00 : f32
      %42 = vector.broadcast %cst_35 : f32 to vector<1x512xf32>
      %43 = arith.maximumf %41, %42 : vector<1x512xf32>
      %44 = arith.truncf %43 : vector<1x512xf32> to vector<1x512xbf16>
      %c0_36 = arith.constant 0 : index
      %c0_37 = arith.constant 0 : index
      %c0_38 = arith.constant 0 : index
      %c0_39 = arith.constant 0 : index
      %45 = vector.load %arg8[%c0_36, %c0_37, %c0_38, %c0_39] : memref<1x1x1x512xbf16, #tpu.memory_space<vmem>>, vector<1x1x1x512xbf16>
      %46 = vector.shape_cast %45 : vector<1x1x1x512xbf16> to vector<1x512xbf16>
      %47 = vector.shape_cast %44 : vector<1x512xbf16> to vector<1x1x1x512xbf16>
      tpu.vector_store %arg8[%c0_36, %c0_37, %c0_38, %c0_39], %47 {strides = array<i32>} : memref<1x1x1x512xbf16, #tpu.memory_space<vmem>>, vector<1x1x1x512xbf16>,
    } else {
    }
    return
  }
  func.func @transform_0(%arg0: i32, %arg1: i32, %arg2: i32) -> (i32, i32, i32, i32) {
    %c1_i32 = arith.constant 1 : i32
    %0 = arith.muli %arg1, %c1_i32 : i32
    %1 = arith.addi %0, %arg2 : i32
    %c0_i32 = arith.constant 0 : i32
    %c0_i32_0 = arith.constant 0 : i32
    %c0_i32_1 = arith.constant 0 : i32
    return %arg0, %1, %c0_i32, %c0_i32_0 : i32, i32, i32, i32
  }
  func.func @transform_1(%arg0: i32, %arg1: i32, %arg2: i32) -> (i32, i32, i32) {
    %c0_i32 = arith.constant 0 : i32
    %c0_i32_0 = arith.constant 0 : i32
    %c0_i32_1 = arith.constant 0 : i32
    %c0_i32_2 = arith.constant 0 : i32
    return %c0_i32, %c0_i32_0, %c0_i32_1 : i32, i32, i32
  }
  func.func @transform_2(%arg0: i32, %arg1: i32, %arg2: i32) -> (i32, i32) {
    %c0_i32 = arith.constant 0 : i32
    %c0_i32_0 = arith.constant 0 : i32
    %c0_i32_1 = arith.constant 0 : i32
    return %c0_i32, %c0_i32_0 : i32, i32
  }
  func.func @transform_3(%arg0: i32, %arg1: i32, %arg2: i32) -> (i32, i32) {
    %c0_i32 = arith.constant 0 : i32
    %c0_i32_0 = arith.constant 0 : i32
    %c0_i32_1 = arith.constant 0 : i32
    return %c0_i32, %c0_i32_0 : i32, i32
  }
  func.func @transform_4(%arg0: i32, %arg1: i32, %arg2: i32) -> (i32, i32, i32, i32) {
    %c0_i32 = arith.constant 0 : i32
    %c0_i32_0 = arith.constant 0 : i32
    %c0_i32_1 = arith.constant 0 : i32
    return %arg0, %arg1, %c0_i32, %c0_i32_0 : i32, i32, i32, i32
  }
  func.func @transform_5(%arg0: i32, %arg1: i32, %arg2: i32) -> (i32, i32, i32, i32) {
    %c0_i32 = arith.constant 0 : i32
    %c0_i32_0 = arith.constant 0 : i32
    %c0_i32_1 = arith.constant 0 : i32
    return %arg0, %arg1, %c0_i32, %c0_i32_0 : i32, i32, i32, i32
  }
}

</mosaic_0001>

<bundles_post_ra>
// kernel: _lambda_.15
= control target key start
LH: loop header
LB: loop body
LE: loop exit
PB: predicated region body
PF: predicated region fallthrough
CT: control target
= control target key end

     0   :  { %s547_s9 = smov 0   ;;  %s549_s10 = smov 0   ;;  %s629_s0 = inlined_call_operand.vmem [shape: bf16[2,18,9,128], index: 0, kind: input, shape index: {}]   ;;  %s630_s1 = inlined_call_operand.vmem [shape: bf16[2,18,9,128], index: 1, kind: input, shape index: {}]   ;;  %s631_s2 = inlined_call_operand.vmem [shape: bf16[2,8,8,128], index: 2, kind: output, shape index: {}]  }
   0x1   :  { %s551_s11 = smov 0   ;;  %s553_s12 = smov 0  }
   0x2   :  { %s555_s13 = smov 0   ;;  %s557_s14 = smov 0  }
   0x3   :  { %s559_s15 = smov 0  }
   0x4 LB: > { %s24_s16 = sadd.s32 1, %s518_s12  ;;  %s27_s17 = sadd.s32 1, %s522_s13  ;;  %s530_s15 = sphi %s559_s15, %s12_s15   ;;  %s526_s14 = sphi %s557_s14, %s637_s14   ;;  %s522_s13 = sphi %s555_s13, %s636_s13   ;;  %s518_s12 = sphi %s553_s12, %s635_s12   ;;  %s514_s11 = sphi %s551_s11, %s634_s11   ;;  %s510_s10 = sphi %s549_s10, %s633_s10   ;;  %s506_s9 = sphi %s547_s9, %s632_s9  }
   0x5   : > { %p25_p0 = scmp.ge.s32.totalorder %s24_s16, 3  ;;  %p406_p1 = scmp.ge.s32.totalorder %s530_s15, 1 }
   0x6   : > { %p171_p2 = scmp.lt.s32.totalorder %s530_s15, 49  ;;  %s31_s18 = sadd.s32 1, %s526_s14 }
   0x7   : > { %s639_s16 = smov (%p25_p0, %s24_s16), 0  ;;  %s641_s17 = smov (!%p25_p0, %s27_s17), %s522_s13 }
   0x8   : > { %p172_p3 = pnand %p406_p1, %p171_p2  ;;  %p29_p4 = scmp.ge.s32.totalorder %s641_s17, 8 }
   0x9   : > { %s407_s19 = sshll.u32 (!%p172_p3), %s510_s10, 1  ;;  %p215_p6 = scmp.lt.s32.totalorder (!%p172_p3), %s514_s11, 1 }
   0xa   : > { %s643_s17 = smov (%p29_p4, %s641_s17), 0  ;;  %s645_s18 = smov (!%p29_p4, %s31_s18), %s526_s14 }
   0xb   : > { %p33_p5 = scmp.ge.s32.totalorder %s645_s18, 2  ;;  %175 = sbr.rel (%p172_p3) target bundleno = 46 (0x2e), region = 28 }
   0xc   : > { %s214_s20 = sadd.s32 (!%p172_p3), %s506_s9, %s407_s19  ;;  %p241_p7 = scmp.lt.s32.totalorder (!%p172_p3), %s510_s10, 7 }
   0xd   : > { %s647_s18 = smov (%p33_p5, %s645_s18), 0  ;;  %p217_p8 = scmp.lt.s32.totalorder (!%p172_p3), %s214_s20, 17 }
   0xe   : > { %p415_p9 = scmp.ne.s32.totalorder (!%p172_p3), %s506_s9, 0 }
  0x10   : > { %s649_s11 = smov (!%p215_p6, %s514_s11), 1  ;;  %s651_s20 = smov (!%p217_p8, %s214_s20), 17  ;;  %vm251_vm0 = vsmask.f32 3328  ;;  %vm252_vm1 = vsmask.f32 7440 }
  0x11   : > { %s419_s21 = smul.u32 36, %s649_s11  ;;  %s413_s22 = sshll.u32 %s649_s11, 3  ;;  %vm253_vm2 = vmor %vm251_vm0, %vm252_vm1 }
  0x12   : > { %s653_s10 = smov (!%p241_p7, %s510_s10), 7  ;;  %s408_s23 = sshll.u32 %s651_s20, 1 }
  0x13   : > { %s221_s24 = sadd.s32 %s419_s21, %s408_s23  ;;  %s244_s25 = sadd.s32 %s413_s22, %s653_s10 }
  0x14   : > { %s409_s26 = sshll.u32 %s221_s24, 2  ;;  %s414_s27 = sshll.u32 %s244_s25, 2 }
  0x15   : > { %s223_s30 = scalar_lea.vmem %s629_s0, %s409_s26  ;;  %s236_s5 = scalar_lea.vmem %s630_s1, %s409_s26 }
  0x16   : > { %s246_s8 = scalar_lea.vmem %s631_s2, %s414_s27  ;;  %v247_v0 = vld [vmem:[%s223_s30] sm:$0xf]  ;;  %v250_v1 = vld [vmem:[%s223_s30 + $0x4] sm:$0x1] }
  0x17   : > { %v255_v2 = vshrl.u32 %v247_v0, 16  ;;  %v258_v3 = vshll.u32 %v247_v0, 16  ;;  %v264_v4 = vshll.u32 %v250_v1, 16  ;;  %v248_v5 = vld [vmem:[%s236_s5] sm:$0xf] }
  0x18   : > { %v249_v10 = vmax.bf16 %v248_v5, %v247_v0 }
  0x19   : > { %v257_v6 = vrot.slane %v255_v2, 4  ;;  %v260_v7 = vrot.slane %v258_v3, 5  ;;  %v266_v9 = vrot.slane %v264_v4, 5 }
  0x1b   : > { %v261_v8 = vor.u32 %v260_v7, %v257_v6 }
  0x1c   : > { %273 = sbr.rel (%p415_p9) target bundleno = 35 (0x23), region = 32 }
  0x1d   : > { %v262_v11 = vrot.slane %v261_v8, 4 }
  0x1f   : > { %v267_v12 = vsel %vm253_vm2, %v262_v11, %v266_v9 }
  0x20   : > { %v269_v13 = vmax.bf16 %v267_v12, %v249_v10 }
  0x22   : > { %274 = vst [vmem:[%s246_s8] sm:$0xf] %v269_v13 }
  0x23 PF: > { %p416_p10 = scmp.eq.s32.totalorder %s506_s9, 0 }
  0x25   : > { %278 = sbr.rel (%p416_p10) target bundleno = 46 (0x2e), region = 36 }
  0x2a   : > { %v279_v14 = vld [vmem:[%s246_s8] sm:$0xf] }
  0x2b   : > { %v280_v15 = vmax.bf16 %v279_v14, %v269_v13 }
  0x2d   : > { %281 = vst [vmem:[%s246_s8] sm:$0xf] %v280_v15 }
  0x2e PF: > { %s12_s15 = sadd.s32 1, %s530_s15   ;;  %s632_s9 = smov %s518_s12 }
  0x2f   : > { %p9_p11 = scmp.ge.s32.totalorder %s12_s15, 50   ;;  %s633_s10 = smov %s522_s13 }
  0x30   : > { %s634_s11 = smov %s526_s14  ;;  %s635_s12 = smov %s639_s16 }
  0x31   : > { %s636_s13 = smov %s643_s17  ;;  %s637_s14 = smov %s647_s18 }
  0x32   :  { %11 = sbr.rel (!%p9_p11) target bundleno = 4 (0x4), region = 69 }

// kernel: _lambda_.14
= control target key start
LH: loop header
LB: loop body
LE: loop exit
PB: predicated region body
PF: predicated region fallthrough
CT: control target
= control target key end

     0   :  { %s1327_s18 = smov 0   ;;  %s1329_s19 = smov 0   ;;  %s1478_s0 = inlined_call_operand.vmem [shape: bf16[2,38,19,16], index: 0, kind: input, shape index: {}]   ;;  %s1479_s1 = inlined_call_operand.vmem [shape: bf16[2,38,19,16], index: 1, kind: input, shape index: {}]   ;;  %s1480_s2 = inlined_call_operand.vmem [shape: bf16[49,16,128], index: 2, kind: input, shape index: {}]   ;;  %s1481_s3 = inlined_call_operand.vmem [shape: f32[1,128], index: 3, kind: input, shape index: {}]   ;;  %s1482_s4 = inlined_call_operand.vmem [shape: f32[1,128], index: 4, kind: input, shape index: {}]   ;;  %s1483_s5 = inlined_call_operand.vmem [shape: bf16[2,16,16,128], index: 5, kind: output, shape index: {}]  }
   0x1   :  { %s1331_s20 = smov 0   ;;  %s1333_s21 = smov 0  }
   0x2   :  { %s1335_s22 = smov 0   ;;  %s1337_s23 = smov 0  }
   0x3   :  { %s1339_s24 = smov 0  }
   0x4 LB: > { %s27_s25 = sadd.s32 1, %s1280_s21  ;;  %s30_s26 = sadd.s32 1, %s1284_s22  ;;  %s1292_s24 = sphi %s1339_s24, %s15_s24   ;;  %s1288_s23 = sphi %s1337_s23, %s1493_s23   ;;  %s1284_s22 = sphi %s1335_s22, %s1492_s22   ;;  %s1280_s21 = sphi %s1333_s21, %s1491_s21   ;;  %s1276_s20 = sphi %s1331_s20, %s1490_s20   ;;  %s1272_s19 = sphi %s1329_s19, %s1489_s19   ;;  %s1268_s18 = sphi %s1327_s18, %s1488_s18  }
   0x5   : > { %p28_p0 = scmp.ge.s32.totalorder %s27_s25, 7  ;;  %p1038_p1 = scmp.ge.s32.totalorder %s1292_s24, 1 }
   0x6   : > { %p246_p2 = scmp.lt.s32.totalorder %s1292_s24, 225  ;;  %s34_s27 = sadd.s32 1, %s1288_s23 }
   0x7   : > { %s1495_s25 = smov (%p28_p0, %s27_s25), 0  ;;  %s1497_s26 = smov (!%p28_p0, %s30_s26), %s1284_s22 }
   0x8   : > { %p247_p3 = pnand %p1038_p1, %p246_p2  ;;  %p32_p4 = scmp.ge.s32.totalorder %s1497_s26, 16 }
   0x9   : > { %s1039_s28 = sshll.u32 (!%p247_p3), %s1272_s19, 1  ;;  %p297_p6 = scmp.lt.s32.totalorder (!%p247_p3), %s1276_s20, 1 }
   0xa   : > { %s1499_s26 = smov (%p32_p4, %s1497_s26), 0  ;;  %s1501_s27 = smov (!%p32_p4, %s34_s27), %s1288_s23 }
   0xb   : > { %1484 = sst [smem:[#allocation3_spill]] %s1499_s26  ;;  %p36_p5 = scmp.ge.s32.totalorder %s1501_s27, 2 }
   0xc   : > { %250 = sbr.rel (%p247_p3) target bundleno = 274 (0x112), region = 40  ;;  %s296_s29 = sadd.s32 (!%p247_p3), %s1268_s18, %s1039_s28 }
   0xd   : > { %s1503_s27 = smov (%p36_p5, %s1501_s27), 0  ;;  %p323_p7 = scmp.lt.s32.totalorder (!%p247_p3), %s1272_s19, 15 }
   0xe   : > { %1485 = sst [smem:[#allocation4_spill]] %s1503_s27  ;;  %p299_p8 = scmp.lt.s32.totalorder (!%p247_p3), %s296_s29, 37 }
   0xf   : > { %p1046_p9 = scmp.ne.s32.totalorder (!%p247_p3), %s1268_s18, 0 }
  0x11   : > { %s1505_s20 = smov (!%p297_p6, %s1276_s20), 1  ;;  %s1507_s29 = smov (!%p299_p8, %s296_s29), 37 }
  0x12   : > { %s1162_s30 = smul.u32 114, %s1505_s20  ;;  %s1044_s6 = sshll.u32 %s1505_s20, 5 }
  0x13   : > { %s1509_s19 = smov (!%p323_p7, %s1272_s19), 15  ;;  %s1161_s7 = smul.u32 3, %s1507_s29 }
  0x14   : > { %s1043_s8 = sshll.u32 %s1509_s19, 1  ;;  %334 = sbr.rel (%p1046_p9) target bundleno = 27 (0x1b), region = 44 }
  0x15   : > { %s303_s9 = sadd.s32 %s1162_s30, %s1161_s7  ;;  %s327_s10 = sadd.s32 %s1044_s6, %s1043_s8 }
  0x16   : > { %s1040_s11 = sshll.u32 %s303_s9, 2  ;;  %s1045_s12 = sshll.u32 %s327_s10, 2 }
  0x17   : > { %s1380_s15 = scalar_lea.vmem %s1478_s0, %s1040_s11  ;;  %s1385_s28 = scalar_lea.vmem %s1479_s1, %s1040_s11 }
  0x18   : > { %s1390_s26 = scalar_lea.vmem %s1483_s5, %s1045_s12 }
  0x19   : > { %v1294_v0 = vmov 0.0  }
  0x1a   : > { %335 = vst [vmem:[#allocation2] sm:$0xff] %v1294_v0  ;;  %336 = vst [vmem:[#allocation2 + $0x8] sm:$0xff] %v1294_v0 }
  0x1b PF: > { %s1097_s19 = smul.u32 56, %s1268_s18  ;;  %v1295_v1 = vmov 0.0   ;;  %vm1296_vm0 = vmmov 0   ;;  %v1224_v2 = vld [vmem:[%s1380_s15] sm:$0xff]   ;;  %vm358_vm1 = vcmask 130048   ;;  %vm643_vm3 = vcmask 1046528  }
  0x1c   : > { %1119 = vmatprep.subr.bf16.mxu0 %v1295_v1  ;;  %1125 = vmatprep.subr.bf16.mxu1 %v1295_v1  ;;  %v470_v3 = vld [vmem:[%s1380_s15] sm:$0xf]  ;;  %v471_v4 = vld [vmem:[%s1380_s15 + $0x4] sm:$0xf]  ;;  %vm487_vm2 = vsmask.f32 7424 }
  0x1d   : > { %s1399_s30 = scalar_lea.vmem %s1480_s2, %s1097_s19  ;;  %1121 = vmatprep.mubr.msk.bf16.mxu0 %vm1296_vm0, %v1295_v1  ;;  %1127 = vmatprep.mubr.msk.bf16.mxu1 %vm1296_vm0, %v1295_v1  ;;  %v1225_v6 = vld [vmem:[%s1385_s28] sm:$0xff]   ;;  %v1061_v7 = vcombine.low %v470_v3, %v471_v4  ;;  %v1229_v13 = vld [vmem:[%s1380_s15 + $0x8] ss:$0 sps:$4 sm:$0x11]   ;;  %vm774_vm4 = vsmask.f32 6400 }
  0x1e   : > { %v1222_v5 = vld [vmem:[%s1399_s30] sm:$0xff]   ;;  %v1223_v8 = vld [vmem:[%s1399_s30 + $0x8] sm:$0xff]   ;;  %v1226_v9 = vld [vmem:[%s1399_s30 + $0x10] sm:$0xff]   ;;  %v496_v16 = vshll.u32 %v1229_v13, 16  ;;  %v645_v36 = vrot.slane %v1229_v13, 1  ;;  %p1090_p10 = scmp.ne.s32.totalorder %s1268_s18, 6 }
  0x1f   : > { %1120 = vmatpush3.bf16.msra.mxu0 %v1222_v5  ;;  %v489_v10 = vshrl.u32 %v1061_v7, 16  ;;  %1126 = vmatpush3.bf16.msra.mxu1 %v1223_v8  ;;  %v1227_v11 = vld [vmem:[%s1399_s30 + $0x18] sm:$0xff]   ;;  %v491_v12 = vshll.u32 %v1061_v7, 16  ;;  %v552_v15 = vld [vmem:[%s1385_s28] sm:$0xf]  ;;  %v1233_v34 = vld [vmem:[%s1399_s30 + $0x28] sm:$0xff]  }
  0x20   : > { %1131 = vmatprep.subr.bf16.mxu0 %v1295_v1  ;;  %1137 = vmatprep.subr.bf16.mxu1 %v1295_v1  ;;  %v553_v17 = vld [vmem:[%s1385_s28 + $0x4] sm:$0xf]  ;;  %v1231_v20 = vld [vmem:[%s1385_s28 + $0x8] ss:$0 sps:$4 sm:$0x11]   ;;  %v498_v21 = vrot.slane %v496_v16, 1 }
  0x21   : > { %v493_v14 = vrot.slane %v491_v12, 1  ;;  %v1068_v19 = vcombine.low %v552_v15, %v553_v17  ;;  %v577_v24 = vshll.u32 %v1231_v20, 16  ;;  %v1232_v25 = vld [vmem:[%s1399_s30 + $0x20] sm:$0xff]   ;;  %v1237_v32 = vld [vmem:[%s1380_s15 + $0x8] ss:$0 sps:$4 sm:$0x33]  }
  0x22   : > { %1122 = vmatmul.mubr.msk.bf16.vlgmr.msra.gmra.mxu0 %vm358_vm1, %v1224_v2  ;;  %1128 = vmatmul.mubr.msk.bf16.vlgmr.msra.gmra.mxu1 %vm358_vm1, %v1225_v6  ;;  %v633_v27 = vld [vmem:[%s1380_s15] sm:$0xe]  ;;  %v784_v40 = vshrl.u32 %v1237_v32, 16  ;;  %v787_v41 = vshll.u32 %v1237_v32, 16  ;;  %v710_v45 = vrot.slane %v1231_v20, 1  ;;  %v1236_v46 = vld [vmem:[%s1399_s30 + $0x30] sm:$0xff]  }
  0x23   : > { %1132 = vmatpush3.bf16.msra.mxu0 %v1226_v9  ;;  %1138 = vmatpush3.bf16.msra.mxu1 %v1227_v11  ;;  %v494_v18 = vor.u32 %v493_v14, %v489_v10  ;;  %v570_v22 = vshrl.u32 %v1068_v19, 16  ;;  %v572_v23 = vshll.u32 %v1068_v19, 16  ;;  %v699_v28 = vld [vmem:[%s1385_s28] sm:$0xe]  ;;  %v579_v30 = vrot.slane %v577_v24, 1  ;;  %v338_v2 = vld [vmem:[#allocation2 + $0x8] sm:$0xff] }
  0x24   : > { %1133 = vmatprep.mubr.msk.bf16.mxu0 %vm1296_vm0, %v1295_v1  ;;  %1139 = vmatprep.mubr.msk.bf16.mxu1 %vm1296_vm0, %v1295_v1  ;;  %v1075_v31 = vcombine.low %v633_v27, %v471_v4  ;;  %v1081_v37 = vcombine.low %v699_v28, %v553_v17  ;;  %v786_v49 = vrot.slane %v784_v40, 1  ;;  %v789_v50 = vrot.slane %v787_v41, 2  ;;  %v337_v59 = vld [vmem:[#allocation2] sm:$0xff] }
  0x25   : > { %1143 = vmatprep.subr.bf16.mxu0 %v1295_v1  ;;  %1149 = vmatprep.subr.bf16.mxu1 %v1295_v1  ;;  %v499_v26 = vsel %vm487_vm2, %v494_v18, %v498_v21  ;;  %v574_v29 = vrot.slane %v572_v23, 1 }
  0x26   : > { %v644_v35 = vrot.slane %v1075_v31, 1  ;;  %v776_v38 = vshrl.u32 %v1075_v31, 16  ;;  %v779_v39 = vshll.u32 %v1075_v31, 16  ;;  %v709_v44 = vrot.slane %v1081_v37, 1 }
  0x27   : > { %v575_v33 = vor.u32 %v574_v29, %v570_v22  ;;  %v790_v53 = vor.u32 %v789_v50, %v786_v49 }
  0x28   : > { %v646_v43 = vsel %vm643_vm3, %v644_v35, %v645_v36  ;;  %v778_v47 = vrot.slane %v776_v38, 1  ;;  %v781_v48 = vrot.slane %v779_v39, 2  ;;  %v711_v51 = vsel %vm643_vm3, %v709_v44, %v710_v45 }
  0x29   : > { %v580_v42 = vsel %vm487_vm2, %v575_v33, %v579_v30 }
  0x2a   : > { %1134 = vmatmul.mubr.msk.bf16.vlgmr.msra.gmra.mxu0 %vm358_vm1, %v499_v26  ;;  %1140 = vmatmul.mubr.msk.bf16.vlgmr.msra.gmra.mxu1 %vm358_vm1, %v580_v42  ;;  %v782_v52 = vor.u32 %v781_v48, %v778_v47 }
  0x2b   : > { %1144 = vmatpush3.bf16.msra.mxu0 %v1232_v25  ;;  %1145 = vmatprep.mubr.msk.bf16.mxu0 %vm1296_vm0, %v1295_v1 }
  0x2c   : > { %1155 = vmatprep.subr.bf16.mxu0 %v1295_v1  ;;  %1150 = vmatpush3.bf16.msra.mxu1 %v1233_v34  ;;  %v791_v54 = vsel %vm774_vm4, %v782_v52, %v790_v53 }
  0x2d   : > { %1151 = vmatprep.mubr.msk.bf16.mxu1 %vm1296_vm0, %v1295_v1 }
  0x32   : > { %1146 = vmatmul.mubr.msk.bf16.vlgmr.msra.gmra.mxu0 %vm358_vm1, %v646_v43  ;;  %1152 = vmatmul.mubr.msk.bf16.vlgmr.msra.gmra.mxu1 %vm358_vm1, %v711_v51 }
  0x33   : > { %1156 = vmatpush3.bf16.msra.mxu0 %v1236_v46  ;;  %1157 = vmatprep.mubr.msk.bf16.mxu0 %vm1296_vm0, %v1295_v1 }
  0x3a   : > { %1158 = vmatmul.mubr.msk.bf16.vlgmr.msra.gmra.mxu0 %vm358_vm1, %v791_v54 }
  0xe2   : > { %v396_v55 = vpop.f32.mrf.mxu0  ;;  %v461_v56 = vpop.f32.mrf.mxu1 }
  0xe3   : > { %v403_v63 = vadd.f32 %v396_v55, %v337_v59 }
  0xe4   : > { %v1123_v57 = vpop.f32.mrf.mxu0  ;;  %v1129_v58 = vpop.f32.mrf.mxu1 }
  0xe5   : > { %v468_v4 = vadd.f32 %v461_v56, %v403_v63 }
  0xe6   : > { %v399_v60 = vpop.f32.mrf.mxu0  ;;  %v464_v61 = vpop.f32.mrf.mxu1 }
  0xe7   : > { %v404_v5 = vadd.f32 %v399_v60, %v338_v2 }
  0xe8   : > { %v1124_v62 = vpop.f32.mrf.mxu0  ;;  %v1130_v0 = vpop.f32.mrf.mxu1 }
  0xe9   : > { %v469_v11 = vadd.f32 %v464_v61, %v404_v5 }
  0xea   : > { %v543_v1 = vpop.f32.mrf.mxu0  ;;  %v624_v6 = vpop.f32.mrf.mxu1 }
  0xeb   : > { %v550_v8 = vadd.f32 %v543_v1, %v468_v4 }
  0xec   : > { %v1135_v3 = vpop.f32.mrf.mxu0  ;;  %v1141_v9 = vpop.f32.mrf.mxu1 }
  0xed   : > { %v631_v14 = vadd.f32 %v624_v6, %v550_v8 }
  0xee   : > { %v546_v7 = vpop.f32.mrf.mxu0  ;;  %v627_v12 = vpop.f32.mrf.mxu1 }
  0xef   : > { %v551_v15 = vadd.f32 %v546_v7, %v469_v11 }
  0xf0   : > { %v1136_v10 = vpop.f32.mrf.mxu0  ;;  %v1142_v16 = vpop.f32.mrf.mxu1 }
  0xf1   : > { %v632_v21 = vadd.f32 %v627_v12, %v551_v15 }
  0xf2   : > { %v690_v13 = vpop.f32.mrf.mxu0  ;;  %v755_v19 = vpop.f32.mrf.mxu1 }
  0xf3   : > { %v697_v18 = vadd.f32 %v690_v13, %v631_v14 }
  0xf4   : > { %v1147_v17 = vpop.f32.mrf.mxu0  ;;  %v1153_v22 = vpop.f32.mrf.mxu1 }
  0xf5   : > { %v762_v24 = vadd.f32 %v755_v19, %v697_v18 }
  0xf6   : > { %v693_v20 = vpop.f32.mrf.mxu0  ;;  %v758_v26 = vpop.f32.mrf.mxu1 }
  0xf7   : > { %v698_v25 = vadd.f32 %v693_v20, %v632_v21 }
  0xf8   : > { %v1148_v23 = vpop.f32.mrf.mxu0  ;;  %v1154_v28 = vpop.f32.mrf.mxu1 }
  0xf9   : > { %v763_v31 = vadd.f32 %v758_v26, %v698_v25 }
  0xfa   : > { %v835_v27 = vpop.f32.mrf.mxu0 }
  0xfb   : > { %v842_v29 = vadd.f32 %v835_v27, %v762_v24 }
  0xfc   : > { %v1159_v30 = vpop.f32.mrf.mxu0 }
  0xfd   : > { %844 = vst [vmem:[#allocation2] sm:$0xff] %v842_v29  ;;  %849 = sbr.rel (%p1090_p10) target bundleno = 274 (0x112), region = 48 }
  0xfe   : > { %v838_v32 = vpop.f32.mrf.mxu0 }
  0xff   : > { %v843_v33 = vadd.f32 %v838_v32, %v763_v31 }
 0x100   : > { %v1160_v34 = vpop.f32.mrf.mxu0 }
 0x101   : > { %845 = vst [vmem:[#allocation2 + $0x8] sm:$0xff] %v843_v33 }
 0x102   : > { %v1091_v37 = vld [vmem:[%s1481_s3] ss:$0 sm:$0xff] }
 0x103   : > { %v1092_v40 = vld [vmem:[%s1482_s4] ss:$0 sm:$0xff] }
 0x104   : > { %v850_v35 = vld [vmem:[#allocation2] sm:$0xff] }
 0x105   : > { %v859_v38 = vmul.f32 %v1091_v37, %v850_v35 }
 0x107   : > { %v868_v41 = vadd.f32 %v1092_v40, %v859_v38 }
 0x108   : > { %v851_v36 = vld [vmem:[#allocation2 + $0x8] sm:$0xff] }
 0x109   : > { %v860_v39 = vmul.f32 %v1091_v37, %v851_v36  ;;  %v870_v43 = vmax.f32 %v868_v41, 0.0 }
 0x10b   : > { %v869_v42 = vadd.f32 %v1092_v40, %v860_v39 }
 0x10d   : > { %v871_v44 = vmax.f32 %v869_v42, 0.0 }
 0x10f   : > { %v1103_v45 = vpack.c.bf16 %v871_v44, %v870_v43 }
 0x111   : > { %1104 = vst [vmem:[%s1390_s26] sm:$0xff] %v1103_v45  }
 0x112 PF: > { %s15_s24 = sadd.s32 1, %s1292_s24   ;;  %s1486_s10 = sld [smem:[#allocation3_spill]] }
 0x113   : > { %p12_p11 = scmp.ge.s32.totalorder %s15_s24, 226   ;;  %s1487_s11 = sld [smem:[#allocation4_spill]] }
 0x114   : > { %s1488_s18 = smov %s1280_s21  ;;  %s1489_s19 = smov %s1284_s22 }
 0x115   : > { %s1490_s20 = smov %s1288_s23  ;;  %s1491_s21 = smov %s1495_s25 }
 0x116   :  { %14 = sbr.rel (!%p12_p11) target bundleno = 4 (0x4), region = 88 }
 0x118   : > { %s1492_s22 = smov %s1486_s10 }
 0x119   : > { %s1493_s23 = smov %s1487_s11 }

// kernel: _lambda_.16
= control target key start
LH: loop header
LB: loop body
LE: loop exit
PB: predicated region body
PF: predicated region fallthrough
CT: control target
= control target key end

     0   :  { %s1067_s15 = smov 0   ;;  %s1069_s16 = smov 0   ;;  %s1221_s0 = inlined_call_operand.vmem [shape: bf16[2,10,10,128], index: 0, kind: input, shape index: {}]   ;;  %s1222_s1 = inlined_call_operand.vmem [shape: bf16[9,128,128], index: 1, kind: input, shape index: {}]   ;;  %s1223_s2 = inlined_call_operand.vmem [shape: f32[1,128], index: 2, kind: input, shape index: {}]   ;;  %s1224_s3 = inlined_call_operand.vmem [shape: f32[1,128], index: 3, kind: input, shape index: {}]   ;;  %s1225_s4 = inlined_call_operand.vmem [shape: bf16[2,8,8,128], index: 4, kind: output, shape index: {}]  }
   0x1   :  { %s1071_s17 = smov 0   ;;  %s1073_s18 = smov 0  }
   0x2   :  { %s1075_s19 = smov 0   ;;  %s1077_s20 = smov 0  }
   0x3   :  { %s1079_s21 = smov 0  }
   0x4 LB: > { %s26_s22 = sadd.s32 1, %s1025_s18  ;;  %s29_s23 = sadd.s32 1, %s1029_s19  ;;  %s1037_s21 = sphi %s1079_s21, %s14_s21   ;;  %s1033_s20 = sphi %s1077_s20, %s1231_s20   ;;  %s1029_s19 = sphi %s1075_s19, %s1230_s19   ;;  %s1025_s18 = sphi %s1073_s18, %s1229_s18   ;;  %s1021_s17 = sphi %s1071_s17, %s1228_s17   ;;  %s1017_s16 = sphi %s1069_s16, %s1227_s16   ;;  %s1013_s15 = sphi %s1067_s15, %s1226_s15  }
   0x5   : > { %p27_p0 = scmp.ge.s32.totalorder %s26_s22, 3  ;;  %p736_p1 = scmp.ge.s32.totalorder %s1037_s21, 1 }
   0x6   : > { %p193_p2 = scmp.lt.s32.totalorder %s1037_s21, 49  ;;  %s33_s24 = sadd.s32 1, %s1033_s20 }
   0x7   : > { %s1233_s22 = smov (%p27_p0, %s26_s22), 0  ;;  %s1235_s23 = smov (!%p27_p0, %s29_s23), %s1029_s19 }
   0x8   : > { %p194_p3 = pnand %p736_p1, %p193_p2  ;;  %p31_p4 = scmp.ge.s32.totalorder %s1235_s23, 8 }
   0x9   : > { %s227_s25 = sadd.s32 (!%p194_p3), %s1013_s15, %s1017_s16  ;;  %p228_p6 = scmp.lt.s32.totalorder (!%p194_p3), %s1021_s17, 1 }
   0xa   : > { %s1237_s23 = smov (%p31_p4, %s1235_s23), 0  ;;  %s1239_s24 = smov (!%p31_p4, %s33_s24), %s1033_s20 }
   0xb   : > { %p35_p5 = scmp.ge.s32.totalorder %s1239_s24, 2  ;;  %197 = sbr.rel (%p194_p3) target bundleno = 308 (0x134), region = 36 }
   0xc   : > { %p230_p7 = scmp.lt.s32.totalorder (!%p194_p3), %s227_s25, 9  ;;  %p240_p8 = scmp.lt.s32.totalorder (!%p194_p3), %s1017_s16, 7 }
   0xd   : > { %s1241_s24 = smov (%p35_p5, %s1239_s24), 0  ;;  %p741_p9 = scmp.ne.s32.totalorder (!%p194_p3), %s1013_s15, 0 }
  0x10   : > { %s1243_s17 = smov (!%p228_p6, %s1021_s17), 1  ;;  %s1245_s25 = smov (!%p230_p7, %s227_s25), 9 }
  0x11   : > { %s897_s26 = smul.u32 20, %s1243_s17  ;;  %s737_s27 = sshll.u32 %s1245_s25, 1 }
  0x12   : > { %s739_s7 = sshll.u32 %s1243_s17, 3  ;;  %s1247_s16 = smov (!%p240_p8, %s1017_s16), 7 }
  0x13   : > { %s234_s28 = sadd.s32 %s897_s26, %s737_s27  ;;  %s243_s8 = sadd.s32 %s739_s7, %s1247_s16 }
  0x14   : > { %s738_s29 = sshll.u32 %s234_s28, 2  ;;  %s740_s9 = sshll.u32 %s243_s8, 2 }
  0x15   : > { %s1119_s6 = scalar_lea.vmem %s1221_s0, %s738_s29  ;;  %s1125_s12 = scalar_lea.vmem %s1225_s4, %s740_s9 }
  0x16   : > { %250 = sbr.rel (%p741_p9) target bundleno = 29 (0x1d), region = 40 }
  0x1b   : > { %v1039_v0 = vmov 0.0  }
  0x1c   : > { %251 = vst [vmem:[#allocation2] sm:$0xff] %v1039_v0 }
  0x1d PF: > { %s809_s13 = smul.u32 192, %s1013_s15  ;;  %v1040_v1 = vmov 0.0   ;;  %vm1041_vm0 = vmmov 0   ;;  %v363_v10 = vld [vmem:[%s1119_s6] sm:$0xf]  ;;  %p804_p10 = scmp.ne.s32.totalorder %s1013_s15, 2 }
  0x1e   : > { %837 = vmatprep.subr.bf16.mxu0 %v1040_v1  ;;  %857 = vmatprep.subr.bf16.mxu1 %v1040_v1  ;;  %v364_v11 = vld [vmem:[%s1119_s6 + $0x4] sm:$0x1]  ;;  %v254_v24 = vld [vmem:[%s1119_s6] sm:$0xf] }
  0x1f   : > { %s1134_s17 = scalar_lea.vmem %s1222_s1, %s809_s13  ;;  %853 = vmatprep.mubr.msk.bf16.mxu0 %vm1041_vm0, %v1040_v1  ;;  %873 = vmatprep.mubr.msk.bf16.mxu1 %vm1041_vm0, %v1040_v1  ;;  %v769_v15 = vcombine.low %v363_v10, %v364_v11  ;;  %v487_v33 = vld [vmem:[%s1119_s6] sm:$0xe] }
  0x20   : > { %v957_v2 = vld [vmem:[%s1134_s17 + $0x38] sm:$0xff]   ;;  %v959_v4 = vld [vmem:[%s1134_s17 + $0x30] sm:$0xff]   ;;  %v961_v6 = vld [vmem:[%s1134_s17 + $0x28] sm:$0xff]   ;;  %v795_v34 = vcombine.low %v487_v33, %v364_v11 }
  0x21   : > { %v958_v3 = vld [vmem:[%s1134_s17 + $0x78] sm:$0xff]   ;;  %838 = vmatpush3.bf16.msra.mxu0 %v957_v2  ;;  %v960_v5 = vld [vmem:[%s1134_s17 + $0x70] sm:$0xff]   ;;  %v962_v7 = vld [vmem:[%s1134_s17 + $0x68] sm:$0xff]   ;;  %v393_v18 = vshll.u32 %v769_v15, 16  ;;  %v391_v21 = vshrl.u32 %v769_v15, 16 }
  0x22   : > { %839 = vmatprep.subr.bf16.mxu0 %v1040_v1  ;;  %858 = vmatpush3.bf16.msra.mxu1 %v958_v3  ;;  %v963_v8 = vld [vmem:[%s1134_s17 + $0x20] sm:$0xff]   ;;  %v965_v12 = vld [vmem:[%s1134_s17 + $0x18] sm:$0xff]   ;;  %v967_v14 = vld [vmem:[%s1134_s17 + $0x10] sm:$0xff]   ;;  %v511_v36 = vrot.slane %v795_v34, 1 }
  0x23   : > { %859 = vmatprep.subr.bf16.mxu1 %v1040_v1  ;;  %v964_v9 = vld [vmem:[%s1134_s17 + $0x60] sm:$0xff]   ;;  %v966_v13 = vld [vmem:[%s1134_s17 + $0x58] sm:$0xff]   ;;  %v968_v16 = vld [vmem:[%s1134_s17 + $0x50] sm:$0xff]   ;;  %v395_v22 = vrot.slane %v393_v18, 1 }
  0x24   : > { %v969_v17 = vld [vmem:[%s1134_s17 + $0x8] sm:$0xff]   ;;  %v971_v20 = vld [vmem:[%s1134_s17] sm:$0xff]   ;;  %v973_v25 = vld [vmem:[%s1134_s17 + $0xb8] sm:$0xff]  }
  0x25   : > { %840 = vmatpush3.bf16.msra.mxu0 %v959_v4  ;;  %v970_v19 = vld [vmem:[%s1134_s17 + $0x48] sm:$0xff]   ;;  %v972_v23 = vld [vmem:[%s1134_s17 + $0x40] sm:$0xff]   ;;  %v396_v26 = vor.u32 %v395_v22, %v391_v21  ;;  %v975_v27 = vld [vmem:[%s1134_s17 + $0xb0] sm:$0xff]  }
  0x26   : > { %841 = vmatprep.subr.bf16.mxu0 %v1040_v1  ;;  %860 = vmatpush3.bf16.msra.mxu1 %v960_v5  ;;  %v976_v28 = vld [vmem:[%s1134_s17 + $0xa8] sm:$0xff]   ;;  %v977_v29 = vld [vmem:[%s1134_s17 + $0xa0] sm:$0xff]   ;;  %v978_v30 = vld [vmem:[%s1134_s17 + $0x98] sm:$0xff]  }
  0x27   : > { %861 = vmatprep.subr.bf16.mxu1 %v1040_v1  ;;  %v979_v31 = vld [vmem:[%s1134_s17 + $0x90] sm:$0xff]   ;;  %v980_v32 = vld [vmem:[%s1134_s17 + $0x88] sm:$0xff]   ;;  %v981_v35 = vld [vmem:[%s1134_s17 + $0x80] sm:$0xff]  }
  0x28   : > { %v252_v45 = vld [vmem:[#allocation2] sm:$0xff] }
  0x29   : > { %842 = vmatpush3.bf16.msra.mxu0 %v961_v6 }
  0x2a   : > { %843 = vmatprep.subr.bf16.mxu0 %v1040_v1  ;;  %862 = vmatpush3.bf16.msra.mxu1 %v962_v7 }
  0x2b   : > { %863 = vmatprep.subr.bf16.mxu1 %v1040_v1 }
  0x2d   : > { %844 = vmatpush3.bf16.msra.mxu0 %v963_v8 }
  0x2e   : > { %845 = vmatprep.subr.bf16.mxu0 %v1040_v1  ;;  %864 = vmatpush3.bf16.msra.mxu1 %v964_v9 }
  0x2f   : > { %865 = vmatprep.subr.bf16.mxu1 %v1040_v1 }
  0x31   : > { %846 = vmatpush3.bf16.msra.mxu0 %v965_v12 }
  0x32   : > { %847 = vmatprep.subr.bf16.mxu0 %v1040_v1  ;;  %866 = vmatpush3.bf16.msra.mxu1 %v966_v13 }
  0x33   : > { %867 = vmatprep.subr.bf16.mxu1 %v1040_v1 }
  0x35   : > { %848 = vmatpush3.bf16.msra.mxu0 %v967_v14 }
  0x36   : > { %849 = vmatprep.subr.bf16.mxu0 %v1040_v1  ;;  %868 = vmatpush3.bf16.msra.mxu1 %v968_v16 }
  0x37   : > { %869 = vmatprep.subr.bf16.mxu1 %v1040_v1 }
  0x39   : > { %850 = vmatpush3.bf16.msra.mxu0 %v969_v17 }
  0x3a   : > { %851 = vmatprep.subr.bf16.mxu0 %v1040_v1  ;;  %870 = vmatpush3.bf16.msra.mxu1 %v970_v19 }
  0x3b   : > { %871 = vmatprep.subr.bf16.mxu1 %v1040_v1 }
  0x3d   : > { %852 = vmatpush3.bf16.msra.mxu0 %v971_v20 }
  0x3e   : > { %872 = vmatpush3.bf16.msra.mxu1 %v972_v23  ;;  %877 = vmatprep.subr.bf16.mxu0 %v1040_v1 }
  0x40   : > { %854 = vmatmul.mubr.bf16.vlgmr.msra.gmra.mxu0 %v254_v24 }
  0x41   : > { %878 = vmatpush3.bf16.msra.mxu0 %v973_v25  ;;  %874 = vmatmul.mubr.bf16.vlgmr.msra.gmra.mxu1 %v396_v26 }
  0x42   : > { %879 = vmatprep.subr.bf16.mxu0 %v1040_v1  ;;  %893 = vmatprep.mubr.msk.bf16.mxu0 %vm1041_vm0, %v1040_v1 }
  0x45   : > { %880 = vmatpush3.bf16.msra.mxu0 %v975_v27 }
  0x46   : > { %881 = vmatprep.subr.bf16.mxu0 %v1040_v1 }
  0x49   : > { %882 = vmatpush3.bf16.msra.mxu0 %v976_v28 }
  0x4a   : > { %883 = vmatprep.subr.bf16.mxu0 %v1040_v1 }
  0x4d   : > { %884 = vmatpush3.bf16.msra.mxu0 %v977_v29 }
  0x4e   : > { %885 = vmatprep.subr.bf16.mxu0 %v1040_v1 }
  0x51   : > { %886 = vmatpush3.bf16.msra.mxu0 %v978_v30 }
  0x52   : > { %887 = vmatprep.subr.bf16.mxu0 %v1040_v1 }
  0x55   : > { %888 = vmatpush3.bf16.msra.mxu0 %v979_v31 }
  0x56   : > { %889 = vmatprep.subr.bf16.mxu0 %v1040_v1 }
  0x59   : > { %890 = vmatpush3.bf16.msra.mxu0 %v980_v32 }
  0x5a   : > { %891 = vmatprep.subr.bf16.mxu0 %v1040_v1 }
  0x5d   : > { %892 = vmatpush3.bf16.msra.mxu0 %v981_v35 }
  0x60   : > { %894 = vmatmul.mubr.bf16.vlgmr.msra.gmra.mxu0 %v511_v36 }
 0x100   : > { %v356_v37 = vpop.f32.mrf.mxu0 }
 0x101   : > { %v480_v38 = vpop.f32.mrf.mxu1  ;;  %v362_v46 = vadd.f32 %v356_v37, %v252_v45 }
 0x102   : > { %v855_v39 = vpop.f32.mrf.mxu0 }
 0x103   : > { %v875_v40 = vpop.f32.mrf.mxu1  ;;  %v486_v47 = vadd.f32 %v480_v38, %v362_v46 }
 0x104   : > { %v359_v41 = vpop.f32.mrf.mxu0 }
 0x105   : > { %v483_v42 = vpop.f32.mrf.mxu1 }
 0x106   : > { %v856_v43 = vpop.f32.mrf.mxu0 }
 0x107   : > { %v876_v44 = vpop.f32.mrf.mxu1 }
 0x120   : > { %v595_v48 = vpop.f32.mrf.mxu0 }
 0x121   : > { %v601_v49 = vadd.f32 %v595_v48, %v486_v47 }
 0x122   : > { %v895_v50 = vpop.f32.mrf.mxu0  ;;  %606 = sbr.rel (%p804_p10) target bundleno = 308 (0x134), region = 44 }
 0x123   : > { %602 = vst [vmem:[#allocation2] sm:$0xff] %v601_v49 }
 0x124   : > { %v598_v51 = vpop.f32.mrf.mxu0 }
 0x126   : > { %v896_v52 = vpop.f32.mrf.mxu0 }
 0x127   : > { %v805_v54 = vld [vmem:[%s1223_s2] ss:$0 sm:$0xff] }
 0x128   : > { %v806_v55 = vld [vmem:[%s1224_s3] ss:$0 sm:$0xff] }
 0x12a   : > { %v607_v53 = vld [vmem:[#allocation2] sm:$0xff] }
 0x12b   : > { %v615_v56 = vmul.f32 %v805_v54, %v607_v53 }
 0x12d   : > { %v623_v57 = vadd.f32 %v806_v55, %v615_v56 }
 0x12f   : > { %v624_v58 = vmax.f32 %v623_v57, 0.0 }
 0x131   : > { %v625_v59 = vpack.c.bf16 %v624_v58, %v624_v58 }
 0x133   : > { %626 = vst [vmem:[%s1125_s12] sm:$0xf] %v625_v59 }
 0x134 PF: > { %s14_s21 = sadd.s32 1, %s1037_s21   ;;  %s1226_s15 = smov %s1025_s18 }
 0x135   : > { %p11_p11 = scmp.ge.s32.totalorder %s14_s21, 50   ;;  %s1227_s16 = smov %s1029_s19 }
 0x136   : > { %s1228_s17 = smov %s1033_s20  ;;  %s1229_s18 = smov %s1233_s22 }
 0x137   : > { %s1230_s19 = smov %s1237_s23  ;;  %s1231_s20 = smov %s1241_s24 }
 0x138   :  { %13 = sbr.rel (!%p11_p11) target bundleno = 4 (0x4), region = 77 }

// kernel: _lambda_.17
= control target key start
LH: loop header
LB: loop body
LE: loop exit
PB: predicated region body
PF: predicated region fallthrough
CT: control target
= control target key end

     0   :  { %s1153_s18 = smov 0   ;;  %s1155_s19 = smov 0   ;;  %s1313_s0 = inlined_call_operand.vmem [shape: bf16[2,10,10,128], index: 0, kind: input, shape index: {}]   ;;  %s1314_s1 = inlined_call_operand.vmem [shape: bf16[9,128,128], index: 1, kind: input, shape index: {}]   ;;  %s1315_s2 = inlined_call_operand.vmem [shape: f32[1,128], index: 2, kind: input, shape index: {}]   ;;  %s1316_s3 = inlined_call_operand.vmem [shape: f32[1,128], index: 3, kind: input, shape index: {}]   ;;  %s1317_s4 = inlined_call_operand.vmem [shape: bf16[2,8,8,128], index: 4, kind: input, shape index: {}]   ;;  %s1318_s5 = inlined_call_operand.vmem [shape: bf16[2,8,8,128], index: 5, kind: output, shape index: {}]  }
   0x1   :  { %s1157_s20 = smov 0   ;;  %s1159_s21 = smov 0  }
   0x2   :  { %s1161_s22 = smov 0   ;;  %s1163_s23 = smov 0  }
   0x3   :  { %s1165_s24 = smov 0  }
   0x4 LB: > { %s27_s25 = sadd.s32 1, %s1106_s21  ;;  %s30_s26 = sadd.s32 1, %s1110_s22  ;;  %s1118_s24 = sphi %s1165_s24, %s15_s24   ;;  %s1114_s23 = sphi %s1163_s23, %s1326_s23   ;;  %s1110_s22 = sphi %s1161_s22, %s1325_s22   ;;  %s1106_s21 = sphi %s1159_s21, %s1324_s21   ;;  %s1102_s20 = sphi %s1157_s20, %s1323_s20   ;;  %s1098_s19 = sphi %s1155_s19, %s1322_s19   ;;  %s1094_s18 = sphi %s1153_s18, %s1321_s18  }
   0x5   : > { %p28_p0 = scmp.ge.s32.totalorder %s27_s25, 3  ;;  %p815_p1 = scmp.ge.s32.totalorder %s1118_s24, 1 }
   0x6   : > { %p233_p2 = scmp.lt.s32.totalorder %s1118_s24, 49  ;;  %s34_s27 = sadd.s32 1, %s1114_s23 }
   0x7   : > { %s1328_s25 = smov (%p28_p0, %s27_s25), 0  ;;  %s1330_s26 = smov (!%p28_p0, %s30_s26), %s1110_s22 }
   0x8   : > { %p234_p3 = pnand %p815_p1, %p233_p2  ;;  %p32_p4 = scmp.ge.s32.totalorder %s1330_s26, 8 }
   0x9   : > { %s277_s28 = sadd.s32 (!%p234_p3), %s1094_s18, %s1098_s19  ;;  %p278_p6 = scmp.lt.s32.totalorder (!%p234_p3), %s1102_s20, 1 }
   0xa   : > { %s1332_s26 = smov (%p32_p4, %s1330_s26), 0  ;;  %s1334_s27 = smov (!%p32_p4, %s34_s27), %s1114_s23 }
   0xb   : > { %p36_p5 = scmp.ge.s32.totalorder %s1334_s27, 2  ;;  %237 = sbr.rel (%p234_p3) target bundleno = 310 (0x136), region = 40 }
   0xc   : > { %p280_p7 = scmp.lt.s32.totalorder (!%p234_p3), %s277_s28, 9  ;;  %p290_p8 = scmp.lt.s32.totalorder (!%p234_p3), %s1098_s19, 7 }
   0xd   : > { %s1336_s27 = smov (%p36_p5, %s1334_s27), 0  ;;  %p822_p9 = scmp.ne.s32.totalorder (!%p234_p3), %s1094_s18, 0 }
   0xe   : > { %1319 = sst [smem:[#allocation3_spill]] %s1336_s27 }
  0x10   : > { %s1338_s20 = smov (!%p278_p6, %s1102_s20), 1  ;;  %s1340_s28 = smov (!%p280_p7, %s277_s28), 9 }
  0x11   : > { %s978_s29 = smul.u32 20, %s1338_s20  ;;  %s816_s30 = sshll.u32 %s1340_s28, 1 }
  0x12   : > { %s818_s11 = sshll.u32 %s1338_s20, 3  ;;  %s1342_s19 = smov (!%p290_p8, %s1098_s19), 7 }
  0x13   : > { %s284_s6 = sadd.s32 %s978_s29, %s816_s30  ;;  %s293_s12 = sadd.s32 %s818_s11, %s1342_s19 }
  0x14   : > { %s817_s7 = sshll.u32 %s284_s6, 2  ;;  %s819_s13 = sshll.u32 %s293_s12, 2 }
  0x15   : > { %s1205_s10 = scalar_lea.vmem %s1313_s0, %s817_s7  ;;  %s1211_s16 = scalar_lea.vmem %s1317_s4, %s819_s13 }
  0x16   : > { %s1216_s28 = scalar_lea.vmem %s1318_s5, %s819_s13  ;;  %308 = sbr.rel (%p822_p9) target bundleno = 29 (0x1d), region = 44 }
  0x1b   : > { %v1120_v0 = vmov 0.0  }
  0x1c   : > { %309 = vst [vmem:[#allocation2] sm:$0xff] %v1120_v0 }
  0x1d PF: > { %s890_s20 = smul.u32 192, %s1094_s18  ;;  %v1121_v1 = vmov 0.0   ;;  %vm1122_vm0 = vmmov 0   ;;  %v421_v10 = vld [vmem:[%s1205_s10] sm:$0xf]  ;;  %p885_p10 = scmp.ne.s32.totalorder %s1094_s18, 2 }
  0x1e   : > { %918 = vmatprep.subr.bf16.mxu0 %v1121_v1  ;;  %938 = vmatprep.subr.bf16.mxu1 %v1121_v1  ;;  %v422_v11 = vld [vmem:[%s1205_s10 + $0x4] sm:$0x1]  ;;  %v312_v24 = vld [vmem:[%s1205_s10] sm:$0xf] }
  0x1f   : > { %s1225_s30 = scalar_lea.vmem %s1314_s1, %s890_s20  ;;  %934 = vmatprep.mubr.msk.bf16.mxu0 %vm1122_vm0, %v1121_v1  ;;  %954 = vmatprep.mubr.msk.bf16.mxu1 %vm1122_vm0, %v1121_v1  ;;  %v850_v15 = vcombine.low %v421_v10, %v422_v11  ;;  %v545_v33 = vld [vmem:[%s1205_s10] sm:$0xe] }
  0x20   : > { %v1038_v2 = vld [vmem:[%s1225_s30 + $0x38] sm:$0xff]   ;;  %v1040_v4 = vld [vmem:[%s1225_s30 + $0x30] sm:$0xff]   ;;  %v1042_v6 = vld [vmem:[%s1225_s30 + $0x28] sm:$0xff]   ;;  %v876_v34 = vcombine.low %v545_v33, %v422_v11 }
  0x21   : > { %v1039_v3 = vld [vmem:[%s1225_s30 + $0x78] sm:$0xff]   ;;  %919 = vmatpush3.bf16.msra.mxu0 %v1038_v2  ;;  %v1041_v5 = vld [vmem:[%s1225_s30 + $0x70] sm:$0xff]   ;;  %v1043_v7 = vld [vmem:[%s1225_s30 + $0x68] sm:$0xff]   ;;  %v451_v18 = vshll.u32 %v850_v15, 16  ;;  %v449_v21 = vshrl.u32 %v850_v15, 16 }
  0x22   : > { %920 = vmatprep.subr.bf16.mxu0 %v1121_v1  ;;  %939 = vmatpush3.bf16.msra.mxu1 %v1039_v3  ;;  %v1044_v8 = vld [vmem:[%s1225_s30 + $0x20] sm:$0xff]   ;;  %v1046_v12 = vld [vmem:[%s1225_s30 + $0x18] sm:$0xff]   ;;  %v1048_v14 = vld [vmem:[%s1225_s30 + $0x10] sm:$0xff]   ;;  %v569_v36 = vrot.slane %v876_v34, 1 }
  0x23   : > { %940 = vmatprep.subr.bf16.mxu1 %v1121_v1  ;;  %v1045_v9 = vld [vmem:[%s1225_s30 + $0x60] sm:$0xff]   ;;  %v1047_v13 = vld [vmem:[%s1225_s30 + $0x58] sm:$0xff]   ;;  %v1049_v16 = vld [vmem:[%s1225_s30 + $0x50] sm:$0xff]   ;;  %v453_v22 = vrot.slane %v451_v18, 1 }
  0x24   : > { %v1050_v17 = vld [vmem:[%s1225_s30 + $0x8] sm:$0xff]   ;;  %v1052_v20 = vld [vmem:[%s1225_s30] sm:$0xff]   ;;  %v1054_v25 = vld [vmem:[%s1225_s30 + $0xb8] sm:$0xff]  }
  0x25   : > { %921 = vmatpush3.bf16.msra.mxu0 %v1040_v4  ;;  %v1051_v19 = vld [vmem:[%s1225_s30 + $0x48] sm:$0xff]   ;;  %v1053_v23 = vld [vmem:[%s1225_s30 + $0x40] sm:$0xff]   ;;  %v454_v26 = vor.u32 %v453_v22, %v449_v21  ;;  %v1056_v27 = vld [vmem:[%s1225_s30 + $0xb0] sm:$0xff]  }
  0x26   : > { %922 = vmatprep.subr.bf16.mxu0 %v1121_v1  ;;  %941 = vmatpush3.bf16.msra.mxu1 %v1041_v5  ;;  %v1057_v28 = vld [vmem:[%s1225_s30 + $0xa8] sm:$0xff]   ;;  %v1058_v29 = vld [vmem:[%s1225_s30 + $0xa0] sm:$0xff]   ;;  %v1059_v30 = vld [vmem:[%s1225_s30 + $0x98] sm:$0xff]  }
  0x27   : > { %942 = vmatprep.subr.bf16.mxu1 %v1121_v1  ;;  %v1060_v31 = vld [vmem:[%s1225_s30 + $0x90] sm:$0xff]   ;;  %v1061_v32 = vld [vmem:[%s1225_s30 + $0x88] sm:$0xff]   ;;  %v1062_v35 = vld [vmem:[%s1225_s30 + $0x80] sm:$0xff]  }
  0x28   : > { %v310_v45 = vld [vmem:[#allocation2] sm:$0xff] }
  0x29   : > { %923 = vmatpush3.bf16.msra.mxu0 %v1042_v6 }
  0x2a   : > { %924 = vmatprep.subr.bf16.mxu0 %v1121_v1  ;;  %943 = vmatpush3.bf16.msra.mxu1 %v1043_v7 }
  0x2b   : > { %944 = vmatprep.subr.bf16.mxu1 %v1121_v1 }
  0x2d   : > { %925 = vmatpush3.bf16.msra.mxu0 %v1044_v8 }
  0x2e   : > { %926 = vmatprep.subr.bf16.mxu0 %v1121_v1  ;;  %945 = vmatpush3.bf16.msra.mxu1 %v1045_v9 }
  0x2f   : > { %946 = vmatprep.subr.bf16.mxu1 %v1121_v1 }
  0x31   : > { %927 = vmatpush3.bf16.msra.mxu0 %v1046_v12 }
  0x32   : > { %928 = vmatprep.subr.bf16.mxu0 %v1121_v1  ;;  %947 = vmatpush3.bf16.msra.mxu1 %v1047_v13 }
  0x33   : > { %948 = vmatprep.subr.bf16.mxu1 %v1121_v1 }
  0x35   : > { %929 = vmatpush3.bf16.msra.mxu0 %v1048_v14 }
  0x36   : > { %930 = vmatprep.subr.bf16.mxu0 %v1121_v1  ;;  %949 = vmatpush3.bf16.msra.mxu1 %v1049_v16 }
  0x37   : > { %950 = vmatprep.subr.bf16.mxu1 %v1121_v1 }
  0x39   : > { %931 = vmatpush3.bf16.msra.mxu0 %v1050_v17 }
  0x3a   : > { %932 = vmatprep.subr.bf16.mxu0 %v1121_v1  ;;  %951 = vmatpush3.bf16.msra.mxu1 %v1051_v19 }
  0x3b   : > { %952 = vmatprep.subr.bf16.mxu1 %v1121_v1 }
  0x3d   : > { %933 = vmatpush3.bf16.msra.mxu0 %v1052_v20 }
  0x3e   : > { %953 = vmatpush3.bf16.msra.mxu1 %v1053_v23  ;;  %958 = vmatprep.subr.bf16.mxu0 %v1121_v1 }
  0x40   : > { %935 = vmatmul.mubr.bf16.vlgmr.msra.gmra.mxu0 %v312_v24 }
  0x41   : > { %959 = vmatpush3.bf16.msra.mxu0 %v1054_v25  ;;  %955 = vmatmul.mubr.bf16.vlgmr.msra.gmra.mxu1 %v454_v26 }
  0x42   : > { %960 = vmatprep.subr.bf16.mxu0 %v1121_v1  ;;  %974 = vmatprep.mubr.msk.bf16.mxu0 %vm1122_vm0, %v1121_v1 }
  0x45   : > { %961 = vmatpush3.bf16.msra.mxu0 %v1056_v27 }
  0x46   : > { %962 = vmatprep.subr.bf16.mxu0 %v1121_v1 }
  0x49   : > { %963 = vmatpush3.bf16.msra.mxu0 %v1057_v28 }
  0x4a   : > { %964 = vmatprep.subr.bf16.mxu0 %v1121_v1 }
  0x4d   : > { %965 = vmatpush3.bf16.msra.mxu0 %v1058_v29 }
  0x4e   : > { %966 = vmatprep.subr.bf16.mxu0 %v1121_v1 }
  0x51   : > { %967 = vmatpush3.bf16.msra.mxu0 %v1059_v30 }
  0x52   : > { %968 = vmatprep.subr.bf16.mxu0 %v1121_v1 }
  0x55   : > { %969 = vmatpush3.bf16.msra.mxu0 %v1060_v31 }
  0x56   : > { %970 = vmatprep.subr.bf16.mxu0 %v1121_v1 }
  0x59   : > { %971 = vmatpush3.bf16.msra.mxu0 %v1061_v32 }
  0x5a   : > { %972 = vmatprep.subr.bf16.mxu0 %v1121_v1 }
  0x5d   : > { %973 = vmatpush3.bf16.msra.mxu0 %v1062_v35 }
  0x60   : > { %975 = vmatmul.mubr.bf16.vlgmr.msra.gmra.mxu0 %v569_v36 }
 0x100   : > { %v414_v37 = vpop.f32.mrf.mxu0 }
 0x101   : > { %v538_v38 = vpop.f32.mrf.mxu1  ;;  %v420_v46 = vadd.f32 %v414_v37, %v310_v45 }
 0x102   : > { %v936_v39 = vpop.f32.mrf.mxu0 }
 0x103   : > { %v956_v40 = vpop.f32.mrf.mxu1  ;;  %v544_v47 = vadd.f32 %v538_v38, %v420_v46 }
 0x104   : > { %v417_v41 = vpop.f32.mrf.mxu0 }
 0x105   : > { %v541_v42 = vpop.f32.mrf.mxu1 }
 0x106   : > { %v937_v43 = vpop.f32.mrf.mxu0 }
 0x107   : > { %v957_v44 = vpop.f32.mrf.mxu1 }
 0x120   : > { %v653_v48 = vpop.f32.mrf.mxu0 }
 0x121   : > { %v659_v49 = vadd.f32 %v653_v48, %v544_v47 }
 0x122   : > { %v976_v50 = vpop.f32.mrf.mxu0  ;;  %664 = sbr.rel (%p885_p10) target bundleno = 310 (0x136), region = 48 }
 0x123   : > { %660 = vst [vmem:[#allocation2] sm:$0xff] %v659_v49 }
 0x124   : > { %v656_v51 = vpop.f32.mrf.mxu0 }
 0x126   : > { %v977_v52 = vpop.f32.mrf.mxu0 }
 0x127   : > { %v886_v54 = vld [vmem:[%s1315_s2] ss:$0 sm:$0xff] }
 0x128   : > { %v887_v55 = vld [vmem:[%s1316_s3] ss:$0 sm:$0xff] }
 0x129   : > { %v682_v57 = vld [vmem:[%s1211_s16] sm:$0xf] }
 0x12a   : > { %v665_v53 = vld [vmem:[#allocation2] sm:$0xff]  ;;  %v683_v58 = vunpack.c.l.bf16 %v682_v57 }
 0x12b   : > { %v673_v56 = vmul.f32 %v886_v54, %v665_v53 }
 0x12d   : > { %v681_v59 = vadd.f32 %v887_v55, %v673_v56 }
 0x12f   : > { %v684_v60 = vadd.f32 %v683_v58, %v681_v59 }
 0x131   : > { %v685_v61 = vmax.f32 %v684_v60, 0.0 }
 0x133   : > { %v686_v62 = vpack.c.bf16 %v685_v61, %v685_v61 }
 0x135   : > { %687 = vst [vmem:[%s1216_s28] sm:$0xf] %v686_v62 }
 0x136 PF: > { %s15_s24 = sadd.s32 1, %s1118_s24   ;;  %s1320_s9 = sld [smem:[#allocation3_spill]] }
 0x137   : > { %p12_p11 = scmp.ge.s32.totalorder %s15_s24, 50   ;;  %s1321_s18 = smov %s1106_s21 }
 0x138   : > { %s1322_s19 = smov %s1110_s22  ;;  %s1323_s20 = smov %s1114_s23 }
 0x139   : > { %s1324_s21 = smov %s1328_s25  ;;  %s1325_s22 = smov %s1332_s26 }
 0x13a   :  { %14 = sbr.rel (!%p12_p11) target bundleno = 4 (0x4), region = 84 }
 0x13c   : > { %s1326_s23 = smov %s1320_s9 }

// kernel: _lambda_.19
= control target key start
LH: loop header
LB: loop body
LE: loop exit
PB: predicated region body
PF: predicated region fallthrough
CT: control target
= control target key end

     0   :  { %s1159_s18 = smov 0   ;;  %s1161_s19 = smov 0   ;;  %s1317_s0 = inlined_call_operand.vmem [shape: bf16[2,10,5,128], index: 0, kind: input, shape index: {}]   ;;  %s1318_s1 = inlined_call_operand.vmem [shape: bf16[2,10,5,128], index: 1, kind: input, shape index: {}]   ;;  %s1319_s2 = inlined_call_operand.vmem [shape: bf16[9,128,128], index: 2, kind: input, shape index: {}]   ;;  %s1320_s3 = inlined_call_operand.vmem [shape: f32[1,128], index: 3, kind: input, shape index: {}]   ;;  %s1321_s4 = inlined_call_operand.vmem [shape: f32[1,128], index: 4, kind: input, shape index: {}]   ;;  %s1322_s5 = inlined_call_operand.vmem [shape: bf16[2,4,4,128], index: 5, kind: output, shape index: {}]  }
   0x1   :  { %s1163_s20 = smov 0   ;;  %s1165_s21 = smov 0  }
   0x2   :  { %s1167_s22 = smov 0   ;;  %s1169_s23 = smov 0  }
   0x3   :  { %s1171_s24 = smov 0  }
   0x4 LB: > { %s27_s25 = sadd.s32 1, %s1112_s21  ;;  %s30_s26 = sadd.s32 1, %s1116_s22  ;;  %s1124_s24 = sphi %s1171_s24, %s15_s24   ;;  %s1120_s23 = sphi %s1169_s23, %s1328_s23   ;;  %s1116_s22 = sphi %s1167_s22, %s1327_s22   ;;  %s1112_s21 = sphi %s1165_s21, %s1326_s21   ;;  %s1108_s20 = sphi %s1163_s20, %s1325_s20   ;;  %s1104_s19 = sphi %s1161_s19, %s1324_s19   ;;  %s1100_s18 = sphi %s1159_s18, %s1323_s18  }
   0x5   : > { %p28_p0 = scmp.ge.s32.totalorder %s27_s25, 3  ;;  %p823_p1 = scmp.ge.s32.totalorder %s1124_s24, 1 }
   0x6   : > { %p244_p2 = scmp.lt.s32.totalorder %s1124_s24, 25  ;;  %s34_s27 = sadd.s32 1, %s1120_s23 }
   0x7   : > { %s1330_s25 = smov (%p28_p0, %s27_s25), 0  ;;  %s1332_s26 = smov (!%p28_p0, %s30_s26), %s1116_s22 }
   0x8   : > { %p245_p3 = pnand %p823_p1, %p244_p2  ;;  %p32_p4 = scmp.ge.s32.totalorder %s1332_s26, 4 }
   0x9   : > { %s824_s28 = sshll.u32 (!%p245_p3), %s1104_s19, 1  ;;  %p292_p6 = scmp.lt.s32.totalorder (!%p245_p3), %s1108_s20, 1 }
   0xa   : > { %s1334_s26 = smov (%p32_p4, %s1332_s26), 0  ;;  %s1336_s27 = smov (!%p32_p4, %s34_s27), %s1120_s23 }
   0xb   : > { %p36_p5 = scmp.ge.s32.totalorder %s1336_s27, 2  ;;  %248 = sbr.rel (%p245_p3) target bundleno = 304 (0x130), region = 40 }
   0xc   : > { %s291_s29 = sadd.s32 (!%p245_p3), %s1100_s18, %s824_s28  ;;  %p316_p7 = scmp.lt.s32.totalorder (!%p245_p3), %s1104_s19, 3 }
   0xd   : > { %s1338_s27 = smov (%p36_p5, %s1336_s27), 0  ;;  %p294_p8 = scmp.lt.s32.totalorder (!%p245_p3), %s291_s29, 9 }
   0xe   : > { %p830_p9 = scmp.ne.s32.totalorder (!%p245_p3), %s1100_s18, 0 }
  0x10   : > { %s1340_s20 = smov (!%p292_p6, %s1108_s20), 1  ;;  %s1342_s29 = smov (!%p294_p8, %s291_s29), 9 }
  0x11   : > { %s985_s30 = smul.u32 10, %s1340_s20  ;;  %s828_s6 = sshll.u32 %s1340_s20, 2 }
  0x12   : > { %s1344_s19 = smov (!%p316_p7, %s1104_s19), 3  ;;  %326 = sbr.rel (%p830_p9) target bundleno = 25 (0x19), region = 44 }
  0x13   : > { %s297_s7 = sadd.s32 %s985_s30, %s1342_s29  ;;  %s319_s9 = sadd.s32 %s828_s6, %s1344_s19 }
  0x14   : > { %s825_s8 = sshll.u32 %s297_s7, 2  ;;  %s829_s16 = sshll.u32 %s319_s9, 1 }
  0x15   : > { %s1212_s12 = scalar_lea.vmem %s1317_s0, %s825_s8  ;;  %s1217_s15 = scalar_lea.vmem %s1318_s1, %s825_s8 }
  0x16   : > { %s1222_s20 = scalar_lea.vmem %s1322_s5, %s829_s16 }
  0x17   : > { %v1126_v0 = vmov 0.0  }
  0x18   : > { %327 = vst [vmem:[#allocation2] sm:$0xf] %v1126_v0 }
  0x19 PF: > { %s897_s19 = smul.u32 192, %s1100_s18  ;;  %v1127_v1 = vmov 0.0   ;;  %vm1128_vm0 = vmmov 0   ;;  %v330_v18 = vld [vmem:[%s1212_s12] sm:$0x3]  ;;  %p892_p10 = scmp.ne.s32.totalorder %s1100_s18, 2 }
  0x1a   : > { %925 = vmatprep.subr.bf16.mxu0 %v1127_v1  ;;  %945 = vmatprep.subr.bf16.mxu1 %v1127_v1  ;;  %v439_v20 = vld [vmem:[%s1217_s15] sm:$0x3] }
  0x1b   : > { %s1231_s6 = scalar_lea.vmem %s1319_s2, %s897_s19  ;;  %941 = vmatprep.mubr.msk.bf16.mxu0 %vm1128_vm0, %v1127_v1  ;;  %961 = vmatprep.mubr.msk.bf16.mxu1 %vm1128_vm0, %v1127_v1  ;;  %v1069_v25 = vld [vmem:[%s1212_s12] ss:$0 sps:$4 sm:$0x77]  }
  0x1c   : > { %v1045_v2 = vld [vmem:[%s1231_s6 + $0x38] sm:$0xff]   ;;  %v1047_v4 = vld [vmem:[%s1231_s6 + $0x30] sm:$0xff]   ;;  %v1049_v6 = vld [vmem:[%s1231_s6 + $0x28] sm:$0xff]   ;;  %v576_v27 = vshll.u32 %v1069_v25, 16  ;;  %v574_v29 = vshrl.u32 %v1069_v25, 16 }
  0x1d   : > { %v1046_v3 = vld [vmem:[%s1231_s6 + $0x78] sm:$0xff]   ;;  %926 = vmatpush3.bf16.msra.mxu0 %v1045_v2  ;;  %v1048_v5 = vld [vmem:[%s1231_s6 + $0x70] sm:$0xff]   ;;  %v1050_v7 = vld [vmem:[%s1231_s6 + $0x68] sm:$0xff]  }
  0x1e   : > { %927 = vmatprep.subr.bf16.mxu0 %v1127_v1  ;;  %946 = vmatpush3.bf16.msra.mxu1 %v1046_v3  ;;  %v1051_v8 = vld [vmem:[%s1231_s6 + $0x20] sm:$0xff]   ;;  %v1053_v10 = vld [vmem:[%s1231_s6 + $0x18] sm:$0xff]   ;;  %v1055_v12 = vld [vmem:[%s1231_s6 + $0x10] sm:$0xff]   ;;  %v578_v30 = vrot.slane %v576_v27, 1 }
  0x1f   : > { %947 = vmatprep.subr.bf16.mxu1 %v1127_v1  ;;  %v1052_v9 = vld [vmem:[%s1231_s6 + $0x60] sm:$0xff]   ;;  %v1054_v11 = vld [vmem:[%s1231_s6 + $0x58] sm:$0xff]   ;;  %v1056_v13 = vld [vmem:[%s1231_s6 + $0x50] sm:$0xff]  }
  0x20   : > { %v1057_v14 = vld [vmem:[%s1231_s6 + $0x8] sm:$0xff]   ;;  %v1059_v16 = vld [vmem:[%s1231_s6] sm:$0xff]   ;;  %v1061_v19 = vld [vmem:[%s1231_s6 + $0xb8] sm:$0xff]   ;;  %v579_v32 = vor.u32 %v578_v30, %v574_v29 }
  0x21   : > { %928 = vmatpush3.bf16.msra.mxu0 %v1047_v4  ;;  %v1058_v15 = vld [vmem:[%s1231_s6 + $0x48] sm:$0xff]   ;;  %v1060_v17 = vld [vmem:[%s1231_s6 + $0x40] sm:$0xff]   ;;  %v1062_v21 = vld [vmem:[%s1231_s6 + $0xb0] sm:$0xff]  }
  0x22   : > { %929 = vmatprep.subr.bf16.mxu0 %v1127_v1  ;;  %948 = vmatpush3.bf16.msra.mxu1 %v1048_v5  ;;  %v1063_v22 = vld [vmem:[%s1231_s6 + $0xa8] sm:$0xff]   ;;  %v1064_v23 = vld [vmem:[%s1231_s6 + $0xa0] sm:$0xff]   ;;  %v1065_v24 = vld [vmem:[%s1231_s6 + $0x98] sm:$0xff]  }
  0x23   : > { %949 = vmatprep.subr.bf16.mxu1 %v1127_v1  ;;  %v1066_v26 = vld [vmem:[%s1231_s6 + $0x90] sm:$0xff]   ;;  %v1067_v28 = vld [vmem:[%s1231_s6 + $0x88] sm:$0xff]   ;;  %v1068_v31 = vld [vmem:[%s1231_s6 + $0x80] sm:$0xff]  }
  0x24   : > { %v328_v41 = vld [vmem:[#allocation2] sm:$0xf] }
  0x25   : > { %930 = vmatpush3.bf16.msra.mxu0 %v1049_v6 }
  0x26   : > { %931 = vmatprep.subr.bf16.mxu0 %v1127_v1  ;;  %950 = vmatpush3.bf16.msra.mxu1 %v1050_v7 }
  0x27   : > { %951 = vmatprep.subr.bf16.mxu1 %v1127_v1 }
  0x29   : > { %932 = vmatpush3.bf16.msra.mxu0 %v1051_v8 }
  0x2a   : > { %933 = vmatprep.subr.bf16.mxu0 %v1127_v1  ;;  %952 = vmatpush3.bf16.msra.mxu1 %v1052_v9 }
  0x2b   : > { %953 = vmatprep.subr.bf16.mxu1 %v1127_v1 }
  0x2d   : > { %934 = vmatpush3.bf16.msra.mxu0 %v1053_v10 }
  0x2e   : > { %935 = vmatprep.subr.bf16.mxu0 %v1127_v1  ;;  %954 = vmatpush3.bf16.msra.mxu1 %v1054_v11 }
  0x2f   : > { %955 = vmatprep.subr.bf16.mxu1 %v1127_v1 }
  0x31   : > { %936 = vmatpush3.bf16.msra.mxu0 %v1055_v12 }
  0x32   : > { %937 = vmatprep.subr.bf16.mxu0 %v1127_v1  ;;  %956 = vmatpush3.bf16.msra.mxu1 %v1056_v13 }
  0x33   : > { %957 = vmatprep.subr.bf16.mxu1 %v1127_v1 }
  0x35   : > { %938 = vmatpush3.bf16.msra.mxu0 %v1057_v14 }
  0x36   : > { %939 = vmatprep.subr.bf16.mxu0 %v1127_v1  ;;  %958 = vmatpush3.bf16.msra.mxu1 %v1058_v15 }
  0x37   : > { %959 = vmatprep.subr.bf16.mxu1 %v1127_v1 }
  0x39   : > { %940 = vmatpush3.bf16.msra.mxu0 %v1059_v16 }
  0x3a   : > { %960 = vmatpush3.bf16.msra.mxu1 %v1060_v17  ;;  %965 = vmatprep.subr.bf16.mxu0 %v1127_v1 }
  0x3c   : > { %942 = vmatmul.mubr.bf16.vlgmr.msra.gmra.mxu0 %v330_v18 }
  0x3d   : > { %966 = vmatpush3.bf16.msra.mxu0 %v1061_v19  ;;  %962 = vmatmul.mubr.bf16.vlgmr.msra.gmra.mxu1 %v439_v20 }
  0x3e   : > { %967 = vmatprep.subr.bf16.mxu0 %v1127_v1  ;;  %981 = vmatprep.mubr.msk.bf16.mxu0 %vm1128_vm0, %v1127_v1 }
  0x41   : > { %968 = vmatpush3.bf16.msra.mxu0 %v1062_v21 }
  0x42   : > { %969 = vmatprep.subr.bf16.mxu0 %v1127_v1 }
  0x45   : > { %970 = vmatpush3.bf16.msra.mxu0 %v1063_v22 }
  0x46   : > { %971 = vmatprep.subr.bf16.mxu0 %v1127_v1 }
  0x49   : > { %972 = vmatpush3.bf16.msra.mxu0 %v1064_v23 }
  0x4a   : > { %973 = vmatprep.subr.bf16.mxu0 %v1127_v1 }
  0x4d   : > { %974 = vmatpush3.bf16.msra.mxu0 %v1065_v24 }
  0x4e   : > { %975 = vmatprep.subr.bf16.mxu0 %v1127_v1 }
  0x51   : > { %976 = vmatpush3.bf16.msra.mxu0 %v1066_v26 }
  0x52   : > { %977 = vmatprep.subr.bf16.mxu0 %v1127_v1 }
  0x55   : > { %978 = vmatpush3.bf16.msra.mxu0 %v1067_v28 }
  0x56   : > { %979 = vmatprep.subr.bf16.mxu0 %v1127_v1 }
  0x59   : > { %980 = vmatpush3.bf16.msra.mxu0 %v1068_v31 }
  0x5c   : > { %982 = vmatmul.mubr.bf16.vlgmr.msra.gmra.mxu0 %v579_v32 }
  0xfc   : > { %v432_v33 = vpop.f32.mrf.mxu0 }
  0xfd   : > { %v542_v34 = vpop.f32.mrf.mxu1  ;;  %v438_v42 = vadd.f32 %v432_v33, %v328_v41 }
  0xfe   : > { %v943_v35 = vpop.f32.mrf.mxu0 }
  0xff   : > { %v963_v36 = vpop.f32.mrf.mxu1  ;;  %v548_v43 = vadd.f32 %v542_v34, %v438_v42 }
 0x100   : > { %v435_v37 = vpop.f32.mrf.mxu0 }
 0x101   : > { %v545_v38 = vpop.f32.mrf.mxu1 }
 0x102   : > { %v944_v39 = vpop.f32.mrf.mxu0 }
 0x103   : > { %v964_v40 = vpop.f32.mrf.mxu1 }
 0x11c   : > { %v663_v44 = vpop.f32.mrf.mxu0 }
 0x11d   : > { %v669_v45 = vadd.f32 %v663_v44, %v548_v43 }
 0x11e   : > { %v983_v46 = vpop.f32.mrf.mxu0  ;;  %674 = sbr.rel (%p892_p10) target bundleno = 304 (0x130), region = 48 }
 0x11f   : > { %670 = vst [vmem:[#allocation2] sm:$0xf] %v669_v45 }
 0x120   : > { %v666_v47 = vpop.f32.mrf.mxu0 }
 0x122   : > { %v984_v48 = vpop.f32.mrf.mxu0 }
 0x123   : > { %v893_v50 = vld [vmem:[%s1320_s3] ss:$0 sm:$0xff] }
 0x124   : > { %v894_v51 = vld [vmem:[%s1321_s4] ss:$0 sm:$0xff] }
 0x126   : > { %v675_v49 = vld [vmem:[#allocation2] sm:$0xf] }
 0x127   : > { %v683_v52 = vmul.f32 %v893_v50, %v675_v49 }
 0x129   : > { %v691_v53 = vadd.f32 %v894_v51, %v683_v52 }
 0x12b   : > { %v692_v54 = vmax.f32 %v691_v53, 0.0 }
 0x12d   : > { %v693_v55 = vpack.c.bf16 %v692_v54, %v692_v54 }
 0x12f   : > { %694 = vst [vmem:[%s1222_s20] sm:$0x3] %v693_v55 }
 0x130 PF: > { %s15_s24 = sadd.s32 1, %s1124_s24   ;;  %s1323_s18 = smov %s1112_s21 }
 0x131   : > { %p12_p11 = scmp.ge.s32.totalorder %s15_s24, 26   ;;  %s1324_s19 = smov %s1116_s22 }
 0x132   : > { %s1325_s20 = smov %s1120_s23  ;;  %s1326_s21 = smov %s1330_s25 }
 0x133   : > { %s1327_s22 = smov %s1334_s26  ;;  %s1328_s23 = smov %s1338_s27 }
 0x134   :  { %14 = sbr.rel (!%p12_p11) target bundleno = 4 (0x4), region = 84 }

// kernel: _lambda_.18
= control target key start
LH: loop header
LB: loop body
LE: loop exit
PB: predicated region body
PF: predicated region fallthrough
CT: control target
= control target key end

     0   :  { %s650_s15 = smov 0   ;;  %s652_s16 = smov 0   ;;  %s744_s0 = inlined_call_operand.vmem [shape: bf16[2,8,4,128], index: 0, kind: input, shape index: {}]   ;;  %s745_s1 = inlined_call_operand.vmem [shape: bf16[1,128,128], index: 1, kind: input, shape index: {}]   ;;  %s746_s2 = inlined_call_operand.vmem [shape: f32[1,128], index: 2, kind: input, shape index: {}]   ;;  %s747_s3 = inlined_call_operand.vmem [shape: f32[1,128], index: 3, kind: input, shape index: {}]   ;;  %s748_s4 = inlined_call_operand.vmem [shape: bf16[2,4,4,128], index: 4, kind: output, shape index: {}]  }
   0x1   :  { %s654_s17 = smov 0   ;;  %s656_s18 = smov 0  }
   0x2   :  { %s658_s19 = smov 0  }
   0x3 LB: > { %s29_s20 = sadd.s32 1, %s613_s17  ;;  %s33_s21 = sadd.s32 1, %s617_s18  ;;  %s621_s19 = sphi %s658_s19, %s14_s19   ;;  %s617_s18 = sphi %s656_s18, %s752_s18   ;;  %s613_s17 = sphi %s654_s17, %s751_s17   ;;  %s609_s16 = sphi %s652_s16, %s750_s16   ;;  %s605_s15 = sphi %s650_s15, %s749_s15  }
   0x4   : > { %p31_p0 = scmp.ge.s32.totalorder %s29_s20, 4  ;;  %p486_p1 = scmp.ge.s32.totalorder %s621_s19, 1 }
   0x5   : > { %p196_p2 = scmp.lt.s32.totalorder %s621_s19, 9 }
   0x6   : > { %s754_s20 = smov (%p31_p0, %s29_s20), 0  ;;  %s756_s21 = smov (!%p31_p0, %s33_s21), %s617_s18 }
   0x7   : > { %p197_p3 = pnand %p486_p1, %p196_p2  ;;  %p35_p4 = scmp.ge.s32.totalorder %s756_s21, 2 }
   0x8   : > { %s487_s30 = sshll.u32 (!%p197_p3), %s605_s15, 1  ;;  %p232_p5 = scmp.lt.s32.totalorder (!%p197_p3), %s609_s16, 1 }
   0x9   : > { %s758_s21 = smov (%p35_p4, %s756_s21), 0  ;;  %200 = sbr.rel (%p197_p3) target bundleno = 257 (0x101), region = 36 }
   0xa   : > { %p234_p6 = scmp.lt.s32.totalorder (!%p197_p3), %s487_s30, 7  ;;  %p244_p7 = scmp.lt.s32.totalorder (!%p197_p3), %s605_s15, 3 }
   0xe   : > { %v575_v0 = vld [vmem:[%s745_s1 + $0x38] sm:$0xff]   ;;  %v623_v1 = vmov 0.0   ;;  %v576_v2 = vld [vmem:[%s745_s1 + $0x30] sm:$0xff]   ;;  %vm624_vm0 = vmmov 0   ;;  %v577_v3 = vld [vmem:[%s745_s1 + $0x28] sm:$0xff]   ;;  %s760_s16 = smov (!%p232_p5, %s609_s16), 1 }
   0xf   : > { %513 = vmatprep.subr.bf16.mxu0 %v623_v1  ;;  %255 = vst [vmem:[#allocation2] sm:$0xf] %v623_v1  ;;  %529 = vmatprep.mubr.msk.bf16.mxu0 %vm624_vm0, %v623_v1  ;;  %v578_v4 = vld [vmem:[%s745_s1 + $0x20] sm:$0xff]   ;;  %v579_v5 = vld [vmem:[%s745_s1 + $0x18] sm:$0xff]   ;;  %s762_s30 = smov (!%p234_p6, %s487_s30), 7  ;;  %v580_v6 = vld [vmem:[%s745_s1 + $0x10] sm:$0xff]  }
  0x10   : > { %514 = vmatpush3.bf16.msra.mxu0 %v575_v0  ;;  %s488_s9 = sshll.u32 %s760_s16, 3  ;;  %v581_v7 = vld [vmem:[%s745_s1 + $0x8] sm:$0xff]   ;;  %v582_v8 = vld [vmem:[%s745_s1] sm:$0xff]   ;;  %s764_s15 = smov (!%p244_p7, %s605_s15), 3 }
  0x11   : > { %515 = vmatprep.subr.bf16.mxu0 %v623_v1  ;;  %s237_s10 = sadd.s32 %s488_s9, %s762_s30  ;;  %s490_s26 = sshll.u32 %s760_s16, 2  ;;  %v500_v16 = vld [vmem:[%s746_s2] ss:$0 sm:$0xff] }
  0x12   : > { %s489_s13 = sshll.u32 %s237_s10, 1  ;;  %s247_s27 = sadd.s32 %s490_s26, %s764_s15  ;;  %v501_v18 = vld [vmem:[%s747_s3] ss:$0 sm:$0xff] }
  0x13   : > { %s239_s25 = scalar_lea.vmem %s744_s0, %s489_s13  ;;  %s491_s6 = sshll.u32 %s247_s27, 1 }
  0x14   : > { %516 = vmatpush3.bf16.msra.mxu0 %v576_v2  ;;  %v257_v9 = vld [vmem:[%s239_s25] sm:$0x3]  ;;  %s249_s9 = scalar_lea.vmem %s748_s4, %s491_s6 }
  0x15   : > { %517 = vmatprep.subr.bf16.mxu0 %v623_v1 }
  0x16   : > { %v256_v10 = vld [vmem:[#allocation2] sm:$0xf] }
  0x18   : > { %518 = vmatpush3.bf16.msra.mxu0 %v577_v3 }
  0x19   : > { %519 = vmatprep.subr.bf16.mxu0 %v623_v1 }
  0x1c   : > { %520 = vmatpush3.bf16.msra.mxu0 %v578_v4 }
  0x1d   : > { %521 = vmatprep.subr.bf16.mxu0 %v623_v1 }
  0x20   : > { %522 = vmatpush3.bf16.msra.mxu0 %v579_v5 }
  0x21   : > { %523 = vmatprep.subr.bf16.mxu0 %v623_v1 }
  0x24   : > { %524 = vmatpush3.bf16.msra.mxu0 %v580_v6 }
  0x25   : > { %525 = vmatprep.subr.bf16.mxu0 %v623_v1 }
  0x28   : > { %526 = vmatpush3.bf16.msra.mxu0 %v581_v7 }
  0x29   : > { %527 = vmatprep.subr.bf16.mxu0 %v623_v1 }
  0x2c   : > { %528 = vmatpush3.bf16.msra.mxu0 %v582_v8 }
  0x2f   : > { %530 = vmatmul.mubr.bf16.vlgmr.msra.gmra.mxu0 %v257_v9 }
  0xef   : > { %v359_v11 = vpop.f32.mrf.mxu0 }
  0xf0   : > { %v365_v12 = vadd.f32 %v359_v11, %v256_v10 }
  0xf1   : > { %v531_v13 = vpop.f32.mrf.mxu0 }
  0xf2   : > { %366 = vst [vmem:[#allocation2] sm:$0xf] %v365_v12 }
  0xf3   : > { %v362_v14 = vpop.f32.mrf.mxu0 }
  0xf5   : > { %v532_v15 = vpop.f32.mrf.mxu0 }
  0xf9   : > { %v370_v17 = vld [vmem:[#allocation2] sm:$0xf] }
  0xfa   : > { %v378_v19 = vmul.f32 %v500_v16, %v370_v17 }
  0xfc   : > { %v386_v20 = vadd.f32 %v501_v18, %v378_v19 }
  0xfe   : > { %v387_v21 = vpack.c.bf16 %v386_v20, %v386_v20 }
 0x100   : > { %388 = vst [vmem:[%s249_s9] sm:$0x3] %v387_v21 }
 0x101 PF: > { %s14_s19 = sadd.s32 1, %s621_s19   ;;  %s749_s15 = smov %s613_s17 }
 0x102   : > { %p11_p8 = scmp.ge.s32.totalorder %s14_s19, 10   ;;  %s750_s16 = smov %s617_s18 }
 0x103   : > { %s751_s17 = smov %s754_s20  ;;  %s752_s18 = smov %s758_s21 }
 0x104   :  { %13 = sbr.rel (!%p11_p8) target bundleno = 3 (0x3), region = 75 }

// kernel: _lambda_.20
= control target key start
LH: loop header
LB: loop body
LE: loop exit
PB: predicated region body
PF: predicated region fallthrough
CT: control target
= control target key end

     0   :  { %s1143_s18 = smov 0   ;;  %s1145_s19 = smov 0   ;;  %s1297_s0 = inlined_call_operand.vmem [shape: bf16[2,6,6,128], index: 0, kind: input, shape index: {}]   ;;  %s1298_s1 = inlined_call_operand.vmem [shape: bf16[9,128,128], index: 1, kind: input, shape index: {}]   ;;  %s1299_s2 = inlined_call_operand.vmem [shape: f32[1,128], index: 2, kind: input, shape index: {}]   ;;  %s1300_s3 = inlined_call_operand.vmem [shape: f32[1,128], index: 3, kind: input, shape index: {}]   ;;  %s1301_s4 = inlined_call_operand.vmem [shape: bf16[2,4,4,128], index: 4, kind: input, shape index: {}]   ;;  %s1302_s5 = inlined_call_operand.vmem [shape: bf16[2,4,4,128], index: 5, kind: output, shape index: {}]  }
   0x1   :  { %s1147_s20 = smov 0   ;;  %s1149_s21 = smov 0  }
   0x2   :  { %s1151_s22 = smov 0   ;;  %s1153_s23 = smov 0  }
   0x3   :  { %s1155_s24 = smov 0  }
   0x4 LB: > { %s27_s25 = sadd.s32 1, %s1096_s21  ;;  %s30_s26 = sadd.s32 1, %s1100_s22  ;;  %s1108_s24 = sphi %s1155_s24, %s15_s24   ;;  %s1104_s23 = sphi %s1153_s23, %s1310_s23   ;;  %s1100_s22 = sphi %s1151_s22, %s1309_s22   ;;  %s1096_s21 = sphi %s1149_s21, %s1308_s21   ;;  %s1092_s20 = sphi %s1147_s20, %s1307_s20   ;;  %s1088_s19 = sphi %s1145_s19, %s1306_s19   ;;  %s1084_s18 = sphi %s1143_s18, %s1305_s18  }
   0x5   : > { %p28_p0 = scmp.ge.s32.totalorder %s27_s25, 3  ;;  %p806_p1 = scmp.ge.s32.totalorder %s1108_s24, 1 }
   0x6   : > { %p232_p2 = scmp.lt.s32.totalorder %s1108_s24, 25  ;;  %s34_s27 = sadd.s32 1, %s1104_s23 }
   0x7   : > { %s1312_s25 = smov (%p28_p0, %s27_s25), 0  ;;  %s1314_s26 = smov (!%p28_p0, %s30_s26), %s1100_s22 }
   0x8   : > { %p233_p3 = pnand %p806_p1, %p232_p2  ;;  %p32_p4 = scmp.ge.s32.totalorder %s1314_s26, 4 }
   0x9   : > { %s275_s28 = sadd.s32 (!%p233_p3), %s1084_s18, %s1088_s19  ;;  %p276_p6 = scmp.lt.s32.totalorder (!%p233_p3), %s1092_s20, 1 }
   0xa   : > { %s1316_s26 = smov (%p32_p4, %s1314_s26), 0  ;;  %s1318_s27 = smov (!%p32_p4, %s34_s27), %s1104_s23 }
   0xb   : > { %p36_p5 = scmp.ge.s32.totalorder %s1318_s27, 2  ;;  %236 = sbr.rel (%p233_p3) target bundleno = 306 (0x132), region = 40 }
   0xc   : > { %p278_p7 = scmp.lt.s32.totalorder (!%p233_p3), %s275_s28, 5  ;;  %p287_p8 = scmp.lt.s32.totalorder (!%p233_p3), %s1088_s19, 3 }
   0xd   : > { %s1320_s27 = smov (%p36_p5, %s1318_s27), 0  ;;  %p812_p9 = scmp.ne.s32.totalorder (!%p233_p3), %s1084_s18, 0 }
   0xe   : > { %1303 = sst [smem:[#allocation3_spill]] %s1320_s27 }
  0x10   : > { %s1322_s20 = smov (!%p276_p6, %s1092_s20), 1  ;;  %s1324_s28 = smov (!%p278_p7, %s275_s28), 5 }
  0x11   : > { %s968_s29 = smul.u32 6, %s1322_s20  ;;  %s808_s30 = sshll.u32 %s1322_s20, 2 }
  0x12   : > { %s1326_s19 = smov (!%p287_p8, %s1088_s19), 3  ;;  %305 = sbr.rel (%p812_p9) target bundleno = 25 (0x19), region = 44 }
  0x13   : > { %s281_s6 = sadd.s32 %s968_s29, %s1324_s28  ;;  %s290_s8 = sadd.s32 %s808_s30, %s1326_s19 }
  0x14   : > { %s807_s7 = sshll.u32 %s281_s6, 2  ;;  %s809_s12 = sshll.u32 %s290_s8, 1 }
  0x15   : > { %s1191_s11 = scalar_lea.vmem %s1297_s0, %s807_s7  ;;  %s1196_s15 = scalar_lea.vmem %s1301_s4, %s809_s12 }
  0x16   : > { %s1201_s27 = scalar_lea.vmem %s1302_s5, %s809_s12 }
  0x17   : > { %v1110_v0 = vmov 0.0  }
  0x18   : > { %306 = vst [vmem:[#allocation2] sm:$0xf] %v1110_v0 }
  0x19 PF: > { %s880_s19 = smul.u32 192, %s1084_s18  ;;  %v1111_v1 = vmov 0.0   ;;  %vm1112_vm0 = vmmov 0   ;;  %v1045_v12 = vld [vmem:[%s1191_s11] ss:$0 sps:$4 sm:$0x77]  }
  0x1a   : > { %908 = vmatprep.subr.bf16.mxu0 %v1111_v1  ;;  %928 = vmatprep.subr.bf16.mxu1 %v1111_v1  ;;  %v445_v16 = vshll.u32 %v1045_v12, 16  ;;  %v443_v19 = vshrl.u32 %v1045_v12, 16  ;;  %v309_v22 = vld [vmem:[%s1191_s11] sm:$0x3]  ;;  %p875_p10 = scmp.ne.s32.totalorder %s1084_s18, 2 }
  0x1b   : > { %s1210_s29 = scalar_lea.vmem %s1298_s1, %s880_s19  ;;  %924 = vmatprep.mubr.msk.bf16.mxu0 %vm1112_vm0, %v1111_v1  ;;  %944 = vmatprep.mubr.msk.bf16.mxu1 %vm1112_vm0, %v1111_v1  ;;  %v1053_v31 = vld [vmem:[%s1191_s11] ss:$0 sps:$4 sm:$0x66]  }
  0x1c   : > { %v1028_v2 = vld [vmem:[%s1210_s29 + $0x38] sm:$0xff]   ;;  %v1030_v4 = vld [vmem:[%s1210_s29 + $0x30] sm:$0xff]   ;;  %v1032_v6 = vld [vmem:[%s1210_s29 + $0x28] sm:$0xff]   ;;  %v447_v20 = vrot.slane %v445_v16, 1  ;;  %v563_v33 = vrot.slane %v1053_v31, 1 }
  0x1d   : > { %v1029_v3 = vld [vmem:[%s1210_s29 + $0x78] sm:$0xff]   ;;  %909 = vmatpush3.bf16.msra.mxu0 %v1028_v2  ;;  %v1031_v5 = vld [vmem:[%s1210_s29 + $0x70] sm:$0xff]   ;;  %v1033_v7 = vld [vmem:[%s1210_s29 + $0x68] sm:$0xff]  }
  0x1e   : > { %910 = vmatprep.subr.bf16.mxu0 %v1111_v1  ;;  %929 = vmatpush3.bf16.msra.mxu1 %v1029_v3  ;;  %v1034_v8 = vld [vmem:[%s1210_s29 + $0x20] sm:$0xff]   ;;  %v1036_v10 = vld [vmem:[%s1210_s29 + $0x18] sm:$0xff]   ;;  %v1038_v13 = vld [vmem:[%s1210_s29 + $0x10] sm:$0xff]   ;;  %v448_v24 = vor.u32 %v447_v20, %v443_v19 }
  0x1f   : > { %930 = vmatprep.subr.bf16.mxu1 %v1111_v1  ;;  %v1035_v9 = vld [vmem:[%s1210_s29 + $0x60] sm:$0xff]   ;;  %v1037_v11 = vld [vmem:[%s1210_s29 + $0x58] sm:$0xff]   ;;  %v1039_v14 = vld [vmem:[%s1210_s29 + $0x50] sm:$0xff]  }
  0x20   : > { %v1040_v15 = vld [vmem:[%s1210_s29 + $0x8] sm:$0xff]   ;;  %v1042_v18 = vld [vmem:[%s1210_s29] sm:$0xff]   ;;  %v1044_v23 = vld [vmem:[%s1210_s29 + $0xb8] sm:$0xff]  }
  0x21   : > { %911 = vmatpush3.bf16.msra.mxu0 %v1030_v4  ;;  %v1041_v17 = vld [vmem:[%s1210_s29 + $0x48] sm:$0xff]   ;;  %v1043_v21 = vld [vmem:[%s1210_s29 + $0x40] sm:$0xff]   ;;  %v1046_v25 = vld [vmem:[%s1210_s29 + $0xb0] sm:$0xff]  }
  0x22   : > { %912 = vmatprep.subr.bf16.mxu0 %v1111_v1  ;;  %931 = vmatpush3.bf16.msra.mxu1 %v1031_v5  ;;  %v1047_v26 = vld [vmem:[%s1210_s29 + $0xa8] sm:$0xff]   ;;  %v1048_v27 = vld [vmem:[%s1210_s29 + $0xa0] sm:$0xff]   ;;  %v1049_v28 = vld [vmem:[%s1210_s29 + $0x98] sm:$0xff]  }
  0x23   : > { %932 = vmatprep.subr.bf16.mxu1 %v1111_v1  ;;  %v1050_v29 = vld [vmem:[%s1210_s29 + $0x90] sm:$0xff]   ;;  %v1051_v30 = vld [vmem:[%s1210_s29 + $0x88] sm:$0xff]   ;;  %v1052_v32 = vld [vmem:[%s1210_s29 + $0x80] sm:$0xff]  }
  0x24   : > { %v307_v42 = vld [vmem:[#allocation2] sm:$0xf] }
  0x25   : > { %913 = vmatpush3.bf16.msra.mxu0 %v1032_v6 }
  0x26   : > { %914 = vmatprep.subr.bf16.mxu0 %v1111_v1  ;;  %933 = vmatpush3.bf16.msra.mxu1 %v1033_v7 }
  0x27   : > { %934 = vmatprep.subr.bf16.mxu1 %v1111_v1 }
  0x29   : > { %915 = vmatpush3.bf16.msra.mxu0 %v1034_v8 }
  0x2a   : > { %916 = vmatprep.subr.bf16.mxu0 %v1111_v1  ;;  %935 = vmatpush3.bf16.msra.mxu1 %v1035_v9 }
  0x2b   : > { %936 = vmatprep.subr.bf16.mxu1 %v1111_v1 }
  0x2d   : > { %917 = vmatpush3.bf16.msra.mxu0 %v1036_v10 }
  0x2e   : > { %918 = vmatprep.subr.bf16.mxu0 %v1111_v1  ;;  %937 = vmatpush3.bf16.msra.mxu1 %v1037_v11 }
  0x2f   : > { %938 = vmatprep.subr.bf16.mxu1 %v1111_v1 }
  0x31   : > { %919 = vmatpush3.bf16.msra.mxu0 %v1038_v13 }
  0x32   : > { %920 = vmatprep.subr.bf16.mxu0 %v1111_v1  ;;  %939 = vmatpush3.bf16.msra.mxu1 %v1039_v14 }
  0x33   : > { %940 = vmatprep.subr.bf16.mxu1 %v1111_v1 }
  0x35   : > { %921 = vmatpush3.bf16.msra.mxu0 %v1040_v15 }
  0x36   : > { %922 = vmatprep.subr.bf16.mxu0 %v1111_v1  ;;  %941 = vmatpush3.bf16.msra.mxu1 %v1041_v17 }
  0x37   : > { %942 = vmatprep.subr.bf16.mxu1 %v1111_v1 }
  0x39   : > { %923 = vmatpush3.bf16.msra.mxu0 %v1042_v18 }
  0x3a   : > { %943 = vmatpush3.bf16.msra.mxu1 %v1043_v21  ;;  %948 = vmatprep.subr.bf16.mxu0 %v1111_v1 }
  0x3c   : > { %925 = vmatmul.mubr.bf16.vlgmr.msra.gmra.mxu0 %v309_v22 }
  0x3d   : > { %949 = vmatpush3.bf16.msra.mxu0 %v1044_v23  ;;  %945 = vmatmul.mubr.bf16.vlgmr.msra.gmra.mxu1 %v448_v24 }
  0x3e   : > { %950 = vmatprep.subr.bf16.mxu0 %v1111_v1  ;;  %964 = vmatprep.mubr.msk.bf16.mxu0 %vm1112_vm0, %v1111_v1 }
  0x41   : > { %951 = vmatpush3.bf16.msra.mxu0 %v1046_v25 }
  0x42   : > { %952 = vmatprep.subr.bf16.mxu0 %v1111_v1 }
  0x45   : > { %953 = vmatpush3.bf16.msra.mxu0 %v1047_v26 }
  0x46   : > { %954 = vmatprep.subr.bf16.mxu0 %v1111_v1 }
  0x49   : > { %955 = vmatpush3.bf16.msra.mxu0 %v1048_v27 }
  0x4a   : > { %956 = vmatprep.subr.bf16.mxu0 %v1111_v1 }
  0x4d   : > { %957 = vmatpush3.bf16.msra.mxu0 %v1049_v28 }
  0x4e   : > { %958 = vmatprep.subr.bf16.mxu0 %v1111_v1 }
  0x51   : > { %959 = vmatpush3.bf16.msra.mxu0 %v1050_v29 }
  0x52   : > { %960 = vmatprep.subr.bf16.mxu0 %v1111_v1 }
  0x55   : > { %961 = vmatpush3.bf16.msra.mxu0 %v1051_v30 }
  0x56   : > { %962 = vmatprep.subr.bf16.mxu0 %v1111_v1 }
  0x59   : > { %963 = vmatpush3.bf16.msra.mxu0 %v1052_v32 }
  0x5c   : > { %965 = vmatmul.mubr.bf16.vlgmr.msra.gmra.mxu0 %v563_v33 }
  0xfc   : > { %v411_v34 = vpop.f32.mrf.mxu0 }
  0xfd   : > { %v532_v35 = vpop.f32.mrf.mxu1  ;;  %v417_v43 = vadd.f32 %v411_v34, %v307_v42 }
  0xfe   : > { %v926_v36 = vpop.f32.mrf.mxu0 }
  0xff   : > { %v946_v37 = vpop.f32.mrf.mxu1  ;;  %v538_v44 = vadd.f32 %v532_v35, %v417_v43 }
 0x100   : > { %v414_v38 = vpop.f32.mrf.mxu0 }
 0x101   : > { %v535_v39 = vpop.f32.mrf.mxu1 }
 0x102   : > { %v927_v40 = vpop.f32.mrf.mxu0 }
 0x103   : > { %v947_v41 = vpop.f32.mrf.mxu1 }
 0x11c   : > { %v647_v45 = vpop.f32.mrf.mxu0 }
 0x11d   : > { %v653_v46 = vadd.f32 %v647_v45, %v538_v44 }
 0x11e   : > { %v966_v47 = vpop.f32.mrf.mxu0  ;;  %658 = sbr.rel (%p875_p10) target bundleno = 306 (0x132), region = 48 }
 0x11f   : > { %654 = vst [vmem:[#allocation2] sm:$0xf] %v653_v46 }
 0x120   : > { %v650_v48 = vpop.f32.mrf.mxu0 }
 0x122   : > { %v967_v49 = vpop.f32.mrf.mxu0 }
 0x123   : > { %v876_v51 = vld [vmem:[%s1299_s2] ss:$0 sm:$0xff] }
 0x124   : > { %v877_v52 = vld [vmem:[%s1300_s3] ss:$0 sm:$0xff] }
 0x125   : > { %v676_v54 = vld [vmem:[%s1196_s15] sm:$0x3] }
 0x126   : > { %v659_v50 = vld [vmem:[#allocation2] sm:$0xf]  ;;  %v677_v55 = vunpack.c.l.bf16 %v676_v54 }
 0x127   : > { %v667_v53 = vmul.f32 %v876_v51, %v659_v50 }
 0x129   : > { %v675_v56 = vadd.f32 %v877_v52, %v667_v53 }
 0x12b   : > { %v678_v57 = vadd.f32 %v677_v55, %v675_v56 }
 0x12d   : > { %v679_v58 = vmax.f32 %v678_v57, 0.0 }
 0x12f   : > { %v680_v59 = vpack.c.bf16 %v679_v58, %v679_v58 }
 0x131   : > { %681 = vst [vmem:[%s1201_s27] sm:$0x3] %v680_v59 }
 0x132 PF: > { %s15_s24 = sadd.s32 1, %s1108_s24   ;;  %s1304_s9 = sld [smem:[#allocation3_spill]] }
 0x133   : > { %p12_p11 = scmp.ge.s32.totalorder %s15_s24, 26   ;;  %s1305_s18 = smov %s1096_s21 }
 0x134   : > { %s1306_s19 = smov %s1100_s22  ;;  %s1307_s20 = smov %s1104_s23 }
 0x135   : > { %s1308_s21 = smov %s1312_s25  ;;  %s1309_s22 = smov %s1316_s26 }
 0x136   :  { %14 = sbr.rel (!%p12_p11) target bundleno = 4 (0x4), region = 84 }
 0x138   : > { %s1310_s23 = smov %s1304_s9 }

// kernel: _lambda_.22
= control target key start
LH: loop header
LB: loop body
LE: loop exit
PB: predicated region body
PF: predicated region fallthrough
CT: control target
= control target key end

     0   :  { %s1336_s18 = smov 0   ;;  %s1338_s19 = smov 0   ;;  %s1491_s0 = inlined_call_operand.vmem [shape: bf16[2,6,3,128], index: 0, kind: input, shape index: {}]   ;;  %s1492_s1 = inlined_call_operand.vmem [shape: bf16[2,6,3,128], index: 1, kind: input, shape index: {}]   ;;  %s1493_s2 = inlined_call_operand.vmem [shape: bf16[9,128,256], index: 2, kind: input, shape index: {}]   ;;  %s1494_s3 = inlined_call_operand.vmem [shape: f32[1,256], index: 3, kind: input, shape index: {}]   ;;  %s1495_s4 = inlined_call_operand.vmem [shape: f32[1,256], index: 4, kind: input, shape index: {}]   ;;  %s1496_s5 = inlined_call_operand.vmem [shape: bf16[2,2,2,256], index: 5, kind: output, shape index: {}]  }
   0x1   :  { %s1340_s20 = smov 0   ;;  %s1342_s21 = smov 0  }
   0x2   :  { %s1344_s22 = smov 0   ;;  %s1346_s23 = smov 0  }
   0x3   :  { %s1348_s24 = smov 0  }
   0x4 LB: > { %s27_s25 = sadd.s32 1, %s1288_s21  ;;  %s30_s26 = sadd.s32 1, %s1292_s22  ;;  %s1300_s24 = sphi %s1348_s24, %s15_s24   ;;  %s1296_s23 = sphi %s1346_s23, %s1502_s23   ;;  %s1292_s22 = sphi %s1344_s22, %s1501_s22   ;;  %s1288_s21 = sphi %s1342_s21, %s1500_s21   ;;  %s1284_s20 = sphi %s1340_s20, %s1499_s20   ;;  %s1280_s19 = sphi %s1338_s19, %s1498_s19   ;;  %s1276_s18 = sphi %s1336_s18, %s1497_s18  }
   0x5   : > { %p28_p0 = scmp.ge.s32.totalorder %s27_s25, 3  ;;  %p1014_p1 = scmp.ge.s32.totalorder %s1300_s24, 1 }
   0x6   : > { %p244_p2 = scmp.lt.s32.totalorder %s1300_s24, 13  ;;  %s34_s27 = sadd.s32 1, %s1296_s23 }
   0x7   : > { %s1504_s25 = smov (%p28_p0, %s27_s25), 0  ;;  %s1506_s26 = smov (!%p28_p0, %s30_s26), %s1292_s22 }
   0x8   : > { %p245_p3 = pnand %p1014_p1, %p244_p2  ;;  %p32_p4 = scmp.ge.s32.totalorder %s1506_s26, 2 }
   0x9   : > { %s1015_s28 = sshll.u32 (!%p245_p3), %s1280_s19, 1  ;;  %p292_p6 = scmp.lt.s32.totalorder (!%p245_p3), %s1284_s20, 1 }
   0xa   : > { %s1508_s26 = smov (%p32_p4, %s1506_s26), 0  ;;  %s1510_s27 = smov (!%p32_p4, %s34_s27), %s1296_s23 }
   0xb   : > { %p36_p5 = scmp.ge.s32.totalorder %s1510_s27, 2  ;;  %248 = sbr.rel (%p245_p3) target bundleno = 322 (0x142), region = 40 }
   0xc   : > { %s291_s29 = sadd.s32 (!%p245_p3), %s1276_s18, %s1015_s28  ;;  %p316_p7 = scmp.lt.s32.totalorder (!%p245_p3), %s1280_s19, 1 }
   0xd   : > { %s1512_s27 = smov (%p36_p5, %s1510_s27), 0  ;;  %p294_p8 = scmp.lt.s32.totalorder (!%p245_p3), %s291_s29, 5 }
   0xe   : > { %p1021_p9 = scmp.ne.s32.totalorder (!%p245_p3), %s1276_s18, 0 }
  0x10   : > { %s1514_s20 = smov (!%p292_p6, %s1284_s20), 1  ;;  %s1516_s29 = smov (!%p294_p8, %s291_s29), 5 }
  0x11   : > { %s1113_s30 = smul.u32 6, %s1514_s20  ;;  %s1518_s19 = smov (!%p316_p7, %s1280_s19), 1 }
  0x12   : > { %s1020_s7 = sshll.u32 %s1514_s20, 2  ;;  %s1019_s9 = sshll.u32 %s1518_s19, 1 }
  0x13   : > { %s297_s6 = sadd.s32 %s1113_s30, %s1516_s29  ;;  %s1391_s16 = sadd.s32 %s1020_s7, %s1019_s9 }
  0x14   : > { %s1016_s8 = sshll.u32 %s297_s6, 1  ;;  %s321_s29 = scalar_lea.vmem %s1496_s5, %s1391_s16 }
  0x15   : > { %s1384_s12 = scalar_lea.vmem %s1491_s0, %s1016_s8  ;;  %s1389_s15 = scalar_lea.vmem %s1492_s1, %s1016_s8 }
  0x16   : > { %326 = sbr.rel (%p1021_p9) target bundleno = 29 (0x1d), region = 44 }
  0x1b   : > { %v1302_v0 = vmov 0.0  }
  0x1c   : > { %327 = vst [vmem:[#allocation2] sm:$0xf] %v1302_v0 }
  0x1d PF: > { %s1112_s19 = smul.u32 384, %s1276_s18  ;;  %v1303_v1 = vmov 0   ;;  %v330_v35 = vld [vmem:[%s1384_s12] sm:$0x1]  ;;  %p1107_p10 = scmp.ne.s32.totalorder %s1276_s18, 2 }
  0x1e   : > { %462 = vmatprep.mubr.bf16.mxu0 %v1303_v1  ;;  %616 = vmatprep.mubr.bf16.mxu1 %v1303_v1  ;;  %v483_v38 = vld [vmem:[%s1389_s15] sm:$0x1] }
  0x1f   : > { %s1404_s6 = scalar_lea.vmem %s1493_s2, %s1112_s19  ;;  %v1090_v48 = vld.sshfl [vmem:[%s1384_s12] sm:$0x3 pattern:$0x76325410] }
  0x20   : > { %v1174_v2 = vld [vmem:[%s1404_s6 + $0x74] ss:$8 sps:$4 sm:$0xff]   ;;  %v1176_v3 = vld [vmem:[%s1404_s6 + $0x70] ss:$8 sps:$4 sm:$0xff]   ;;  %v1180_v6 = vld [vmem:[%s1404_s6 + $0x64] ss:$8 sps:$4 sm:$0xff]  }
  0x21   : > { %430 = vmatprep.subr.bf16.mxu0 %v1174_v2  ;;  %v1177_v4 = vld [vmem:[%s1404_s6 + $0xf4] ss:$8 sps:$4 sm:$0xff]   ;;  %v1179_v5 = vld [vmem:[%s1404_s6 + $0xf0] ss:$8 sps:$4 sm:$0xff]   ;;  %v1182_v7 = vld [vmem:[%s1404_s6 + $0x60] ss:$8 sps:$4 sm:$0xff]  }
  0x22   : > { %431 = vmatpush1.bf16.msra.mxu0 %v1176_v3  ;;  %584 = vmatprep.subr.bf16.mxu1 %v1177_v4  ;;  %v1183_v8 = vld [vmem:[%s1404_s6 + $0xe4] ss:$8 sps:$4 sm:$0xff]   ;;  %v1185_v9 = vld [vmem:[%s1404_s6 + $0xe0] ss:$8 sps:$4 sm:$0xff]   ;;  %v1186_v10 = vld [vmem:[%s1404_s6 + $0x54] ss:$8 sps:$4 sm:$0xff]   ;;  %v477_v3 = vlaneseq }
  0x23   : > { %585 = vmatpush1.bf16.msra.mxu1 %v1179_v5  ;;  %432 = vmatprep.subr.bf16.mxu0 %v1180_v6  ;;  %v1188_v11 = vld [vmem:[%s1404_s6 + $0x50] ss:$8 sps:$4 sm:$0xff]   ;;  %v1189_v12 = vld [vmem:[%s1404_s6 + $0xd4] ss:$8 sps:$4 sm:$0xff]   ;;  %v1192_v13 = vld [vmem:[%s1404_s6 + $0x44] ss:$8 sps:$4 sm:$0xff]  }
  0x24   : > { %586 = vmatprep.subr.bf16.mxu1 %v1183_v8  ;;  %v1191_v14 = vld [vmem:[%s1404_s6 + $0xd0] ss:$8 sps:$4 sm:$0xff]   ;;  %v1195_v15 = vld [vmem:[%s1404_s6 + $0xc4] ss:$8 sps:$4 sm:$0xff]   ;;  %v1194_v16 = vld [vmem:[%s1404_s6 + $0x40] ss:$8 sps:$4 sm:$0xff]  }
  0x25   : > { %v1198_v17 = vld [vmem:[%s1404_s6 + $0x34] ss:$8 sps:$4 sm:$0xff]   ;;  %v1197_v18 = vld [vmem:[%s1404_s6 + $0xc0] ss:$8 sps:$4 sm:$0xff]   ;;  %v1200_v20 = vld [vmem:[%s1404_s6 + $0x30] ss:$8 sps:$4 sm:$0xff]  }
  0x26   : > { %433 = vmatpush1.bf16.msra.mxu0 %v1182_v7  ;;  %v1201_v19 = vld [vmem:[%s1404_s6 + $0xb4] ss:$8 sps:$4 sm:$0xff]   ;;  %v1204_v21 = vld [vmem:[%s1404_s6 + $0x24] ss:$8 sps:$4 sm:$0xff]   ;;  %v1203_v22 = vld [vmem:[%s1404_s6 + $0xb0] ss:$8 sps:$4 sm:$0xff]  }
  0x27   : > { %434 = vmatprep.subr.bf16.mxu0 %v1186_v10  ;;  %587 = vmatpush1.bf16.msra.mxu1 %v1185_v9  ;;  %v1207_v23 = vld [vmem:[%s1404_s6 + $0xa4] ss:$8 sps:$4 sm:$0xff]   ;;  %v1206_v24 = vld [vmem:[%s1404_s6 + $0x20] ss:$8 sps:$4 sm:$0xff]   ;;  %v1210_v25 = vld [vmem:[%s1404_s6 + $0x14] ss:$8 sps:$4 sm:$0xff]  }
  0x28   : > { %588 = vmatprep.subr.bf16.mxu1 %v1189_v12  ;;  %v1209_v26 = vld [vmem:[%s1404_s6 + $0xa0] ss:$8 sps:$4 sm:$0xff]   ;;  %v1213_v27 = vld [vmem:[%s1404_s6 + $0x94] ss:$8 sps:$4 sm:$0xff]   ;;  %v1212_v28 = vld [vmem:[%s1404_s6 + $0x10] ss:$8 sps:$4 sm:$0xff]  }
  0x29   : > { %v1216_v29 = vld [vmem:[%s1404_s6 + $0x4] ss:$8 sps:$4 sm:$0xff]   ;;  %v1215_v30 = vld [vmem:[%s1404_s6 + $0x90] ss:$8 sps:$4 sm:$0xff]   ;;  %v1218_v32 = vld [vmem:[%s1404_s6] ss:$8 sps:$4 sm:$0xff]  }
  0x2a   : > { %435 = vmatpush1.bf16.msra.mxu0 %v1188_v11  ;;  %v1219_v31 = vld [vmem:[%s1404_s6 + $0x84] ss:$8 sps:$4 sm:$0xff]   ;;  %v1224_v33 = vld [vmem:[%s1404_s6 + $0x174] ss:$8 sps:$4 sm:$0xff]   ;;  %v1221_v34 = vld [vmem:[%s1404_s6 + $0x80] ss:$8 sps:$4 sm:$0xff]  }
  0x2b   : > { %436 = vmatprep.subr.bf16.mxu0 %v1192_v13  ;;  %589 = vmatpush1.bf16.msra.mxu1 %v1191_v14  ;;  %v1222_v36 = vld [vmem:[%s1404_s6 + $0x170] ss:$8 sps:$4 sm:$0xff]   ;;  %v1227_v37 = vld [vmem:[%s1404_s6 + $0x164] ss:$8 sps:$4 sm:$0xff]   ;;  %v1225_v39 = vld [vmem:[%s1404_s6 + $0x160] ss:$8 sps:$4 sm:$0xff]  }
  0x2c   : > { %590 = vmatprep.subr.bf16.mxu1 %v1195_v15  ;;  %v1230_v40 = vld [vmem:[%s1404_s6 + $0x154] ss:$8 sps:$4 sm:$0xff]   ;;  %v1228_v41 = vld [vmem:[%s1404_s6 + $0x150] ss:$8 sps:$4 sm:$0xff]   ;;  %v1233_v42 = vld [vmem:[%s1404_s6 + $0x144] ss:$8 sps:$4 sm:$0xff]  }
  0x2d   : > { %v1231_v43 = vld [vmem:[%s1404_s6 + $0x140] ss:$8 sps:$4 sm:$0xff]   ;;  %v1236_v44 = vld [vmem:[%s1404_s6 + $0x134] ss:$8 sps:$4 sm:$0xff]   ;;  %v1234_v45 = vld [vmem:[%s1404_s6 + $0x130] ss:$8 sps:$4 sm:$0xff]  }
  0x2e   : > { %437 = vmatpush1.bf16.msra.mxu0 %v1194_v16  ;;  %v1239_v46 = vld [vmem:[%s1404_s6 + $0x124] ss:$8 sps:$4 sm:$0xff]   ;;  %v1237_v47 = vld [vmem:[%s1404_s6 + $0x120] ss:$8 sps:$4 sm:$0xff]   ;;  %v1242_v49 = vld [vmem:[%s1404_s6 + $0x114] ss:$8 sps:$4 sm:$0xff]  }
  0x2f   : > { %438 = vmatprep.subr.bf16.mxu0 %v1198_v17  ;;  %591 = vmatpush1.bf16.msra.mxu1 %v1197_v18  ;;  %v669_v50 = vshll.u32 %v1090_v48, 16  ;;  %v1240_v51 = vld [vmem:[%s1404_s6 + $0x110] ss:$8 sps:$4 sm:$0xff]   ;;  %v1245_v52 = vld [vmem:[%s1404_s6 + $0x104] ss:$8 sps:$4 sm:$0xff]   ;;  %v667_v53 = vshrl.u32 %v1090_v48, 16 }
  0x30   : > { %592 = vmatprep.subr.bf16.mxu1 %v1201_v19  ;;  %v1243_v55 = vld [vmem:[%s1404_s6 + $0x100] ss:$8 sps:$4 sm:$0xff]   ;;  %v478_v5 = vshrl.u32 %v477_v3, 7 }
  0x31   : > { %v671_v54 = vrot.slane %v669_v50, 1  ;;  %v328_v10 = vld [vmem:[#allocation2] sm:$0xf] }
  0x32   : > { %439 = vmatpush1.bf16.msra.mxu0 %v1200_v20 }
  0x33   : > { %440 = vmatprep.subr.bf16.mxu0 %v1204_v21  ;;  %593 = vmatpush1.bf16.msra.mxu1 %v1203_v22  ;;  %v672_v56 = vor.u32 %v671_v54, %v667_v53 }
  0x34   : > { %594 = vmatprep.subr.bf16.mxu1 %v1207_v23 }
  0x36   : > { %441 = vmatpush1.bf16.msra.mxu0 %v1206_v24 }
  0x37   : > { %442 = vmatprep.subr.bf16.mxu0 %v1210_v25  ;;  %595 = vmatpush1.bf16.msra.mxu1 %v1209_v26 }
  0x38   : > { %596 = vmatprep.subr.bf16.mxu1 %v1213_v27 }
  0x3a   : > { %443 = vmatpush1.bf16.msra.mxu0 %v1212_v28 }
  0x3b   : > { %444 = vmatprep.subr.bf16.mxu0 %v1216_v29  ;;  %597 = vmatpush1.bf16.msra.mxu1 %v1215_v30 }
  0x3c   : > { %598 = vmatprep.subr.bf16.mxu1 %v1219_v31 }
  0x3e   : > { %445 = vmatpush1.bf16.msra.mxu0 %v1218_v32 }
  0x3f   : > { %754 = vmatprep.subr.bf16.mxu0 %v1224_v33  ;;  %599 = vmatpush1.bf16.msra.mxu1 %v1221_v34 }
  0x41   : > { %463 = vmatmul.mubr.bf16.vlgmr.msra.gmra.mxu0 %v330_v35 }
  0x42   : > { %755 = vmatpush1.bf16.msra.mxu0 %v1222_v36  ;;  %786 = vmatprep.mubr.bf16.mxu0 %v1303_v1  ;;  %v1304_v1 = vmov 1983009808  }
  0x43   : > { %617 = vmatmul.mubr.bf16.vlgmr.msra.gmra.mxu1 %v483_v38  ;;  %756 = vmatprep.subr.bf16.mxu0 %v1227_v37  ;;  %v475_v2 = vunpack.c.l.s4 %v1304_v1 }
  0x45   : > { %v476_v4 = vunpack.c.0.s8 %v475_v2 }
  0x46   : > { %757 = vmatpush1.bf16.msra.mxu0 %v1225_v39 }
  0x47   : > { %758 = vmatprep.subr.bf16.mxu0 %v1230_v40  ;;  %v479_v7 = vsub.s32 %v476_v4, %v478_v5 }
  0x4a   : > { %759 = vmatpush1.bf16.msra.mxu0 %v1228_v41 }
  0x4b   : > { %760 = vmatprep.subr.bf16.mxu0 %v1233_v42 }
  0x4e   : > { %761 = vmatpush1.bf16.msra.mxu0 %v1231_v43 }
  0x4f   : > { %762 = vmatprep.subr.bf16.mxu0 %v1236_v44 }
  0x52   : > { %763 = vmatpush1.bf16.msra.mxu0 %v1234_v45 }
  0x53   : > { %764 = vmatprep.subr.bf16.mxu0 %v1239_v46 }
  0x56   : > { %765 = vmatpush1.bf16.msra.mxu0 %v1237_v47 }
  0x57   : > { %766 = vmatprep.subr.bf16.mxu0 %v1242_v49 }
  0x5a   : > { %767 = vmatpush1.bf16.msra.mxu0 %v1240_v51 }
  0x5b   : > { %768 = vmatprep.subr.bf16.mxu0 %v1245_v52 }
  0x5e   : > { %769 = vmatpush1.bf16.msra.mxu0 %v1243_v55 }
  0x61   : > { %787 = vmatmul.mubr.bf16.vlgmr.msra.gmra.mxu0 %v672_v56 }
 0x101   : > { %v464_v57 = vpop.f32.mrf.mxu0 }
 0x103   : > { %v466_v58 = vpop.f32.mrf.mxu0  ;;  %v618_v59 = vpop.f32.mrf.mxu1 }
 0x104   : > { %v473_v6 = vcombine.low %v464_v57, %v466_v58 }
 0x105   : > { %v468_v60 = vpop.f32.mrf.mxu0  ;;  %v620_v61 = vpop.f32.mrf.mxu1 }
 0x106   : > { %v480_v8 = vrot.slane %v473_v6, %v479_v7  ;;  %v627_v9 = vcombine.low %v618_v59, %v620_v61 }
 0x107   : > { %v469_v62 = vpop.f32.mrf.mxu0  ;;  %v622_v63 = vpop.f32.mrf.mxu1 }
 0x108   : > { %v482_v12 = vadd.f32 %v480_v8, %v328_v10  ;;  %v634_v13 = vrot.slane %v627_v9, %v479_v7 }
 0x109   : > { %v623_v0 = vpop.f32.mrf.mxu1 }
 0x10a   : > { %v636_v17 = vadd.f32 %v634_v13, %v482_v12 }
 0x121   : > { %v788_v11 = vpop.f32.mrf.mxu0 }
 0x123   : > { %v790_v14 = vpop.f32.mrf.mxu0 }
 0x124   : > { %v797_v15 = vcombine.low %v788_v11, %v790_v14 }
 0x125   : > { %v792_v16 = vpop.f32.mrf.mxu0 }
 0x126   : > { %v804_v18 = vrot.slane %v797_v15, %v479_v7  ;;  %811 = sbr.rel (%p1107_p10) target bundleno = 322 (0x142), region = 48 }
 0x127   : > { %v793_v19 = vpop.f32.mrf.mxu0 }
 0x128   : > { %v806_v20 = vadd.f32 %v804_v18, %v636_v17 }
 0x12a   : > { %807 = vst [vmem:[#allocation2] sm:$0xf] %v806_v20 }
 0x12b   : > { %v813_v21 = vld [vmem:[%s1494_s3] sm:$0x3]  ;;  %v817_v22 = vsub.s32 0, %v478_v5  ;;  %v821_v23 = vsub.s32 1, %v478_v5  ;;  %v1305_v35 = vmov 1966171168  }
 0x12c   : > { %v833_v24 = vld [vmem:[%s1495_s4] sm:$0x3]  ;;  %v871_v36 = vunpack.c.l.s4 %v1305_v35 }
 0x12d   : > { %v818_v25 = vrot.slane %v813_v21, %v817_v22  ;;  %v822_v26 = vrot.slane %v813_v21, %v821_v23  ;;  %v838_v27 = vrot.slane %v833_v24, %v817_v22  ;;  %v842_v28 = vrot.slane %v833_v24, %v821_v23 }
 0x12e   : > { %v872_v39 = vunpack.c.0.s8 %v871_v36 }
 0x12f   : > { %v823_v29 = vcombine.low %v818_v25, %v822_v26  ;;  %v843_v30 = vcombine.low %v838_v27, %v842_v28 }
 0x130   : > { %v875_v42 = vsub.s32 %v872_v39, %v478_v5 }
 0x131   : > { %v812_v31 = vld [vmem:[#allocation2] sm:$0xf]  ;;  %v830_v32 = vrot.slane %v823_v29, %v479_v7  ;;  %v850_v33 = vrot.slane %v843_v30, %v479_v7 }
 0x133   : > { %v832_v34 = vmul.f32 %v830_v32, %v812_v31 }
 0x135   : > { %v852_v37 = vadd.f32 %v850_v33, %v832_v34 }
 0x137   : > { %v853_v38 = vmax.f32 %v852_v37, 0.0 }
 0x139   : > { %v861_v40 = vrot.slane %v853_v38, %v479_v7 }
 0x13b   : > { %v862_v41 = vcombine.high %v861_v40, %v861_v40 }
 0x13d   : > { %v1108_v43 = vpack.c.bf16 %v862_v41, %v861_v40 }
 0x13f   : > { %v876_v44 = vrot.slane %v1108_v43, %v875_v42 }
 0x141   : > { %1109 = vst.sshfl [vmem:[%s321_s29] sm:$0x5 pattern:$0x73625140] %v876_v44 }
 0x142 PF: > { %s15_s24 = sadd.s32 1, %s1300_s24   ;;  %s1497_s18 = smov %s1288_s21 }
 0x143   : > { %p12_p11 = scmp.ge.s32.totalorder %s15_s24, 14   ;;  %s1498_s19 = smov %s1292_s22 }
 0x144   : > { %s1499_s20 = smov %s1296_s23  ;;  %s1500_s21 = smov %s1504_s25 }
 0x145   : > { %s1501_s22 = smov %s1508_s26  ;;  %s1502_s23 = smov %s1512_s27 }
 0x146   :  { %14 = sbr.rel (!%p12_p11) target bundleno = 4 (0x4), region = 84 }

// kernel: _lambda_.21
= control target key start
LH: loop header
LB: loop body
LE: loop exit
PB: predicated region body
PF: predicated region fallthrough
CT: control target
= control target key end

     0   :  { %s740_s15 = smov 0   ;;  %s742_s16 = smov 0   ;;  %s861_s0 = inlined_call_operand.vmem [shape: bf16[2,4,2,128], index: 0, kind: input, shape index: {}]   ;;  %s862_s1 = inlined_call_operand.vmem [shape: bf16[1,128,256], index: 1, kind: input, shape index: {}]   ;;  %s863_s2 = inlined_call_operand.vmem [shape: f32[1,256], index: 2, kind: input, shape index: {}]   ;;  %s864_s3 = inlined_call_operand.vmem [shape: f32[1,256], index: 3, kind: input, shape index: {}]   ;;  %s865_s4 = inlined_call_operand.vmem [shape: bf16[2,2,2,256], index: 4, kind: output, shape index: {}]  }
   0x1   :  { %s744_s17 = smov 0   ;;  %s746_s18 = smov 0  }
   0x2   :  { %s748_s19 = smov 0  }
   0x3 LB: > { %s29_s20 = sadd.s32 1, %s701_s17  ;;  %s33_s21 = sadd.s32 1, %s705_s18  ;;  %s709_s19 = sphi %s748_s19, %s14_s19   ;;  %s705_s18 = sphi %s746_s18, %s869_s18   ;;  %s701_s17 = sphi %s744_s17, %s868_s17   ;;  %s697_s16 = sphi %s742_s16, %s867_s16   ;;  %s693_s15 = sphi %s740_s15, %s866_s15  }
   0x4   : > { %p31_p0 = scmp.ge.s32.totalorder %s29_s20, 2  ;;  %p578_p1 = scmp.ge.s32.totalorder %s709_s19, 1 }
   0x5   : > { %p195_p2 = scmp.lt.s32.totalorder %s709_s19, 5 }
   0x6   : > { %s871_s20 = smov (%p31_p0, %s29_s20), 0  ;;  %s873_s21 = smov (!%p31_p0, %s33_s21), %s705_s18 }
   0x7   : > { %p196_p3 = pnand %p578_p1, %p195_p2  ;;  %p35_p4 = scmp.ge.s32.totalorder %s873_s21, 2 }
   0x8   : > { %s579_s14 = sshll.u32 (!%p196_p3), %s693_s15, 1  ;;  %p230_p5 = scmp.lt.s32.totalorder (!%p196_p3), %s697_s16, 1 }
   0x9   : > { %s875_s21 = smov (%p35_p4, %s873_s21), 0  ;;  %199 = sbr.rel (%p196_p3) target bundleno = 269 (0x10d), region = 36 }
   0xa   : > { %p232_p6 = scmp.lt.s32.totalorder (!%p196_p3), %s579_s14, 3  ;;  %p241_p7 = scmp.lt.s32.totalorder (!%p196_p3), %s693_s15, 1 }
   0xe   : > { %v647_v0 = vld [vmem:[%s862_s1 + $0x74] ss:$8 sps:$4 sm:$0xff]   ;;  %v649_v1 = vld [vmem:[%s862_s1 + $0x70] ss:$8 sps:$4 sm:$0xff]   ;;  %v711_v2 = vmov 0   ;;  %s877_s16 = smov (!%p230_p5, %s697_s16), 1  ;;  %v401_v21 = vlaneseq }
   0xf   : > { %386 = vmatprep.mubr.bf16.mxu0 %v711_v2  ;;  %354 = vmatprep.subr.bf16.mxu0 %v647_v0  ;;  %v650_v3 = vld [vmem:[%s862_s1 + $0x64] ss:$8 sps:$4 sm:$0xff]   ;;  %v652_v4 = vld [vmem:[%s862_s1 + $0x60] ss:$8 sps:$4 sm:$0xff]   ;;  %v653_v5 = vld [vmem:[%s862_s1 + $0x54] ss:$8 sps:$4 sm:$0xff]  }
  0x10   : > { %355 = vmatpush1.bf16.msra.mxu0 %v649_v1  ;;  %v655_v6 = vld [vmem:[%s862_s1 + $0x50] ss:$8 sps:$4 sm:$0xff]   ;;  %v656_v7 = vld [vmem:[%s862_s1 + $0x44] ss:$8 sps:$4 sm:$0xff]   ;;  %v658_v8 = vld [vmem:[%s862_s1 + $0x40] ss:$8 sps:$4 sm:$0xff]  }
  0x11   : > { %356 = vmatprep.subr.bf16.mxu0 %v650_v3  ;;  %v659_v9 = vld [vmem:[%s862_s1 + $0x34] ss:$8 sps:$4 sm:$0xff]   ;;  %v661_v10 = vld [vmem:[%s862_s1 + $0x30] ss:$8 sps:$4 sm:$0xff]   ;;  %v662_v11 = vld [vmem:[%s862_s1 + $0x24] ss:$8 sps:$4 sm:$0xff]  }
  0x12   : > { %v664_v12 = vld [vmem:[%s862_s1 + $0x20] ss:$8 sps:$4 sm:$0xff]   ;;  %v665_v13 = vld [vmem:[%s862_s1 + $0x14] ss:$8 sps:$4 sm:$0xff]   ;;  %s879_s14 = smov (!%p232_p6, %s579_s14), 3  ;;  %s580_s30 = sshll.u32 %s877_s16, 2 }
  0x13   : > { %v667_v14 = vld [vmem:[%s862_s1 + $0x10] ss:$8 sps:$4 sm:$0xff]   ;;  %v668_v15 = vld [vmem:[%s862_s1 + $0x4] ss:$8 sps:$4 sm:$0xff]   ;;  %s235_s9 = sadd.s32 %s580_s30, %s879_s14  ;;  %v670_v16 = vld [vmem:[%s862_s1] ss:$8 sps:$4 sm:$0xff]  }
  0x14   : > { %357 = vmatpush1.bf16.msra.mxu0 %v652_v4  ;;  %s236_s22 = scalar_lea.vmem %s861_s0, %s235_s9  ;;  %v712_v18 = vmov 0.0   ;;  %v713_v19 = vmov 1983009808   ;;  %v402_v23 = vshrl.u32 %v401_v21, 7  ;;  %v412_v29 = vld [vmem:[%s863_s2] sm:$0x3] }
  0x15   : > { %358 = vmatprep.subr.bf16.mxu0 %v653_v5  ;;  %v254_v17 = vld [vmem:[%s236_s22] sm:$0x1]  ;;  %252 = vst [vmem:[#allocation2] sm:$0xf] %v712_v18  ;;  %v399_v20 = vunpack.c.l.s4 %v713_v19  ;;  %v714_v45 = vmov 1966171168  }
  0x16   : > { %v416_v26 = vsub.s32 0, %v402_v23  ;;  %v420_v27 = vsub.s32 1, %v402_v23  ;;  %v432_v32 = vld [vmem:[%s864_s3] sm:$0x3]  ;;  %v469_v46 = vunpack.c.l.s4 %v714_v45  ;;  %s881_s15 = smov (!%p241_p7, %s693_s15), 1 }
  0x17   : > { %v400_v22 = vunpack.c.0.s8 %v399_v20  ;;  %s581_s26 = sshll.u32 %s881_s15, 1 }
  0x18   : > { %359 = vmatpush1.bf16.msra.mxu0 %v655_v6  ;;  %v417_v35 = vrot.slane %v412_v29, %v416_v26  ;;  %v421_v36 = vrot.slane %v412_v29, %v420_v27  ;;  %v437_v39 = vrot.slane %v432_v32, %v416_v26  ;;  %v441_v40 = vrot.slane %v432_v32, %v420_v27  ;;  %s245_s27 = sadd.s32 %s581_s26, %s580_s30 }
  0x19   : > { %360 = vmatprep.subr.bf16.mxu0 %v656_v7  ;;  %v403_v25 = vsub.s32 %v400_v22, %v402_v23  ;;  %v470_v50 = vunpack.c.0.s8 %v469_v46  ;;  %s246_s5 = scalar_lea.vmem %s865_s4, %s245_s27 }
  0x1a   : > { %v422_v41 = vcombine.low %v417_v35, %v421_v36  ;;  %v442_v42 = vcombine.low %v437_v39, %v441_v40 }
  0x1b   : > { %v473_v53 = vsub.s32 %v470_v50, %v402_v23 }
  0x1c   : > { %361 = vmatpush1.bf16.msra.mxu0 %v658_v8  ;;  %v253_v31 = vld [vmem:[#allocation2] sm:$0xf]  ;;  %v429_v43 = vrot.slane %v422_v41, %v403_v25  ;;  %v449_v44 = vrot.slane %v442_v42, %v403_v25 }
  0x1d   : > { %362 = vmatprep.subr.bf16.mxu0 %v659_v9 }
  0x20   : > { %363 = vmatpush1.bf16.msra.mxu0 %v661_v10 }
  0x21   : > { %364 = vmatprep.subr.bf16.mxu0 %v662_v11 }
  0x24   : > { %365 = vmatpush1.bf16.msra.mxu0 %v664_v12 }
  0x25   : > { %366 = vmatprep.subr.bf16.mxu0 %v665_v13 }
  0x28   : > { %367 = vmatpush1.bf16.msra.mxu0 %v667_v14 }
  0x29   : > { %368 = vmatprep.subr.bf16.mxu0 %v668_v15 }
  0x2c   : > { %369 = vmatpush1.bf16.msra.mxu0 %v670_v16 }
  0x2f   : > { %387 = vmatmul.mubr.bf16.vlgmr.msra.gmra.mxu0 %v254_v17 }
  0xef   : > { %v388_v24 = vpop.f32.mrf.mxu0 }
  0xf1   : > { %v390_v28 = vpop.f32.mrf.mxu0 }
  0xf2   : > { %v397_v30 = vcombine.low %v388_v24, %v390_v28 }
  0xf3   : > { %v392_v33 = vpop.f32.mrf.mxu0 }
  0xf4   : > { %v404_v34 = vrot.slane %v397_v30, %v403_v25 }
  0xf5   : > { %v393_v37 = vpop.f32.mrf.mxu0 }
  0xf6   : > { %v406_v38 = vadd.f32 %v404_v34, %v253_v31 }
  0xf8   : > { %407 = vst [vmem:[#allocation2] sm:$0xf] %v406_v38 }
  0xff   : > { %v411_v47 = vld [vmem:[#allocation2] sm:$0xf] }
 0x100   : > { %v431_v48 = vmul.f32 %v429_v43, %v411_v47 }
 0x102   : > { %v451_v49 = vadd.f32 %v449_v44, %v431_v48 }
 0x104   : > { %v459_v51 = vrot.slane %v451_v49, %v403_v25 }
 0x106   : > { %v460_v52 = vcombine.high %v459_v51, %v459_v51 }
 0x108   : > { %v599_v54 = vpack.c.bf16 %v460_v52, %v459_v51 }
 0x10a   : > { %v474_v55 = vrot.slane %v599_v54, %v473_v53 }
 0x10c   : > { %600 = vst.sshfl [vmem:[%s246_s5] sm:$0x5 pattern:$0x73625140] %v474_v55 }
 0x10d PF: > { %s14_s19 = sadd.s32 1, %s709_s19   ;;  %s866_s15 = smov %s701_s17 }
 0x10e   : > { %p11_p8 = scmp.ge.s32.totalorder %s14_s19, 6   ;;  %s867_s16 = smov %s705_s18 }
 0x10f   : > { %s868_s17 = smov %s871_s20  ;;  %s869_s18 = smov %s875_s21 }
 0x110   :  { %13 = sbr.rel (!%p11_p8) target bundleno = 3 (0x3), region = 75 }

// kernel: _lambda_.23
= control target key start
LH: loop header
LB: loop body
LE: loop exit
PB: predicated region body
PF: predicated region fallthrough
CT: control target
= control target key end

     0   :  { %s1792_s18 = smov 0   ;;  %s1794_s19 = smov 0   ;;  %s2017_s0 = inlined_call_operand.vmem [shape: bf16[2,4,4,256], index: 0, kind: input, shape index: {}]   ;;  %s2018_s1 = inlined_call_operand.vmem [shape: bf16[9,256,256], index: 1, kind: input, shape index: {}]   ;;  %s2019_s2 = inlined_call_operand.vmem [shape: f32[1,256], index: 2, kind: input, shape index: {}]   ;;  %s2020_s3 = inlined_call_operand.vmem [shape: f32[1,256], index: 3, kind: input, shape index: {}]   ;;  %s2021_s4 = inlined_call_operand.vmem [shape: bf16[2,2,2,256], index: 4, kind: input, shape index: {}]   ;;  %s2022_s5 = inlined_call_operand.vmem [shape: bf16[2,2,2,256], index: 5, kind: output, shape index: {}]  }
   0x1   :  { %s1796_s20 = smov 0   ;;  %s1798_s21 = smov 0  }
   0x2   :  { %s1800_s22 = smov 0   ;;  %s1802_s23 = smov 0  }
   0x3   :  { %s1804_s24 = smov 0  }
   0x4 LB: > { %s27_s25 = sadd.s32 1, %s1745_s21  ;;  %s30_s26 = sadd.s32 1, %s1749_s22  ;;  %s1757_s24 = sphi %s1804_s24, %s15_s24   ;;  %s1753_s23 = sphi %s1802_s23, %s2028_s23   ;;  %s1749_s22 = sphi %s1800_s22, %s2027_s22   ;;  %s1745_s21 = sphi %s1798_s21, %s2026_s21   ;;  %s1741_s20 = sphi %s1796_s20, %s2025_s20   ;;  %s1737_s19 = sphi %s1794_s19, %s2024_s19   ;;  %s1733_s18 = sphi %s1792_s18, %s2023_s18  }
   0x5   : > { %p28_p0 = scmp.ge.s32.totalorder %s27_s25, 3  ;;  %p1318_p1 = scmp.ge.s32.totalorder %s1757_s24, 1 }
   0x6   : > { %p233_p2 = scmp.lt.s32.totalorder %s1757_s24, 13  ;;  %s34_s27 = sadd.s32 1, %s1753_s23 }
   0x7   : > { %s2030_s25 = smov (%p28_p0, %s27_s25), 0  ;;  %s2032_s26 = smov (!%p28_p0, %s30_s26), %s1749_s22 }
   0x8   : > { %p234_p3 = pnand %p1318_p1, %p233_p2  ;;  %p32_p4 = scmp.ge.s32.totalorder %s2032_s26, 2 }
   0x9   : > { %s277_s28 = sadd.s32 (!%p234_p3), %s1733_s18, %s1737_s19  ;;  %p278_p6 = scmp.lt.s32.totalorder (!%p234_p3), %s1741_s20, 1 }
   0xa   : > { %s2034_s26 = smov (%p32_p4, %s2032_s26), 0  ;;  %s2036_s27 = smov (!%p32_p4, %s34_s27), %s1753_s23 }
   0xb   : > { %p36_p5 = scmp.ge.s32.totalorder %s2036_s27, 2  ;;  %237 = sbr.rel (%p234_p3) target bundleno = 387 (0x183), region = 40 }
   0xc   : > { %p280_p7 = scmp.lt.s32.totalorder (!%p234_p3), %s277_s28, 3  ;;  %p290_p8 = scmp.lt.s32.totalorder (!%p234_p3), %s1737_s19, 1 }
   0xd   : > { %s2038_s27 = smov (%p36_p5, %s2036_s27), 0  ;;  %p1326_p9 = scmp.ne.s32.totalorder (!%p234_p3), %s1733_s18, 0 }
  0x10   : > { %s2040_s20 = smov (!%p278_p6, %s1741_s20), 1  ;;  %s2042_s28 = smov (!%p280_p7, %s277_s28), 3 }
  0x11   : > { %s1320_s29 = sshll.u32 %s2040_s20, 3  ;;  %s1319_s30 = sshll.u32 %s2042_s28, 1 }
  0x12   : > { %s284_s6 = sadd.s32 %s1320_s29, %s1319_s30  ;;  %s1323_s11 = sshll.u32 %s2040_s20, 2 }
  0x13   : > { %s1321_s7 = sshll.u32 %s284_s6, 1  ;;  %s2044_s19 = smov (!%p290_p8, %s1737_s19), 1 }
  0x14   : > { %s1844_s10 = scalar_lea.vmem %s2017_s0, %s1321_s7  ;;  %s1322_s12 = sshll.u32 %s2044_s19, 1 }
  0x15   : > { %s1847_s13 = sadd.s32 %s1323_s11, %s1322_s12  ;;  %307 = sbr.rel (%p1326_p9) target bundleno = 28 (0x1c), region = 44 }
  0x16   : > { %s295_s16 = scalar_lea.vmem %s2021_s4, %s1847_s13  ;;  %s303_s29 = scalar_lea.vmem %s2022_s5, %s1847_s13 }
  0x1a   : > { %v1759_v0 = vmov 0.0  }
  0x1b   : > { %308 = vst [vmem:[#allocation2] sm:$0xf] %v1759_v0 }
  0x1c PF: > { %s1499_s19 = smul.u32 768, %s1733_s18  ;;  %v1860_v1 = vld.sshfl [vmem:[%s1844_s10] sm:$0x11 pattern:$0x76325410]  ;;  %p1494_p10 = scmp.ne.s32.totalorder %s1733_s18, 2 }
  0x1d   : > { %v355_v2 = vcombine.high %v1860_v1, %v1860_v1  ;;  %v1865_v3 = vld.sshfl [vmem:[%s1844_s10] sm:$0x33 pattern:$0x76325410] }
  0x1e   : > { %s1870_s6 = scalar_lea.vmem %s2018_s1, %s1499_s19  ;;  %v616_v4 = vcombine.high %v1865_v3, %v1865_v3 }
  0x1f   : > { %v1559_v5 = vld [vmem:[%s1870_s6 + $0x74] ss:$8 sps:$4 sm:$0xff]   ;;  %550 = vmatprep.mubr.bf16.mxu0 %v355_v2  ;;  %v1561_v6 = vld [vmem:[%s1870_s6 + $0x70] ss:$8 sps:$4 sm:$0xff]   ;;  %v1565_v11 = vld [vmem:[%s1870_s6 + $0x64] ss:$8 sps:$4 sm:$0xff]  }
  0x20   : > { %v625_v7 = vshrl.u32 %v616_v4, 16  ;;  %v627_v8 = vshll.u32 %v616_v4, 16  ;;  %518 = vmatprep.subr.bf16.mxu0 %v1559_v5  ;;  %v1562_v9 = vld [vmem:[%s1870_s6 + $0x174] ss:$8 sps:$4 sm:$0xff]   ;;  %v1564_v10 = vld [vmem:[%s1870_s6 + $0x170] ss:$8 sps:$4 sm:$0xff]  }
  0x21   : > { %519 = vmatpush1.bf16.msra.mxu0 %v1561_v6  ;;  %v1567_v12 = vld [vmem:[%s1870_s6 + $0x60] ss:$8 sps:$4 sm:$0xff]   ;;  %793 = vmatprep.subr.bf16.mxu1 %v1562_v9  ;;  %v1568_v14 = vld [vmem:[%s1870_s6 + $0x164] ss:$8 sps:$4 sm:$0xff]   ;;  %v1571_v17 = vld [vmem:[%s1870_s6 + $0x54] ss:$8 sps:$4 sm:$0xff]  }
  0x22   : > { %v629_v13 = vrot.slane %v627_v8, 1  ;;  %794 = vmatpush1.bf16.msra.mxu1 %v1564_v10  ;;  %520 = vmatprep.subr.bf16.mxu0 %v1565_v11  ;;  %v1570_v15 = vld [vmem:[%s1870_s6 + $0x160] ss:$8 sps:$4 sm:$0xff]   ;;  %v1573_v18 = vld [vmem:[%s1870_s6 + $0x50] ss:$8 sps:$4 sm:$0xff]   ;;  %v620_v8 = vshll.u32 %v1865_v3, 16 }
  0x23   : > { %795 = vmatprep.subr.bf16.mxu1 %v1568_v14  ;;  %v1574_v19 = vld [vmem:[%s1870_s6 + $0x154] ss:$8 sps:$4 sm:$0xff]   ;;  %v1577_v20 = vld [vmem:[%s1870_s6 + $0x44] ss:$8 sps:$4 sm:$0xff]   ;;  %v1576_v21 = vld [vmem:[%s1870_s6 + $0x150] ss:$8 sps:$4 sm:$0xff]  }
  0x24   : > { %v630_v16 = vor.u32 %v629_v13, %v625_v7  ;;  %v1580_v22 = vld [vmem:[%s1870_s6 + $0x144] ss:$8 sps:$4 sm:$0xff]   ;;  %v1579_v23 = vld [vmem:[%s1870_s6 + $0x40] ss:$8 sps:$4 sm:$0xff]   ;;  %v1583_v24 = vld [vmem:[%s1870_s6 + $0x34] ss:$8 sps:$4 sm:$0xff]  }
  0x25   : > { %521 = vmatpush1.bf16.msra.mxu0 %v1567_v12  ;;  %v1582_v25 = vld [vmem:[%s1870_s6 + $0x140] ss:$8 sps:$4 sm:$0xff]   ;;  %v1586_v26 = vld [vmem:[%s1870_s6 + $0x134] ss:$8 sps:$4 sm:$0xff]   ;;  %v1585_v27 = vld [vmem:[%s1870_s6 + $0x30] ss:$8 sps:$4 sm:$0xff]  }
  0x26   : > { %825 = vmatprep.mubr.bf16.mxu1 %v630_v16  ;;  %522 = vmatprep.subr.bf16.mxu0 %v1571_v17  ;;  %v1589_v28 = vld [vmem:[%s1870_s6 + $0x24] ss:$8 sps:$4 sm:$0xff]   ;;  %v1588_v29 = vld [vmem:[%s1870_s6 + $0x130] ss:$8 sps:$4 sm:$0xff]   ;;  %v1591_v31 = vld [vmem:[%s1870_s6 + $0x20] ss:$8 sps:$4 sm:$0xff]  }
  0x27   : > { %796 = vmatpush1.bf16.msra.mxu1 %v1570_v15  ;;  %v1592_v30 = vld [vmem:[%s1870_s6 + $0x124] ss:$8 sps:$4 sm:$0xff]   ;;  %v1595_v32 = vld [vmem:[%s1870_s6 + $0x14] ss:$8 sps:$4 sm:$0xff]   ;;  %v1594_v33 = vld [vmem:[%s1870_s6 + $0x120] ss:$8 sps:$4 sm:$0xff]  }
  0x28   : > { %797 = vmatprep.subr.bf16.mxu1 %v1574_v19  ;;  %v1598_v34 = vld [vmem:[%s1870_s6 + $0x114] ss:$8 sps:$4 sm:$0xff]   ;;  %v1597_v35 = vld [vmem:[%s1870_s6 + $0x10] ss:$8 sps:$4 sm:$0xff]   ;;  %v1601_v36 = vld [vmem:[%s1870_s6 + $0x4] ss:$8 sps:$4 sm:$0xff]  }
  0x29   : > { %523 = vmatpush1.bf16.msra.mxu0 %v1573_v18  ;;  %v1600_v37 = vld [vmem:[%s1870_s6 + $0x110] ss:$8 sps:$4 sm:$0xff]   ;;  %v1604_v38 = vld [vmem:[%s1870_s6 + $0x104] ss:$8 sps:$4 sm:$0xff]   ;;  %v1603_v39 = vld [vmem:[%s1870_s6] ss:$8 sps:$4 sm:$0xff]  }
  0x2a   : > { %524 = vmatprep.subr.bf16.mxu0 %v1577_v20  ;;  %v1607_v40 = vld [vmem:[%s1870_s6 + $0xf4] ss:$8 sps:$4 sm:$0xff]   ;;  %v1606_v41 = vld [vmem:[%s1870_s6 + $0x100] ss:$8 sps:$4 sm:$0xff]   ;;  %v1609_v43 = vld [vmem:[%s1870_s6 + $0xf0] ss:$8 sps:$4 sm:$0xff]  }
  0x2b   : > { %798 = vmatpush1.bf16.msra.mxu1 %v1576_v21  ;;  %v1610_v42 = vld [vmem:[%s1870_s6 + $0x1f4] ss:$8 sps:$4 sm:$0xff]   ;;  %v1613_v44 = vld [vmem:[%s1870_s6 + $0xe4] ss:$8 sps:$4 sm:$0xff]   ;;  %v1612_v45 = vld [vmem:[%s1870_s6 + $0x1f0] ss:$8 sps:$4 sm:$0xff]  }
  0x2c   : > { %799 = vmatprep.subr.bf16.mxu1 %v1580_v22  ;;  %v1616_v46 = vld [vmem:[%s1870_s6 + $0x1e4] ss:$8 sps:$4 sm:$0xff]   ;;  %v1615_v47 = vld [vmem:[%s1870_s6 + $0xe0] ss:$8 sps:$4 sm:$0xff]   ;;  %v1619_v48 = vld [vmem:[%s1870_s6 + $0xd4] ss:$8 sps:$4 sm:$0xff]  }
  0x2d   : > { %525 = vmatpush1.bf16.msra.mxu0 %v1579_v23  ;;  %v1618_v49 = vld [vmem:[%s1870_s6 + $0x1e0] ss:$8 sps:$4 sm:$0xff]   ;;  %v1622_v50 = vld [vmem:[%s1870_s6 + $0x1d4] ss:$8 sps:$4 sm:$0xff]   ;;  %v1621_v51 = vld [vmem:[%s1870_s6 + $0xd0] ss:$8 sps:$4 sm:$0xff]  }
  0x2e   : > { %526 = vmatprep.subr.bf16.mxu0 %v1583_v24  ;;  %v1625_v52 = vld [vmem:[%s1870_s6 + $0xc4] ss:$8 sps:$4 sm:$0xff]   ;;  %v1624_v53 = vld [vmem:[%s1870_s6 + $0x1d0] ss:$8 sps:$4 sm:$0xff]   ;;  %v1627_v55 = vld [vmem:[%s1870_s6 + $0xc0] ss:$8 sps:$4 sm:$0xff]  }
  0x2f   : > { %800 = vmatpush1.bf16.msra.mxu1 %v1582_v25  ;;  %v1628_v54 = vld [vmem:[%s1870_s6 + $0x1c4] ss:$8 sps:$4 sm:$0xff]   ;;  %v1631_v56 = vld [vmem:[%s1870_s6 + $0xb4] ss:$8 sps:$4 sm:$0xff]   ;;  %v1630_v57 = vld [vmem:[%s1870_s6 + $0x1c0] ss:$8 sps:$4 sm:$0xff]  }
  0x30   : > { %801 = vmatprep.subr.bf16.mxu1 %v1586_v26  ;;  %v1634_v58 = vld [vmem:[%s1870_s6 + $0x1b4] ss:$8 sps:$4 sm:$0xff]   ;;  %v1633_v59 = vld [vmem:[%s1870_s6 + $0xb0] ss:$8 sps:$4 sm:$0xff]   ;;  %v1637_v60 = vld [vmem:[%s1870_s6 + $0xa4] ss:$8 sps:$4 sm:$0xff]  }
  0x31   : > { %527 = vmatpush1.bf16.msra.mxu0 %v1585_v27  ;;  %v1636_v61 = vld [vmem:[%s1870_s6 + $0x1b0] ss:$8 sps:$4 sm:$0xff]   ;;  %v1640_v62 = vld [vmem:[%s1870_s6 + $0x1a4] ss:$8 sps:$4 sm:$0xff]   ;;  %v1639_v63 = vld [vmem:[%s1870_s6 + $0xa0] ss:$8 sps:$4 sm:$0xff]  }
  0x32   : > { %528 = vmatprep.subr.bf16.mxu0 %v1589_v28  ;;  %v1643_v0 = vld [vmem:[%s1870_s6 + $0x94] ss:$8 sps:$4 sm:$0xff]   ;;  %v1642_v2 = vld [vmem:[%s1870_s6 + $0x1a0] ss:$8 sps:$4 sm:$0xff]   ;;  %v1645_v6 = vld [vmem:[%s1870_s6 + $0x90] ss:$8 sps:$4 sm:$0xff]  }
  0x33   : > { %802 = vmatpush1.bf16.msra.mxu1 %v1588_v29  ;;  %v1646_v4 = vld [vmem:[%s1870_s6 + $0x194] ss:$8 sps:$4 sm:$0xff]   ;;  %v1933_v5 = vld.sshfl [vmem:[%s1844_s10] sm:$0x22 pattern:$0x76325410] }
  0x34   : > { %803 = vmatprep.subr.bf16.mxu1 %v1592_v30  ;;  %v1649_v7 = vld [vmem:[%s1870_s6 + $0x84] ss:$8 sps:$4 sm:$0xff]   ;;  %v1648_v9 = vld [vmem:[%s1870_s6 + $0x190] ss:$8 sps:$4 sm:$0xff]   ;;  %v1651_v11 = vld [vmem:[%s1870_s6 + $0x80] ss:$8 sps:$4 sm:$0xff]   ;;  %v891_v12 = vcombine.high %v1933_v5, %v1933_v5 }
  0x35   : > { %529 = vmatpush1.bf16.msra.mxu0 %v1591_v31  ;;  %v1652_v10 = vld [vmem:[%s1870_s6 + $0x184] ss:$8 sps:$4 sm:$0xff]   ;;  %v1657_v13 = vld [vmem:[%s1870_s6 + $0x274] ss:$8 sps:$4 sm:$0xff]   ;;  %v618_v14 = vshrl.u32 %v1865_v3, 16  ;;  %v622_v15 = vrot.slane %v620_v8, 1 }
  0x36   : > { %530 = vmatprep.subr.bf16.mxu0 %v1595_v32  ;;  %v1654_v16 = vld [vmem:[%s1870_s6 + $0x180] ss:$8 sps:$4 sm:$0xff]   ;;  %v1655_v17 = vld [vmem:[%s1870_s6 + $0x270] ss:$8 sps:$4 sm:$0xff]   ;;  %v893_v18 = vrot.slane %v891_v12, 1 }
  0x37   : > { %804 = vmatpush1.bf16.msra.mxu1 %v1594_v33  ;;  %v623_v19 = vor.u32 %v622_v15, %v618_v14  ;;  %v1660_v20 = vld [vmem:[%s1870_s6 + $0x264] ss:$8 sps:$4 sm:$0xff]   ;;  %v1658_v3 = vld [vmem:[%s1870_s6 + $0x260] ss:$8 sps:$4 sm:$0xff]   ;;  %v1663_v21 = vld [vmem:[%s1870_s6 + $0x254] ss:$8 sps:$4 sm:$0xff]  }
  0x38   : > { %805 = vmatprep.subr.bf16.mxu1 %v1598_v34  ;;  %v1661_v22 = vld [vmem:[%s1870_s6 + $0x250] ss:$8 sps:$4 sm:$0xff]   ;;  %v1666_v23 = vld [vmem:[%s1870_s6 + $0x244] ss:$8 sps:$4 sm:$0xff]   ;;  %v1664_v24 = vld [vmem:[%s1870_s6 + $0x240] ss:$8 sps:$4 sm:$0xff]  }
  0x39   : > { %531 = vmatpush1.bf16.msra.mxu0 %v1597_v35  ;;  %v1667_v25 = vld [vmem:[%s1870_s6 + $0x230] ss:$8 sps:$4 sm:$0xff]   ;;  %v1672_v26 = vld [vmem:[%s1870_s6 + $0x224] ss:$8 sps:$4 sm:$0xff]   ;;  %v1670_v27 = vld [vmem:[%s1870_s6 + $0x220] ss:$8 sps:$4 sm:$0xff]  }
  0x3a   : > { %532 = vmatprep.subr.bf16.mxu0 %v1601_v36  ;;  %v1675_v28 = vld [vmem:[%s1870_s6 + $0x214] ss:$8 sps:$4 sm:$0xff]   ;;  %v1673_v29 = vld [vmem:[%s1870_s6 + $0x210] ss:$8 sps:$4 sm:$0xff]   ;;  %v1678_v30 = vld [vmem:[%s1870_s6 + $0x204] ss:$8 sps:$4 sm:$0xff]  }
  0x3b   : > { %806 = vmatpush1.bf16.msra.mxu1 %v1600_v37  ;;  %v1676_v31 = vld [vmem:[%s1870_s6 + $0x200] ss:$8 sps:$4 sm:$0xff]   ;;  %v1681_v32 = vld [vmem:[%s1870_s6 + $0x2f4] ss:$8 sps:$4 sm:$0xff]   ;;  %v1679_v33 = vld [vmem:[%s1870_s6 + $0x2f0] ss:$8 sps:$4 sm:$0xff]  }
  0x3c   : > { %807 = vmatprep.subr.bf16.mxu1 %v1604_v38  ;;  %v1684_v34 = vld [vmem:[%s1870_s6 + $0x2e4] ss:$8 sps:$4 sm:$0xff]   ;;  %v1682_v35 = vld [vmem:[%s1870_s6 + $0x2e0] ss:$8 sps:$4 sm:$0xff]   ;;  %v1687_v36 = vld [vmem:[%s1870_s6 + $0x2d4] ss:$8 sps:$4 sm:$0xff]  }
  0x3d   : > { %533 = vmatpush1.bf16.msra.mxu0 %v1603_v39  ;;  %v1685_v37 = vld [vmem:[%s1870_s6 + $0x2d0] ss:$8 sps:$4 sm:$0xff]   ;;  %v1690_v38 = vld [vmem:[%s1870_s6 + $0x2c4] ss:$8 sps:$4 sm:$0xff]   ;;  %v1688_v39 = vld [vmem:[%s1870_s6 + $0x2c0] ss:$8 sps:$4 sm:$0xff]  }
  0x3e   : > { %534 = vmatprep.subr.bf16.mxu0 %v1607_v40  ;;  %v1693_v40 = vld [vmem:[%s1870_s6 + $0x2b4] ss:$8 sps:$4 sm:$0xff]  }
  0x3f   : > { %808 = vmatpush1.bf16.msra.mxu1 %v1606_v41  ;;  %v1691_v41 = vld [vmem:[%s1870_s6 + $0x2b0] ss:$8 sps:$4 sm:$0xff]  }
  0x40   : > { %809 = vmatprep.subr.bf16.mxu1 %v1610_v42  ;;  %v1696_v42 = vld [vmem:[%s1870_s6 + $0x2a4] ss:$8 sps:$4 sm:$0xff]  }
  0x41   : > { %535 = vmatpush2.bf16.msra.mxu0 %v1609_v43  ;;  %v1694_v43 = vld [vmem:[%s1870_s6 + $0x2a0] ss:$8 sps:$4 sm:$0xff]  }
  0x42   : > { %536 = vmatprep.subr.bf16.mxu0 %v1613_v44  ;;  %v1699_v44 = vld [vmem:[%s1870_s6 + $0x294] ss:$8 sps:$4 sm:$0xff]  }
  0x43   : > { %810 = vmatpush2.bf16.msra.mxu1 %v1612_v45  ;;  %v1697_v45 = vld [vmem:[%s1870_s6 + $0x290] ss:$8 sps:$4 sm:$0xff]  }
  0x44   : > { %811 = vmatprep.subr.bf16.mxu1 %v1616_v46  ;;  %v1702_v46 = vld [vmem:[%s1870_s6 + $0x284] ss:$8 sps:$4 sm:$0xff]  }
  0x45   : > { %537 = vmatpush2.bf16.msra.mxu0 %v1615_v47  ;;  %v1700_v47 = vld [vmem:[%s1870_s6 + $0x280] ss:$8 sps:$4 sm:$0xff]  }
  0x46   : > { %538 = vmatprep.subr.bf16.mxu0 %v1619_v48  ;;  %v892_v48 = vrot.slane %v1933_v5, 1 }
  0x47   : > { %812 = vmatpush2.bf16.msra.mxu1 %v1618_v49 }
  0x48   : > { %813 = vmatprep.subr.bf16.mxu1 %v1622_v50 }
  0x49   : > { %539 = vmatpush2.bf16.msra.mxu0 %v1621_v51 }
  0x4a   : > { %540 = vmatprep.subr.bf16.mxu0 %v1625_v52 }
  0x4b   : > { %814 = vmatpush2.bf16.msra.mxu1 %v1624_v53 }
  0x4c   : > { %815 = vmatprep.subr.bf16.mxu1 %v1628_v54 }
  0x4d   : > { %541 = vmatpush2.bf16.msra.mxu0 %v1627_v55 }
  0x4e   : > { %542 = vmatprep.subr.bf16.mxu0 %v1631_v56 }
  0x4f   : > { %816 = vmatpush2.bf16.msra.mxu1 %v1630_v57  ;;  %v1760_v57 = vmov 1983009808  }
  0x50   : > { %817 = vmatprep.subr.bf16.mxu1 %v1634_v58  ;;  %v563_v58 = vunpack.c.l.s4 %v1760_v57 }
  0x51   : > { %543 = vmatpush2.bf16.msra.mxu0 %v1633_v59  ;;  %v565_v59 = vlaneseq }
  0x52   : > { %544 = vmatprep.subr.bf16.mxu0 %v1637_v60  ;;  %v564_v60 = vunpack.c.0.s8 %v563_v58 }
  0x53   : > { %818 = vmatpush2.bf16.msra.mxu1 %v1636_v61  ;;  %v566_v61 = vshrl.u32 %v565_v59, 7 }
  0x54   : > { %819 = vmatprep.subr.bf16.mxu1 %v1640_v62 }
  0x55   : > { %545 = vmatpush2.bf16.msra.mxu0 %v1639_v63  ;;  %v567_v63 = vsub.s32 %v564_v60, %v566_v61 }
  0x56   : > { %546 = vmatprep.subr.bf16.mxu0 %v1643_v0 }
  0x57   : > { %820 = vmatpush2.bf16.msra.mxu1 %v1642_v2 }
  0x58   : > { %821 = vmatprep.subr.bf16.mxu1 %v1646_v4  ;;  %v309_v4 = vld [vmem:[#allocation2] sm:$0xf] }
  0x59   : > { %547 = vmatpush2.bf16.msra.mxu0 %v1645_v6 }
  0x5a   : > { %548 = vmatprep.subr.bf16.mxu0 %v1649_v7 }
  0x5b   : > { %822 = vmatpush2.bf16.msra.mxu1 %v1648_v9 }
  0x5c   : > { %823 = vmatprep.subr.bf16.mxu1 %v1652_v10 }
  0x5d   : > { %549 = vmatpush2.bf16.msra.mxu0 %v1651_v11 }
  0x5e   : > { %1056 = vmatprep.subr.bf16.mxu0 %v1657_v13 }
  0x5f   : > { %824 = vmatpush2.bf16.msra.mxu1 %v1654_v16 }
  0x60   : > { %551 = vmatmul.mubr.bf16.vlgmr.msra.gmra.mxu0 %v1860_v1  ;;  %v1669_v1 = vld [vmem:[%s1870_s6 + $0x234] ss:$8 sps:$4 sm:$0xff]  }
  0x61   : > { %1057 = vmatpush1.bf16.msra.mxu0 %v1655_v17  ;;  %1088 = vmatprep.mubr.bf16.mxu0 %v893_v18 }
  0x62   : > { %826 = vmatmul.mubr.bf16.vlgmr.msra.gmra.mxu1 %v623_v19  ;;  %1058 = vmatprep.subr.bf16.mxu0 %v1660_v20 }
  0x65   : > { %1059 = vmatpush1.bf16.msra.mxu0 %v1658_v3 }
  0x66   : > { %1060 = vmatprep.subr.bf16.mxu0 %v1663_v21 }
  0x69   : > { %1061 = vmatpush1.bf16.msra.mxu0 %v1661_v22 }
  0x6a   : > { %1062 = vmatprep.subr.bf16.mxu0 %v1666_v23 }
  0x6d   : > { %1063 = vmatpush1.bf16.msra.mxu0 %v1664_v24 }
  0x6e   : > { %1064 = vmatprep.subr.bf16.mxu0 %v1669_v1 }
  0x71   : > { %1065 = vmatpush1.bf16.msra.mxu0 %v1667_v25 }
  0x72   : > { %1066 = vmatprep.subr.bf16.mxu0 %v1672_v26 }
  0x75   : > { %1067 = vmatpush1.bf16.msra.mxu0 %v1670_v27 }
  0x76   : > { %1068 = vmatprep.subr.bf16.mxu0 %v1675_v28 }
  0x79   : > { %1069 = vmatpush1.bf16.msra.mxu0 %v1673_v29 }
  0x7a   : > { %1070 = vmatprep.subr.bf16.mxu0 %v1678_v30 }
  0x7d   : > { %1071 = vmatpush1.bf16.msra.mxu0 %v1676_v31 }
  0x7e   : > { %1072 = vmatprep.subr.bf16.mxu0 %v1681_v32 }
  0x81   : > { %1073 = vmatpush2.bf16.msra.mxu0 %v1679_v33 }
  0x82   : > { %1074 = vmatprep.subr.bf16.mxu0 %v1684_v34 }
  0x85   : > { %1075 = vmatpush2.bf16.msra.mxu0 %v1682_v35 }
  0x86   : > { %1076 = vmatprep.subr.bf16.mxu0 %v1687_v36 }
  0x89   : > { %1077 = vmatpush2.bf16.msra.mxu0 %v1685_v37 }
  0x8a   : > { %1078 = vmatprep.subr.bf16.mxu0 %v1690_v38 }
  0x8d   : > { %1079 = vmatpush2.bf16.msra.mxu0 %v1688_v39 }
  0x8e   : > { %1080 = vmatprep.subr.bf16.mxu0 %v1693_v40 }
  0x91   : > { %1081 = vmatpush2.bf16.msra.mxu0 %v1691_v41 }
  0x92   : > { %1082 = vmatprep.subr.bf16.mxu0 %v1696_v42 }
  0x95   : > { %1083 = vmatpush2.bf16.msra.mxu0 %v1694_v43 }
  0x96   : > { %1084 = vmatprep.subr.bf16.mxu0 %v1699_v44 }
  0x99   : > { %1085 = vmatpush2.bf16.msra.mxu0 %v1697_v45 }
  0x9a   : > { %1086 = vmatprep.subr.bf16.mxu0 %v1702_v46 }
  0x9d   : > { %1087 = vmatpush2.bf16.msra.mxu0 %v1700_v47 }
  0xa0   : > { %1089 = vmatmul.mubr.bf16.vlgmr.msra.gmra.mxu0 %v892_v48 }
 0x120   : > { %v552_v49 = vpop.f32.mrf.mxu0 }
 0x122   : > { %v554_v50 = vpop.f32.mrf.mxu0  ;;  %v827_v51 = vpop.f32.mrf.mxu1 }
 0x123   : > { %v561_v62 = vcombine.low %v552_v49, %v554_v50 }
 0x124   : > { %v556_v52 = vpop.f32.mrf.mxu0  ;;  %v829_v53 = vpop.f32.mrf.mxu1 }
 0x125   : > { %v568_v0 = vrot.slane %v561_v62, %v567_v63  ;;  %v836_v2 = vcombine.low %v827_v51, %v829_v53 }
 0x126   : > { %v557_v54 = vpop.f32.mrf.mxu0  ;;  %v831_v55 = vpop.f32.mrf.mxu1 }
 0x127   : > { %v570_v6 = vadd.f32 %v568_v0, %v309_v4  ;;  %v843_v7 = vrot.slane %v836_v2, %v567_v63 }
 0x128   : > { %v832_v56 = vpop.f32.mrf.mxu1 }
 0x129   : > { %v845_v11 = vadd.f32 %v843_v7, %v570_v6 }
 0x160   : > { %v1090_v5 = vpop.f32.mrf.mxu0 }
 0x162   : > { %v1092_v8 = vpop.f32.mrf.mxu0 }
 0x163   : > { %v1099_v9 = vcombine.low %v1090_v5, %v1092_v8 }
 0x164   : > { %v1094_v10 = vpop.f32.mrf.mxu0 }
 0x165   : > { %v1106_v12 = vrot.slane %v1099_v9, %v567_v63  ;;  %1113 = sbr.rel (%p1494_p10) target bundleno = 387 (0x183), region = 48 }
 0x166   : > { %v1095_v13 = vpop.f32.mrf.mxu0 }
 0x167   : > { %v1108_v14 = vadd.f32 %v1106_v12, %v845_v11 }
 0x169   : > { %1109 = vst [vmem:[#allocation2] sm:$0xf] %v1108_v14 }
 0x16a   : > { %v1115_v15 = vld [vmem:[%s2019_s2] sm:$0x3]  ;;  %v1119_v16 = vsub.s32 0, %v566_v61  ;;  %v1123_v17 = vsub.s32 1, %v566_v61  ;;  %v1761_v30 = vmov 1966171168  }
 0x16b   : > { %v1135_v18 = vld [vmem:[%s2020_s3] sm:$0x3]  ;;  %v1176_v31 = vunpack.c.l.s4 %v1761_v30 }
 0x16c   : > { %v1120_v19 = vrot.slane %v1115_v15, %v1119_v16  ;;  %v1124_v20 = vrot.slane %v1115_v15, %v1123_v17  ;;  %v1140_v3 = vrot.slane %v1135_v18, %v1119_v16  ;;  %v1144_v21 = vrot.slane %v1135_v18, %v1123_v17  ;;  %v1155_v1 = vld [vmem:[%s295_s16] sm:$0x3] }
 0x16d   : > { %v1156_v28 = vunpack.c.l.bf16 %v1155_v1  ;;  %v1177_v34 = vunpack.c.0.s8 %v1176_v31 }
 0x16e   : > { %v1125_v22 = vcombine.low %v1120_v19, %v1124_v20  ;;  %v1145_v23 = vcombine.low %v1140_v3, %v1144_v21 }
 0x16f   : > { %v1180_v37 = vsub.s32 %v1177_v34, %v566_v61 }
 0x170   : > { %v1114_v24 = vld [vmem:[#allocation2] sm:$0xf]  ;;  %v1132_v25 = vrot.slane %v1125_v22, %v567_v63  ;;  %v1152_v26 = vrot.slane %v1145_v23, %v567_v63 }
 0x172   : > { %v1134_v27 = vmul.f32 %v1132_v25, %v1114_v24 }
 0x174   : > { %v1154_v29 = vadd.f32 %v1152_v26, %v1134_v27 }
 0x176   : > { %v1157_v32 = vadd.f32 %v1156_v28, %v1154_v29 }
 0x178   : > { %v1158_v33 = vmax.f32 %v1157_v32, 0.0 }
 0x17a   : > { %v1166_v35 = vrot.slane %v1158_v33, %v567_v63 }
 0x17c   : > { %v1167_v36 = vcombine.high %v1166_v35, %v1166_v35 }
 0x17e   : > { %v1495_v38 = vpack.c.bf16 %v1167_v36, %v1166_v35 }
 0x180   : > { %v1181_v39 = vrot.slane %v1495_v38, %v1180_v37 }
 0x182   : > { %1496 = vst.sshfl [vmem:[%s303_s29] sm:$0x5 pattern:$0x73625140] %v1181_v39 }
 0x183 PF: > { %s15_s24 = sadd.s32 1, %s1757_s24   ;;  %s2023_s18 = smov %s1745_s21 }
 0x184   : > { %p12_p11 = scmp.ge.s32.totalorder %s15_s24, 14   ;;  %s2024_s19 = smov %s1749_s22 }
 0x185   : > { %s2025_s20 = smov %s1753_s23  ;;  %s2026_s21 = smov %s2030_s25 }
 0x186   : > { %s2027_s22 = smov %s2034_s26  ;;  %s2028_s23 = smov %s2038_s27 }
 0x187   :  { %14 = sbr.rel (!%p12_p11) target bundleno = 4 (0x4), region = 84 }

// kernel: _lambda_.27
= control target key start
LH: loop header
LB: loop body
LE: loop exit
PB: predicated region body
PF: predicated region fallthrough
CT: control target
= control target key end

     0   :  { %v94_v32 = vlaneseq  ;;  %s614_s0 = inlined_call_operand.vmem [shape: bf16[2,1,512], index: 0, kind: input, shape index: {}]   ;;  %s615_s1 = inlined_call_operand.vmem [shape: f32[512,128], index: 1, kind: input, shape index: {}]   ;;  %s616_s2 = inlined_call_operand.vmem [shape: f32[1,128], index: 2, kind: input, shape index: {}]   ;;  %s617_s3 = inlined_call_operand.hbm [shape: f32[2,128], index: 3, kind: output, shape index: {}]  }
   0x1   :  { %v52_v0 = vld [vmem:[%s615_s1 + $0xf8] sm:$0xff]  ;;  %v51_v4 = vld [vmem:[%s615_s1 + $0xf0] sm:$0xff]  ;;  %v50_v8 = vld [vmem:[%s615_s1 + $0xe8] sm:$0xff] }
   0x2   :  { %v84_v1 = vld [vmem:[%s615_s1 + $0x1f8] sm:$0xff]  ;;  %295 = vmatprep.subr.mxu0 %v52_v0  ;;  %v83_v5 = vld [vmem:[%s615_s1 + $0x1f0] sm:$0xff]  ;;  %v82_v9 = vld [vmem:[%s615_s1 + $0x1e8] sm:$0xff]  ;;  %v95_v41 = vshrl.u32 %v94_v32, 7 }
   0x3   :  { %v36_v2 = vld [vmem:[%s615_s1 + $0x78] sm:$0xff]  ;;  %330 = vmatprep.subr.mxu1 %v84_v1  ;;  %v35_v6 = vld [vmem:[%s615_s1 + $0x70] sm:$0xff]  ;;  %v34_v10 = vld [vmem:[%s615_s1 + $0x68] sm:$0xff] }
   0x4   :  { %v68_v3 = vld [vmem:[%s615_s1 + $0x178] sm:$0xff]  ;;  %296 = vmatpush3.msra.mxu0 %v36_v2  ;;  %v67_v7 = vld [vmem:[%s615_s1 + $0x170] sm:$0xff]  ;;  %v66_v11 = vld [vmem:[%s615_s1 + $0x168] sm:$0xff]  ;;  %v100_v51 = vsub.s32 2, %v95_v41 }
   0x5   :  { %331 = vmatpush3.msra.mxu1 %v68_v3  ;;  %297 = vmatprep.subr.mxu0 %v51_v4  ;;  %v49_v12 = vld [vmem:[%s615_s1 + $0xe0] sm:$0xff]  ;;  %v48_v16 = vld [vmem:[%s615_s1 + $0xd8] sm:$0xff]  ;;  %v47_v20 = vld [vmem:[%s615_s1 + $0xd0] sm:$0xff] }
   0x6   :  { %332 = vmatprep.subr.mxu1 %v83_v5  ;;  %298 = vmatpush3.msra.mxu0 %v35_v6  ;;  %v81_v13 = vld [vmem:[%s615_s1 + $0x1e0] sm:$0xff]  ;;  %v80_v17 = vld [vmem:[%s615_s1 + $0x1d8] sm:$0xff]  ;;  %v79_v21 = vld [vmem:[%s615_s1 + $0x1d0] sm:$0xff] }
   0x7   :  { %333 = vmatpush3.msra.mxu1 %v67_v7  ;;  %299 = vmatprep.subr.mxu0 %v50_v8  ;;  %v33_v14 = vld [vmem:[%s615_s1 + $0x60] sm:$0xff]  ;;  %v32_v18 = vld [vmem:[%s615_s1 + $0x58] sm:$0xff]  ;;  %v31_v22 = vld [vmem:[%s615_s1 + $0x50] sm:$0xff] }
   0x8   :  { %334 = vmatprep.subr.mxu1 %v82_v9  ;;  %v65_v15 = vld [vmem:[%s615_s1 + $0x160] sm:$0xff]  ;;  %300 = vmatpush3.msra.mxu0 %v34_v10  ;;  %v64_v19 = vld [vmem:[%s615_s1 + $0x158] sm:$0xff]  ;;  %v63_v23 = vld [vmem:[%s615_s1 + $0x150] sm:$0xff] }
   0x9   :  { %335 = vmatpush3.msra.mxu1 %v66_v11  ;;  %301 = vmatprep.subr.mxu0 %v49_v12  ;;  %v46_v24 = vld [vmem:[%s615_s1 + $0xc8] sm:$0xff]  ;;  %v45_v28 = vld [vmem:[%s615_s1 + $0xc0] sm:$0xff]  ;;  %v44_v33 = vld [vmem:[%s615_s1 + $0xb8] sm:$0xff] }
   0xa   :  { %336 = vmatprep.subr.mxu1 %v81_v13  ;;  %302 = vmatpush3.msra.mxu0 %v33_v14  ;;  %v78_v25 = vld [vmem:[%s615_s1 + $0x1c8] sm:$0xff]  ;;  %v77_v29 = vld [vmem:[%s615_s1 + $0x1c0] sm:$0xff]  ;;  %v76_v34 = vld [vmem:[%s615_s1 + $0x1b8] sm:$0xff] }
   0xb   :  { %337 = vmatpush3.msra.mxu1 %v65_v15  ;;  %303 = vmatprep.subr.mxu0 %v48_v16  ;;  %v30_v26 = vld [vmem:[%s615_s1 + $0x48] sm:$0xff]  ;;  %v29_v30 = vld [vmem:[%s615_s1 + $0x40] sm:$0xff]  ;;  %v28_v35 = vld [vmem:[%s615_s1 + $0x38] sm:$0xff] }
   0xc   :  { %338 = vmatprep.subr.mxu1 %v80_v17  ;;  %304 = vmatpush3.msra.mxu0 %v32_v18  ;;  %v62_v27 = vld [vmem:[%s615_s1 + $0x148] sm:$0xff]  ;;  %v61_v31 = vld [vmem:[%s615_s1 + $0x140] sm:$0xff]  ;;  %v60_v36 = vld [vmem:[%s615_s1 + $0x138] sm:$0xff] }
   0xd   :  { %339 = vmatpush3.msra.mxu1 %v64_v19  ;;  %305 = vmatprep.subr.mxu0 %v47_v20  ;;  %v43_v37 = vld [vmem:[%s615_s1 + $0xb0] sm:$0xff]  ;;  %v42_v42 = vld [vmem:[%s615_s1 + $0xa8] sm:$0xff]  ;;  %v41_v46 = vld [vmem:[%s615_s1 + $0xa0] sm:$0xff] }
   0xe   :  { %340 = vmatprep.subr.mxu1 %v79_v21  ;;  %306 = vmatpush3.msra.mxu0 %v31_v22  ;;  %v75_v38 = vld [vmem:[%s615_s1 + $0x1b0] sm:$0xff]  ;;  %v74_v43 = vld [vmem:[%s615_s1 + $0x1a8] sm:$0xff]  ;;  %v73_v47 = vld [vmem:[%s615_s1 + $0x1a0] sm:$0xff] }
   0xf   :  { %341 = vmatpush3.msra.mxu1 %v63_v23  ;;  %307 = vmatprep.subr.mxu0 %v46_v24  ;;  %v27_v39 = vld [vmem:[%s615_s1 + $0x30] sm:$0xff]  ;;  %v26_v44 = vld [vmem:[%s615_s1 + $0x28] sm:$0xff]  ;;  %v25_v48 = vld [vmem:[%s615_s1 + $0x20] sm:$0xff] }
  0x10   :  { %342 = vmatprep.subr.mxu1 %v78_v25  ;;  %308 = vmatpush3.msra.mxu0 %v30_v26  ;;  %v59_v40 = vld [vmem:[%s615_s1 + $0x130] sm:$0xff]  ;;  %v58_v45 = vld [vmem:[%s615_s1 + $0x128] sm:$0xff]  ;;  %v57_v49 = vld [vmem:[%s615_s1 + $0x120] sm:$0xff] }
  0x11   :  { %343 = vmatpush3.msra.mxu1 %v62_v27  ;;  %309 = vmatprep.subr.mxu0 %v45_v28  ;;  %v292_v50 = vld [vmem:[%s614_s0] sm:$0xff]  }
  0x12   :  { %344 = vmatprep.subr.mxu1 %v77_v29  ;;  %310 = vmatpush3.msra.mxu0 %v29_v30 }
  0x13   :  { %345 = vmatpush3.msra.mxu1 %v61_v31  ;;  %311 = vmatprep.subr.mxu0 %v44_v33 }
  0x14   :  { %346 = vmatprep.subr.mxu1 %v76_v34  ;;  %312 = vmatpush3.msra.mxu0 %v28_v35 }
  0x15   :  { %347 = vmatpush3.msra.mxu1 %v60_v36  ;;  %313 = vmatprep.subr.mxu0 %v43_v37 }
  0x16   :  { %348 = vmatprep.subr.mxu1 %v75_v38  ;;  %314 = vmatpush3.msra.mxu0 %v27_v39 }
  0x17   :  { %349 = vmatpush3.msra.mxu1 %v59_v40  ;;  %315 = vmatprep.subr.mxu0 %v42_v42 }
  0x18   :  { %350 = vmatprep.subr.mxu1 %v74_v43 }
  0x19   :  { %8 = vsyncpa [#allocation3], 0  ;;  %316 = vmatpush3.msra.mxu0 %v26_v44  ;;  %351 = vmatpush3.msra.mxu1 %v58_v45  ;;  %v40_v52 = vld [vmem:[%s615_s1 + $0x98] sm:$0xff]  ;;  %v293_v54 = vunpack.c.l.bf16 %v292_v50  ;;  %v294_v55 = vunpack.c.h.bf16 %v292_v50  ;;  %v108_v56 = vsub.s32 6, %v95_v41  ;;  %v96_v57 = vsub.s32 0, %v95_v41  ;;  %v39_v61 = vld [vmem:[%s615_s1 + $0x90] sm:$0xff] }
  0x1a   :  { %v72_v53 = vld [vmem:[%s615_s1 + $0x198] sm:$0xff]  ;;  %317 = vmatprep.subr.mxu0 %v41_v46  ;;  %352 = vmatprep.subr.mxu1 %v73_v47  ;;  %v104_v60 = vsub.s32 4, %v95_v41  ;;  %v71_v62 = vld [vmem:[%s615_s1 + $0x190] sm:$0xff]  ;;  %v38_v3 = vld [vmem:[%s615_s1 + $0x88] sm:$0xff]  ;;  %vm126_vm0 = vcmask 1041409  }
  0x1b   :  { %v24_v58 = vld [vmem:[%s615_s1 + $0x18] sm:$0xff]  ;;  %318 = vmatpush3.msra.mxu0 %v25_v48  ;;  %353 = vmatpush3.msra.mxu1 %v57_v49  ;;  %v23_v63 = vld [vmem:[%s615_s1 + $0x10] sm:$0xff]  ;;  %v101_v1 = vrot.slane %v293_v54, %v100_v51  ;;  %v117_v2 = vrot.slane %v294_v55, %v100_v51  ;;  %v70_v4 = vld [vmem:[%s615_s1 + $0x188] sm:$0xff]  ;;  %v109_v5 = vrot.slane %v293_v54, %v108_v56 }
  0x1c   :  { %v56_v59 = vld [vmem:[%s615_s1 + $0x118] sm:$0xff]  ;;  %319 = vmatprep.subr.mxu0 %v40_v52  ;;  %354 = vmatprep.subr.mxu1 %v72_v53  ;;  %v55_v0 = vld [vmem:[%s615_s1 + $0x110] sm:$0xff]  ;;  %v125_v6 = vrot.slane %v294_v55, %v108_v56  ;;  %v97_v7 = vrot.slane %v293_v54, %v96_v57  ;;  %v22_v8 = vld [vmem:[%s615_s1 + $0x8] sm:$0xff]  ;;  %v113_v10 = vrot.slane %v294_v55, %v96_v57 }
  0x1d   :  { %320 = vmatpush3.msra.mxu0 %v24_v58  ;;  %355 = vmatpush3.msra.mxu1 %v56_v59  ;;  %v54_v9 = vld [vmem:[%s615_s1 + $0x108] sm:$0xff]  ;;  %v105_v11 = vrot.slane %v293_v54, %v104_v60  ;;  %v121_v12 = vrot.slane %v294_v55, %v104_v60  ;;  %v37_v13 = vld [vmem:[%s615_s1 + $0x80] sm:$0xff]  ;;  %v128_v16 = vsel %vm126_vm0, %v117_v2, %v101_v1 }
  0x1e   :  { %321 = vmatprep.subr.mxu0 %v39_v61  ;;  %356 = vmatprep.subr.mxu1 %v71_v62  ;;  %v69_v14 = vld [vmem:[%s615_s1 + $0x180] sm:$0xff]  ;;  %v130_v18 = vsel %vm126_vm0, %v125_v6, %v109_v5  ;;  %v127_v19 = vsel %vm126_vm0, %v113_v10, %v97_v7 }
  0x1f   :  { %322 = vmatpush3.msra.mxu0 %v23_v63  ;;  %357 = vmatpush3.msra.mxu1 %v55_v0  ;;  %v21_v15 = vld [vmem:[%s615_s1] sm:$0xff]  ;;  %v129_v20 = vsel %vm126_vm0, %v121_v12, %v105_v11 }
  0x20   :  { %323 = vmatprep.subr.mxu0 %v38_v3  ;;  %358 = vmatprep.subr.mxu1 %v70_v4  ;;  %v53_v17 = vld [vmem:[%s615_s1 + $0x100] sm:$0xff]  ;;  %s388_s1 = smov [#allocation2]  }
  0x21   :  { %324 = vmatpush3.msra.mxu0 %v22_v8  ;;  %359 = vmatpush3.msra.mxu1 %v54_v9  ;;  %v290_v23 = vld [vmem:[%s616_s2] ss:$0 sm:$0xff]  ;;  %s282_s7 = sshll.u32 %s388_s1, 4  ;;  %s283_s7 = int_to_ptr.vmem [resolvable:$true] %s282_s7 }
  0x22   :  { %325 = vmatprep.subr.mxu0 %v37_v13  ;;  %360 = vmatprep.subr.mxu1 %v69_v14  ;;  %s366_s8 = scalar_lea.vmem %s283_s7, 32  ;;  %p371_p1 = scmp.lt.s32.totalorder %s283_s7, %s283_s7 }
  0x23   :  { %326 = vmatpush3.msra.mxu0 %v21_v15  ;;  %199 = vmatprep.mubr.f32.mxu0 %v128_v16  ;;  %p367_p0 = scmp.ne.s32.totalorder %s283_s7, %s366_s8  ;;  %p372_p2 = scmp.lt.s32.totalorder %s366_s8, %s366_s8 }
  0x24   :  { %361 = vmatpush3.msra.mxu1 %v53_v17  ;;  %269 = vmatprep.mubr.f32.mxu1 %v130_v18 }
  0x25   :  { %200 = vmatmul.mubr.f32.vlgmr.msra.gmra.mxu0 %v127_v19  ;;  %270 = vmatmul.mubr.f32.vlgmr.msra.gmra.mxu1 %v129_v20  ;;  %p373_p3 = por %p372_p2, %p371_p1 }
  0x27   :  { %p374_p4 = pnand %p373_p3, %p367_p0 }
  0xe5   :  { %v327_v21 = vpop.f32.mrf.mxu0  ;;  %v362_v22 = vpop.f32.mrf.mxu1 }
  0xe7   :  { %v328_v24 = vpop.f32.mrf.mxu0  ;;  %v363_v25 = vpop.f32.mrf.mxu1 }
  0xe8   :  { %v329_v26 = vadd.f32 %v328_v24, %v327_v21  ;;  %v364_v28 = vadd.f32 %v363_v25, %v362_v22 }
  0xea   :  { %v202_v27 = vadd.f32 %v329_v26, %v290_v23 }
  0xec   :  { %v272_v29 = vadd.f32 %v364_v28, %v202_v27 }
  0xee   :  { %275 = vst [vmem:[#allocation2] sm:$0x3] %v272_v29 }
  0xef   :  { %377 = shalt.err (!%p374_p4)
}
  0xf0   :  { %285 = dma.vmem_to_hbm [thread:$0]  %s283_s7, 32, %s617_s3, [#allocation3]  }
  0xf1   :  { %386 = dma.done.wait [#allocation3], 32  }
  0xf2   :  { %387 = vsyncadd [#allocation3], 4294967264 }
  0xf3   :  { %289 = vsyncpa [#allocation3], 1 }

// kernel: _lambda_.24
= control target key start
LH: loop header
LB: loop body
LE: loop exit
PB: predicated region body
PF: predicated region fallthrough
CT: control target
= control target key end

     0   :  { %s1207_s15 = smov 0   ;;  %s1209_s16 = smov 0   ;;  %s1488_s0 = inlined_call_operand.vmem [shape: bf16[2,2,1,256], index: 0, kind: input, shape index: {}]   ;;  %s1489_s1 = inlined_call_operand.vmem [shape: bf16[1,256,512], index: 1, kind: input, shape index: {}]   ;;  %s1490_s2 = inlined_call_operand.vmem [shape: f32[1,512], index: 2, kind: input, shape index: {}]   ;;  %s1491_s3 = inlined_call_operand.vmem [shape: f32[1,512], index: 3, kind: input, shape index: {}]   ;;  %s1492_s4 = inlined_call_operand.vmem [shape: bf16[2,1,1,512], index: 4, kind: output, shape index: {}]  }
   0x1   :  { %s1211_s17 = smov 0  }
   0x2 LB: > { %s33_s18 = sadd.s32 1, %s1174_s16  ;;  %p962_p0 = scmp.ge.s32.totalorder %s1178_s17, 1  ;;  %s1178_s17 = sphi %s1211_s17, %s14_s17   ;;  %s1174_s16 = sphi %s1209_s16, %s1500_s16   ;;  %s1170_s15 = sphi %s1207_s15, %s1499_s15  }
   0x3   : > { %p35_p1 = scmp.ge.s32.totalorder %s33_s18, 2  ;;  %p196_p2 = scmp.lt.s32.totalorder %s1178_s17, 3 }
   0x5   : > { %s1502_s18 = smov (%p35_p1, %s33_s18), 0  ;;  %p197_p3 = pnand %p962_p0, %p196_p2 }
   0x6   : > { %p232_p4 = scmp.lt.s32.totalorder (!%p197_p3), %s1170_s15, 1 }
   0x7   : > { %200 = sbr.rel (%p197_p3) target bundleno = 306 (0x132), region = 36 }
   0xc   : > { %v1060_v0 = vld [vmem:[%s1489_s1 + $0xe4] ss:$16 sps:$4 sm:$0xff]   ;;  %v1062_v1 = vld [vmem:[%s1489_s1 + $0xec] ss:$16 sps:$4 sm:$0xff]   ;;  %v1064_v2 = vld [vmem:[%s1489_s1 + $0xe0] ss:$16 sps:$4 sm:$0xff]   ;;  %v254_v38 = vlaneseq }
   0xd   : > { %673 = vmatprep.subr.bf16.mxu0 %v1060_v0  ;;  %v1065_v3 = vld [vmem:[%s1489_s1 + $0xe8] ss:$16 sps:$4 sm:$0xff]   ;;  %714 = vmatprep.subr.bf16.mxu1 %v1062_v1  ;;  %v1066_v4 = vld [vmem:[%s1489_s1 + $0xc4] ss:$16 sps:$4 sm:$0xff]   ;;  %v1068_v5 = vld [vmem:[%s1489_s1 + $0xcc] ss:$16 sps:$4 sm:$0xff]  }
   0xe   : > { %674 = vmatpush1.bf16.msra.mxu0 %v1064_v2  ;;  %715 = vmatpush1.bf16.msra.mxu1 %v1065_v3  ;;  %v1070_v6 = vld [vmem:[%s1489_s1 + $0xc0] ss:$16 sps:$4 sm:$0xff]   ;;  %v1071_v7 = vld [vmem:[%s1489_s1 + $0xc8] ss:$16 sps:$4 sm:$0xff]   ;;  %v1072_v8 = vld [vmem:[%s1489_s1 + $0xa4] ss:$16 sps:$4 sm:$0xff]  }
   0xf   : > { %675 = vmatprep.subr.bf16.mxu0 %v1066_v4  ;;  %716 = vmatprep.subr.bf16.mxu1 %v1068_v5  ;;  %v1074_v9 = vld [vmem:[%s1489_s1 + $0xac] ss:$16 sps:$4 sm:$0xff]   ;;  %v1076_v10 = vld [vmem:[%s1489_s1 + $0xa0] ss:$16 sps:$4 sm:$0xff]   ;;  %v1077_v11 = vld [vmem:[%s1489_s1 + $0xa8] ss:$16 sps:$4 sm:$0xff]  }
  0x10   : > { %v1078_v12 = vld [vmem:[%s1489_s1 + $0x84] ss:$16 sps:$4 sm:$0xff]   ;;  %v1080_v13 = vld [vmem:[%s1489_s1 + $0x8c] ss:$16 sps:$4 sm:$0xff]   ;;  %v1082_v14 = vld [vmem:[%s1489_s1 + $0x80] ss:$16 sps:$4 sm:$0xff]  }
  0x11   : > { %v1083_v15 = vld [vmem:[%s1489_s1 + $0x88] ss:$16 sps:$4 sm:$0xff]   ;;  %v1084_v16 = vld [vmem:[%s1489_s1 + $0x64] ss:$16 sps:$4 sm:$0xff]   ;;  %v1086_v17 = vld [vmem:[%s1489_s1 + $0x6c] ss:$16 sps:$4 sm:$0xff]  }
  0x12   : > { %676 = vmatpush1.bf16.msra.mxu0 %v1070_v6  ;;  %717 = vmatpush1.bf16.msra.mxu1 %v1071_v7  ;;  %v1088_v18 = vld [vmem:[%s1489_s1 + $0x60] ss:$16 sps:$4 sm:$0xff]   ;;  %v1089_v19 = vld [vmem:[%s1489_s1 + $0x68] ss:$16 sps:$4 sm:$0xff]   ;;  %v1090_v20 = vld [vmem:[%s1489_s1 + $0x44] ss:$16 sps:$4 sm:$0xff]  }
  0x13   : > { %677 = vmatprep.subr.bf16.mxu0 %v1072_v8  ;;  %718 = vmatprep.subr.bf16.mxu1 %v1074_v9  ;;  %v1092_v21 = vld [vmem:[%s1489_s1 + $0x4c] ss:$16 sps:$4 sm:$0xff]   ;;  %v1094_v22 = vld [vmem:[%s1489_s1 + $0x40] ss:$16 sps:$4 sm:$0xff]   ;;  %v1095_v23 = vld [vmem:[%s1489_s1 + $0x48] ss:$16 sps:$4 sm:$0xff]  }
  0x14   : > { %v1096_v24 = vld [vmem:[%s1489_s1 + $0x24] ss:$16 sps:$4 sm:$0xff]   ;;  %v1098_v25 = vld [vmem:[%s1489_s1 + $0x2c] ss:$16 sps:$4 sm:$0xff]   ;;  %v1100_v26 = vld [vmem:[%s1489_s1 + $0x20] ss:$16 sps:$4 sm:$0xff]  }
  0x15   : > { %v1101_v27 = vld [vmem:[%s1489_s1 + $0x28] ss:$16 sps:$4 sm:$0xff]   ;;  %v1102_v28 = vld [vmem:[%s1489_s1 + $0x4] ss:$16 sps:$4 sm:$0xff]   ;;  %v1104_v29 = vld [vmem:[%s1489_s1 + $0xc] ss:$16 sps:$4 sm:$0xff]  }
  0x16   : > { %678 = vmatpush1.bf16.msra.mxu0 %v1076_v10  ;;  %719 = vmatpush1.bf16.msra.mxu1 %v1077_v11  ;;  %v1106_v30 = vld [vmem:[%s1489_s1] ss:$16 sps:$4 sm:$0xff]   ;;  %v1107_v31 = vld [vmem:[%s1489_s1 + $0x8] ss:$16 sps:$4 sm:$0xff]   ;;  %v1108_v32 = vld [vmem:[%s1489_s1 + $0x1e4] ss:$16 sps:$4 sm:$0xff]  }
  0x17   : > { %679 = vmatprep.subr.bf16.mxu0 %v1078_v12  ;;  %720 = vmatprep.subr.bf16.mxu1 %v1080_v13  ;;  %v1110_v33 = vld [vmem:[%s1489_s1 + $0x1ec] ss:$16 sps:$4 sm:$0xff]   ;;  %v1112_v34 = vld [vmem:[%s1489_s1 + $0x1e0] ss:$16 sps:$4 sm:$0xff]   ;;  %v1113_v35 = vld [vmem:[%s1489_s1 + $0x1e8] ss:$16 sps:$4 sm:$0xff]  }
  0x18   : > { %v1114_v36 = vld [vmem:[%s1489_s1 + $0x1c4] ss:$16 sps:$4 sm:$0xff]   ;;  %v1116_v37 = vld [vmem:[%s1489_s1 + $0x1cc] ss:$16 sps:$4 sm:$0xff]   ;;  %s1504_s15 = smov (!%p232_p4, %s1170_s15), 1  ;;  %v1359_v46 = vshrl.u32 %v254_v38, 7 }
  0x19   : > { %v1180_v39 = vmov 1966171168   ;;  %v1118_v41 = vld [vmem:[%s1489_s1 + $0x1c0] ss:$16 sps:$4 sm:$0xff]   ;;  %v1119_v42 = vld [vmem:[%s1489_s1 + $0x1c8] ss:$16 sps:$4 sm:$0xff]  }
  0x1a   : > { %680 = vmatpush1.bf16.msra.mxu0 %v1082_v14  ;;  %721 = vmatpush1.bf16.msra.mxu1 %v1083_v15  ;;  %v338_v40 = vunpack.c.l.s4 %v1180_v39  ;;  %v1120_v43 = vld [vmem:[%s1489_s1 + $0x1a4] ss:$16 sps:$4 sm:$0xff]   ;;  %v1122_v44 = vld [vmem:[%s1489_s1 + $0x1ac] ss:$16 sps:$4 sm:$0xff]   ;;  %s963_s11 = sshll.u32 %s1504_s15, 2  ;;  %vm1438_vm0 = vcmp.lt.s32.totalorder %v254_v38, 512 }
  0x1b   : > { %681 = vmatprep.subr.bf16.mxu0 %v1084_v16  ;;  %722 = vmatprep.subr.bf16.mxu1 %v1086_v17  ;;  %v1124_v47 = vld [vmem:[%s1489_s1 + $0x1a0] ss:$16 sps:$4 sm:$0xff]   ;;  %v1125_v48 = vld [vmem:[%s1489_s1 + $0x1a8] ss:$16 sps:$4 sm:$0xff]   ;;  %v1126_v49 = vld [vmem:[%s1489_s1 + $0x184] ss:$16 sps:$4 sm:$0xff]   ;;  %s239_s24 = scalar_lea.vmem %s1488_s0, %s963_s11  ;;  %s249_s27 = scalar_lea.vmem %s1492_s4, %s963_s11 }
  0x1c   : > { %v339_v45 = vunpack.c.0.s8 %v338_v40  ;;  %v1128_v50 = vld [vmem:[%s1489_s1 + $0x18c] ss:$16 sps:$4 sm:$0xff]   ;;  %v965_v52 = vld.sshfl [vmem:[%s239_s24] sm:$0x11 pattern:$0x75316420] }
  0x1d   : > { %v1130_v53 = vld [vmem:[%s1489_s1 + $0x180] ss:$16 sps:$4 sm:$0xff]   ;;  %v1131_v54 = vld [vmem:[%s1489_s1 + $0x188] ss:$16 sps:$4 sm:$0xff]   ;;  %v336_v55 = vcombine.high %v965_v52, %v965_v52  ;;  %v1132_v56 = vld [vmem:[%s1489_s1 + $0x164] ss:$16 sps:$4 sm:$0xff]  }
  0x1e   : > { %682 = vmatpush1.bf16.msra.mxu0 %v1088_v18  ;;  %723 = vmatpush1.bf16.msra.mxu1 %v1089_v19  ;;  %v1379_v51 = vsub.s32 %v339_v45, %v1359_v46  ;;  %v1134_v57 = vld [vmem:[%s1489_s1 + $0x16c] ss:$16 sps:$4 sm:$0xff]   ;;  %v1136_v59 = vld [vmem:[%s1489_s1 + $0x160] ss:$16 sps:$4 sm:$0xff]   ;;  %v1137_v60 = vld [vmem:[%s1489_s1 + $0x168] ss:$16 sps:$4 sm:$0xff]  }
  0x1f   : > { %683 = vmatprep.subr.bf16.mxu0 %v1090_v20  ;;  %724 = vmatprep.subr.bf16.mxu1 %v1092_v21  ;;  %v1138_v61 = vld [vmem:[%s1489_s1 + $0x144] ss:$16 sps:$4 sm:$0xff]   ;;  %v1140_v62 = vld [vmem:[%s1489_s1 + $0x14c] ss:$16 sps:$4 sm:$0xff]   ;;  %v1142_v63 = vld [vmem:[%s1489_s1 + $0x140] ss:$16 sps:$4 sm:$0xff]  }
  0x20   : > { %v350_v58 = vrot.slane %v336_v55, %v1379_v51  ;;  %v1143_v0 = vld [vmem:[%s1489_s1 + $0x148] ss:$16 sps:$4 sm:$0xff]   ;;  %v1144_v1 = vld [vmem:[%s1489_s1 + $0x124] ss:$16 sps:$4 sm:$0xff]   ;;  %v1146_v2 = vld [vmem:[%s1489_s1 + $0x12c] ss:$16 sps:$4 sm:$0xff]   ;;  %v343_v9 = vrot.slane %v965_v52, %v1379_v51 }
  0x21   : > { %v1148_v3 = vld [vmem:[%s1489_s1 + $0x120] ss:$16 sps:$4 sm:$0xff]   ;;  %v1149_v4 = vld [vmem:[%s1489_s1 + $0x128] ss:$16 sps:$4 sm:$0xff]   ;;  %v1150_v5 = vld [vmem:[%s1489_s1 + $0x104] ss:$16 sps:$4 sm:$0xff]  }
  0x22   : > { %684 = vmatpush1.bf16.msra.mxu0 %v1094_v22  ;;  %725 = vmatpush1.bf16.msra.mxu1 %v1095_v23  ;;  %v1152_v6 = vld [vmem:[%s1489_s1 + $0x10c] ss:$16 sps:$4 sm:$0xff]   ;;  %v1154_v7 = vld [vmem:[%s1489_s1 + $0x100] ss:$16 sps:$4 sm:$0xff]   ;;  %v1155_v8 = vld [vmem:[%s1489_s1 + $0x108] ss:$16 sps:$4 sm:$0xff]  }
  0x23   : > { %685 = vmatprep.subr.bf16.mxu0 %v1096_v24  ;;  %726 = vmatprep.subr.bf16.mxu1 %v1098_v25  ;;  %v1181_v11 = vmov 0.0   ;;  %vm852_vm1 = vcmask 1040384   ;;  %vm853_vm2 = vsmask.f32 256  ;;  %vm855_vm3 = vcmask 1041409  }
  0x24   : > { %705 = vmatprep.mubr.bf16.mxu0 %v350_v58  ;;  %746 = vmatprep.mubr.bf16.mxu1 %v350_v58  ;;  %258 = vst.msk [vmem:[#allocation2] sm:$0xf] %vm1438_vm0, %v1181_v11  ;;  %vm856_vm4 = vsmask.f32 1280  ;;  %vm1456_vm5 = vmand %vm852_vm1, %vm853_vm2  ;;  %vm859_vm7 = vcmask 1042434   ;;  %vm863_vm11 = vcmask 1043459  }
  0x25   : > { %vm1463_vm6 = vmand %vm855_vm3, %vm856_vm4  ;;  %vm860_vm8 = vsmask.f32 2304  ;;  %vm864_vm12 = vsmask.f32 3328 }
  0x26   : > { %686 = vmatpush1.bf16.msra.mxu0 %v1100_v26  ;;  %727 = vmatpush1.bf16.msra.mxu1 %v1101_v27  ;;  %vm858_vm9 = vmor %vm1463_vm6, %vm1456_vm5 }
  0x27   : > { %687 = vmatprep.subr.bf16.mxu0 %v1102_v28  ;;  %728 = vmatprep.subr.bf16.mxu1 %v1104_v29  ;;  %v794_v28 = vld [vmem:[%s1490_s2] sm:$0xf]  ;;  %vm861_vm10 = vmand %vm859_vm7, %vm860_vm8 }
  0x28   : > { %vm862_vm13 = vmor %vm861_vm10, %vm858_vm9 }
  0x29   : > { %vm865_vm14 = vmand %vm863_vm11, %vm864_vm12 }
  0x2a   : > { %688 = vmatpush1.bf16.msra.mxu0 %v1106_v30  ;;  %729 = vmatpush1.bf16.msra.mxu1 %v1107_v31  ;;  %v796_v30 = vld [vmem:[%s1491_s3] sm:$0xf]  ;;  %v801_v31 = vsub.s32 0, %v1359_v46  ;;  %vm866_vm15 = vmor %vm865_vm14, %vm862_vm13 }
  0x2b   : > { %689 = vmatprep.subr.bf16.mxu0 %v1108_v32  ;;  %730 = vmatprep.subr.bf16.mxu1 %v1110_v33  ;;  %v259_v25 = vld [vmem:[#allocation2] sm:$0xf] }
  0x2e   : > { %690 = vmatpush2.bf16.msra.mxu0 %v1112_v34  ;;  %731 = vmatpush2.bf16.msra.mxu1 %v1113_v35  ;;  %v805_v34 = vsub.s32 1, %v1359_v46  ;;  %v809_v35 = vsub.s32 2, %v1359_v46 }
  0x2f   : > { %691 = vmatprep.subr.bf16.mxu0 %v1114_v36  ;;  %732 = vmatprep.subr.bf16.mxu1 %v1116_v37  ;;  %v813_v36 = vsub.s32 3, %v1359_v46 }
  0x32   : > { %692 = vmatpush2.bf16.msra.mxu0 %v1118_v41  ;;  %733 = vmatpush2.bf16.msra.mxu1 %v1119_v42 }
  0x33   : > { %693 = vmatprep.subr.bf16.mxu0 %v1120_v43  ;;  %734 = vmatprep.subr.bf16.mxu1 %v1122_v44 }
  0x36   : > { %694 = vmatpush2.bf16.msra.mxu0 %v1124_v47  ;;  %735 = vmatpush2.bf16.msra.mxu1 %v1125_v48  ;;  %v867_v48 = vld [vmem:[%s249_s27] sm:$0xf] }
  0x37   : > { %695 = vmatprep.subr.bf16.mxu0 %v1126_v49  ;;  %736 = vmatprep.subr.bf16.mxu1 %v1128_v50 }
  0x3a   : > { %696 = vmatpush2.bf16.msra.mxu0 %v1130_v53  ;;  %737 = vmatpush2.bf16.msra.mxu1 %v1131_v54 }
  0x3b   : > { %697 = vmatprep.subr.bf16.mxu0 %v1132_v56  ;;  %738 = vmatprep.subr.bf16.mxu1 %v1134_v57 }
  0x3e   : > { %698 = vmatpush2.bf16.msra.mxu0 %v1136_v59  ;;  %739 = vmatpush2.bf16.msra.mxu1 %v1137_v60 }
  0x3f   : > { %699 = vmatprep.subr.bf16.mxu0 %v1138_v61  ;;  %740 = vmatprep.subr.bf16.mxu1 %v1140_v62 }
  0x42   : > { %700 = vmatpush2.bf16.msra.mxu0 %v1142_v63  ;;  %741 = vmatpush2.bf16.msra.mxu1 %v1143_v0 }
  0x43   : > { %701 = vmatprep.subr.bf16.mxu0 %v1144_v1  ;;  %742 = vmatprep.subr.bf16.mxu1 %v1146_v2 }
  0x46   : > { %702 = vmatpush2.bf16.msra.mxu0 %v1148_v3  ;;  %743 = vmatpush2.bf16.msra.mxu1 %v1149_v4 }
  0x47   : > { %703 = vmatprep.subr.bf16.mxu0 %v1150_v5  ;;  %744 = vmatprep.subr.bf16.mxu1 %v1152_v6 }
  0x4a   : > { %704 = vmatpush2.bf16.msra.mxu0 %v1154_v7  ;;  %745 = vmatpush2.bf16.msra.mxu1 %v1155_v8 }
  0x4d   : > { %706 = vmatmul.mubr.bf16.vlgmr.msra.gmra.mxu0 %v343_v9  ;;  %747 = vmatmul.mubr.bf16.vlgmr.msra.gmra.mxu1 %v343_v9 }
 0x10d   : > { %v707_v12 = vpop.f32.mrf.mxu0  ;;  %v748_v13 = vpop.f32.mrf.mxu1 }
 0x10f   : > { %v709_v14 = vpop.f32.mrf.mxu0  ;;  %v750_v15 = vpop.f32.mrf.mxu1 }
 0x110   : > { %v759_v16 = vcombine.low %v707_v12, %v709_v14  ;;  %v760_v17 = vcombine.low %v748_v13, %v750_v15 }
 0x111   : > { %v711_v18 = vpop.f32.mrf.mxu0  ;;  %v752_v19 = vpop.f32.mrf.mxu1 }
 0x112   : > { %v767_v20 = vrot.slane %v759_v16, %v1379_v51  ;;  %v774_v21 = vrot.slane %v760_v17, %v1379_v51 }
 0x113   : > { %v712_v22 = vpop.f32.mrf.mxu0  ;;  %v753_v23 = vpop.f32.mrf.mxu1 }
 0x114   : > { %v775_v24 = vcombine.low %v767_v20, %v774_v21 }
 0x116   : > { %v782_v26 = vrot.slane %v775_v24, %v1379_v51 }
 0x118   : > { %v784_v27 = vadd.f32 %v782_v26, %v259_v25 }
 0x11a   : > { %789 = vst.msk [vmem:[#allocation2] sm:$0xf] %vm1438_vm0, %v784_v27 }
 0x121   : > { %v793_v29 = vld [vmem:[#allocation2] sm:$0xf] }
 0x122   : > { %v795_v33 = vmul.f32 %v794_v28, %v793_v29 }
 0x124   : > { %v797_v38 = vadd.f32 %v796_v30, %v795_v33 }
 0x126   : > { %v802_v39 = vrot.slane %v797_v38, %v801_v31  ;;  %v806_v40 = vrot.slane %v797_v38, %v805_v34  ;;  %v810_v41 = vrot.slane %v797_v38, %v809_v35  ;;  %v814_v42 = vrot.slane %v797_v38, %v813_v36 }
 0x128   : > { %v1030_v43 = vpack.c.bf16 %v806_v40, %v802_v39  ;;  %v1031_v44 = vpack.c.bf16 %v814_v42, %v810_v41 }
 0x12a   : > { %v835_v45 = vrot.slane %v1030_v43, %v1379_v51  ;;  %v842_v46 = vrot.slane %v1031_v44, %v1379_v51 }
 0x12c   : > { %v843_v47 = vcombine.low %v835_v45, %v842_v46 }
 0x12e   : > { %v850_v49 = vrot.slane %v843_v47, %v1379_v51 }
 0x130   : > { %v868_v50 = vsel %vm866_vm15, %v850_v49, %v867_v48 }
 0x131   : > { %869 = vst [vmem:[%s249_s27] sm:$0xf] %v868_v50 }
 0x132 PF: > { %s14_s17 = sadd.s32 1, %s1178_s17   ;;  %s1499_s15 = smov %s1174_s16 }
 0x133   : > { %p11_p5 = scmp.ge.s32.totalorder %s14_s17, 4   ;;  %s1500_s16 = smov %s1502_s18 }
 0x135   :  { %13 = sbr.rel (!%p11_p5) target bundleno = 2 (0x2), region = 75 }

// kernel: _lambda_.25
= control target key start
LH: loop header
LB: loop body
LE: loop exit
PB: predicated region body
PF: predicated region fallthrough
CT: control target
= control target key end

     0   :  { %s2866_s18 = smov 0   ;;  %s2868_s19 = smov 0   ;;  %s3202_s0 = inlined_call_operand.vmem [shape: bf16[2,4,2,256], index: 0, kind: input, shape index: {}]   ;;  %s3203_s1 = inlined_call_operand.vmem [shape: bf16[2,4,2,256], index: 1, kind: input, shape index: {}]   ;;  %s3204_s2 = inlined_call_operand.vmem [shape: bf16[9,256,512], index: 2, kind: input, shape index: {}]   ;;  %s3205_s3 = inlined_call_operand.vmem [shape: f32[1,512], index: 3, kind: input, shape index: {}]   ;;  %s3206_s4 = inlined_call_operand.vmem [shape: f32[1,512], index: 4, kind: input, shape index: {}]   ;;  %s3207_s5 = inlined_call_operand.vmem [shape: bf16[2,1,1,512], index: 5, kind: output, shape index: {}]  }
   0x1   :  { %s2870_s20 = smov 0   ;;  %s2872_s21 = smov 0  }
   0x2   :  { %s2874_s22 = smov 0  }
   0x3 LB: > { %s27_s23 = sadd.s32 1, %s2824_s20  ;;  %s34_s24 = sadd.s32 1, %s2828_s21  ;;  %s2832_s22 = sphi %s2874_s22, %s15_s22   ;;  %s2828_s21 = sphi %s2872_s21, %s3215_s21   ;;  %s2824_s20 = sphi %s2870_s20, %s3214_s20   ;;  %s2820_s19 = sphi %s2868_s19, %s3213_s19   ;;  %s2816_s18 = sphi %s2866_s18, %s3212_s18  }
   0x4   : > { %p28_p0 = scmp.ge.s32.totalorder %s27_s23, 3  ;;  %p2124_p1 = scmp.ge.s32.totalorder %s2832_s22, 1 }
   0x5   : > { %p244_p2 = scmp.lt.s32.totalorder %s2832_s22, 7 }
   0x6   : > { %s3217_s23 = smov (%p28_p0, %s27_s23), 0  ;;  %s3219_s24 = smov (!%p28_p0, %s34_s24), %s2828_s21 }
   0x7   : > { %p245_p3 = pnand %p2124_p1, %p244_p2  ;;  %p36_p4 = scmp.ge.s32.totalorder %s3219_s24, 2 }
   0x8   : > { %p292_p5 = scmp.lt.s32.totalorder (!%p245_p3), %s2820_s19, 1  ;;  %p294_p6 = scmp.lt.s32.totalorder (!%p245_p3), %s2816_s18, 3 }
   0x9   : > { %s3221_s24 = smov (%p36_p4, %s3219_s24), 0  ;;  %248 = sbr.rel (%p245_p3) target bundleno = 454 (0x1c6), region = 40 }
   0xa   : > { %p2130_p7 = scmp.ne.s32.totalorder (!%p245_p3), %s2816_s18, 0 }
   0xe   : > { %s3223_s19 = smov (!%p292_p5, %s2820_s19), 1 }
   0xf   : > { %s295_s25 = scalar_select %p294_p6, %s2816_s18, 3 }
  0x10   : > { %s2126_s26 = sshll.u32 %s3223_s19, 3  ;;  %s2129_s27 = sshll.u32 %s3223_s19, 2 }
  0x11   : > { %s2125_s28 = sshll.u32 %s295_s25, 1  ;;  %s2903_s6 = scalar_lea.vmem %s3207_s5, %s2129_s27 }
  0x12   : > { %s2905_s7 = sadd.s32 %s2126_s26, %s2125_s28  ;;  %325 = sbr.rel (%p2130_p7) target bundleno = 27 (0x1b), region = 44 }
  0x13   : > { %s299_s10 = scalar_lea.vmem %s3202_s0, %s2905_s7  ;;  %s311_s13 = scalar_lea.vmem %s3203_s1, %s2905_s7 }
  0x17   : > { %v326_v0 = vlaneseq  ;;  %v2834_v1 = vmov 0.0  }
  0x19   : > { %vm328_vm0 = vcmp.lt.s32.totalorder %v326_v0, 512 }
  0x1a   : > { %330 = vst.msk [vmem:[#allocation2] sm:$0xf] %vm328_vm0, %v2834_v1 }
  0x1b PF: > { %s2463_s14 = smul.u32 1536, %s2816_s18  ;;  %v413_v2 = vlaneseq  ;;  %v2917_v3 = vld.sshfl [vmem:[%s299_s10] sm:$0x11 pattern:$0x75316420]  ;;  %p2458_p8 = scmp.ne.s32.totalorder %s2816_s18, 2 }
  0x1c   : > { %v2835_v4 = vmov 1966171168   ;;  %v409_v9 = vcombine.high %v2917_v3, %v2917_v3 }
  0x1d   : > { %s2922_s17 = scalar_lea.vmem %s3204_s2, %s2463_s14  ;;  %v411_v5 = vunpack.c.l.s4 %v2835_v4  ;;  %v2925_v6 = vshrl.u32 %v413_v2, 7  ;;  %vm1918_vm1 = vcmp.lt.s32.totalorder %v413_v2, 512 }
  0x1e   : > { %v2506_v7 = vld [vmem:[%s2922_s17 + $0xe4] ss:$16 sps:$4 sm:$0xff]   ;;  %v2508_v8 = vld [vmem:[%s2922_s17 + $0xec] ss:$16 sps:$4 sm:$0xff]   ;;  %v2510_v11 = vld [vmem:[%s2922_s17 + $0xe0] ss:$16 sps:$4 sm:$0xff]  }
  0x1f   : > { %v412_v10 = vunpack.c.0.s8 %v411_v5  ;;  %746 = vmatprep.subr.bf16.mxu0 %v2506_v7  ;;  %v2511_v12 = vld [vmem:[%s2922_s17 + $0xe8] ss:$16 sps:$4 sm:$0xff]   ;;  %787 = vmatprep.subr.bf16.mxu1 %v2508_v8  ;;  %v2512_v13 = vld [vmem:[%s2922_s17 + $0xc4] ss:$16 sps:$4 sm:$0xff]   ;;  %v2514_v15 = vld [vmem:[%s2922_s17 + $0xcc] ss:$16 sps:$4 sm:$0xff]  }
  0x20   : > { %747 = vmatpush1.bf16.msra.mxu0 %v2510_v11  ;;  %788 = vmatpush1.bf16.msra.mxu1 %v2511_v12  ;;  %v2516_v16 = vld [vmem:[%s2922_s17 + $0xc0] ss:$16 sps:$4 sm:$0xff]   ;;  %v2517_v17 = vld [vmem:[%s2922_s17 + $0xc8] ss:$16 sps:$4 sm:$0xff]   ;;  %v2518_v19 = vld [vmem:[%s2922_s17 + $0xa4] ss:$16 sps:$4 sm:$0xff]  }
  0x21   : > { %v2935_v14 = vsub.s32 %v412_v10, %v2925_v6  ;;  %748 = vmatprep.subr.bf16.mxu0 %v2512_v13  ;;  %789 = vmatprep.subr.bf16.mxu1 %v2514_v15  ;;  %v2520_v20 = vld [vmem:[%s2922_s17 + $0xac] ss:$16 sps:$4 sm:$0xff]   ;;  %v2522_v21 = vld [vmem:[%s2922_s17 + $0xa0] ss:$16 sps:$4 sm:$0xff]   ;;  %v2523_v22 = vld [vmem:[%s2922_s17 + $0xa8] ss:$16 sps:$4 sm:$0xff]  }
  0x22   : > { %v2524_v23 = vld [vmem:[%s2922_s17 + $0x84] ss:$16 sps:$4 sm:$0xff]   ;;  %v2526_v24 = vld [vmem:[%s2922_s17 + $0x8c] ss:$16 sps:$4 sm:$0xff]   ;;  %v2528_v25 = vld [vmem:[%s2922_s17 + $0x80] ss:$16 sps:$4 sm:$0xff]  }
  0x23   : > { %v2941_v18 = vrot.slane %v409_v9, %v2935_v14  ;;  %v2529_v26 = vld [vmem:[%s2922_s17 + $0x88] ss:$16 sps:$4 sm:$0xff]   ;;  %v2530_v27 = vld [vmem:[%s2922_s17 + $0x64] ss:$16 sps:$4 sm:$0xff]   ;;  %v2532_v28 = vld [vmem:[%s2922_s17 + $0x6c] ss:$16 sps:$4 sm:$0xff]  }
  0x24   : > { %749 = vmatpush1.bf16.msra.mxu0 %v2516_v16  ;;  %790 = vmatpush1.bf16.msra.mxu1 %v2517_v17  ;;  %v2534_v29 = vld [vmem:[%s2922_s17 + $0x60] ss:$16 sps:$4 sm:$0xff]   ;;  %v2535_v30 = vld [vmem:[%s2922_s17 + $0x68] ss:$16 sps:$4 sm:$0xff]   ;;  %v2536_v31 = vld [vmem:[%s2922_s17 + $0x44] ss:$16 sps:$4 sm:$0xff]  }
  0x25   : > { %778 = vmatprep.mubr.bf16.mxu0 %v2941_v18  ;;  %819 = vmatprep.mubr.bf16.mxu1 %v2941_v18  ;;  %v2538_v32 = vld [vmem:[%s2922_s17 + $0x4c] ss:$16 sps:$4 sm:$0xff]   ;;  %v2540_v33 = vld [vmem:[%s2922_s17 + $0x40] ss:$16 sps:$4 sm:$0xff]   ;;  %v2541_v34 = vld [vmem:[%s2922_s17 + $0x48] ss:$16 sps:$4 sm:$0xff]  }
  0x26   : > { %750 = vmatprep.subr.bf16.mxu0 %v2518_v19  ;;  %791 = vmatprep.subr.bf16.mxu1 %v2520_v20  ;;  %v2542_v35 = vld [vmem:[%s2922_s17 + $0x24] ss:$16 sps:$4 sm:$0xff]   ;;  %v2544_v36 = vld [vmem:[%s2922_s17 + $0x2c] ss:$16 sps:$4 sm:$0xff]   ;;  %v2546_v37 = vld [vmem:[%s2922_s17 + $0x20] ss:$16 sps:$4 sm:$0xff]   ;;  %v3014_v20 = vrot.slane %v2917_v3, %v2935_v14 }
  0x27   : > { %v2547_v38 = vld [vmem:[%s2922_s17 + $0x28] ss:$16 sps:$4 sm:$0xff]   ;;  %v2548_v39 = vld [vmem:[%s2922_s17 + $0x4] ss:$16 sps:$4 sm:$0xff]   ;;  %v2550_v40 = vld [vmem:[%s2922_s17 + $0xc] ss:$16 sps:$4 sm:$0xff]  }
  0x28   : > { %751 = vmatpush1.bf16.msra.mxu0 %v2522_v21  ;;  %792 = vmatpush1.bf16.msra.mxu1 %v2523_v22  ;;  %v2552_v41 = vld [vmem:[%s2922_s17] ss:$16 sps:$4 sm:$0xff]   ;;  %v2553_v42 = vld [vmem:[%s2922_s17 + $0x8] ss:$16 sps:$4 sm:$0xff]   ;;  %v2554_v43 = vld [vmem:[%s2922_s17 + $0x1e4] ss:$16 sps:$4 sm:$0xff]  }
  0x29   : > { %752 = vmatprep.subr.bf16.mxu0 %v2524_v23  ;;  %793 = vmatprep.subr.bf16.mxu1 %v2526_v24  ;;  %v2556_v44 = vld [vmem:[%s2922_s17 + $0x1ec] ss:$16 sps:$4 sm:$0xff]   ;;  %v2558_v45 = vld [vmem:[%s2922_s17 + $0x1e0] ss:$16 sps:$4 sm:$0xff]   ;;  %v2559_v46 = vld [vmem:[%s2922_s17 + $0x1e8] ss:$16 sps:$4 sm:$0xff]  }
  0x2a   : > { %v2560_v47 = vld [vmem:[%s2922_s17 + $0x1c4] ss:$16 sps:$4 sm:$0xff]   ;;  %v2562_v48 = vld [vmem:[%s2922_s17 + $0x1cc] ss:$16 sps:$4 sm:$0xff]   ;;  %v2564_v49 = vld [vmem:[%s2922_s17 + $0x1c0] ss:$16 sps:$4 sm:$0xff]  }
  0x2b   : > { %v2565_v50 = vld [vmem:[%s2922_s17 + $0x1c8] ss:$16 sps:$4 sm:$0xff]   ;;  %v2566_v51 = vld [vmem:[%s2922_s17 + $0x1a4] ss:$16 sps:$4 sm:$0xff]   ;;  %v2568_v52 = vld [vmem:[%s2922_s17 + $0x1ac] ss:$16 sps:$4 sm:$0xff]  }
  0x2c   : > { %753 = vmatpush1.bf16.msra.mxu0 %v2528_v25  ;;  %794 = vmatpush1.bf16.msra.mxu1 %v2529_v26  ;;  %v2570_v53 = vld [vmem:[%s2922_s17 + $0x1a0] ss:$16 sps:$4 sm:$0xff]   ;;  %v2571_v54 = vld [vmem:[%s2922_s17 + $0x1a8] ss:$16 sps:$4 sm:$0xff]   ;;  %v2572_v55 = vld [vmem:[%s2922_s17 + $0x184] ss:$16 sps:$4 sm:$0xff]  }
  0x2d   : > { %754 = vmatprep.subr.bf16.mxu0 %v2530_v27  ;;  %795 = vmatprep.subr.bf16.mxu1 %v2532_v28  ;;  %v2574_v56 = vld [vmem:[%s2922_s17 + $0x18c] ss:$16 sps:$4 sm:$0xff]   ;;  %v2576_v57 = vld [vmem:[%s2922_s17 + $0x180] ss:$16 sps:$4 sm:$0xff]   ;;  %v2577_v58 = vld [vmem:[%s2922_s17 + $0x188] ss:$16 sps:$4 sm:$0xff]  }
  0x2e   : > { %v2578_v59 = vld [vmem:[%s2922_s17 + $0x164] ss:$16 sps:$4 sm:$0xff]   ;;  %v2580_v60 = vld [vmem:[%s2922_s17 + $0x16c] ss:$16 sps:$4 sm:$0xff]   ;;  %v2582_v61 = vld [vmem:[%s2922_s17 + $0x160] ss:$16 sps:$4 sm:$0xff]  }
  0x2f   : > { %v2583_v62 = vld [vmem:[%s2922_s17 + $0x168] ss:$16 sps:$4 sm:$0xff]   ;;  %v2584_v63 = vld [vmem:[%s2922_s17 + $0x144] ss:$16 sps:$4 sm:$0xff]   ;;  %v2586_v0 = vld [vmem:[%s2922_s17 + $0x14c] ss:$16 sps:$4 sm:$0xff]  }
  0x30   : > { %755 = vmatpush1.bf16.msra.mxu0 %v2534_v29  ;;  %796 = vmatpush1.bf16.msra.mxu1 %v2535_v30  ;;  %v2588_v1 = vld [vmem:[%s2922_s17 + $0x140] ss:$16 sps:$4 sm:$0xff]   ;;  %v2589_v4 = vld [vmem:[%s2922_s17 + $0x148] ss:$16 sps:$4 sm:$0xff]   ;;  %v2590_v5 = vld [vmem:[%s2922_s17 + $0x124] ss:$16 sps:$4 sm:$0xff]  }
  0x31   : > { %756 = vmatprep.subr.bf16.mxu0 %v2536_v31  ;;  %797 = vmatprep.subr.bf16.mxu1 %v2538_v32  ;;  %v2592_v7 = vld [vmem:[%s2922_s17 + $0x12c] ss:$16 sps:$4 sm:$0xff]   ;;  %v2594_v8 = vld [vmem:[%s2922_s17 + $0x120] ss:$16 sps:$4 sm:$0xff]   ;;  %v2595_v9 = vld [vmem:[%s2922_s17 + $0x128] ss:$16 sps:$4 sm:$0xff]  }
  0x32   : > { %v2596_v10 = vld [vmem:[%s2922_s17 + $0x104] ss:$16 sps:$4 sm:$0xff]   ;;  %v2598_v11 = vld [vmem:[%s2922_s17 + $0x10c] ss:$16 sps:$4 sm:$0xff]   ;;  %v2600_v13 = vld [vmem:[%s2922_s17 + $0x100] ss:$16 sps:$4 sm:$0xff]  }
  0x33   : > { %v3004_v12 = vld.sshfl [vmem:[%s311_s13] sm:$0x11 pattern:$0x75316420]  ;;  %v2601_v15 = vld [vmem:[%s2922_s17 + $0x108] ss:$16 sps:$4 sm:$0xff]  }
  0x34   : > { %757 = vmatpush1.bf16.msra.mxu0 %v2540_v33  ;;  %798 = vmatpush1.bf16.msra.mxu1 %v2541_v34  ;;  %v2604_v16 = vld [vmem:[%s2922_s17 + $0x2e4] ss:$16 sps:$4 sm:$0xff]   ;;  %v2607_v17 = vld [vmem:[%s2922_s17 + $0x2ec] ss:$16 sps:$4 sm:$0xff]   ;;  %v935_v19 = vcombine.high %v3004_v12, %v3004_v12  ;;  %v2602_v21 = vld [vmem:[%s2922_s17 + $0x2e0] ss:$16 sps:$4 sm:$0xff]  }
  0x35   : > { %758 = vmatprep.subr.bf16.mxu0 %v2542_v35  ;;  %799 = vmatprep.subr.bf16.mxu1 %v2544_v36  ;;  %v2605_v22 = vld [vmem:[%s2922_s17 + $0x2e8] ss:$16 sps:$4 sm:$0xff]   ;;  %v2610_v23 = vld [vmem:[%s2922_s17 + $0x2c4] ss:$16 sps:$4 sm:$0xff]   ;;  %v2613_v24 = vld [vmem:[%s2922_s17 + $0x2cc] ss:$16 sps:$4 sm:$0xff]  }
  0x36   : > { %v949_v25 = vrot.slane %v935_v19, %v2935_v14  ;;  %v2608_v3 = vld [vmem:[%s2922_s17 + $0x2c0] ss:$16 sps:$4 sm:$0xff]   ;;  %v2611_v26 = vld [vmem:[%s2922_s17 + $0x2c8] ss:$16 sps:$4 sm:$0xff]   ;;  %v2616_v27 = vld [vmem:[%s2922_s17 + $0x2a4] ss:$16 sps:$4 sm:$0xff]  }
  0x37   : > { %v2619_v28 = vld [vmem:[%s2922_s17 + $0x2ac] ss:$16 sps:$4 sm:$0xff]   ;;  %v2614_v29 = vld [vmem:[%s2922_s17 + $0x2a0] ss:$16 sps:$4 sm:$0xff]   ;;  %v2617_v30 = vld [vmem:[%s2922_s17 + $0x2a8] ss:$16 sps:$4 sm:$0xff]  }
  0x38   : > { %759 = vmatpush1.bf16.msra.mxu0 %v2546_v37  ;;  %800 = vmatpush1.bf16.msra.mxu1 %v2547_v38  ;;  %v2622_v31 = vld [vmem:[%s2922_s17 + $0x284] ss:$16 sps:$4 sm:$0xff]   ;;  %v2625_v32 = vld [vmem:[%s2922_s17 + $0x28c] ss:$16 sps:$4 sm:$0xff]   ;;  %v2620_v33 = vld [vmem:[%s2922_s17 + $0x280] ss:$16 sps:$4 sm:$0xff]  }
  0x39   : > { %760 = vmatprep.subr.bf16.mxu0 %v2548_v39  ;;  %801 = vmatprep.subr.bf16.mxu1 %v2550_v40  ;;  %v2623_v34 = vld [vmem:[%s2922_s17 + $0x288] ss:$16 sps:$4 sm:$0xff]   ;;  %v2628_v35 = vld [vmem:[%s2922_s17 + $0x264] ss:$16 sps:$4 sm:$0xff]   ;;  %v2631_v36 = vld [vmem:[%s2922_s17 + $0x26c] ss:$16 sps:$4 sm:$0xff]  }
  0x3a   : > { %v2626_v37 = vld [vmem:[%s2922_s17 + $0x260] ss:$16 sps:$4 sm:$0xff]   ;;  %v2629_v38 = vld [vmem:[%s2922_s17 + $0x268] ss:$16 sps:$4 sm:$0xff]   ;;  %v2634_v39 = vld [vmem:[%s2922_s17 + $0x244] ss:$16 sps:$4 sm:$0xff]  }
  0x3b   : > { %v2637_v40 = vld [vmem:[%s2922_s17 + $0x24c] ss:$16 sps:$4 sm:$0xff]   ;;  %v2686_v19 = vld [vmem:[%s2922_s17 + $0x320] ss:$16 sps:$4 sm:$0xff]  }
  0x3c   : > { %761 = vmatpush1.bf16.msra.mxu0 %v2552_v41  ;;  %802 = vmatpush1.bf16.msra.mxu1 %v2553_v42  ;;  %v2632_v41 = vld [vmem:[%s2922_s17 + $0x240] ss:$16 sps:$4 sm:$0xff]   ;;  %v2635_v42 = vld [vmem:[%s2922_s17 + $0x248] ss:$16 sps:$4 sm:$0xff]  }
  0x3d   : > { %762 = vmatprep.subr.bf16.mxu0 %v2554_v43  ;;  %803 = vmatprep.subr.bf16.mxu1 %v2556_v44  ;;  %v2640_v43 = vld [vmem:[%s2922_s17 + $0x224] ss:$16 sps:$4 sm:$0xff]   ;;  %v2643_v44 = vld [vmem:[%s2922_s17 + $0x22c] ss:$16 sps:$4 sm:$0xff]  }
  0x40   : > { %763 = vmatpush2.bf16.msra.mxu0 %v2558_v45  ;;  %804 = vmatpush2.bf16.msra.mxu1 %v2559_v46  ;;  %v2638_v45 = vld [vmem:[%s2922_s17 + $0x220] ss:$16 sps:$4 sm:$0xff]   ;;  %v2641_v46 = vld [vmem:[%s2922_s17 + $0x228] ss:$16 sps:$4 sm:$0xff]  }
  0x41   : > { %764 = vmatprep.subr.bf16.mxu0 %v2560_v47  ;;  %805 = vmatprep.subr.bf16.mxu1 %v2562_v48  ;;  %v2646_v47 = vld [vmem:[%s2922_s17 + $0x204] ss:$16 sps:$4 sm:$0xff]   ;;  %v2649_v48 = vld [vmem:[%s2922_s17 + $0x20c] ss:$16 sps:$4 sm:$0xff]  }
  0x44   : > { %765 = vmatpush2.bf16.msra.mxu0 %v2564_v49  ;;  %806 = vmatpush2.bf16.msra.mxu1 %v2565_v50  ;;  %v2644_v49 = vld [vmem:[%s2922_s17 + $0x200] ss:$16 sps:$4 sm:$0xff]   ;;  %v2647_v50 = vld [vmem:[%s2922_s17 + $0x208] ss:$16 sps:$4 sm:$0xff]  }
  0x45   : > { %766 = vmatprep.subr.bf16.mxu0 %v2566_v51  ;;  %807 = vmatprep.subr.bf16.mxu1 %v2568_v52  ;;  %v2652_v51 = vld [vmem:[%s2922_s17 + $0x3e4] ss:$16 sps:$4 sm:$0xff]   ;;  %v2655_v52 = vld [vmem:[%s2922_s17 + $0x3ec] ss:$16 sps:$4 sm:$0xff]  }
  0x48   : > { %767 = vmatpush2.bf16.msra.mxu0 %v2570_v53  ;;  %808 = vmatpush2.bf16.msra.mxu1 %v2571_v54  ;;  %v2650_v53 = vld [vmem:[%s2922_s17 + $0x3e0] ss:$16 sps:$4 sm:$0xff]   ;;  %v2653_v54 = vld [vmem:[%s2922_s17 + $0x3e8] ss:$16 sps:$4 sm:$0xff]  }
  0x49   : > { %768 = vmatprep.subr.bf16.mxu0 %v2572_v55  ;;  %809 = vmatprep.subr.bf16.mxu1 %v2574_v56  ;;  %v2658_v55 = vld [vmem:[%s2922_s17 + $0x3c4] ss:$16 sps:$4 sm:$0xff]   ;;  %v2661_v56 = vld [vmem:[%s2922_s17 + $0x3cc] ss:$16 sps:$4 sm:$0xff]  }
  0x4c   : > { %769 = vmatpush2.bf16.msra.mxu0 %v2576_v57  ;;  %810 = vmatpush2.bf16.msra.mxu1 %v2577_v58  ;;  %v2656_v57 = vld [vmem:[%s2922_s17 + $0x3c0] ss:$16 sps:$4 sm:$0xff]   ;;  %v2659_v58 = vld [vmem:[%s2922_s17 + $0x3c8] ss:$16 sps:$4 sm:$0xff]  }
  0x4d   : > { %770 = vmatprep.subr.bf16.mxu0 %v2578_v59  ;;  %811 = vmatprep.subr.bf16.mxu1 %v2580_v60  ;;  %v2664_v59 = vld [vmem:[%s2922_s17 + $0x3a4] ss:$16 sps:$4 sm:$0xff]   ;;  %v2667_v60 = vld [vmem:[%s2922_s17 + $0x3ac] ss:$16 sps:$4 sm:$0xff]  }
  0x50   : > { %771 = vmatpush2.bf16.msra.mxu0 %v2582_v61  ;;  %812 = vmatpush2.bf16.msra.mxu1 %v2583_v62  ;;  %v2662_v61 = vld [vmem:[%s2922_s17 + $0x3a0] ss:$16 sps:$4 sm:$0xff]   ;;  %v2665_v62 = vld [vmem:[%s2922_s17 + $0x3a8] ss:$16 sps:$4 sm:$0xff]  }
  0x51   : > { %772 = vmatprep.subr.bf16.mxu0 %v2584_v63  ;;  %813 = vmatprep.subr.bf16.mxu1 %v2586_v0  ;;  %v2670_v63 = vld [vmem:[%s2922_s17 + $0x384] ss:$16 sps:$4 sm:$0xff]   ;;  %v2673_v0 = vld [vmem:[%s2922_s17 + $0x38c] ss:$16 sps:$4 sm:$0xff]  }
  0x54   : > { %773 = vmatpush2.bf16.msra.mxu0 %v2588_v1  ;;  %814 = vmatpush2.bf16.msra.mxu1 %v2589_v4  ;;  %v2668_v1 = vld [vmem:[%s2922_s17 + $0x380] ss:$16 sps:$4 sm:$0xff]   ;;  %v2671_v4 = vld [vmem:[%s2922_s17 + $0x388] ss:$16 sps:$4 sm:$0xff]  }
  0x55   : > { %774 = vmatprep.subr.bf16.mxu0 %v2590_v5  ;;  %815 = vmatprep.subr.bf16.mxu1 %v2592_v7  ;;  %v2676_v5 = vld [vmem:[%s2922_s17 + $0x364] ss:$16 sps:$4 sm:$0xff]   ;;  %v2679_v7 = vld [vmem:[%s2922_s17 + $0x36c] ss:$16 sps:$4 sm:$0xff]  }
  0x58   : > { %775 = vmatpush2.bf16.msra.mxu0 %v2594_v8  ;;  %816 = vmatpush2.bf16.msra.mxu1 %v2595_v9  ;;  %v2674_v8 = vld [vmem:[%s2922_s17 + $0x360] ss:$16 sps:$4 sm:$0xff]   ;;  %v2677_v9 = vld [vmem:[%s2922_s17 + $0x368] ss:$16 sps:$4 sm:$0xff]  }
  0x59   : > { %776 = vmatprep.subr.bf16.mxu0 %v2596_v10  ;;  %817 = vmatprep.subr.bf16.mxu1 %v2598_v11  ;;  %v2682_v10 = vld [vmem:[%s2922_s17 + $0x344] ss:$16 sps:$4 sm:$0xff]   ;;  %v2685_v11 = vld [vmem:[%s2922_s17 + $0x34c] ss:$16 sps:$4 sm:$0xff]  }
  0x5c   : > { %777 = vmatpush2.bf16.msra.mxu0 %v2600_v13  ;;  %818 = vmatpush2.bf16.msra.mxu1 %v2601_v15  ;;  %v2680_v13 = vld [vmem:[%s2922_s17 + $0x340] ss:$16 sps:$4 sm:$0xff]   ;;  %v2683_v15 = vld [vmem:[%s2922_s17 + $0x348] ss:$16 sps:$4 sm:$0xff]  }
  0x5d   : > { %1272 = vmatprep.subr.bf16.mxu0 %v2604_v16  ;;  %1313 = vmatprep.subr.bf16.mxu1 %v2607_v17  ;;  %v2688_v16 = vld [vmem:[%s2922_s17 + $0x324] ss:$16 sps:$4 sm:$0xff]   ;;  %v2691_v17 = vld [vmem:[%s2922_s17 + $0x32c] ss:$16 sps:$4 sm:$0xff]  }
  0x5f   : > { %779 = vmatmul.mubr.bf16.vlgmr.msra.gmra.mxu0 %v3014_v20  ;;  %820 = vmatmul.mubr.bf16.vlgmr.msra.gmra.mxu1 %v3014_v20 }
  0x60   : > { %1273 = vmatpush1.bf16.msra.mxu0 %v2602_v21  ;;  %1314 = vmatpush1.bf16.msra.mxu1 %v2605_v22  ;;  %v2689_v21 = vld [vmem:[%s2922_s17 + $0x328] ss:$16 sps:$4 sm:$0xff]   ;;  %v2694_v22 = vld [vmem:[%s2922_s17 + $0x304] ss:$16 sps:$4 sm:$0xff]  }
  0x61   : > { %1274 = vmatprep.subr.bf16.mxu0 %v2610_v23  ;;  %1315 = vmatprep.subr.bf16.mxu1 %v2613_v24  ;;  %v2697_v23 = vld [vmem:[%s2922_s17 + $0x30c] ss:$16 sps:$4 sm:$0xff]   ;;  %v2692_v24 = vld [vmem:[%s2922_s17 + $0x300] ss:$16 sps:$4 sm:$0xff]  }
  0x62   : > { %1304 = vmatprep.mubr.bf16.mxu0 %v949_v25  ;;  %1345 = vmatprep.mubr.bf16.mxu1 %v949_v25  ;;  %v2695_v25 = vld [vmem:[%s2922_s17 + $0x308] ss:$16 sps:$4 sm:$0xff]  }
  0x64   : > { %1275 = vmatpush1.bf16.msra.mxu0 %v2608_v3  ;;  %1316 = vmatpush1.bf16.msra.mxu1 %v2611_v26  ;;  %v2700_v3 = vld [vmem:[%s2922_s17 + $0x4e4] ss:$16 sps:$4 sm:$0xff]   ;;  %v2703_v26 = vld [vmem:[%s2922_s17 + $0x4ec] ss:$16 sps:$4 sm:$0xff]  }
  0x65   : > { %1276 = vmatprep.subr.bf16.mxu0 %v2616_v27  ;;  %1317 = vmatprep.subr.bf16.mxu1 %v2619_v28  ;;  %v942_v27 = vrot.slane %v3004_v12, %v2935_v14  ;;  %v2698_v28 = vld [vmem:[%s2922_s17 + $0x4e0] ss:$16 sps:$4 sm:$0xff]  }
  0x66   : > { %v2704_v12 = vld [vmem:[%s2922_s17 + $0x4c0] ss:$16 sps:$4 sm:$0xff]  }
  0x68   : > { %1277 = vmatpush1.bf16.msra.mxu0 %v2614_v29  ;;  %1318 = vmatpush1.bf16.msra.mxu1 %v2617_v30  ;;  %v2701_v29 = vld [vmem:[%s2922_s17 + $0x4e8] ss:$16 sps:$4 sm:$0xff]   ;;  %v2706_v30 = vld [vmem:[%s2922_s17 + $0x4c4] ss:$16 sps:$4 sm:$0xff]  }
  0x69   : > { %1278 = vmatprep.subr.bf16.mxu0 %v2622_v31  ;;  %1319 = vmatprep.subr.bf16.mxu1 %v2625_v32  ;;  %v2709_v31 = vld [vmem:[%s2922_s17 + $0x4cc] ss:$16 sps:$4 sm:$0xff]   ;;  %v1480_v32 = vshrl.u32 %v2941_v18, 16  ;;  %v2710_v18 = vld [vmem:[%s2922_s17 + $0x4a0] ss:$16 sps:$4 sm:$0xff]  }
  0x6c   : > { %1279 = vmatpush1.bf16.msra.mxu0 %v2620_v33  ;;  %1320 = vmatpush1.bf16.msra.mxu1 %v2623_v34  ;;  %v2707_v33 = vld [vmem:[%s2922_s17 + $0x4c8] ss:$16 sps:$4 sm:$0xff]   ;;  %v2712_v34 = vld [vmem:[%s2922_s17 + $0x4a4] ss:$16 sps:$4 sm:$0xff]  }
  0x6d   : > { %1280 = vmatprep.subr.bf16.mxu0 %v2628_v35  ;;  %1321 = vmatprep.subr.bf16.mxu1 %v2631_v36  ;;  %v2715_v35 = vld [vmem:[%s2922_s17 + $0x4ac] ss:$16 sps:$4 sm:$0xff]   ;;  %v2713_v36 = vld [vmem:[%s2922_s17 + $0x4a8] ss:$16 sps:$4 sm:$0xff]  }
  0x70   : > { %1281 = vmatpush1.bf16.msra.mxu0 %v2626_v37  ;;  %1322 = vmatpush1.bf16.msra.mxu1 %v2629_v38  ;;  %v2718_v37 = vld [vmem:[%s2922_s17 + $0x484] ss:$16 sps:$4 sm:$0xff]   ;;  %v2721_v38 = vld [vmem:[%s2922_s17 + $0x48c] ss:$16 sps:$4 sm:$0xff]  }
  0x71   : > { %1282 = vmatprep.subr.bf16.mxu0 %v2634_v39  ;;  %1323 = vmatprep.subr.bf16.mxu1 %v2637_v40  ;;  %v2716_v39 = vld [vmem:[%s2922_s17 + $0x480] ss:$16 sps:$4 sm:$0xff]   ;;  %v2719_v40 = vld [vmem:[%s2922_s17 + $0x488] ss:$16 sps:$4 sm:$0xff]  }
  0x74   : > { %1283 = vmatpush1.bf16.msra.mxu0 %v2632_v41  ;;  %1324 = vmatpush1.bf16.msra.mxu1 %v2635_v42  ;;  %v2724_v41 = vld [vmem:[%s2922_s17 + $0x464] ss:$16 sps:$4 sm:$0xff]   ;;  %v2727_v42 = vld [vmem:[%s2922_s17 + $0x46c] ss:$16 sps:$4 sm:$0xff]  }
  0x75   : > { %1284 = vmatprep.subr.bf16.mxu0 %v2640_v43  ;;  %1325 = vmatprep.subr.bf16.mxu1 %v2643_v44  ;;  %v2722_v43 = vld [vmem:[%s2922_s17 + $0x460] ss:$16 sps:$4 sm:$0xff]   ;;  %v2725_v44 = vld [vmem:[%s2922_s17 + $0x468] ss:$16 sps:$4 sm:$0xff]  }
  0x78   : > { %1285 = vmatpush1.bf16.msra.mxu0 %v2638_v45  ;;  %1326 = vmatpush1.bf16.msra.mxu1 %v2641_v46  ;;  %v2730_v45 = vld [vmem:[%s2922_s17 + $0x444] ss:$16 sps:$4 sm:$0xff]   ;;  %v2733_v46 = vld [vmem:[%s2922_s17 + $0x44c] ss:$16 sps:$4 sm:$0xff]  }
  0x79   : > { %1286 = vmatprep.subr.bf16.mxu0 %v2646_v47  ;;  %1327 = vmatprep.subr.bf16.mxu1 %v2649_v48  ;;  %v2728_v47 = vld [vmem:[%s2922_s17 + $0x440] ss:$16 sps:$4 sm:$0xff]   ;;  %v2731_v48 = vld [vmem:[%s2922_s17 + $0x448] ss:$16 sps:$4 sm:$0xff]  }
  0x7c   : > { %1287 = vmatpush1.bf16.msra.mxu0 %v2644_v49  ;;  %1328 = vmatpush1.bf16.msra.mxu1 %v2647_v50  ;;  %v2736_v49 = vld [vmem:[%s2922_s17 + $0x424] ss:$16 sps:$4 sm:$0xff]   ;;  %v2739_v50 = vld [vmem:[%s2922_s17 + $0x42c] ss:$16 sps:$4 sm:$0xff]  }
  0x7d   : > { %1288 = vmatprep.subr.bf16.mxu0 %v2652_v51  ;;  %1329 = vmatprep.subr.bf16.mxu1 %v2655_v52  ;;  %v2734_v51 = vld [vmem:[%s2922_s17 + $0x420] ss:$16 sps:$4 sm:$0xff]   ;;  %v2737_v52 = vld [vmem:[%s2922_s17 + $0x428] ss:$16 sps:$4 sm:$0xff]  }
  0x80   : > { %1289 = vmatpush2.bf16.msra.mxu0 %v2650_v53  ;;  %1330 = vmatpush2.bf16.msra.mxu1 %v2653_v54  ;;  %v2742_v53 = vld [vmem:[%s2922_s17 + $0x404] ss:$16 sps:$4 sm:$0xff]   ;;  %v2745_v54 = vld [vmem:[%s2922_s17 + $0x40c] ss:$16 sps:$4 sm:$0xff]  }
  0x81   : > { %1290 = vmatprep.subr.bf16.mxu0 %v2658_v55  ;;  %1331 = vmatprep.subr.bf16.mxu1 %v2661_v56  ;;  %v2740_v55 = vld [vmem:[%s2922_s17 + $0x400] ss:$16 sps:$4 sm:$0xff]   ;;  %v2743_v56 = vld [vmem:[%s2922_s17 + $0x408] ss:$16 sps:$4 sm:$0xff]  }
  0x84   : > { %1291 = vmatpush2.bf16.msra.mxu0 %v2656_v57  ;;  %1332 = vmatpush2.bf16.msra.mxu1 %v2659_v58  ;;  %v2748_v57 = vld [vmem:[%s2922_s17 + $0x5e4] ss:$16 sps:$4 sm:$0xff]   ;;  %v2751_v58 = vld [vmem:[%s2922_s17 + $0x5ec] ss:$16 sps:$4 sm:$0xff]  }
  0x85   : > { %1292 = vmatprep.subr.bf16.mxu0 %v2664_v59  ;;  %1333 = vmatprep.subr.bf16.mxu1 %v2667_v60  ;;  %v2746_v59 = vld [vmem:[%s2922_s17 + $0x5e0] ss:$16 sps:$4 sm:$0xff]   ;;  %v2749_v60 = vld [vmem:[%s2922_s17 + $0x5e8] ss:$16 sps:$4 sm:$0xff]  }
  0x88   : > { %1293 = vmatpush2.bf16.msra.mxu0 %v2662_v61  ;;  %1334 = vmatpush2.bf16.msra.mxu1 %v2665_v62  ;;  %v2754_v61 = vld [vmem:[%s2922_s17 + $0x5c4] ss:$16 sps:$4 sm:$0xff]   ;;  %v2757_v62 = vld [vmem:[%s2922_s17 + $0x5cc] ss:$16 sps:$4 sm:$0xff]  }
  0x89   : > { %1294 = vmatprep.subr.bf16.mxu0 %v2670_v63  ;;  %1335 = vmatprep.subr.bf16.mxu1 %v2673_v0  ;;  %v2752_v63 = vld [vmem:[%s2922_s17 + $0x5c0] ss:$16 sps:$4 sm:$0xff]   ;;  %v2755_v0 = vld [vmem:[%s2922_s17 + $0x5c8] ss:$16 sps:$4 sm:$0xff]  }
  0x8c   : > { %1295 = vmatpush2.bf16.msra.mxu0 %v2668_v1  ;;  %1336 = vmatpush2.bf16.msra.mxu1 %v2671_v4  ;;  %v2760_v1 = vld [vmem:[%s2922_s17 + $0x5a4] ss:$16 sps:$4 sm:$0xff]   ;;  %v2763_v4 = vld [vmem:[%s2922_s17 + $0x5ac] ss:$16 sps:$4 sm:$0xff]  }
  0x8d   : > { %1296 = vmatprep.subr.bf16.mxu0 %v2676_v5  ;;  %1337 = vmatprep.subr.bf16.mxu1 %v2679_v7  ;;  %v2758_v5 = vld [vmem:[%s2922_s17 + $0x5a0] ss:$16 sps:$4 sm:$0xff]   ;;  %v2761_v7 = vld [vmem:[%s2922_s17 + $0x5a8] ss:$16 sps:$4 sm:$0xff]  }
  0x90   : > { %1297 = vmatpush2.bf16.msra.mxu0 %v2674_v8  ;;  %1338 = vmatpush2.bf16.msra.mxu1 %v2677_v9  ;;  %v2766_v8 = vld [vmem:[%s2922_s17 + $0x584] ss:$16 sps:$4 sm:$0xff]   ;;  %v2769_v9 = vld [vmem:[%s2922_s17 + $0x58c] ss:$16 sps:$4 sm:$0xff]  }
  0x91   : > { %1298 = vmatprep.subr.bf16.mxu0 %v2682_v10  ;;  %1339 = vmatprep.subr.bf16.mxu1 %v2685_v11  ;;  %v2764_v10 = vld [vmem:[%s2922_s17 + $0x580] ss:$16 sps:$4 sm:$0xff]   ;;  %v2767_v11 = vld [vmem:[%s2922_s17 + $0x588] ss:$16 sps:$4 sm:$0xff]  }
  0x94   : > { %1299 = vmatpush2.bf16.msra.mxu0 %v2680_v13  ;;  %1340 = vmatpush2.bf16.msra.mxu1 %v2683_v15  ;;  %v2772_v13 = vld [vmem:[%s2922_s17 + $0x564] ss:$16 sps:$4 sm:$0xff]   ;;  %v2775_v15 = vld [vmem:[%s2922_s17 + $0x56c] ss:$16 sps:$4 sm:$0xff]  }
  0x95   : > { %1300 = vmatprep.subr.bf16.mxu0 %v2688_v16  ;;  %1341 = vmatprep.subr.bf16.mxu1 %v2691_v17  ;;  %v2770_v16 = vld [vmem:[%s2922_s17 + $0x560] ss:$16 sps:$4 sm:$0xff]   ;;  %v2773_v17 = vld [vmem:[%s2922_s17 + $0x568] ss:$16 sps:$4 sm:$0xff]  }
  0x98   : > { %1301 = vmatpush2.bf16.msra.mxu0 %v2686_v19  ;;  %1342 = vmatpush2.bf16.msra.mxu1 %v2689_v21  ;;  %v2778_v19 = vld [vmem:[%s2922_s17 + $0x544] ss:$16 sps:$4 sm:$0xff]   ;;  %v2781_v21 = vld [vmem:[%s2922_s17 + $0x54c] ss:$16 sps:$4 sm:$0xff]  }
  0x99   : > { %1302 = vmatprep.subr.bf16.mxu0 %v2694_v22  ;;  %1343 = vmatprep.subr.bf16.mxu1 %v2697_v23  ;;  %v2776_v22 = vld [vmem:[%s2922_s17 + $0x540] ss:$16 sps:$4 sm:$0xff]   ;;  %v2779_v23 = vld [vmem:[%s2922_s17 + $0x548] ss:$16 sps:$4 sm:$0xff]  }
  0x9c   : > { %1303 = vmatpush2.bf16.msra.mxu0 %v2692_v24  ;;  %1344 = vmatpush2.bf16.msra.mxu1 %v2695_v25  ;;  %v2784_v24 = vld [vmem:[%s2922_s17 + $0x524] ss:$16 sps:$4 sm:$0xff]   ;;  %v2787_v25 = vld [vmem:[%s2922_s17 + $0x52c] ss:$16 sps:$4 sm:$0xff]  }
  0x9d   : > { %1804 = vmatprep.subr.bf16.mxu0 %v2700_v3  ;;  %1845 = vmatprep.subr.bf16.mxu1 %v2703_v26  ;;  %v2782_v3 = vld [vmem:[%s2922_s17 + $0x520] ss:$16 sps:$4 sm:$0xff]   ;;  %v2785_v26 = vld [vmem:[%s2922_s17 + $0x528] ss:$16 sps:$4 sm:$0xff]  }
  0x9f   : > { %1305 = vmatmul.mubr.bf16.vlgmr.msra.gmra.mxu0 %v942_v27  ;;  %1346 = vmatmul.mubr.bf16.vlgmr.msra.gmra.mxu1 %v942_v27  ;;  %v2790_v27 = vld [vmem:[%s2922_s17 + $0x504] ss:$16 sps:$4 sm:$0xff]  }
  0xa0   : > { %1805 = vmatpush1.bf16.msra.mxu0 %v2698_v28  ;;  %1846 = vmatpush1.bf16.msra.mxu1 %v2701_v29  ;;  %v2793_v28 = vld [vmem:[%s2922_s17 + $0x50c] ss:$16 sps:$4 sm:$0xff]   ;;  %v2788_v29 = vld [vmem:[%s2922_s17 + $0x500] ss:$16 sps:$4 sm:$0xff]  }
  0xa1   : > { %1806 = vmatprep.subr.bf16.mxu0 %v2706_v30  ;;  %1847 = vmatprep.subr.bf16.mxu1 %v2709_v31  ;;  %v2791_v30 = vld [vmem:[%s2922_s17 + $0x508] ss:$16 sps:$4 sm:$0xff]   ;;  %v1477_v31 = vshrl.u32 %v3014_v20, 16 }
  0xa2   : > { %1836 = vmatprep.mubr.bf16.mxu0 %v1480_v32  ;;  %1877 = vmatprep.mubr.bf16.mxu1 %v1480_v32 }
  0xa4   : > { %1807 = vmatpush1.bf16.msra.mxu0 %v2704_v12  ;;  %1848 = vmatpush1.bf16.msra.mxu1 %v2707_v33 }
  0xa5   : > { %1808 = vmatprep.subr.bf16.mxu0 %v2712_v34  ;;  %1849 = vmatprep.subr.bf16.mxu1 %v2715_v35 }
  0xa8   : > { %1809 = vmatpush1.bf16.msra.mxu0 %v2710_v18  ;;  %1850 = vmatpush1.bf16.msra.mxu1 %v2713_v36 }
  0xa9   : > { %1810 = vmatprep.subr.bf16.mxu0 %v2718_v37  ;;  %1851 = vmatprep.subr.bf16.mxu1 %v2721_v38 }
  0xac   : > { %1811 = vmatpush1.bf16.msra.mxu0 %v2716_v39  ;;  %1852 = vmatpush1.bf16.msra.mxu1 %v2719_v40 }
  0xad   : > { %1812 = vmatprep.subr.bf16.mxu0 %v2724_v41  ;;  %1853 = vmatprep.subr.bf16.mxu1 %v2727_v42 }
  0xb0   : > { %1813 = vmatpush1.bf16.msra.mxu0 %v2722_v43  ;;  %1854 = vmatpush1.bf16.msra.mxu1 %v2725_v44 }
  0xb1   : > { %1814 = vmatprep.subr.bf16.mxu0 %v2730_v45  ;;  %1855 = vmatprep.subr.bf16.mxu1 %v2733_v46 }
  0xb4   : > { %1815 = vmatpush1.bf16.msra.mxu0 %v2728_v47  ;;  %1856 = vmatpush1.bf16.msra.mxu1 %v2731_v48 }
  0xb5   : > { %1816 = vmatprep.subr.bf16.mxu0 %v2736_v49  ;;  %1857 = vmatprep.subr.bf16.mxu1 %v2739_v50 }
  0xb8   : > { %1817 = vmatpush1.bf16.msra.mxu0 %v2734_v51  ;;  %1858 = vmatpush1.bf16.msra.mxu1 %v2737_v52 }
  0xb9   : > { %1818 = vmatprep.subr.bf16.mxu0 %v2742_v53  ;;  %1859 = vmatprep.subr.bf16.mxu1 %v2745_v54  ;;  %v331_v53 = vld [vmem:[#allocation2] sm:$0xf] }
  0xbc   : > { %1819 = vmatpush1.bf16.msra.mxu0 %v2740_v55  ;;  %1860 = vmatpush1.bf16.msra.mxu1 %v2743_v56 }
  0xbd   : > { %1820 = vmatprep.subr.bf16.mxu0 %v2748_v57  ;;  %1861 = vmatprep.subr.bf16.mxu1 %v2751_v58 }
  0xc0   : > { %1821 = vmatpush2.bf16.msra.mxu0 %v2746_v59  ;;  %1862 = vmatpush2.bf16.msra.mxu1 %v2749_v60 }
  0xc1   : > { %1822 = vmatprep.subr.bf16.mxu0 %v2754_v61  ;;  %1863 = vmatprep.subr.bf16.mxu1 %v2757_v62 }
  0xc4   : > { %1823 = vmatpush2.bf16.msra.mxu0 %v2752_v63  ;;  %1864 = vmatpush2.bf16.msra.mxu1 %v2755_v0 }
  0xc5   : > { %1824 = vmatprep.subr.bf16.mxu0 %v2760_v1  ;;  %1865 = vmatprep.subr.bf16.mxu1 %v2763_v4 }
  0xc8   : > { %1825 = vmatpush2.bf16.msra.mxu0 %v2758_v5  ;;  %1866 = vmatpush2.bf16.msra.mxu1 %v2761_v7 }
  0xc9   : > { %1826 = vmatprep.subr.bf16.mxu0 %v2766_v8  ;;  %1867 = vmatprep.subr.bf16.mxu1 %v2769_v9 }
  0xcc   : > { %1827 = vmatpush2.bf16.msra.mxu0 %v2764_v10  ;;  %1868 = vmatpush2.bf16.msra.mxu1 %v2767_v11 }
  0xcd   : > { %1828 = vmatprep.subr.bf16.mxu0 %v2772_v13  ;;  %1869 = vmatprep.subr.bf16.mxu1 %v2775_v15 }
  0xd0   : > { %1829 = vmatpush2.bf16.msra.mxu0 %v2770_v16  ;;  %1870 = vmatpush2.bf16.msra.mxu1 %v2773_v17 }
  0xd1   : > { %1830 = vmatprep.subr.bf16.mxu0 %v2778_v19  ;;  %1871 = vmatprep.subr.bf16.mxu1 %v2781_v21 }
  0xd4   : > { %1831 = vmatpush2.bf16.msra.mxu0 %v2776_v22  ;;  %1872 = vmatpush2.bf16.msra.mxu1 %v2779_v23 }
  0xd5   : > { %1832 = vmatprep.subr.bf16.mxu0 %v2784_v24  ;;  %1873 = vmatprep.subr.bf16.mxu1 %v2787_v25 }
  0xd8   : > { %1833 = vmatpush2.bf16.msra.mxu0 %v2782_v3  ;;  %1874 = vmatpush2.bf16.msra.mxu1 %v2785_v26 }
  0xd9   : > { %1834 = vmatprep.subr.bf16.mxu0 %v2790_v27  ;;  %1875 = vmatprep.subr.bf16.mxu1 %v2793_v28 }
  0xdc   : > { %1835 = vmatpush2.bf16.msra.mxu0 %v2788_v29  ;;  %1876 = vmatpush2.bf16.msra.mxu1 %v2791_v30 }
  0xdf   : > { %1837 = vmatmul.mubr.bf16.vlgmr.msra.gmra.mxu0 %v1477_v31  ;;  %1878 = vmatmul.mubr.bf16.vlgmr.msra.gmra.mxu1 %v1477_v31 }
 0x11f   : > { %v780_v32 = vpop.f32.mrf.mxu0  ;;  %v821_v12 = vpop.f32.mrf.mxu1 }
 0x121   : > { %v782_v33 = vpop.f32.mrf.mxu0  ;;  %v823_v34 = vpop.f32.mrf.mxu1 }
 0x122   : > { %v832_v35 = vcombine.low %v780_v32, %v782_v33  ;;  %v833_v18 = vcombine.low %v821_v12, %v823_v34 }
 0x123   : > { %v784_v36 = vpop.f32.mrf.mxu0  ;;  %v825_v37 = vpop.f32.mrf.mxu1 }
 0x124   : > { %v840_v38 = vrot.slane %v832_v35, %v2935_v14  ;;  %v847_v39 = vrot.slane %v833_v18, %v2935_v14 }
 0x125   : > { %v785_v40 = vpop.f32.mrf.mxu0  ;;  %v826_v41 = vpop.f32.mrf.mxu1 }
 0x126   : > { %v848_v42 = vcombine.low %v840_v38, %v847_v39 }
 0x128   : > { %v855_v50 = vrot.slane %v848_v42, %v2935_v14 }
 0x12a   : > { %v857_v57 = vadd.f32 %v855_v50, %v331_v53 }
 0x15f   : > { %v1306_v20 = vpop.f32.mrf.mxu0  ;;  %v1347_v43 = vpop.f32.mrf.mxu1 }
 0x161   : > { %v1308_v44 = vpop.f32.mrf.mxu0  ;;  %v1349_v45 = vpop.f32.mrf.mxu1 }
 0x162   : > { %v1358_v46 = vcombine.low %v1306_v20, %v1308_v44  ;;  %v1359_v47 = vcombine.low %v1347_v43, %v1349_v45 }
 0x163   : > { %v1310_v48 = vpop.f32.mrf.mxu0  ;;  %v1351_v49 = vpop.f32.mrf.mxu1 }
 0x164   : > { %v1366_v51 = vrot.slane %v1358_v46, %v2935_v14  ;;  %v1373_v52 = vrot.slane %v1359_v47, %v2935_v14 }
 0x165   : > { %v1311_v54 = vpop.f32.mrf.mxu0  ;;  %v1352_v55 = vpop.f32.mrf.mxu1 }
 0x166   : > { %v1374_v56 = vcombine.low %v1366_v51, %v1373_v52 }
 0x168   : > { %v1381_v58 = vrot.slane %v1374_v56, %v2935_v14 }
 0x16a   : > { %v1383_v59 = vadd.f32 %v1381_v58, %v857_v57 }
 0x19f   : > { %v1838_v60 = vpop.f32.mrf.mxu0  ;;  %v1879_v61 = vpop.f32.mrf.mxu1 }
 0x1a1   : > { %v1840_v62 = vpop.f32.mrf.mxu0  ;;  %v1881_v63 = vpop.f32.mrf.mxu1 }
 0x1a2   : > { %v1890_v0 = vcombine.low %v1838_v60, %v1840_v62  ;;  %v1891_v1 = vcombine.low %v1879_v61, %v1881_v63 }
 0x1a3   : > { %v1842_v4 = vpop.f32.mrf.mxu0  ;;  %v1883_v5 = vpop.f32.mrf.mxu1 }
 0x1a4   : > { %v1898_v7 = vrot.slane %v1890_v0, %v2935_v14  ;;  %v1905_v8 = vrot.slane %v1891_v1, %v2935_v14 }
 0x1a5   : > { %v1843_v9 = vpop.f32.mrf.mxu0  ;;  %v1884_v10 = vpop.f32.mrf.mxu1 }
 0x1a6   : > { %v1906_v11 = vcombine.low %v1898_v7, %v1905_v8 }
 0x1a8   : > { %v1913_v13 = vrot.slane %v1906_v11, %v2935_v14  ;;  %1924 = sbr.rel (%p2458_p8) target bundleno = 454 (0x1c6), region = 48 }
 0x1aa   : > { %v1915_v15 = vadd.f32 %v1913_v13, %v1383_v59 }
 0x1ac   : > { %1920 = vst.msk [vmem:[#allocation2] sm:$0xf] %vm1918_vm1, %v1915_v15 }
 0x1ad   : > { %v1926_v17 = vld [vmem:[%s3205_s3] sm:$0xf]  ;;  %v1934_v22 = vsub.s32 0, %v2925_v6  ;;  %v1938_v23 = vsub.s32 1, %v2925_v6  ;;  %vm1985_vm2 = vcmask 1040384   ;;  %vm1988_vm4 = vcmask 1041409  }
 0x1ae   : > { %v1928_v19 = vld [vmem:[%s3206_s4] sm:$0xf]  ;;  %vm1986_vm3 = vsmask.f32 256  ;;  %v1942_v24 = vsub.s32 2, %v2925_v6  ;;  %v1946_v25 = vsub.s32 3, %v2925_v6 }
 0x1af   : > { %vm3170_vm5 = vmand %vm1985_vm2, %vm1986_vm3  ;;  %vm1989_vm6 = vsmask.f32 1280  ;;  %vm1992_vm8 = vcmask 1042434   ;;  %vm1993_vm9 = vsmask.f32 2304  ;;  %vm1996_vm12 = vcmask 1043459  }
 0x1b0   : > { %vm3174_vm7 = vmand %vm1988_vm4, %vm1989_vm6  ;;  %vm1997_vm13 = vsmask.f32 3328  ;;  %v2000_v35 = vld [vmem:[%s2903_s6] sm:$0xf] }
 0x1b1   : > { %vm1991_vm10 = vmor %vm3174_vm7, %vm3170_vm5 }
 0x1b2   : > { %vm1994_vm11 = vmand %vm1992_vm8, %vm1993_vm9 }
 0x1b3   : > { %v1925_v16 = vld [vmem:[#allocation2] sm:$0xf]  ;;  %vm1995_vm14 = vmor %vm1994_vm11, %vm1991_vm10 }
 0x1b4   : > { %v1927_v21 = vmul.f32 %v1926_v17, %v1925_v16  ;;  %vm1998_vm15 = vmand %vm1996_vm12, %vm1997_vm13 }
 0x1b5   : > { %vm1999_vm0 = vmor %vm1998_vm15, %vm1995_vm14 }
 0x1b6   : > { %v1929_v2 = vadd.f32 %v1928_v19, %v1927_v21 }
 0x1b8   : > { %v1930_v27 = vmax.f32 %v1929_v2, 0.0 }
 0x1ba   : > { %v1935_v28 = vrot.slane %v1930_v27, %v1934_v22  ;;  %v1939_v6 = vrot.slane %v1930_v27, %v1938_v23  ;;  %v1943_v29 = vrot.slane %v1930_v27, %v1942_v24  ;;  %v1947_v30 = vrot.slane %v1930_v27, %v1946_v25 }
 0x1bc   : > { %v2459_v31 = vpack.c.bf16 %v1939_v6, %v1935_v28  ;;  %v2460_v32 = vpack.c.bf16 %v1947_v30, %v1943_v29 }
 0x1be   : > { %v1968_v12 = vrot.slane %v2459_v31, %v2935_v14  ;;  %v1975_v33 = vrot.slane %v2460_v32, %v2935_v14 }
 0x1c0   : > { %v1976_v34 = vcombine.low %v1968_v12, %v1975_v33 }
 0x1c2   : > { %v1983_v18 = vrot.slane %v1976_v34, %v2935_v14 }
 0x1c4   : > { %v2001_v36 = vsel %vm1999_vm0, %v1983_v18, %v2000_v35 }
 0x1c5   : > { %2002 = vst [vmem:[%s2903_s6] sm:$0xf] %v2001_v36 }
 0x1c6 PF: > { %s15_s22 = sadd.s32 1, %s2832_s22   ;;  %s3212_s18 = smov %s2824_s20 }
 0x1c7   : > { %p12_p9 = scmp.ge.s32.totalorder %s15_s22, 8   ;;  %s3213_s19 = smov %s2828_s21 }
 0x1c8   : > { %s3214_s20 = smov %s3217_s23  ;;  %s3215_s21 = smov %s3221_s24 }
 0x1c9   :  { %14 = sbr.rel (!%p12_p9) target bundleno = 3 (0x3), region = 84 }

// kernel: _lambda_.26
= control target key start
LH: loop header
LB: loop body
LE: loop exit
PB: predicated region body
PF: predicated region fallthrough
CT: control target
= control target key end

     0   :  { %s4872_s18 = smov 0   ;;  %s4874_s19 = smov 0   ;;  %s5463_s0 = inlined_call_operand.vmem [shape: bf16[2,3,3,512], index: 0, kind: input, shape index: {}]   ;;  %s5464_s1 = inlined_call_operand.vmem [shape: bf16[9,512,512], index: 1, kind: input, shape index: {}]   ;;  %s5465_s2 = inlined_call_operand.vmem [shape: f32[1,512], index: 2, kind: input, shape index: {}]   ;;  %s5466_s3 = inlined_call_operand.vmem [shape: f32[1,512], index: 3, kind: input, shape index: {}]   ;;  %s5467_s4 = inlined_call_operand.vmem [shape: bf16[2,1,1,512], index: 4, kind: input, shape index: {}]   ;;  %s5468_s5 = inlined_call_operand.vmem [shape: bf16[2,1,1,512], index: 5, kind: output, shape index: {}]  }
   0x1   :  { %s4876_s20 = smov 0   ;;  %s4878_s21 = smov 0  }
   0x2   :  { %s4880_s22 = smov 0  }
   0x3 LB: > { %s27_s23 = sadd.s32 1, %s4829_s20  ;;  %s34_s24 = sadd.s32 1, %s4833_s21  ;;  %s4837_s22 = sphi %s4880_s22, %s15_s22   ;;  %s4833_s21 = sphi %s4878_s21, %s5476_s21   ;;  %s4829_s20 = sphi %s4876_s20, %s5475_s20   ;;  %s4825_s19 = sphi %s4874_s19, %s5474_s19   ;;  %s4821_s18 = sphi %s4872_s18, %s5473_s18  }
   0x4   : > { %p28_p0 = scmp.ge.s32.totalorder %s27_s23, 3  ;;  %p3520_p1 = scmp.ge.s32.totalorder %s4837_s22, 1 }
   0x5   : > { %p233_p2 = scmp.lt.s32.totalorder %s4837_s22, 7 }
   0x6   : > { %s5478_s23 = smov (%p28_p0, %s27_s23), 0  ;;  %s5480_s24 = smov (!%p28_p0, %s34_s24), %s4833_s21 }
   0x7   : > { %p234_p3 = pnand %p3520_p1, %p233_p2  ;;  %p36_p4 = scmp.ge.s32.totalorder %s5480_s24, 2 }
   0x8   : > { %p278_p5 = scmp.lt.s32.totalorder (!%p234_p3), %s4825_s19, 1  ;;  %p280_p6 = scmp.lt.s32.totalorder (!%p234_p3), %s4821_s18, 2 }
   0x9   : > { %s5482_s24 = smov (%p36_p4, %s5480_s24), 0  ;;  %237 = sbr.rel (%p234_p3) target bundleno = 652 (0x28c), region = 40 }
   0xa   : > { %p3525_p7 = scmp.ne.s32.totalorder (!%p234_p3), %s4821_s18, 0 }
   0xe   : > { %s5484_s19 = smov (!%p278_p5, %s4825_s19), 1 }
   0xf   : > { %s281_s25 = scalar_select %p280_p6, %s4821_s18, 2 }
  0x10   : > { %s4176_s26 = smul.u32 12, %s5484_s19  ;;  %s3523_s27 = sshll.u32 %s5484_s19, 2 }
  0x11   : > { %s3521_s28 = sshll.u32 %s281_s25, 2  ;;  %s4909_s6 = scalar_lea.vmem %s5467_s4, %s3523_s27 }
  0x12   : > { %s284_s7 = sadd.s32 %s4176_s26, %s3521_s28  ;;  %s4914_s10 = scalar_lea.vmem %s5468_s5, %s3523_s27 }
  0x13   : > { %s3522_s11 = sshll.u32 %s284_s7, 1  ;;  %307 = sbr.rel (%p3525_p7) target bundleno = 28 (0x1c), region = 44 }
  0x14   : > { %s4919_s14 = scalar_lea.vmem %s5463_s0, %s3522_s11 }
  0x18   : > { %v308_v0 = vlaneseq  ;;  %v4839_v1 = vmov 0.0  }
  0x1a   : > { %vm310_vm0 = vcmp.lt.s32.totalorder %v308_v0, 512 }
  0x1b   : > { %312 = vst.msk [vmem:[#allocation2] sm:$0xf] %vm310_vm0, %v4839_v1 }
  0x1c PF: > { %s4175_s15 = smul.u32 3072, %s4821_s18  ;;  %v315_v2 = vld [vmem:[%s4919_s14] sm:$0x55]  ;;  %v452_v3 = vlaneseq  ;;  %v4840_v4 = vmov 1983009808   ;;  %p4170_p8 = scmp.ne.s32.totalorder %s4821_s18, 2 }
  0x1d   : > { %v450_v5 = vunpack.c.l.s4 %v4840_v4  ;;  %v448_v9 = vcombine.high %v315_v2, %v315_v2 }
  0x1e   : > { %s4927_s19 = scalar_lea.vmem %s5464_s1, %s4175_s15  ;;  %v4930_v6 = vshrl.u32 %v452_v3, 7  ;;  %vm3299_vm1 = vcmp.lt.s32.totalorder %v452_v3, 512 }
  0x1f   : > { %v4220_v7 = vld [vmem:[%s4927_s19 + $0xe4] ss:$16 sps:$4 sm:$0xff]   ;;  %v451_v8 = vunpack.c.0.s8 %v450_v5  ;;  %v4224_v11 = vld [vmem:[%s4927_s19 + $0xe0] ss:$16 sps:$4 sm:$0xff]  }
  0x20   : > { %v4222_v10 = vld [vmem:[%s4927_s19 + $0x2e4] ss:$16 sps:$4 sm:$0xff]   ;;  %1109 = vmatprep.subr.bf16.mxu0 %v4220_v7  ;;  %v4225_v12 = vld [vmem:[%s4927_s19 + $0x2e0] ss:$16 sps:$4 sm:$0xff]  }
  0x21   : > { %v4937_v13 = vsub.s32 %v451_v8, %v4930_v6  ;;  %1150 = vmatprep.subr.bf16.mxu1 %v4222_v10  ;;  %v4226_v14 = vld [vmem:[%s4927_s19 + $0xc4] ss:$16 sps:$4 sm:$0xff]   ;;  %1110 = vmatpush1.bf16.msra.mxu0 %v4224_v11  ;;  %v4230_v16 = vld [vmem:[%s4927_s19 + $0xc0] ss:$16 sps:$4 sm:$0xff]  }
  0x22   : > { %1151 = vmatpush1.bf16.msra.mxu1 %v4225_v12  ;;  %v4228_v15 = vld [vmem:[%s4927_s19 + $0x2c4] ss:$16 sps:$4 sm:$0xff]   ;;  %1111 = vmatprep.subr.bf16.mxu0 %v4226_v14  ;;  %v4231_v19 = vld [vmem:[%s4927_s19 + $0x2c0] ss:$16 sps:$4 sm:$0xff]  }
  0x23   : > { %v4943_v17 = vrot.slane %v315_v2, %v4937_v13  ;;  %v4946_v18 = vrot.slane %v448_v9, %v4937_v13  ;;  %1152 = vmatprep.subr.bf16.mxu1 %v4228_v15  ;;  %v4232_v20 = vld [vmem:[%s4927_s19 + $0xa4] ss:$16 sps:$4 sm:$0xff]   ;;  %v4236_v24 = vld [vmem:[%s4927_s19 + $0xa0] ss:$16 sps:$4 sm:$0xff]  }
  0x24   : > { %v4234_v23 = vld [vmem:[%s4927_s19 + $0x2a4] ss:$16 sps:$4 sm:$0xff]   ;;  %v4237_v25 = vld [vmem:[%s4927_s19 + $0x2a0] ss:$16 sps:$4 sm:$0xff]  }
  0x25   : > { %v4952_v21 = vcombine.high %v4943_v17, %v4943_v17  ;;  %v4956_v22 = vcombine.high %v4946_v18, %v4946_v18  ;;  %1112 = vmatpush1.bf16.msra.mxu0 %v4230_v16  ;;  %v4238_v26 = vld [vmem:[%s4927_s19 + $0x84] ss:$16 sps:$4 sm:$0xff]   ;;  %v4242_v28 = vld [vmem:[%s4927_s19 + $0x80] ss:$16 sps:$4 sm:$0xff]  }
  0x26   : > { %1153 = vmatpush1.bf16.msra.mxu1 %v4231_v19  ;;  %1113 = vmatprep.subr.bf16.mxu0 %v4232_v20  ;;  %v4240_v27 = vld [vmem:[%s4927_s19 + $0x284] ss:$16 sps:$4 sm:$0xff]   ;;  %v4243_v29 = vld [vmem:[%s4927_s19 + $0x280] ss:$16 sps:$4 sm:$0xff]   ;;  %v4319_v19 = vld [vmem:[%s4927_s19 + $0xec] ss:$16 sps:$4 sm:$0xff]  }
  0x27   : > { %1154 = vmatprep.subr.bf16.mxu1 %v4234_v23  ;;  %1141 = vmatprep.mubr.bf16.mxu0 %v4952_v21  ;;  %v4244_v30 = vld [vmem:[%s4927_s19 + $0x64] ss:$16 sps:$4 sm:$0xff]   ;;  %v4248_v32 = vld [vmem:[%s4927_s19 + $0x60] ss:$16 sps:$4 sm:$0xff]   ;;  %v4322_v20 = vld [vmem:[%s4927_s19 + $0x2ec] ss:$16 sps:$4 sm:$0xff]  }
  0x28   : > { %1182 = vmatprep.mubr.bf16.mxu1 %v4956_v22  ;;  %v4246_v31 = vld [vmem:[%s4927_s19 + $0x264] ss:$16 sps:$4 sm:$0xff]   ;;  %v4249_v33 = vld [vmem:[%s4927_s19 + $0x260] ss:$16 sps:$4 sm:$0xff]   ;;  %v4317_v23 = vld [vmem:[%s4927_s19 + $0xe8] ss:$16 sps:$4 sm:$0xff]  }
  0x29   : > { %1114 = vmatpush1.bf16.msra.mxu0 %v4236_v24  ;;  %v4250_v34 = vld [vmem:[%s4927_s19 + $0x44] ss:$16 sps:$4 sm:$0xff]   ;;  %v4254_v36 = vld [vmem:[%s4927_s19 + $0x40] ss:$16 sps:$4 sm:$0xff]   ;;  %v4320_v24 = vld [vmem:[%s4927_s19 + $0x2e8] ss:$16 sps:$4 sm:$0xff]  }
  0x2a   : > { %1155 = vmatpush1.bf16.msra.mxu1 %v4237_v25  ;;  %1115 = vmatprep.subr.bf16.mxu0 %v4238_v26  ;;  %v4252_v35 = vld [vmem:[%s4927_s19 + $0x244] ss:$16 sps:$4 sm:$0xff]   ;;  %v4255_v37 = vld [vmem:[%s4927_s19 + $0x240] ss:$16 sps:$4 sm:$0xff]   ;;  %v4325_v25 = vld [vmem:[%s4927_s19 + $0xcc] ss:$16 sps:$4 sm:$0xff]  }
  0x2b   : > { %1156 = vmatprep.subr.bf16.mxu1 %v4240_v27  ;;  %v4256_v38 = vld [vmem:[%s4927_s19 + $0x24] ss:$16 sps:$4 sm:$0xff]   ;;  %v4260_v40 = vld [vmem:[%s4927_s19 + $0x20] ss:$16 sps:$4 sm:$0xff]   ;;  %v4328_v26 = vld [vmem:[%s4927_s19 + $0x2cc] ss:$16 sps:$4 sm:$0xff]  }
  0x2c   : > { %v4258_v39 = vld [vmem:[%s4927_s19 + $0x224] ss:$16 sps:$4 sm:$0xff]   ;;  %v4261_v41 = vld [vmem:[%s4927_s19 + $0x220] ss:$16 sps:$4 sm:$0xff]   ;;  %v4323_v27 = vld [vmem:[%s4927_s19 + $0xc8] ss:$16 sps:$4 sm:$0xff]  }
  0x2d   : > { %1116 = vmatpush1.bf16.msra.mxu0 %v4242_v28  ;;  %v4262_v42 = vld [vmem:[%s4927_s19 + $0x4] ss:$16 sps:$4 sm:$0xff]   ;;  %v4266_v44 = vld [vmem:[%s4927_s19] ss:$16 sps:$4 sm:$0xff]   ;;  %v4326_v28 = vld [vmem:[%s4927_s19 + $0x2c8] ss:$16 sps:$4 sm:$0xff]  }
  0x2e   : > { %1157 = vmatpush1.bf16.msra.mxu1 %v4243_v29  ;;  %1117 = vmatprep.subr.bf16.mxu0 %v4244_v30  ;;  %v4264_v43 = vld [vmem:[%s4927_s19 + $0x204] ss:$16 sps:$4 sm:$0xff]   ;;  %v4267_v45 = vld [vmem:[%s4927_s19 + $0x200] ss:$16 sps:$4 sm:$0xff]   ;;  %v4331_v29 = vld [vmem:[%s4927_s19 + $0xac] ss:$16 sps:$4 sm:$0xff]  }
  0x2f   : > { %1158 = vmatprep.subr.bf16.mxu1 %v4246_v31  ;;  %v4268_v46 = vld [vmem:[%s4927_s19 + $0x1e4] ss:$16 sps:$4 sm:$0xff]   ;;  %v4272_v48 = vld [vmem:[%s4927_s19 + $0x1e0] ss:$16 sps:$4 sm:$0xff]   ;;  %v4334_v30 = vld [vmem:[%s4927_s19 + $0x2ac] ss:$16 sps:$4 sm:$0xff]  }
  0x30   : > { %v4270_v47 = vld [vmem:[%s4927_s19 + $0x3e4] ss:$16 sps:$4 sm:$0xff]   ;;  %v4273_v49 = vld [vmem:[%s4927_s19 + $0x3e0] ss:$16 sps:$4 sm:$0xff]   ;;  %v4329_v31 = vld [vmem:[%s4927_s19 + $0xa8] ss:$16 sps:$4 sm:$0xff]  }
  0x31   : > { %1118 = vmatpush1.bf16.msra.mxu0 %v4248_v32  ;;  %v4274_v50 = vld [vmem:[%s4927_s19 + $0x1c4] ss:$16 sps:$4 sm:$0xff]   ;;  %v4278_v52 = vld [vmem:[%s4927_s19 + $0x1c0] ss:$16 sps:$4 sm:$0xff]   ;;  %v4332_v32 = vld [vmem:[%s4927_s19 + $0x2a8] ss:$16 sps:$4 sm:$0xff]  }
  0x32   : > { %1159 = vmatpush1.bf16.msra.mxu1 %v4249_v33  ;;  %1119 = vmatprep.subr.bf16.mxu0 %v4250_v34  ;;  %v4276_v51 = vld [vmem:[%s4927_s19 + $0x3c4] ss:$16 sps:$4 sm:$0xff]   ;;  %v4279_v53 = vld [vmem:[%s4927_s19 + $0x3c0] ss:$16 sps:$4 sm:$0xff]   ;;  %v4337_v33 = vld [vmem:[%s4927_s19 + $0x8c] ss:$16 sps:$4 sm:$0xff]  }
  0x33   : > { %1160 = vmatprep.subr.bf16.mxu1 %v4252_v35  ;;  %v4280_v54 = vld [vmem:[%s4927_s19 + $0x1a4] ss:$16 sps:$4 sm:$0xff]   ;;  %v4284_v56 = vld [vmem:[%s4927_s19 + $0x1a0] ss:$16 sps:$4 sm:$0xff]   ;;  %v4340_v34 = vld [vmem:[%s4927_s19 + $0x28c] ss:$16 sps:$4 sm:$0xff]  }
  0x34   : > { %v4282_v55 = vld [vmem:[%s4927_s19 + $0x3a4] ss:$16 sps:$4 sm:$0xff]   ;;  %v4285_v57 = vld [vmem:[%s4927_s19 + $0x3a0] ss:$16 sps:$4 sm:$0xff]   ;;  %v4335_v35 = vld [vmem:[%s4927_s19 + $0x88] ss:$16 sps:$4 sm:$0xff]  }
  0x35   : > { %1120 = vmatpush1.bf16.msra.mxu0 %v4254_v36  ;;  %v4286_v58 = vld [vmem:[%s4927_s19 + $0x184] ss:$16 sps:$4 sm:$0xff]   ;;  %v4290_v60 = vld [vmem:[%s4927_s19 + $0x180] ss:$16 sps:$4 sm:$0xff]   ;;  %v4338_v36 = vld [vmem:[%s4927_s19 + $0x288] ss:$16 sps:$4 sm:$0xff]  }
  0x36   : > { %1161 = vmatpush1.bf16.msra.mxu1 %v4255_v37  ;;  %1121 = vmatprep.subr.bf16.mxu0 %v4256_v38  ;;  %v4288_v59 = vld [vmem:[%s4927_s19 + $0x384] ss:$16 sps:$4 sm:$0xff]   ;;  %v4291_v61 = vld [vmem:[%s4927_s19 + $0x380] ss:$16 sps:$4 sm:$0xff]   ;;  %v4341_v37 = vld [vmem:[%s4927_s19 + $0x68] ss:$16 sps:$4 sm:$0xff]  }
  0x37   : > { %1162 = vmatprep.subr.bf16.mxu1 %v4258_v39  ;;  %v4292_v62 = vld [vmem:[%s4927_s19 + $0x164] ss:$16 sps:$4 sm:$0xff]   ;;  %v4296_v0 = vld [vmem:[%s4927_s19 + $0x160] ss:$16 sps:$4 sm:$0xff]   ;;  %v4344_v38 = vld [vmem:[%s4927_s19 + $0x268] ss:$16 sps:$4 sm:$0xff]  }
  0x38   : > { %v4294_v63 = vld [vmem:[%s4927_s19 + $0x364] ss:$16 sps:$4 sm:$0xff]   ;;  %v4297_v1 = vld [vmem:[%s4927_s19 + $0x360] ss:$16 sps:$4 sm:$0xff]   ;;  %v4349_v39 = vld [vmem:[%s4927_s19 + $0x4c] ss:$16 sps:$4 sm:$0xff]  }
  0x39   : > { %1122 = vmatpush1.bf16.msra.mxu0 %v4260_v40  ;;  %v4298_v2 = vld [vmem:[%s4927_s19 + $0x144] ss:$16 sps:$4 sm:$0xff]   ;;  %v4302_v5 = vld [vmem:[%s4927_s19 + $0x140] ss:$16 sps:$4 sm:$0xff]   ;;  %v4352_v40 = vld [vmem:[%s4927_s19 + $0x24c] ss:$16 sps:$4 sm:$0xff]  }
  0x3a   : > { %1163 = vmatpush1.bf16.msra.mxu1 %v4261_v41  ;;  %1123 = vmatprep.subr.bf16.mxu0 %v4262_v42  ;;  %v4300_v4 = vld [vmem:[%s4927_s19 + $0x344] ss:$16 sps:$4 sm:$0xff]   ;;  %v4303_v7 = vld [vmem:[%s4927_s19 + $0x340] ss:$16 sps:$4 sm:$0xff]   ;;  %v4347_v41 = vld [vmem:[%s4927_s19 + $0x48] ss:$16 sps:$4 sm:$0xff]  }
  0x3b   : > { %1164 = vmatprep.subr.bf16.mxu1 %v4264_v43  ;;  %v4304_v8 = vld [vmem:[%s4927_s19 + $0x124] ss:$16 sps:$4 sm:$0xff]   ;;  %v4308_v10 = vld [vmem:[%s4927_s19 + $0x120] ss:$16 sps:$4 sm:$0xff]   ;;  %v4350_v42 = vld [vmem:[%s4927_s19 + $0x248] ss:$16 sps:$4 sm:$0xff]  }
  0x3c   : > { %v4306_v9 = vld [vmem:[%s4927_s19 + $0x324] ss:$16 sps:$4 sm:$0xff]   ;;  %v4309_v11 = vld [vmem:[%s4927_s19 + $0x320] ss:$16 sps:$4 sm:$0xff]   ;;  %v4355_v43 = vld [vmem:[%s4927_s19 + $0x2c] ss:$16 sps:$4 sm:$0xff]  }
  0x3d   : > { %1124 = vmatpush1.bf16.msra.mxu0 %v4266_v44  ;;  %v4310_v12 = vld [vmem:[%s4927_s19 + $0x104] ss:$16 sps:$4 sm:$0xff]   ;;  %v4314_v15 = vld [vmem:[%s4927_s19 + $0x100] ss:$16 sps:$4 sm:$0xff]   ;;  %v4358_v44 = vld [vmem:[%s4927_s19 + $0x22c] ss:$16 sps:$4 sm:$0xff]  }
  0x3e   : > { %1165 = vmatpush1.bf16.msra.mxu1 %v4267_v45  ;;  %1125 = vmatprep.subr.bf16.mxu0 %v4268_v46  ;;  %v4312_v14 = vld [vmem:[%s4927_s19 + $0x304] ss:$16 sps:$4 sm:$0xff]   ;;  %v4315_v16 = vld [vmem:[%s4927_s19 + $0x300] ss:$16 sps:$4 sm:$0xff]   ;;  %v4353_v45 = vld [vmem:[%s4927_s19 + $0x28] ss:$16 sps:$4 sm:$0xff]  }
  0x3f   : > { %1166 = vmatprep.subr.bf16.mxu1 %v4270_v47  ;;  %v4356_v46 = vld [vmem:[%s4927_s19 + $0x228] ss:$16 sps:$4 sm:$0xff]   ;;  %v4361_v47 = vld [vmem:[%s4927_s19 + $0xc] ss:$16 sps:$4 sm:$0xff]  }
  0x41   : > { %1126 = vmatpush2.bf16.msra.mxu0 %v4272_v48  ;;  %v4364_v48 = vld [vmem:[%s4927_s19 + $0x20c] ss:$16 sps:$4 sm:$0xff]  }
  0x42   : > { %1167 = vmatpush2.bf16.msra.mxu1 %v4273_v49  ;;  %1127 = vmatprep.subr.bf16.mxu0 %v4274_v50  ;;  %v4359_v49 = vld [vmem:[%s4927_s19 + $0x8] ss:$16 sps:$4 sm:$0xff]  }
  0x43   : > { %1168 = vmatprep.subr.bf16.mxu1 %v4276_v51  ;;  %v4362_v50 = vld [vmem:[%s4927_s19 + $0x208] ss:$16 sps:$4 sm:$0xff]   ;;  %v4367_v51 = vld [vmem:[%s4927_s19 + $0x1ec] ss:$16 sps:$4 sm:$0xff]  }
  0x45   : > { %1128 = vmatpush2.bf16.msra.mxu0 %v4278_v52  ;;  %v4370_v52 = vld [vmem:[%s4927_s19 + $0x3ec] ss:$16 sps:$4 sm:$0xff]  }
  0x46   : > { %1169 = vmatpush2.bf16.msra.mxu1 %v4279_v53  ;;  %1129 = vmatprep.subr.bf16.mxu0 %v4280_v54  ;;  %v4365_v53 = vld [vmem:[%s4927_s19 + $0x1e8] ss:$16 sps:$4 sm:$0xff]  }
  0x47   : > { %1170 = vmatprep.subr.bf16.mxu1 %v4282_v55  ;;  %v4368_v54 = vld [vmem:[%s4927_s19 + $0x3e8] ss:$16 sps:$4 sm:$0xff]   ;;  %v4373_v55 = vld [vmem:[%s4927_s19 + $0x1cc] ss:$16 sps:$4 sm:$0xff]  }
  0x49   : > { %1130 = vmatpush2.bf16.msra.mxu0 %v4284_v56  ;;  %v4376_v56 = vld [vmem:[%s4927_s19 + $0x3cc] ss:$16 sps:$4 sm:$0xff]  }
  0x4a   : > { %1171 = vmatpush2.bf16.msra.mxu1 %v4285_v57  ;;  %1131 = vmatprep.subr.bf16.mxu0 %v4286_v58  ;;  %v4371_v57 = vld [vmem:[%s4927_s19 + $0x1c8] ss:$16 sps:$4 sm:$0xff]  }
  0x4b   : > { %1172 = vmatprep.subr.bf16.mxu1 %v4288_v59  ;;  %v4374_v58 = vld [vmem:[%s4927_s19 + $0x3c8] ss:$16 sps:$4 sm:$0xff]   ;;  %v4379_v59 = vld [vmem:[%s4927_s19 + $0x1ac] ss:$16 sps:$4 sm:$0xff]  }
  0x4d   : > { %1132 = vmatpush2.bf16.msra.mxu0 %v4290_v60  ;;  %v4382_v60 = vld [vmem:[%s4927_s19 + $0x3ac] ss:$16 sps:$4 sm:$0xff]  }
  0x4e   : > { %1173 = vmatpush2.bf16.msra.mxu1 %v4291_v61  ;;  %1133 = vmatprep.subr.bf16.mxu0 %v4292_v62  ;;  %v4377_v61 = vld [vmem:[%s4927_s19 + $0x1a8] ss:$16 sps:$4 sm:$0xff]  }
  0x4f   : > { %1174 = vmatprep.subr.bf16.mxu1 %v4294_v63  ;;  %v4380_v62 = vld [vmem:[%s4927_s19 + $0x3a8] ss:$16 sps:$4 sm:$0xff]   ;;  %v4385_v63 = vld [vmem:[%s4927_s19 + $0x18c] ss:$16 sps:$4 sm:$0xff]  }
  0x51   : > { %1134 = vmatpush2.bf16.msra.mxu0 %v4296_v0  ;;  %v4388_v0 = vld [vmem:[%s4927_s19 + $0x38c] ss:$16 sps:$4 sm:$0xff]  }
  0x52   : > { %1175 = vmatpush2.bf16.msra.mxu1 %v4297_v1  ;;  %1135 = vmatprep.subr.bf16.mxu0 %v4298_v2  ;;  %v4383_v1 = vld [vmem:[%s4927_s19 + $0x188] ss:$16 sps:$4 sm:$0xff]  }
  0x53   : > { %1176 = vmatprep.subr.bf16.mxu1 %v4300_v4  ;;  %v4386_v2 = vld [vmem:[%s4927_s19 + $0x388] ss:$16 sps:$4 sm:$0xff]   ;;  %v4391_v4 = vld [vmem:[%s4927_s19 + $0x16c] ss:$16 sps:$4 sm:$0xff]  }
  0x55   : > { %1136 = vmatpush2.bf16.msra.mxu0 %v4302_v5  ;;  %v4394_v5 = vld [vmem:[%s4927_s19 + $0x36c] ss:$16 sps:$4 sm:$0xff]  }
  0x56   : > { %1177 = vmatpush2.bf16.msra.mxu1 %v4303_v7  ;;  %1137 = vmatprep.subr.bf16.mxu0 %v4304_v8  ;;  %v4389_v7 = vld [vmem:[%s4927_s19 + $0x168] ss:$16 sps:$4 sm:$0xff]  }
  0x57   : > { %1178 = vmatprep.subr.bf16.mxu1 %v4306_v9  ;;  %v4392_v8 = vld [vmem:[%s4927_s19 + $0x368] ss:$16 sps:$4 sm:$0xff]   ;;  %v4397_v9 = vld [vmem:[%s4927_s19 + $0x14c] ss:$16 sps:$4 sm:$0xff]  }
  0x59   : > { %1138 = vmatpush2.bf16.msra.mxu0 %v4308_v10  ;;  %v4400_v10 = vld [vmem:[%s4927_s19 + $0x34c] ss:$16 sps:$4 sm:$0xff]  }
  0x5a   : > { %1179 = vmatpush2.bf16.msra.mxu1 %v4309_v11  ;;  %1139 = vmatprep.subr.bf16.mxu0 %v4310_v12  ;;  %v4395_v11 = vld [vmem:[%s4927_s19 + $0x148] ss:$16 sps:$4 sm:$0xff]  }
  0x5b   : > { %1180 = vmatprep.subr.bf16.mxu1 %v4312_v14  ;;  %v4398_v12 = vld [vmem:[%s4927_s19 + $0x348] ss:$16 sps:$4 sm:$0xff]   ;;  %v4403_v14 = vld [vmem:[%s4927_s19 + $0x12c] ss:$16 sps:$4 sm:$0xff]  }
  0x5d   : > { %1140 = vmatpush2.bf16.msra.mxu0 %v4314_v15  ;;  %v4406_v15 = vld [vmem:[%s4927_s19 + $0x32c] ss:$16 sps:$4 sm:$0xff]  }
  0x5e   : > { %1181 = vmatpush2.bf16.msra.mxu1 %v4315_v16  ;;  %1191 = vmatprep.subr.bf16.mxu0 %v4319_v19  ;;  %v4401_v16 = vld [vmem:[%s4927_s19 + $0x128] ss:$16 sps:$4 sm:$0xff]  }
  0x5f   : > { %1232 = vmatprep.subr.bf16.mxu1 %v4322_v20  ;;  %v4404_v19 = vld [vmem:[%s4927_s19 + $0x328] ss:$16 sps:$4 sm:$0xff]   ;;  %v4409_v20 = vld [vmem:[%s4927_s19 + $0x10c] ss:$16 sps:$4 sm:$0xff]  }
  0x60   : > { %1142 = vmatmul.mubr.bf16.vlgmr.msra.gmra.mxu0 %v4943_v17 }
  0x61   : > { %1183 = vmatmul.mubr.bf16.vlgmr.msra.gmra.mxu1 %v4946_v18  ;;  %1192 = vmatpush1.bf16.msra.mxu0 %v4317_v23  ;;  %v4412_v23 = vld [vmem:[%s4927_s19 + $0x30c] ss:$16 sps:$4 sm:$0xff]  }
  0x62   : > { %1233 = vmatpush1.bf16.msra.mxu1 %v4320_v24  ;;  %1193 = vmatprep.subr.bf16.mxu0 %v4325_v25  ;;  %v4407_v24 = vld [vmem:[%s4927_s19 + $0x108] ss:$16 sps:$4 sm:$0xff]  }
  0x63   : > { %1234 = vmatprep.subr.bf16.mxu1 %v4328_v26  ;;  %1223 = vmatprep.mubr.bf16.mxu0 %v4952_v21  ;;  %v4343_v21 = vld [vmem:[%s4927_s19 + $0x6c] ss:$16 sps:$4 sm:$0xff]   ;;  %v4410_v25 = vld [vmem:[%s4927_s19 + $0x308] ss:$16 sps:$4 sm:$0xff]   ;;  %v4415_v26 = vld [vmem:[%s4927_s19 + $0x4e4] ss:$16 sps:$4 sm:$0xff]  }
  0x64   : > { %1264 = vmatprep.mubr.bf16.mxu1 %v4956_v22  ;;  %v4346_v22 = vld [vmem:[%s4927_s19 + $0x26c] ss:$16 sps:$4 sm:$0xff]  }
  0x65   : > { %1194 = vmatpush1.bf16.msra.mxu0 %v4323_v27  ;;  %v4418_v27 = vld [vmem:[%s4927_s19 + $0x6e4] ss:$16 sps:$4 sm:$0xff]  }
  0x66   : > { %1235 = vmatpush1.bf16.msra.mxu1 %v4326_v28  ;;  %1195 = vmatprep.subr.bf16.mxu0 %v4331_v29  ;;  %v4413_v28 = vld [vmem:[%s4927_s19 + $0x4e0] ss:$16 sps:$4 sm:$0xff]  }
  0x67   : > { %1236 = vmatprep.subr.bf16.mxu1 %v4334_v30  ;;  %v4416_v29 = vld [vmem:[%s4927_s19 + $0x6e0] ss:$16 sps:$4 sm:$0xff]  }
  0x68   : > { %v1303_v30 = vld [vmem:[%s4919_s14] sm:$0x55] }
  0x69   : > { %1196 = vmatpush1.bf16.msra.mxu0 %v4329_v31  ;;  %v4421_v31 = vld [vmem:[%s4927_s19 + $0x4c4] ss:$16 sps:$4 sm:$0xff]  }
  0x6a   : > { %1237 = vmatpush1.bf16.msra.mxu1 %v4332_v32  ;;  %1197 = vmatprep.subr.bf16.mxu0 %v4337_v33  ;;  %v4424_v32 = vld [vmem:[%s4927_s19 + $0x6c4] ss:$16 sps:$4 sm:$0xff]   ;;  %v5091_v33 = vrot.slane %v1303_v30, %v4937_v13 }
  0x6b   : > { %1238 = vmatprep.subr.bf16.mxu1 %v4340_v34  ;;  %v1437_v34 = vcombine.high %v1303_v30, %v1303_v30  ;;  %v4502_v30 = vld [vmem:[%s4927_s19 + $0x724] ss:$16 sps:$4 sm:$0xff]  }
  0x6d   : > { %1198 = vmatpush1.bf16.msra.mxu0 %v4335_v35  ;;  %v4419_v35 = vld [vmem:[%s4927_s19 + $0x4c0] ss:$16 sps:$4 sm:$0xff]  }
  0x6e   : > { %1239 = vmatpush1.bf16.msra.mxu1 %v4338_v36  ;;  %1199 = vmatprep.subr.bf16.mxu0 %v4343_v21  ;;  %v1452_v36 = vcombine.high %v5091_v33, %v5091_v33  ;;  %v5099_v21 = vrot.slane %v1437_v34, %v4937_v13  ;;  %v4505_v34 = vld [vmem:[%s4927_s19 + $0x504] ss:$16 sps:$4 sm:$0xff]  }
  0x6f   : > { %1240 = vmatprep.subr.bf16.mxu1 %v4346_v22  ;;  %v4422_v22 = vld [vmem:[%s4927_s19 + $0x6c0] ss:$16 sps:$4 sm:$0xff]  }
  0x71   : > { %1200 = vmatpush1.bf16.msra.mxu0 %v4341_v37  ;;  %v4427_v37 = vld [vmem:[%s4927_s19 + $0x4a4] ss:$16 sps:$4 sm:$0xff]  }
  0x72   : > { %1241 = vmatpush1.bf16.msra.mxu1 %v4344_v38  ;;  %1201 = vmatprep.subr.bf16.mxu0 %v4349_v39  ;;  %v1453_v38 = vcombine.high %v5099_v21, %v5099_v21 }
  0x73   : > { %1242 = vmatprep.subr.bf16.mxu1 %v4352_v40  ;;  %v4425_v40 = vld [vmem:[%s4927_s19 + $0x4a0] ss:$16 sps:$4 sm:$0xff]  }
  0x74   : > { %v5109_v39 = vshrl.u32 %v1453_v38, 16  ;;  %v1455_v38 = vshrl.u32 %v5091_v33, 16 }
  0x75   : > { %1202 = vmatpush1.bf16.msra.mxu0 %v4347_v41  ;;  %v4428_v41 = vld [vmem:[%s4927_s19 + $0x6a0] ss:$16 sps:$4 sm:$0xff]  }
  0x76   : > { %1243 = vmatpush1.bf16.msra.mxu1 %v4350_v42  ;;  %1203 = vmatprep.subr.bf16.mxu0 %v4355_v43  ;;  %v4433_v42 = vld [vmem:[%s4927_s19 + $0x484] ss:$16 sps:$4 sm:$0xff]  }
  0x77   : > { %1244 = vmatprep.subr.bf16.mxu1 %v4358_v44  ;;  %v4436_v43 = vld [vmem:[%s4927_s19 + $0x684] ss:$16 sps:$4 sm:$0xff]   ;;  %v4431_v44 = vld [vmem:[%s4927_s19 + $0x480] ss:$16 sps:$4 sm:$0xff]  }
  0x79   : > { %1204 = vmatpush1.bf16.msra.mxu0 %v4353_v45  ;;  %v4434_v45 = vld [vmem:[%s4927_s19 + $0x680] ss:$16 sps:$4 sm:$0xff]  }
  0x7a   : > { %1245 = vmatpush1.bf16.msra.mxu1 %v4356_v46  ;;  %1205 = vmatprep.subr.bf16.mxu0 %v4361_v47  ;;  %v4439_v46 = vld [vmem:[%s4927_s19 + $0x464] ss:$16 sps:$4 sm:$0xff]  }
  0x7b   : > { %1246 = vmatprep.subr.bf16.mxu1 %v4364_v48  ;;  %v4442_v47 = vld [vmem:[%s4927_s19 + $0x664] ss:$16 sps:$4 sm:$0xff]   ;;  %v4437_v48 = vld [vmem:[%s4927_s19 + $0x460] ss:$16 sps:$4 sm:$0xff]  }
  0x7d   : > { %1206 = vmatpush1.bf16.msra.mxu0 %v4359_v49  ;;  %v4440_v49 = vld [vmem:[%s4927_s19 + $0x660] ss:$16 sps:$4 sm:$0xff]  }
  0x7e   : > { %1247 = vmatpush1.bf16.msra.mxu1 %v4362_v50  ;;  %1207 = vmatprep.subr.bf16.mxu0 %v4367_v51  ;;  %v4445_v50 = vld [vmem:[%s4927_s19 + $0x444] ss:$16 sps:$4 sm:$0xff]  }
  0x7f   : > { %1248 = vmatprep.subr.bf16.mxu1 %v4370_v52  ;;  %v4448_v51 = vld [vmem:[%s4927_s19 + $0x644] ss:$16 sps:$4 sm:$0xff]   ;;  %v4443_v52 = vld [vmem:[%s4927_s19 + $0x440] ss:$16 sps:$4 sm:$0xff]  }
  0x81   : > { %1208 = vmatpush2.bf16.msra.mxu0 %v4365_v53  ;;  %v4446_v53 = vld [vmem:[%s4927_s19 + $0x640] ss:$16 sps:$4 sm:$0xff]  }
  0x82   : > { %1249 = vmatpush2.bf16.msra.mxu1 %v4368_v54  ;;  %1209 = vmatprep.subr.bf16.mxu0 %v4373_v55  ;;  %v4451_v54 = vld [vmem:[%s4927_s19 + $0x424] ss:$16 sps:$4 sm:$0xff]  }
  0x83   : > { %1250 = vmatprep.subr.bf16.mxu1 %v4376_v56  ;;  %v4454_v55 = vld [vmem:[%s4927_s19 + $0x624] ss:$16 sps:$4 sm:$0xff]   ;;  %v4449_v56 = vld [vmem:[%s4927_s19 + $0x420] ss:$16 sps:$4 sm:$0xff]  }
  0x85   : > { %1210 = vmatpush2.bf16.msra.mxu0 %v4371_v57  ;;  %v4452_v57 = vld [vmem:[%s4927_s19 + $0x620] ss:$16 sps:$4 sm:$0xff]  }
  0x86   : > { %1251 = vmatpush2.bf16.msra.mxu1 %v4374_v58  ;;  %1211 = vmatprep.subr.bf16.mxu0 %v4379_v59  ;;  %v4457_v58 = vld [vmem:[%s4927_s19 + $0x404] ss:$16 sps:$4 sm:$0xff]  }
  0x87   : > { %1252 = vmatprep.subr.bf16.mxu1 %v4382_v60  ;;  %v4460_v59 = vld [vmem:[%s4927_s19 + $0x604] ss:$16 sps:$4 sm:$0xff]   ;;  %v4455_v60 = vld [vmem:[%s4927_s19 + $0x400] ss:$16 sps:$4 sm:$0xff]  }
  0x89   : > { %1212 = vmatpush2.bf16.msra.mxu0 %v4377_v61  ;;  %v4458_v61 = vld [vmem:[%s4927_s19 + $0x600] ss:$16 sps:$4 sm:$0xff]  }
  0x8a   : > { %1253 = vmatpush2.bf16.msra.mxu1 %v4380_v62  ;;  %1213 = vmatprep.subr.bf16.mxu0 %v4385_v63  ;;  %v4463_v62 = vld [vmem:[%s4927_s19 + $0x5e4] ss:$16 sps:$4 sm:$0xff]  }
  0x8b   : > { %1254 = vmatprep.subr.bf16.mxu1 %v4388_v0  ;;  %v4466_v63 = vld [vmem:[%s4927_s19 + $0x7e4] ss:$16 sps:$4 sm:$0xff]   ;;  %v4461_v0 = vld [vmem:[%s4927_s19 + $0x5e0] ss:$16 sps:$4 sm:$0xff]  }
  0x8d   : > { %1214 = vmatpush2.bf16.msra.mxu0 %v4383_v1  ;;  %v4464_v1 = vld [vmem:[%s4927_s19 + $0x7e0] ss:$16 sps:$4 sm:$0xff]  }
  0x8e   : > { %1255 = vmatpush2.bf16.msra.mxu1 %v4386_v2  ;;  %1215 = vmatprep.subr.bf16.mxu0 %v4391_v4  ;;  %v4469_v2 = vld [vmem:[%s4927_s19 + $0x5c4] ss:$16 sps:$4 sm:$0xff]  }
  0x8f   : > { %1256 = vmatprep.subr.bf16.mxu1 %v4394_v5  ;;  %v4472_v4 = vld [vmem:[%s4927_s19 + $0x7c4] ss:$16 sps:$4 sm:$0xff]   ;;  %v4467_v5 = vld [vmem:[%s4927_s19 + $0x5c0] ss:$16 sps:$4 sm:$0xff]  }
  0x91   : > { %1216 = vmatpush2.bf16.msra.mxu0 %v4389_v7  ;;  %v4470_v7 = vld [vmem:[%s4927_s19 + $0x7c0] ss:$16 sps:$4 sm:$0xff]  }
  0x92   : > { %1257 = vmatpush2.bf16.msra.mxu1 %v4392_v8  ;;  %1217 = vmatprep.subr.bf16.mxu0 %v4397_v9  ;;  %v4475_v8 = vld [vmem:[%s4927_s19 + $0x5a4] ss:$16 sps:$4 sm:$0xff]  }
  0x93   : > { %1258 = vmatprep.subr.bf16.mxu1 %v4400_v10  ;;  %v4478_v9 = vld [vmem:[%s4927_s19 + $0x7a4] ss:$16 sps:$4 sm:$0xff]   ;;  %v4473_v10 = vld [vmem:[%s4927_s19 + $0x5a0] ss:$16 sps:$4 sm:$0xff]  }
  0x95   : > { %1218 = vmatpush2.bf16.msra.mxu0 %v4395_v11  ;;  %v4476_v11 = vld [vmem:[%s4927_s19 + $0x7a0] ss:$16 sps:$4 sm:$0xff]  }
  0x96   : > { %1259 = vmatpush2.bf16.msra.mxu1 %v4398_v12  ;;  %1219 = vmatprep.subr.bf16.mxu0 %v4403_v14  ;;  %v4481_v12 = vld [vmem:[%s4927_s19 + $0x584] ss:$16 sps:$4 sm:$0xff]  }
  0x97   : > { %1260 = vmatprep.subr.bf16.mxu1 %v4406_v15  ;;  %v4484_v14 = vld [vmem:[%s4927_s19 + $0x784] ss:$16 sps:$4 sm:$0xff]   ;;  %v4479_v15 = vld [vmem:[%s4927_s19 + $0x580] ss:$16 sps:$4 sm:$0xff]  }
  0x99   : > { %1220 = vmatpush2.bf16.msra.mxu0 %v4401_v16  ;;  %v4482_v16 = vld [vmem:[%s4927_s19 + $0x780] ss:$16 sps:$4 sm:$0xff]  }
  0x9a   : > { %1261 = vmatpush2.bf16.msra.mxu1 %v4404_v19  ;;  %1221 = vmatprep.subr.bf16.mxu0 %v4409_v20  ;;  %v4487_v19 = vld [vmem:[%s4927_s19 + $0x564] ss:$16 sps:$4 sm:$0xff]  }
  0x9b   : > { %1262 = vmatprep.subr.bf16.mxu1 %v4412_v23  ;;  %v4490_v20 = vld [vmem:[%s4927_s19 + $0x764] ss:$16 sps:$4 sm:$0xff]   ;;  %v4485_v23 = vld [vmem:[%s4927_s19 + $0x560] ss:$16 sps:$4 sm:$0xff]  }
  0x9d   : > { %1222 = vmatpush2.bf16.msra.mxu0 %v4407_v24  ;;  %v4488_v24 = vld [vmem:[%s4927_s19 + $0x760] ss:$16 sps:$4 sm:$0xff]  }
  0x9e   : > { %1263 = vmatpush2.bf16.msra.mxu1 %v4410_v25  ;;  %2110 = vmatprep.subr.bf16.mxu0 %v4415_v26  ;;  %v4493_v25 = vld [vmem:[%s4927_s19 + $0x544] ss:$16 sps:$4 sm:$0xff]  }
  0x9f   : > { %2151 = vmatprep.subr.bf16.mxu1 %v4418_v27  ;;  %v4496_v26 = vld [vmem:[%s4927_s19 + $0x744] ss:$16 sps:$4 sm:$0xff]   ;;  %v4491_v27 = vld [vmem:[%s4927_s19 + $0x540] ss:$16 sps:$4 sm:$0xff]  }
  0xa0   : > { %1224 = vmatmul.mubr.bf16.vlgmr.msra.gmra.mxu0 %v4943_v17  ;;  %v4430_v17 = vld [vmem:[%s4927_s19 + $0x6a4] ss:$16 sps:$4 sm:$0xff]  }
  0xa1   : > { %1265 = vmatmul.mubr.bf16.vlgmr.msra.gmra.mxu1 %v4946_v18  ;;  %2111 = vmatpush1.bf16.msra.mxu0 %v4413_v28  ;;  %v5104_v18 = vshrl.u32 %v1452_v36, 16  ;;  %v4494_v28 = vld [vmem:[%s4927_s19 + $0x740] ss:$16 sps:$4 sm:$0xff]  }
  0xa2   : > { %2152 = vmatpush1.bf16.msra.mxu1 %v4416_v29  ;;  %2112 = vmatprep.subr.bf16.mxu0 %v4421_v31  ;;  %v4499_v29 = vld [vmem:[%s4927_s19 + $0x524] ss:$16 sps:$4 sm:$0xff]   ;;  %v4497_v31 = vld [vmem:[%s4927_s19 + $0x520] ss:$16 sps:$4 sm:$0xff]  }
  0xa3   : > { %2153 = vmatprep.subr.bf16.mxu1 %v4424_v32  ;;  %2142 = vmatprep.mubr.bf16.mxu0 %v5104_v18  ;;  %v4500_v32 = vld [vmem:[%s4927_s19 + $0x720] ss:$16 sps:$4 sm:$0xff]  }
  0xa4   : > { %2183 = vmatprep.mubr.bf16.mxu1 %v5109_v39  ;;  %v4503_v36 = vld [vmem:[%s4927_s19 + $0x500] ss:$16 sps:$4 sm:$0xff]  }
  0xa5   : > { %2113 = vmatpush1.bf16.msra.mxu0 %v4419_v35  ;;  %v4508_v35 = vld [vmem:[%s4927_s19 + $0x704] ss:$16 sps:$4 sm:$0xff]  }
  0xa6   : > { %2154 = vmatpush1.bf16.msra.mxu1 %v4422_v22  ;;  %2114 = vmatprep.subr.bf16.mxu0 %v4427_v37  ;;  %v4506_v22 = vld [vmem:[%s4927_s19 + $0x700] ss:$16 sps:$4 sm:$0xff]   ;;  %v4512_v37 = vld [vmem:[%s4927_s19 + $0x4ec] ss:$16 sps:$4 sm:$0xff]  }
  0xa7   : > { %2155 = vmatprep.subr.bf16.mxu1 %v4430_v17  ;;  %v4515_v17 = vld [vmem:[%s4927_s19 + $0x6ec] ss:$16 sps:$4 sm:$0xff]  }
  0xa9   : > { %2115 = vmatpush1.bf16.msra.mxu0 %v4425_v40  ;;  %v1461_v40 = vshrl.u32 %v5099_v21, 16 }
  0xaa   : > { %2156 = vmatpush1.bf16.msra.mxu1 %v4428_v41  ;;  %2116 = vmatprep.subr.bf16.mxu0 %v4433_v42  ;;  %v4510_v41 = vld [vmem:[%s4927_s19 + $0x4e8] ss:$16 sps:$4 sm:$0xff]  }
  0xab   : > { %2157 = vmatprep.subr.bf16.mxu1 %v4436_v43  ;;  %v4513_v42 = vld [vmem:[%s4927_s19 + $0x6e8] ss:$16 sps:$4 sm:$0xff]   ;;  %v4518_v43 = vld [vmem:[%s4927_s19 + $0x4cc] ss:$16 sps:$4 sm:$0xff]  }
  0xad   : > { %2117 = vmatpush1.bf16.msra.mxu0 %v4431_v44  ;;  %v4521_v44 = vld [vmem:[%s4927_s19 + $0x6cc] ss:$16 sps:$4 sm:$0xff]  }
  0xae   : > { %2158 = vmatpush1.bf16.msra.mxu1 %v4434_v45  ;;  %2118 = vmatprep.subr.bf16.mxu0 %v4439_v46  ;;  %v4516_v45 = vld [vmem:[%s4927_s19 + $0x4c8] ss:$16 sps:$4 sm:$0xff]  }
  0xaf   : > { %2159 = vmatprep.subr.bf16.mxu1 %v4442_v47  ;;  %v4519_v46 = vld [vmem:[%s4927_s19 + $0x6c8] ss:$16 sps:$4 sm:$0xff]   ;;  %v4524_v47 = vld [vmem:[%s4927_s19 + $0x4ac] ss:$16 sps:$4 sm:$0xff]  }
  0xb1   : > { %2119 = vmatpush1.bf16.msra.mxu0 %v4437_v48  ;;  %v4527_v48 = vld [vmem:[%s4927_s19 + $0x6ac] ss:$16 sps:$4 sm:$0xff]  }
  0xb2   : > { %2160 = vmatpush1.bf16.msra.mxu1 %v4440_v49  ;;  %2120 = vmatprep.subr.bf16.mxu0 %v4445_v50  ;;  %v4522_v49 = vld [vmem:[%s4927_s19 + $0x4a8] ss:$16 sps:$4 sm:$0xff]  }
  0xb3   : > { %2161 = vmatprep.subr.bf16.mxu1 %v4448_v51  ;;  %v4525_v50 = vld [vmem:[%s4927_s19 + $0x6a8] ss:$16 sps:$4 sm:$0xff]   ;;  %v4530_v51 = vld [vmem:[%s4927_s19 + $0x48c] ss:$16 sps:$4 sm:$0xff]  }
  0xb5   : > { %2121 = vmatpush1.bf16.msra.mxu0 %v4443_v52  ;;  %v4533_v52 = vld [vmem:[%s4927_s19 + $0x68c] ss:$16 sps:$4 sm:$0xff]  }
  0xb6   : > { %2162 = vmatpush1.bf16.msra.mxu1 %v4446_v53  ;;  %2122 = vmatprep.subr.bf16.mxu0 %v4451_v54  ;;  %v4528_v53 = vld [vmem:[%s4927_s19 + $0x488] ss:$16 sps:$4 sm:$0xff]   ;;  %v4539_v54 = vld [vmem:[%s4927_s19 + $0x66c] ss:$16 sps:$4 sm:$0xff]  }
  0xb7   : > { %2163 = vmatprep.subr.bf16.mxu1 %v4454_v55  ;;  %v4534_v55 = vld [vmem:[%s4927_s19 + $0x468] ss:$16 sps:$4 sm:$0xff]  }
  0xb9   : > { %2123 = vmatpush1.bf16.msra.mxu0 %v4449_v56  ;;  %v4537_v56 = vld [vmem:[%s4927_s19 + $0x668] ss:$16 sps:$4 sm:$0xff]  }
  0xba   : > { %2164 = vmatpush1.bf16.msra.mxu1 %v4452_v57  ;;  %2124 = vmatprep.subr.bf16.mxu0 %v4457_v58  ;;  %v4542_v57 = vld [vmem:[%s4927_s19 + $0x44c] ss:$16 sps:$4 sm:$0xff]  }
  0xbb   : > { %2165 = vmatprep.subr.bf16.mxu1 %v4460_v59  ;;  %v4545_v58 = vld [vmem:[%s4927_s19 + $0x64c] ss:$16 sps:$4 sm:$0xff]   ;;  %v4540_v59 = vld [vmem:[%s4927_s19 + $0x448] ss:$16 sps:$4 sm:$0xff]  }
  0xbd   : > { %2125 = vmatpush1.bf16.msra.mxu0 %v4455_v60  ;;  %v4543_v60 = vld [vmem:[%s4927_s19 + $0x648] ss:$16 sps:$4 sm:$0xff]  }
  0xbe   : > { %2166 = vmatpush1.bf16.msra.mxu1 %v4458_v61  ;;  %2126 = vmatprep.subr.bf16.mxu0 %v4463_v62  ;;  %v4548_v61 = vld [vmem:[%s4927_s19 + $0x42c] ss:$16 sps:$4 sm:$0xff]  }
  0xbf   : > { %2167 = vmatprep.subr.bf16.mxu1 %v4466_v63  ;;  %v4551_v62 = vld [vmem:[%s4927_s19 + $0x62c] ss:$16 sps:$4 sm:$0xff]   ;;  %v4546_v63 = vld [vmem:[%s4927_s19 + $0x428] ss:$16 sps:$4 sm:$0xff]  }
  0xc1   : > { %2127 = vmatpush2.bf16.msra.mxu0 %v4461_v0  ;;  %v4549_v0 = vld [vmem:[%s4927_s19 + $0x628] ss:$16 sps:$4 sm:$0xff]  }
  0xc2   : > { %2168 = vmatpush2.bf16.msra.mxu1 %v4464_v1  ;;  %2128 = vmatprep.subr.bf16.mxu0 %v4469_v2  ;;  %v4554_v1 = vld [vmem:[%s4927_s19 + $0x40c] ss:$16 sps:$4 sm:$0xff]  }
  0xc3   : > { %2169 = vmatprep.subr.bf16.mxu1 %v4472_v4  ;;  %v4557_v2 = vld [vmem:[%s4927_s19 + $0x60c] ss:$16 sps:$4 sm:$0xff]   ;;  %v4552_v4 = vld [vmem:[%s4927_s19 + $0x408] ss:$16 sps:$4 sm:$0xff]  }
  0xc5   : > { %2129 = vmatpush2.bf16.msra.mxu0 %v4467_v5  ;;  %v4555_v5 = vld [vmem:[%s4927_s19 + $0x608] ss:$16 sps:$4 sm:$0xff]  }
  0xc6   : > { %2170 = vmatpush2.bf16.msra.mxu1 %v4470_v7  ;;  %2130 = vmatprep.subr.bf16.mxu0 %v4475_v8  ;;  %v4560_v7 = vld [vmem:[%s4927_s19 + $0x5ec] ss:$16 sps:$4 sm:$0xff]  }
  0xc7   : > { %2171 = vmatprep.subr.bf16.mxu1 %v4478_v9  ;;  %v4563_v8 = vld [vmem:[%s4927_s19 + $0x7ec] ss:$16 sps:$4 sm:$0xff]   ;;  %v4558_v9 = vld [vmem:[%s4927_s19 + $0x5e8] ss:$16 sps:$4 sm:$0xff]  }
  0xc9   : > { %2131 = vmatpush2.bf16.msra.mxu0 %v4473_v10  ;;  %v4561_v10 = vld [vmem:[%s4927_s19 + $0x7e8] ss:$16 sps:$4 sm:$0xff]  }
  0xca   : > { %2172 = vmatpush2.bf16.msra.mxu1 %v4476_v11  ;;  %2132 = vmatprep.subr.bf16.mxu0 %v4481_v12  ;;  %v4566_v11 = vld [vmem:[%s4927_s19 + $0x5cc] ss:$16 sps:$4 sm:$0xff]  }
  0xcb   : > { %2173 = vmatprep.subr.bf16.mxu1 %v4484_v14  ;;  %v4569_v12 = vld [vmem:[%s4927_s19 + $0x7cc] ss:$16 sps:$4 sm:$0xff]   ;;  %v4564_v14 = vld [vmem:[%s4927_s19 + $0x5c8] ss:$16 sps:$4 sm:$0xff]  }
  0xcd   : > { %2133 = vmatpush2.bf16.msra.mxu0 %v4479_v15  ;;  %v4567_v15 = vld [vmem:[%s4927_s19 + $0x7c8] ss:$16 sps:$4 sm:$0xff]  }
  0xce   : > { %2174 = vmatpush2.bf16.msra.mxu1 %v4482_v16  ;;  %2134 = vmatprep.subr.bf16.mxu0 %v4487_v19  ;;  %v4572_v16 = vld [vmem:[%s4927_s19 + $0x5ac] ss:$16 sps:$4 sm:$0xff]  }
  0xcf   : > { %2175 = vmatprep.subr.bf16.mxu1 %v4490_v20  ;;  %v4575_v19 = vld [vmem:[%s4927_s19 + $0x7ac] ss:$16 sps:$4 sm:$0xff]   ;;  %v4570_v20 = vld [vmem:[%s4927_s19 + $0x5a8] ss:$16 sps:$4 sm:$0xff]  }
  0xd1   : > { %2135 = vmatpush2.bf16.msra.mxu0 %v4485_v23  ;;  %v4573_v23 = vld [vmem:[%s4927_s19 + $0x7a8] ss:$16 sps:$4 sm:$0xff]  }
  0xd2   : > { %2176 = vmatpush2.bf16.msra.mxu1 %v4488_v24  ;;  %2136 = vmatprep.subr.bf16.mxu0 %v4493_v25  ;;  %v4578_v24 = vld [vmem:[%s4927_s19 + $0x58c] ss:$16 sps:$4 sm:$0xff]  }
  0xd3   : > { %2177 = vmatprep.subr.bf16.mxu1 %v4496_v26  ;;  %v4581_v25 = vld [vmem:[%s4927_s19 + $0x78c] ss:$16 sps:$4 sm:$0xff]   ;;  %v4576_v26 = vld [vmem:[%s4927_s19 + $0x588] ss:$16 sps:$4 sm:$0xff]  }
  0xd5   : > { %2137 = vmatpush2.bf16.msra.mxu0 %v4491_v27  ;;  %v4579_v27 = vld [vmem:[%s4927_s19 + $0x788] ss:$16 sps:$4 sm:$0xff]  }
  0xd6   : > { %2178 = vmatpush2.bf16.msra.mxu1 %v4494_v28  ;;  %2138 = vmatprep.subr.bf16.mxu0 %v4499_v29  ;;  %v4584_v28 = vld [vmem:[%s4927_s19 + $0x56c] ss:$16 sps:$4 sm:$0xff]  }
  0xd7   : > { %2179 = vmatprep.subr.bf16.mxu1 %v4502_v30  ;;  %v4587_v29 = vld [vmem:[%s4927_s19 + $0x76c] ss:$16 sps:$4 sm:$0xff]   ;;  %v4582_v30 = vld [vmem:[%s4927_s19 + $0x568] ss:$16 sps:$4 sm:$0xff]  }
  0xd9   : > { %2139 = vmatpush2.bf16.msra.mxu0 %v4497_v31  ;;  %v4585_v31 = vld [vmem:[%s4927_s19 + $0x768] ss:$16 sps:$4 sm:$0xff]  }
  0xda   : > { %2180 = vmatpush2.bf16.msra.mxu1 %v4500_v32  ;;  %2140 = vmatprep.subr.bf16.mxu0 %v4505_v34  ;;  %v4590_v32 = vld [vmem:[%s4927_s19 + $0x54c] ss:$16 sps:$4 sm:$0xff]  }
  0xdb   : > { %2181 = vmatprep.subr.bf16.mxu1 %v4508_v35  ;;  %v4593_v34 = vld [vmem:[%s4927_s19 + $0x74c] ss:$16 sps:$4 sm:$0xff]   ;;  %v4588_v35 = vld [vmem:[%s4927_s19 + $0x548] ss:$16 sps:$4 sm:$0xff]  }
  0xdd   : > { %2141 = vmatpush2.bf16.msra.mxu0 %v4503_v36  ;;  %v4591_v36 = vld [vmem:[%s4927_s19 + $0x748] ss:$16 sps:$4 sm:$0xff]  }
  0xde   : > { %2182 = vmatpush2.bf16.msra.mxu1 %v4506_v22  ;;  %2192 = vmatprep.subr.bf16.mxu0 %v4512_v37  ;;  %v2304_v22 = vld [vmem:[%s4919_s14] sm:$0xaa]  ;;  %v4596_v37 = vld [vmem:[%s4927_s19 + $0x52c] ss:$16 sps:$4 sm:$0xff]  }
  0xdf   : > { %2233 = vmatprep.subr.bf16.mxu1 %v4515_v17  ;;  %v4599_v17 = vld [vmem:[%s4927_s19 + $0x72c] ss:$16 sps:$4 sm:$0xff]  }
  0xe0   : > { %2143 = vmatmul.mubr.bf16.vlgmr.msra.gmra.mxu0 %v1455_v38 }
  0xe1   : > { %2184 = vmatmul.mubr.bf16.vlgmr.msra.gmra.mxu1 %v1461_v40  ;;  %2193 = vmatpush1.bf16.msra.mxu0 %v4510_v41  ;;  %v2438_v41 = vcombine.high %v2304_v22, %v2304_v22 }
  0xe2   : > { %2234 = vmatpush1.bf16.msra.mxu1 %v4513_v42  ;;  %2194 = vmatprep.subr.bf16.mxu0 %v4518_v43  ;;  %v4594_v42 = vld [vmem:[%s4927_s19 + $0x528] ss:$16 sps:$4 sm:$0xff]  }
  0xe3   : > { %2235 = vmatprep.subr.bf16.mxu1 %v4521_v44  ;;  %2224 = vmatprep.mubr.bf16.mxu0 %v5104_v18  ;;  %v4531_v18 = vld [vmem:[%s4927_s19 + $0x688] ss:$16 sps:$4 sm:$0xff]   ;;  %v4602_v44 = vld [vmem:[%s4927_s19 + $0x50c] ss:$16 sps:$4 sm:$0xff]  }
  0xe4   : > { %2265 = vmatprep.mubr.bf16.mxu1 %v5109_v39  ;;  %v4536_v39 = vld [vmem:[%s4927_s19 + $0x46c] ss:$16 sps:$4 sm:$0xff]   ;;  %v4597_v43 = vld [vmem:[%s4927_s19 + $0x728] ss:$16 sps:$4 sm:$0xff]  }
  0xe5   : > { %2195 = vmatpush1.bf16.msra.mxu0 %v4516_v45  ;;  %v4605_v45 = vld [vmem:[%s4927_s19 + $0x70c] ss:$16 sps:$4 sm:$0xff]  }
  0xe6   : > { %2236 = vmatpush1.bf16.msra.mxu1 %v4519_v46  ;;  %2196 = vmatprep.subr.bf16.mxu0 %v4524_v47  ;;  %v5238_v46 = vrot.slane %v2304_v22, %v4937_v13  ;;  %v5241_v47 = vrot.slane %v2438_v41, %v4937_v13  ;;  %v4648_v22 = vld [vmem:[%s4927_s19 + $0x800] ss:$16 sps:$4 sm:$0xff]   ;;  %v4659_v41 = vld [vmem:[%s4927_s19 + $0xbe4] ss:$16 sps:$4 sm:$0xff]  }
  0xe7   : > { %2237 = vmatprep.subr.bf16.mxu1 %v4527_v48  ;;  %v4600_v48 = vld [vmem:[%s4927_s19 + $0x508] ss:$16 sps:$4 sm:$0xff]  }
  0xe8   : > { %v2454_v13 = vcombine.high %v5241_v47, %v5241_v47 }
  0xe9   : > { %2197 = vmatpush1.bf16.msra.mxu0 %v4522_v49  ;;  %v4603_v49 = vld [vmem:[%s4927_s19 + $0x708] ss:$16 sps:$4 sm:$0xff]  }
  0xea   : > { %2238 = vmatpush1.bf16.msra.mxu1 %v4525_v50  ;;  %2198 = vmatprep.subr.bf16.mxu0 %v4530_v51  ;;  %v4608_v50 = vld [vmem:[%s4927_s19 + $0x8e4] ss:$16 sps:$4 sm:$0xff]  }
  0xeb   : > { %2239 = vmatprep.subr.bf16.mxu1 %v4533_v52  ;;  %v4611_v51 = vld [vmem:[%s4927_s19 + $0xae4] ss:$16 sps:$4 sm:$0xff]   ;;  %v4841_v52 = vmov 1966171168  }
  0xed   : > { %2199 = vmatpush1.bf16.msra.mxu0 %v4528_v53  ;;  %v1280_v53 = vunpack.c.l.s4 %v4841_v52  ;;  %v4666_v52 = vld [vmem:[%s4927_s19 + $0x9a0] ss:$16 sps:$4 sm:$0xff]  }
  0xee   : > { %2240 = vmatpush1.bf16.msra.mxu1 %v4531_v18  ;;  %2200 = vmatprep.subr.bf16.mxu0 %v4536_v39  ;;  %v2453_v18 = vcombine.high %v5238_v46, %v5238_v46  ;;  %v4606_v39 = vld [vmem:[%s4927_s19 + $0x8e0] ss:$16 sps:$4 sm:$0xff]  }
  0xef   : > { %2241 = vmatprep.subr.bf16.mxu1 %v4539_v54  ;;  %v4609_v54 = vld [vmem:[%s4927_s19 + $0xae0] ss:$16 sps:$4 sm:$0xff]  }
  0xf1   : > { %2201 = vmatpush1.bf16.msra.mxu0 %v4534_v55  ;;  %v4614_v55 = vld [vmem:[%s4927_s19 + $0x8c4] ss:$16 sps:$4 sm:$0xff]  }
  0xf2   : > { %2242 = vmatpush1.bf16.msra.mxu1 %v4537_v56  ;;  %2202 = vmatprep.subr.bf16.mxu0 %v4542_v57  ;;  %v4617_v56 = vld [vmem:[%s4927_s19 + $0xac4] ss:$16 sps:$4 sm:$0xff]   ;;  %v1281_v57 = vunpack.c.0.s8 %v1280_v53  ;;  %v4669_v53 = vld [vmem:[%s4927_s19 + $0xba0] ss:$16 sps:$4 sm:$0xff]  }
  0xf3   : > { %2243 = vmatprep.subr.bf16.mxu1 %v4545_v58  ;;  %v5255_v58 = vrot.slane %v2453_v18, 1  ;;  %v4674_v18 = vld [vmem:[%s4927_s19 + $0x984] ss:$16 sps:$4 sm:$0xff]  }
  0xf4   : > { %v5268_v33 = vsub.s32 %v1281_v57, %v4930_v6  ;;  %v4678_v57 = vld [vmem:[%s4927_s19 + $0x960] ss:$16 sps:$4 sm:$0xff]  }
  0xf5   : > { %2203 = vmatpush1.bf16.msra.mxu0 %v4540_v59  ;;  %v5257_v59 = vrot.slane %v2454_v13, 1  ;;  %v4677_v13 = vld [vmem:[%s4927_s19 + $0xb84] ss:$16 sps:$4 sm:$0xff]  }
  0xf6   : > { %2244 = vmatpush1.bf16.msra.mxu1 %v4543_v60  ;;  %2204 = vmatprep.subr.bf16.mxu0 %v4548_v61 }
  0xf7   : > { %2245 = vmatprep.subr.bf16.mxu1 %v4551_v62 }
  0xf9   : > { %2205 = vmatpush1.bf16.msra.mxu0 %v4546_v63  ;;  %v4612_v63 = vld [vmem:[%s4927_s19 + $0x8c0] ss:$16 sps:$4 sm:$0xff]  }
  0xfa   : > { %2246 = vmatpush1.bf16.msra.mxu1 %v4549_v0  ;;  %2206 = vmatprep.subr.bf16.mxu0 %v4554_v1  ;;  %v4615_v0 = vld [vmem:[%s4927_s19 + $0xac0] ss:$16 sps:$4 sm:$0xff]  }
  0xfb   : > { %2247 = vmatprep.subr.bf16.mxu1 %v4557_v2 }
  0xfd   : > { %2207 = vmatpush1.bf16.msra.mxu0 %v4552_v4  ;;  %v4620_v4 = vld [vmem:[%s4927_s19 + $0x8a4] ss:$16 sps:$4 sm:$0xff]  }
  0xfe   : > { %2248 = vmatpush1.bf16.msra.mxu1 %v4555_v5  ;;  %2208 = vmatprep.subr.bf16.mxu0 %v4560_v7  ;;  %v4623_v5 = vld [vmem:[%s4927_s19 + $0xaa4] ss:$16 sps:$4 sm:$0xff]  }
  0xff   : > { %2249 = vmatprep.subr.bf16.mxu1 %v4563_v8  ;;  %v4618_v8 = vld [vmem:[%s4927_s19 + $0x8a0] ss:$16 sps:$4 sm:$0xff]  }
 0x101   : > { %2209 = vmatpush2.bf16.msra.mxu0 %v4558_v9  ;;  %v4621_v9 = vld [vmem:[%s4927_s19 + $0xaa0] ss:$16 sps:$4 sm:$0xff]  }
 0x102   : > { %2250 = vmatpush2.bf16.msra.mxu1 %v4561_v10  ;;  %2210 = vmatprep.subr.bf16.mxu0 %v4566_v11 }
 0x103   : > { %2251 = vmatprep.subr.bf16.mxu1 %v4569_v12  ;;  %v4626_v12 = vld [vmem:[%s4927_s19 + $0x884] ss:$16 sps:$4 sm:$0xff]  }
 0x105   : > { %2211 = vmatpush2.bf16.msra.mxu0 %v4564_v14  ;;  %v4629_v14 = vld [vmem:[%s4927_s19 + $0xa84] ss:$16 sps:$4 sm:$0xff]  }
 0x106   : > { %2252 = vmatpush2.bf16.msra.mxu1 %v4567_v15  ;;  %2212 = vmatprep.subr.bf16.mxu0 %v4572_v16  ;;  %v4624_v16 = vld [vmem:[%s4927_s19 + $0x880] ss:$16 sps:$4 sm:$0xff]  }
 0x107   : > { %2253 = vmatprep.subr.bf16.mxu1 %v4575_v19  ;;  %v4627_v19 = vld [vmem:[%s4927_s19 + $0xa80] ss:$16 sps:$4 sm:$0xff]  }
 0x109   : > { %2213 = vmatpush2.bf16.msra.mxu0 %v4570_v20  ;;  %v4632_v20 = vld [vmem:[%s4927_s19 + $0x864] ss:$16 sps:$4 sm:$0xff]  }
 0x10a   : > { %2254 = vmatpush2.bf16.msra.mxu1 %v4573_v23  ;;  %2214 = vmatprep.subr.bf16.mxu0 %v4578_v24  ;;  %v4635_v23 = vld [vmem:[%s4927_s19 + $0xa64] ss:$16 sps:$4 sm:$0xff]   ;;  %v4630_v24 = vld [vmem:[%s4927_s19 + $0x860] ss:$16 sps:$4 sm:$0xff]  }
 0x10b   : > { %2255 = vmatprep.subr.bf16.mxu1 %v4581_v25  ;;  %v4633_v25 = vld [vmem:[%s4927_s19 + $0xa60] ss:$16 sps:$4 sm:$0xff]  }
 0x10d   : > { %2215 = vmatpush2.bf16.msra.mxu0 %v4576_v26  ;;  %v4638_v26 = vld [vmem:[%s4927_s19 + $0x844] ss:$16 sps:$4 sm:$0xff]  }
 0x10e   : > { %2256 = vmatpush2.bf16.msra.mxu1 %v4579_v27  ;;  %2216 = vmatprep.subr.bf16.mxu0 %v4584_v28  ;;  %v4641_v27 = vld [vmem:[%s4927_s19 + $0xa44] ss:$16 sps:$4 sm:$0xff]   ;;  %v4636_v28 = vld [vmem:[%s4927_s19 + $0x840] ss:$16 sps:$4 sm:$0xff]  }
 0x10f   : > { %2257 = vmatprep.subr.bf16.mxu1 %v4587_v29  ;;  %v4639_v29 = vld [vmem:[%s4927_s19 + $0xa40] ss:$16 sps:$4 sm:$0xff]  }
 0x111   : > { %2217 = vmatpush2.bf16.msra.mxu0 %v4582_v30  ;;  %v4644_v30 = vld [vmem:[%s4927_s19 + $0x824] ss:$16 sps:$4 sm:$0xff]  }
 0x112   : > { %2258 = vmatpush2.bf16.msra.mxu1 %v4585_v31  ;;  %2218 = vmatprep.subr.bf16.mxu0 %v4590_v32  ;;  %v4647_v31 = vld [vmem:[%s4927_s19 + $0xa24] ss:$16 sps:$4 sm:$0xff]   ;;  %v4642_v32 = vld [vmem:[%s4927_s19 + $0x820] ss:$16 sps:$4 sm:$0xff]  }
 0x113   : > { %2259 = vmatprep.subr.bf16.mxu1 %v4593_v34  ;;  %v4645_v34 = vld [vmem:[%s4927_s19 + $0xa20] ss:$16 sps:$4 sm:$0xff]  }
 0x115   : > { %2219 = vmatpush2.bf16.msra.mxu0 %v4588_v35  ;;  %v4650_v35 = vld [vmem:[%s4927_s19 + $0x804] ss:$16 sps:$4 sm:$0xff]  }
 0x116   : > { %2260 = vmatpush2.bf16.msra.mxu1 %v4591_v36  ;;  %2220 = vmatprep.subr.bf16.mxu0 %v4596_v37  ;;  %v4653_v36 = vld [vmem:[%s4927_s19 + $0xa04] ss:$16 sps:$4 sm:$0xff]   ;;  %v4651_v37 = vld [vmem:[%s4927_s19 + $0xa00] ss:$16 sps:$4 sm:$0xff]  }
 0x117   : > { %2261 = vmatprep.subr.bf16.mxu1 %v4599_v17  ;;  %v4656_v17 = vld [vmem:[%s4927_s19 + $0x9e4] ss:$16 sps:$4 sm:$0xff]  }
 0x119   : > { %2221 = vmatpush2.bf16.msra.mxu0 %v4594_v42  ;;  %v4654_v42 = vld [vmem:[%s4927_s19 + $0x9e0] ss:$16 sps:$4 sm:$0xff]  }
 0x11a   : > { %2262 = vmatpush2.bf16.msra.mxu1 %v4597_v43  ;;  %2222 = vmatprep.subr.bf16.mxu0 %v4602_v44  ;;  %v4657_v43 = vld [vmem:[%s4927_s19 + $0xbe0] ss:$16 sps:$4 sm:$0xff]   ;;  %v4662_v44 = vld [vmem:[%s4927_s19 + $0x9c4] ss:$16 sps:$4 sm:$0xff]  }
 0x11b   : > { %2263 = vmatprep.subr.bf16.mxu1 %v4605_v45  ;;  %v4665_v45 = vld [vmem:[%s4927_s19 + $0xbc4] ss:$16 sps:$4 sm:$0xff]  }
 0x11d   : > { %2223 = vmatpush2.bf16.msra.mxu0 %v4600_v48  ;;  %v4660_v48 = vld [vmem:[%s4927_s19 + $0x9c0] ss:$16 sps:$4 sm:$0xff]  }
 0x11e   : > { %2264 = vmatpush2.bf16.msra.mxu1 %v4603_v49  ;;  %3103 = vmatprep.subr.bf16.mxu0 %v4608_v50  ;;  %v4663_v49 = vld [vmem:[%s4927_s19 + $0xbc0] ss:$16 sps:$4 sm:$0xff]   ;;  %v4668_v50 = vld [vmem:[%s4927_s19 + $0x9a4] ss:$16 sps:$4 sm:$0xff]  }
 0x11f   : > { %3144 = vmatprep.subr.bf16.mxu1 %v4611_v51  ;;  %v4671_v51 = vld [vmem:[%s4927_s19 + $0xba4] ss:$16 sps:$4 sm:$0xff]  }
 0x120   : > { %v1143_v60 = vpop.f32.mrf.mxu0  ;;  %2225 = vmatmul.mubr.bf16.vlgmr.msra.gmra.mxu0 %v1455_v38 }
 0x121   : > { %v1184_v61 = vpop.f32.mrf.mxu1  ;;  %2266 = vmatmul.mubr.bf16.vlgmr.msra.gmra.mxu1 %v1461_v40  ;;  %3104 = vmatpush1.bf16.msra.mxu0 %v4606_v39  ;;  %v4672_v39 = vld [vmem:[%s4927_s19 + $0x980] ss:$16 sps:$4 sm:$0xff]  }
 0x122   : > { %v1185_v62 = vadd.f32 %v1184_v61, %v1143_v60  ;;  %3145 = vmatpush1.bf16.msra.mxu1 %v4609_v54  ;;  %v1145_v1 = vpop.f32.mrf.mxu0  ;;  %3105 = vmatprep.subr.bf16.mxu0 %v4614_v55  ;;  %v4675_v54 = vld [vmem:[%s4927_s19 + $0xb80] ss:$16 sps:$4 sm:$0xff]   ;;  %v4680_v55 = vld [vmem:[%s4927_s19 + $0x964] ss:$16 sps:$4 sm:$0xff]  }
 0x123   : > { %v1186_v2 = vpop.f32.mrf.mxu1  ;;  %3146 = vmatprep.subr.bf16.mxu1 %v4617_v56  ;;  %3135 = vmatprep.mubr.bf16.mxu0 %v5255_v58  ;;  %v4683_v56 = vld [vmem:[%s4927_s19 + $0xb64] ss:$16 sps:$4 sm:$0xff]   ;;  %v4681_v60 = vld [vmem:[%s4927_s19 + $0xb60] ss:$16 sps:$4 sm:$0xff]  }
 0x124   : > { %v1187_v21 = vadd.f32 %v1186_v2, %v1145_v1  ;;  %3176 = vmatprep.mubr.bf16.mxu1 %v5257_v59  ;;  %v1147_v38 = vpop.f32.mrf.mxu0  ;;  %v4686_v61 = vld [vmem:[%s4927_s19 + $0x944] ss:$16 sps:$4 sm:$0xff]  }
 0x125   : > { %v1188_v40 = vpop.f32.mrf.mxu1  ;;  %3106 = vmatpush1.bf16.msra.mxu0 %v4612_v63  ;;  %v4684_v63 = vld [vmem:[%s4927_s19 + $0x940] ss:$16 sps:$4 sm:$0xff]   ;;  %v4692_v1 = vld [vmem:[%s4927_s19 + $0x924] ss:$16 sps:$4 sm:$0xff]  }
 0x126   : > { %v1277_v7 = vcombine.low %v1185_v62, %v1187_v21  ;;  %3147 = vmatpush1.bf16.msra.mxu1 %v4615_v0  ;;  %v1148_v10 = vpop.f32.mrf.mxu0  ;;  %3107 = vmatprep.subr.bf16.mxu0 %v4620_v4  ;;  %v4689_v62 = vld [vmem:[%s4927_s19 + $0xb44] ss:$16 sps:$4 sm:$0xff]   ;;  %v4687_v0 = vld [vmem:[%s4927_s19 + $0xb40] ss:$16 sps:$4 sm:$0xff]  }
 0x127   : > { %v1189_v11 = vpop.f32.mrf.mxu1  ;;  %3148 = vmatprep.subr.bf16.mxu1 %v4623_v5  ;;  %v4695_v2 = vld [vmem:[%s4927_s19 + $0xb24] ss:$16 sps:$4 sm:$0xff]   ;;  %v4690_v4 = vld [vmem:[%s4927_s19 + $0x920] ss:$16 sps:$4 sm:$0xff]   ;;  %v2455_v10 = vrot.slane %v5238_v46, 1 }
 0x128   : > { %v5277_v15 = vrot.slane %v1277_v7, %v5268_v33  ;;  %v4693_v5 = vld [vmem:[%s4927_s19 + $0xb20] ss:$16 sps:$4 sm:$0xff]   ;;  %v4698_v21 = vld [vmem:[%s4927_s19 + $0x904] ss:$16 sps:$4 sm:$0xff]   ;;  %v2457_v11 = vrot.slane %v5241_v47, 1 }
 0x129   : > { %3108 = vmatpush1.bf16.msra.mxu0 %v4618_v8  ;;  %v4701_v38 = vld [vmem:[%s4927_s19 + $0xb04] ss:$16 sps:$4 sm:$0xff]   ;;  %v4696_v40 = vld [vmem:[%s4927_s19 + $0x900] ss:$16 sps:$4 sm:$0xff]   ;;  %v4705_v8 = vld [vmem:[%s4927_s19 + $0x8ec] ss:$16 sps:$4 sm:$0xff]  }
 0x12a   : > { %3149 = vmatpush1.bf16.msra.mxu1 %v4621_v9  ;;  %3109 = vmatprep.subr.bf16.mxu0 %v4626_v12  ;;  %v4699_v7 = vld [vmem:[%s4927_s19 + $0xb00] ss:$16 sps:$4 sm:$0xff]   ;;  %v4708_v9 = vld [vmem:[%s4927_s19 + $0xaec] ss:$16 sps:$4 sm:$0xff]   ;;  %v4703_v12 = vld [vmem:[%s4927_s19 + $0x8e8] ss:$16 sps:$4 sm:$0xff]  }
 0x12b   : > { %3150 = vmatprep.subr.bf16.mxu1 %v4629_v14  ;;  %v4706_v14 = vld [vmem:[%s4927_s19 + $0xae8] ss:$16 sps:$4 sm:$0xff]  }
 0x12d   : > { %3110 = vmatpush1.bf16.msra.mxu0 %v4624_v16  ;;  %v4711_v16 = vld [vmem:[%s4927_s19 + $0x8cc] ss:$16 sps:$4 sm:$0xff]  }
 0x12e   : > { %3151 = vmatpush1.bf16.msra.mxu1 %v4627_v19  ;;  %3111 = vmatprep.subr.bf16.mxu0 %v4632_v20  ;;  %v4714_v19 = vld [vmem:[%s4927_s19 + $0xacc] ss:$16 sps:$4 sm:$0xff]  }
 0x12f   : > { %3152 = vmatprep.subr.bf16.mxu1 %v4635_v23 }
 0x131   : > { %3112 = vmatpush1.bf16.msra.mxu0 %v4630_v24 }
 0x132   : > { %3153 = vmatpush1.bf16.msra.mxu1 %v4633_v25  ;;  %3113 = vmatprep.subr.bf16.mxu0 %v4638_v26  ;;  %v4709_v25 = vld [vmem:[%s4927_s19 + $0x8c8] ss:$16 sps:$4 sm:$0xff]  }
 0x133   : > { %3154 = vmatprep.subr.bf16.mxu1 %v4641_v27  ;;  %v4712_v26 = vld [vmem:[%s4927_s19 + $0xac8] ss:$16 sps:$4 sm:$0xff]  }
 0x135   : > { %3114 = vmatpush1.bf16.msra.mxu0 %v4636_v28 }
 0x136   : > { %3155 = vmatpush1.bf16.msra.mxu1 %v4639_v29  ;;  %3115 = vmatprep.subr.bf16.mxu0 %v4644_v30  ;;  %v4717_v29 = vld [vmem:[%s4927_s19 + $0x8ac] ss:$16 sps:$4 sm:$0xff]  }
 0x137   : > { %3156 = vmatprep.subr.bf16.mxu1 %v4647_v31  ;;  %v4720_v30 = vld [vmem:[%s4927_s19 + $0xaac] ss:$16 sps:$4 sm:$0xff]  }
 0x139   : > { %3116 = vmatpush1.bf16.msra.mxu0 %v4642_v32 }
 0x13a   : > { %3157 = vmatpush1.bf16.msra.mxu1 %v4645_v34  ;;  %3117 = vmatprep.subr.bf16.mxu0 %v4650_v35 }
 0x13b   : > { %3158 = vmatprep.subr.bf16.mxu1 %v4653_v36  ;;  %v4715_v36 = vld [vmem:[%s4927_s19 + $0x8a8] ss:$16 sps:$4 sm:$0xff]  }
 0x13d   : > { %3118 = vmatpush1.bf16.msra.mxu0 %v4648_v22  ;;  %v4718_v22 = vld [vmem:[%s4927_s19 + $0xaa8] ss:$16 sps:$4 sm:$0xff]  }
 0x13e   : > { %3159 = vmatpush1.bf16.msra.mxu1 %v4651_v37  ;;  %3119 = vmatprep.subr.bf16.mxu0 %v4656_v17 }
 0x13f   : > { %3160 = vmatprep.subr.bf16.mxu1 %v4659_v41  ;;  %v4723_v41 = vld [vmem:[%s4927_s19 + $0x88c] ss:$16 sps:$4 sm:$0xff]  }
 0x141   : > { %3120 = vmatpush2.bf16.msra.mxu0 %v4654_v42 }
 0x142   : > { %3161 = vmatpush2.bf16.msra.mxu1 %v4657_v43  ;;  %3121 = vmatprep.subr.bf16.mxu0 %v4662_v44  ;;  %v4721_v43 = vld [vmem:[%s4927_s19 + $0x888] ss:$16 sps:$4 sm:$0xff]  }
 0x143   : > { %3162 = vmatprep.subr.bf16.mxu1 %v4665_v45  ;;  %v4724_v44 = vld [vmem:[%s4927_s19 + $0xa88] ss:$16 sps:$4 sm:$0xff]   ;;  %v4729_v45 = vld [vmem:[%s4927_s19 + $0x86c] ss:$16 sps:$4 sm:$0xff]  }
 0x145   : > { %3122 = vmatpush2.bf16.msra.mxu0 %v4660_v48  ;;  %v4732_v48 = vld [vmem:[%s4927_s19 + $0xa6c] ss:$16 sps:$4 sm:$0xff]  }
 0x146   : > { %3163 = vmatpush2.bf16.msra.mxu1 %v4663_v49  ;;  %3123 = vmatprep.subr.bf16.mxu0 %v4668_v50  ;;  %v4730_v50 = vld [vmem:[%s4927_s19 + $0xa68] ss:$16 sps:$4 sm:$0xff]  }
 0x147   : > { %3164 = vmatprep.subr.bf16.mxu1 %v4671_v51  ;;  %v4735_v51 = vld [vmem:[%s4927_s19 + $0x84c] ss:$16 sps:$4 sm:$0xff]  }
 0x149   : > { %3124 = vmatpush2.bf16.msra.mxu0 %v4666_v52  ;;  %v4738_v52 = vld [vmem:[%s4927_s19 + $0xa4c] ss:$16 sps:$4 sm:$0xff]  }
 0x14a   : > { %3165 = vmatpush2.bf16.msra.mxu1 %v4669_v53  ;;  %3125 = vmatprep.subr.bf16.mxu0 %v4674_v18  ;;  %v4733_v53 = vld [vmem:[%s4927_s19 + $0x848] ss:$16 sps:$4 sm:$0xff]  }
 0x14b   : > { %3166 = vmatprep.subr.bf16.mxu1 %v4677_v13  ;;  %v4736_v18 = vld [vmem:[%s4927_s19 + $0xa48] ss:$16 sps:$4 sm:$0xff]   ;;  %v4741_v13 = vld [vmem:[%s4927_s19 + $0x82c] ss:$16 sps:$4 sm:$0xff]  }
 0x14d   : > { %3126 = vmatpush2.bf16.msra.mxu0 %v4672_v39  ;;  %v4744_v39 = vld [vmem:[%s4927_s19 + $0xa2c] ss:$16 sps:$4 sm:$0xff]  }
 0x14e   : > { %3167 = vmatpush2.bf16.msra.mxu1 %v4675_v54  ;;  %3127 = vmatprep.subr.bf16.mxu0 %v4680_v55  ;;  %v4739_v54 = vld [vmem:[%s4927_s19 + $0x828] ss:$16 sps:$4 sm:$0xff]  }
 0x14f   : > { %3168 = vmatprep.subr.bf16.mxu1 %v4683_v56  ;;  %v4742_v55 = vld [vmem:[%s4927_s19 + $0xa28] ss:$16 sps:$4 sm:$0xff]   ;;  %v4747_v56 = vld [vmem:[%s4927_s19 + $0x80c] ss:$16 sps:$4 sm:$0xff]  }
 0x151   : > { %3128 = vmatpush2.bf16.msra.mxu0 %v4678_v57  ;;  %v4750_v57 = vld [vmem:[%s4927_s19 + $0xa0c] ss:$16 sps:$4 sm:$0xff]  }
 0x152   : > { %3169 = vmatpush2.bf16.msra.mxu1 %v4681_v60  ;;  %3129 = vmatprep.subr.bf16.mxu0 %v4686_v61  ;;  %v4745_v60 = vld [vmem:[%s4927_s19 + $0x808] ss:$16 sps:$4 sm:$0xff]  }
 0x153   : > { %3170 = vmatprep.subr.bf16.mxu1 %v4689_v62  ;;  %v4748_v61 = vld [vmem:[%s4927_s19 + $0xa08] ss:$16 sps:$4 sm:$0xff]   ;;  %v4753_v62 = vld [vmem:[%s4927_s19 + $0x9ec] ss:$16 sps:$4 sm:$0xff]  }
 0x155   : > { %3130 = vmatpush2.bf16.msra.mxu0 %v4684_v63  ;;  %v4756_v63 = vld [vmem:[%s4927_s19 + $0xbec] ss:$16 sps:$4 sm:$0xff]  }
 0x156   : > { %3171 = vmatpush2.bf16.msra.mxu1 %v4687_v0  ;;  %3131 = vmatprep.subr.bf16.mxu0 %v4692_v1  ;;  %v4751_v0 = vld [vmem:[%s4927_s19 + $0x9e8] ss:$16 sps:$4 sm:$0xff]  }
 0x157   : > { %3172 = vmatprep.subr.bf16.mxu1 %v4695_v2  ;;  %v4754_v1 = vld [vmem:[%s4927_s19 + $0xbe8] ss:$16 sps:$4 sm:$0xff]   ;;  %v4759_v2 = vld [vmem:[%s4927_s19 + $0x9cc] ss:$16 sps:$4 sm:$0xff]  }
 0x159   : > { %3132 = vmatpush2.bf16.msra.mxu0 %v4690_v4  ;;  %v4762_v4 = vld [vmem:[%s4927_s19 + $0xbcc] ss:$16 sps:$4 sm:$0xff]  }
 0x15a   : > { %3173 = vmatpush2.bf16.msra.mxu1 %v4693_v5  ;;  %3133 = vmatprep.subr.bf16.mxu0 %v4698_v21  ;;  %v4757_v5 = vld [vmem:[%s4927_s19 + $0x9c8] ss:$16 sps:$4 sm:$0xff]  }
 0x15b   : > { %3174 = vmatprep.subr.bf16.mxu1 %v4701_v38  ;;  %v4760_v21 = vld [vmem:[%s4927_s19 + $0xbc8] ss:$16 sps:$4 sm:$0xff]   ;;  %v4765_v38 = vld [vmem:[%s4927_s19 + $0x9ac] ss:$16 sps:$4 sm:$0xff]  }
 0x15d   : > { %3134 = vmatpush2.bf16.msra.mxu0 %v4696_v40  ;;  %v4768_v40 = vld [vmem:[%s4927_s19 + $0xbac] ss:$16 sps:$4 sm:$0xff]  }
 0x15e   : > { %3175 = vmatpush2.bf16.msra.mxu1 %v4699_v7  ;;  %3185 = vmatprep.subr.bf16.mxu0 %v4705_v8  ;;  %v4763_v7 = vld [vmem:[%s4927_s19 + $0x9a8] ss:$16 sps:$4 sm:$0xff]  }
 0x15f   : > { %3226 = vmatprep.subr.bf16.mxu1 %v4708_v9  ;;  %v4766_v8 = vld [vmem:[%s4927_s19 + $0xba8] ss:$16 sps:$4 sm:$0xff]   ;;  %v4771_v9 = vld [vmem:[%s4927_s19 + $0x98c] ss:$16 sps:$4 sm:$0xff]  }
 0x160   : > { %v1225_v20 = vpop.f32.mrf.mxu0  ;;  %3136 = vmatmul.mubr.bf16.vlgmr.msra.gmra.mxu0 %v2455_v10 }
 0x161   : > { %v1266_v23 = vpop.f32.mrf.mxu1  ;;  %3177 = vmatmul.mubr.bf16.vlgmr.msra.gmra.mxu1 %v2457_v11  ;;  %3186 = vmatpush1.bf16.msra.mxu0 %v4703_v12  ;;  %v4774_v12 = vld [vmem:[%s4927_s19 + $0xb8c] ss:$16 sps:$4 sm:$0xff]  }
 0x162   : > { %v1267_v24 = vadd.f32 %v1266_v23, %v1225_v20  ;;  %3227 = vmatpush1.bf16.msra.mxu1 %v4706_v14  ;;  %v1227_v27 = vpop.f32.mrf.mxu0  ;;  %3187 = vmatprep.subr.bf16.mxu0 %v4711_v16  ;;  %v4769_v14 = vld [vmem:[%s4927_s19 + $0x988] ss:$16 sps:$4 sm:$0xff]   ;;  %v4780_v20 = vld [vmem:[%s4927_s19 + $0xb6c] ss:$16 sps:$4 sm:$0xff]  }
 0x163   : > { %v1268_v28 = vpop.f32.mrf.mxu1  ;;  %3228 = vmatprep.subr.bf16.mxu1 %v4714_v19  ;;  %3217 = vmatprep.mubr.bf16.mxu0 %v5255_v58  ;;  %v4726_v58 = vld [vmem:[%s4927_s19 + $0xa8c] ss:$16 sps:$4 sm:$0xff]   ;;  %v4772_v16 = vld [vmem:[%s4927_s19 + $0xb88] ss:$16 sps:$4 sm:$0xff]  }
 0x164   : > { %v1269_v31 = vadd.f32 %v1268_v28, %v1227_v27  ;;  %3258 = vmatprep.mubr.bf16.mxu1 %v5257_v59  ;;  %v1229_v32 = vpop.f32.mrf.mxu0  ;;  %v4777_v19 = vld [vmem:[%s4927_s19 + $0x96c] ss:$16 sps:$4 sm:$0xff]   ;;  %v4775_v23 = vld [vmem:[%s4927_s19 + $0x968] ss:$16 sps:$4 sm:$0xff]  }
 0x165   : > { %v1270_v34 = vpop.f32.mrf.mxu1  ;;  %3188 = vmatpush1.bf16.msra.mxu0 %v4709_v25  ;;  %v4783_v25 = vld [vmem:[%s4927_s19 + $0x94c] ss:$16 sps:$4 sm:$0xff]   ;;  %v4781_v27 = vld [vmem:[%s4927_s19 + $0x948] ss:$16 sps:$4 sm:$0xff]  }
 0x166   : > { %v1278_v35 = vcombine.low %v1267_v24, %v1269_v31  ;;  %3229 = vmatpush1.bf16.msra.mxu1 %v4712_v26  ;;  %v1230_v37 = vpop.f32.mrf.mxu0  ;;  %3189 = vmatprep.subr.bf16.mxu0 %v4717_v29  ;;  %v4778_v24 = vld [vmem:[%s4927_s19 + $0xb68] ss:$16 sps:$4 sm:$0xff]   ;;  %v4786_v26 = vld [vmem:[%s4927_s19 + $0xb4c] ss:$16 sps:$4 sm:$0xff]  }
 0x167   : > { %v1271_v17 = vpop.f32.mrf.mxu1  ;;  %3230 = vmatprep.subr.bf16.mxu1 %v4720_v30  ;;  %v4784_v28 = vld [vmem:[%s4927_s19 + $0xb48] ss:$16 sps:$4 sm:$0xff]   ;;  %v4789_v29 = vld [vmem:[%s4927_s19 + $0x92c] ss:$16 sps:$4 sm:$0xff]  }
 0x168   : > { %v1292_v59 = vrot.slane %v1278_v35, %v5268_v33  ;;  %v4792_v30 = vld [vmem:[%s4927_s19 + $0xb2c] ss:$16 sps:$4 sm:$0xff]   ;;  %v4787_v31 = vld [vmem:[%s4927_s19 + $0x928] ss:$16 sps:$4 sm:$0xff]  }
 0x169   : > { %3190 = vmatpush1.bf16.msra.mxu0 %v4715_v36  ;;  %v4790_v32 = vld [vmem:[%s4927_s19 + $0xb28] ss:$16 sps:$4 sm:$0xff]   ;;  %v4795_v34 = vld [vmem:[%s4927_s19 + $0x90c] ss:$16 sps:$4 sm:$0xff]  }
 0x16a   : > { %v1293_v42 = vcombine.low %v5277_v15, %v1292_v59  ;;  %3231 = vmatpush1.bf16.msra.mxu1 %v4718_v22  ;;  %3191 = vmatprep.subr.bf16.mxu0 %v4723_v41  ;;  %v4727_v15 = vld [vmem:[%s4927_s19 + $0x868] ss:$16 sps:$4 sm:$0xff]   ;;  %v4798_v35 = vld [vmem:[%s4927_s19 + $0xb0c] ss:$16 sps:$4 sm:$0xff]  }
 0x16b   : > { %3232 = vmatprep.subr.bf16.mxu1 %v4726_v58  ;;  %v4793_v36 = vld [vmem:[%s4927_s19 + $0x908] ss:$16 sps:$4 sm:$0xff]  }
 0x16c   : > { %v5358_v49 = vrot.slane %v1293_v42, %v5268_v33  ;;  %v4796_v22 = vld [vmem:[%s4927_s19 + $0xb08] ss:$16 sps:$4 sm:$0xff]  }
 0x16d   : > { %3192 = vmatpush1.bf16.msra.mxu0 %v4721_v43 }
 0x16e   : > { %3233 = vmatpush1.bf16.msra.mxu1 %v4724_v44  ;;  %3193 = vmatprep.subr.bf16.mxu0 %v4729_v45 }
 0x16f   : > { %3234 = vmatprep.subr.bf16.mxu1 %v4732_v48 }
 0x171   : > { %3194 = vmatpush1.bf16.msra.mxu0 %v4727_v15 }
 0x172   : > { %3235 = vmatpush1.bf16.msra.mxu1 %v4730_v50  ;;  %3195 = vmatprep.subr.bf16.mxu0 %v4735_v51 }
 0x173   : > { %3236 = vmatprep.subr.bf16.mxu1 %v4738_v52 }
 0x175   : > { %3196 = vmatpush1.bf16.msra.mxu0 %v4733_v53 }
 0x176   : > { %3237 = vmatpush1.bf16.msra.mxu1 %v4736_v18  ;;  %3197 = vmatprep.subr.bf16.mxu0 %v4741_v13 }
 0x177   : > { %3238 = vmatprep.subr.bf16.mxu1 %v4744_v39 }
 0x179   : > { %3198 = vmatpush1.bf16.msra.mxu0 %v4739_v54 }
 0x17a   : > { %3239 = vmatpush1.bf16.msra.mxu1 %v4742_v55  ;;  %3199 = vmatprep.subr.bf16.mxu0 %v4747_v56  ;;  %v313_v56 = vld [vmem:[#allocation2] sm:$0xf] }
 0x17b   : > { %3240 = vmatprep.subr.bf16.mxu1 %v4750_v57 }
 0x17d   : > { %3200 = vmatpush1.bf16.msra.mxu0 %v4745_v60  ;;  %v1302_v60 = vadd.f32 %v5358_v49, %v313_v56 }
 0x17e   : > { %3241 = vmatpush1.bf16.msra.mxu1 %v4748_v61  ;;  %3201 = vmatprep.subr.bf16.mxu0 %v4753_v62 }
 0x17f   : > { %3242 = vmatprep.subr.bf16.mxu1 %v4756_v63 }
 0x181   : > { %3202 = vmatpush2.bf16.msra.mxu0 %v4751_v0 }
 0x182   : > { %3243 = vmatpush2.bf16.msra.mxu1 %v4754_v1  ;;  %3203 = vmatprep.subr.bf16.mxu0 %v4759_v2 }
 0x183   : > { %3244 = vmatprep.subr.bf16.mxu1 %v4762_v4 }
 0x185   : > { %3204 = vmatpush2.bf16.msra.mxu0 %v4757_v5 }
 0x186   : > { %3245 = vmatpush2.bf16.msra.mxu1 %v4760_v21  ;;  %3205 = vmatprep.subr.bf16.mxu0 %v4765_v38 }
 0x187   : > { %3246 = vmatprep.subr.bf16.mxu1 %v4768_v40 }
 0x189   : > { %3206 = vmatpush2.bf16.msra.mxu0 %v4763_v7 }
 0x18a   : > { %3247 = vmatpush2.bf16.msra.mxu1 %v4766_v8  ;;  %3207 = vmatprep.subr.bf16.mxu0 %v4771_v9 }
 0x18b   : > { %3248 = vmatprep.subr.bf16.mxu1 %v4774_v12 }
 0x18d   : > { %3208 = vmatpush2.bf16.msra.mxu0 %v4769_v14 }
 0x18e   : > { %3249 = vmatpush2.bf16.msra.mxu1 %v4772_v16  ;;  %3209 = vmatprep.subr.bf16.mxu0 %v4777_v19 }
 0x18f   : > { %3250 = vmatprep.subr.bf16.mxu1 %v4780_v20 }
 0x191   : > { %3210 = vmatpush2.bf16.msra.mxu0 %v4775_v23 }
 0x192   : > { %3251 = vmatpush2.bf16.msra.mxu1 %v4778_v24  ;;  %3211 = vmatprep.subr.bf16.mxu0 %v4783_v25 }
 0x193   : > { %3252 = vmatprep.subr.bf16.mxu1 %v4786_v26 }
 0x195   : > { %3212 = vmatpush2.bf16.msra.mxu0 %v4781_v27 }
 0x196   : > { %3253 = vmatpush2.bf16.msra.mxu1 %v4784_v28  ;;  %3213 = vmatprep.subr.bf16.mxu0 %v4789_v29 }
 0x197   : > { %3254 = vmatprep.subr.bf16.mxu1 %v4792_v30 }
 0x199   : > { %3214 = vmatpush2.bf16.msra.mxu0 %v4787_v31 }
 0x19a   : > { %3255 = vmatpush2.bf16.msra.mxu1 %v4790_v32  ;;  %3215 = vmatprep.subr.bf16.mxu0 %v4795_v34 }
 0x19b   : > { %3256 = vmatprep.subr.bf16.mxu1 %v4798_v35 }
 0x19d   : > { %3216 = vmatpush2.bf16.msra.mxu0 %v4793_v36 }
 0x19e   : > { %3257 = vmatpush2.bf16.msra.mxu1 %v4796_v22 }
 0x1a0   : > { %v2144_v37 = vpop.f32.mrf.mxu0  ;;  %3218 = vmatmul.mubr.bf16.vlgmr.msra.gmra.mxu0 %v2455_v10 }
 0x1a1   : > { %v2185_v17 = vpop.f32.mrf.mxu1  ;;  %3259 = vmatmul.mubr.bf16.vlgmr.msra.gmra.mxu1 %v2457_v11 }
 0x1a2   : > { %v2186_v41 = vadd.f32 %v2185_v17, %v2144_v37  ;;  %v2146_v58 = vpop.f32.mrf.mxu0 }
 0x1a3   : > { %v2187_v59 = vpop.f32.mrf.mxu1 }
 0x1a4   : > { %v2188_v42 = vadd.f32 %v2187_v59, %v2146_v58  ;;  %v2148_v43 = vpop.f32.mrf.mxu0 }
 0x1a5   : > { %v2189_v44 = vpop.f32.mrf.mxu1 }
 0x1a6   : > { %v2278_v45 = vcombine.low %v2186_v41, %v2188_v42  ;;  %v2149_v48 = vpop.f32.mrf.mxu0 }
 0x1a7   : > { %v2190_v15 = vpop.f32.mrf.mxu1 }
 0x1a8   : > { %v2286_v50 = vrot.slane %v2278_v45, %v5268_v33 }
 0x1e0   : > { %v2226_v51 = vpop.f32.mrf.mxu0 }
 0x1e1   : > { %v2267_v52 = vpop.f32.mrf.mxu1 }
 0x1e2   : > { %v2268_v53 = vadd.f32 %v2267_v52, %v2226_v51  ;;  %v2228_v18 = vpop.f32.mrf.mxu0 }
 0x1e3   : > { %v2269_v46 = vpop.f32.mrf.mxu1 }
 0x1e4   : > { %v2270_v10 = vadd.f32 %v2269_v46, %v2228_v18  ;;  %v2230_v13 = vpop.f32.mrf.mxu0 }
 0x1e5   : > { %v2271_v47 = vpop.f32.mrf.mxu1 }
 0x1e6   : > { %v2279_v11 = vcombine.low %v2268_v53, %v2270_v10  ;;  %v2231_v39 = vpop.f32.mrf.mxu0 }
 0x1e7   : > { %v2272_v54 = vpop.f32.mrf.mxu1 }
 0x1e8   : > { %v2293_v55 = vrot.slane %v2279_v11, %v5268_v33 }
 0x1ea   : > { %v2294_v57 = vcombine.low %v2286_v50, %v2293_v55 }
 0x1ec   : > { %v2301_v61 = vrot.slane %v2294_v57, %v5268_v33 }
 0x1ee   : > { %v2303_v62 = vadd.f32 %v2301_v61, %v1302_v60 }
 0x220   : > { %v3137_v63 = vpop.f32.mrf.mxu0 }
 0x221   : > { %v3178_v0 = vpop.f32.mrf.mxu1 }
 0x222   : > { %v3179_v1 = vadd.f32 %v3178_v0, %v3137_v63  ;;  %v3139_v2 = vpop.f32.mrf.mxu0 }
 0x223   : > { %v3180_v4 = vpop.f32.mrf.mxu1 }
 0x224   : > { %v3181_v5 = vadd.f32 %v3180_v4, %v3139_v2  ;;  %v3141_v21 = vpop.f32.mrf.mxu0 }
 0x225   : > { %v3182_v38 = vpop.f32.mrf.mxu1 }
 0x226   : > { %v3271_v40 = vcombine.low %v3179_v1, %v3181_v5  ;;  %v3142_v7 = vpop.f32.mrf.mxu0 }
 0x227   : > { %v3183_v8 = vpop.f32.mrf.mxu1 }
 0x228   : > { %v3279_v9 = vrot.slane %v3271_v40, %v5268_v33 }
 0x260   : > { %v3219_v12 = vpop.f32.mrf.mxu0 }
 0x261   : > { %v3260_v14 = vpop.f32.mrf.mxu1 }
 0x262   : > { %v3221_v16 = vpop.f32.mrf.mxu0  ;;  %v3261_v19 = vadd.f32 %v3260_v14, %v3219_v12 }
 0x263   : > { %v3262_v49 = vpop.f32.mrf.mxu1 }
 0x264   : > { %v3263_v20 = vadd.f32 %v3262_v49, %v3221_v16  ;;  %v3223_v23 = vpop.f32.mrf.mxu0 }
 0x265   : > { %v3264_v24 = vpop.f32.mrf.mxu1 }
 0x266   : > { %v3272_v25 = vcombine.low %v3261_v19, %v3263_v20  ;;  %v3224_v26 = vpop.f32.mrf.mxu0 }
 0x267   : > { %v3265_v27 = vpop.f32.mrf.mxu1 }
 0x268   : > { %v3286_v28 = vrot.slane %v3272_v25, %v5268_v33 }
 0x26a   : > { %v3287_v29 = vcombine.low %v3279_v9, %v3286_v28 }
 0x26c   : > { %v3294_v30 = vrot.slane %v3287_v29, %v5268_v33  ;;  %3305 = sbr.rel (%p4170_p8) target bundleno = 652 (0x28c), region = 48 }
 0x26e   : > { %v3296_v31 = vadd.f32 %v3294_v30, %v2303_v62 }
 0x270   : > { %3301 = vst.msk [vmem:[#allocation2] sm:$0xf] %vm3299_vm1, %v3296_v31 }
 0x271   : > { %v3307_v34 = vld [vmem:[%s5465_s2] sm:$0xf]  ;;  %vm3378_vm2 = vcmask 1040384   ;;  %vm3379_vm3 = vsmask.f32 256  ;;  %vm3381_vm4 = vcmask 1041409  }
 0x272   : > { %v3309_v35 = vld [vmem:[%s5466_s3] sm:$0xf]  ;;  %vm3382_vm5 = vsmask.f32 1280  ;;  %v3327_v41 = vsub.s32 0, %v4930_v6  ;;  %vm5428_vm6 = vmand %vm3378_vm2, %vm3379_vm3  ;;  %v3331_v42 = vsub.s32 1, %v4930_v6 }
 0x273   : > { %v3311_v22 = vld [vmem:[%s4909_s6] sm:$0xf]  ;;  %v3335_v43 = vsub.s32 2, %v4930_v6  ;;  %v3339_v44 = vsub.s32 3, %v4930_v6  ;;  %vm5435_vm7 = vmand %vm3381_vm4, %vm3382_vm5  ;;  %vm3385_vm8 = vcmask 1042434   ;;  %vm3389_vm12 = vcmask 1043459  }
 0x274   : > { %v3312_v37 = vunpack.c.l.bf16 %v3311_v22  ;;  %vm3386_vm9 = vsmask.f32 2304  ;;  %vm3384_vm10 = vmor %vm5435_vm7, %vm5428_vm6  ;;  %vm3390_vm13 = vsmask.f32 3328  ;;  %v3393_v13 = vld [vmem:[%s4914_s10] sm:$0xf] }
 0x275   : > { %vm3387_vm11 = vmand %vm3385_vm8, %vm3386_vm9 }
 0x276   : > { %v3320_v17 = vrot.slane %v3312_v37, %v5268_v33  ;;  %vm3388_vm14 = vmor %vm3387_vm11, %vm3384_vm10 }
 0x277   : > { %v3306_v32 = vld [vmem:[#allocation2] sm:$0xf]  ;;  %vm3391_vm15 = vmand %vm3389_vm12, %vm3390_vm13 }
 0x278   : > { %v3308_v36 = vmul.f32 %v3307_v34, %v3306_v32  ;;  %vm3392_vm0 = vmor %vm3391_vm15, %vm3388_vm14 }
 0x27a   : > { %v3310_v3 = vadd.f32 %v3309_v35, %v3308_v36 }
 0x27c   : > { %v3322_v59 = vadd.f32 %v3320_v17, %v3310_v3 }
 0x27e   : > { %v3323_v48 = vmax.f32 %v3322_v59, 0.0 }
 0x280   : > { %v3328_v15 = vrot.slane %v3323_v48, %v3327_v41  ;;  %v3332_v50 = vrot.slane %v3323_v48, %v3331_v42  ;;  %v3336_v51 = vrot.slane %v3323_v48, %v3335_v43  ;;  %v3340_v52 = vrot.slane %v3323_v48, %v3339_v44 }
 0x282   : > { %v4171_v6 = vpack.c.bf16 %v3332_v50, %v3328_v15  ;;  %v4172_v53 = vpack.c.bf16 %v3340_v52, %v3336_v51 }
 0x284   : > { %v3361_v18 = vrot.slane %v4171_v6, %v5268_v33  ;;  %v3368_v46 = vrot.slane %v4172_v53, %v5268_v33 }
 0x286   : > { %v3369_v10 = vcombine.low %v3361_v18, %v3368_v46 }
 0x288   : > { %v3376_v47 = vrot.slane %v3369_v10, %v5268_v33 }
 0x28a   : > { %v3394_v11 = vsel %vm3392_vm0, %v3376_v47, %v3393_v13 }
 0x28b   : > { %3395 = vst [vmem:[%s4914_s10] sm:$0xf] %v3394_v11 }
 0x28c PF: > { %s15_s22 = sadd.s32 1, %s4837_s22   ;;  %s5473_s18 = smov %s4829_s20 }
 0x28d   : > { %p12_p9 = scmp.ge.s32.totalorder %s15_s22, 8   ;;  %s5474_s19 = smov %s4833_s21 }
 0x28e   : > { %s5475_s20 = smov %s5478_s23  ;;  %s5476_s21 = smov %s5482_s24 }
 0x28f   :  { %14 = sbr.rel (!%p12_p9) target bundleno = 3 (0x3), region = 84 }

</bundles_post_ra>
